<compile_context>
chip_gen: v5e
topology: v5e:2x2
jax: 0.10.0
libtpu: 0.0.40
codegen_flags: <defaults>
</compile_context>

<pallas_src>
import jax
import jax.numpy as jnp
from jax.experimental import pallas as pl
from jax.experimental.pallas import tpu as pltpu


# ----------------------------------------------------------------------------
# Pallas kernel
# ----------------------------------------------------------------------------
def _wcmf_kernel(x_ref,
                 w_blk_ref, b_blk_ref,
                 w_c1_ref, b_c1_ref,
                 w_c2_ref, b_c2_ref,
                 out_ref,
                 pad_cat, pad_f, frfd32):
    _, H, W, C2 = x_ref.shape          # x = [rgb | depth] along channels, bf16
    C = C2 // 2
    HW = H * W

    # --- conv_r1 + conv_d1: ONE block-diagonal 1x1 matmul (+folded BN) + ReLU -
    x = x_ref[0].reshape(HW, C2)                                   # bf16
    frfd = jnp.maximum(
        jnp.dot(x, w_blk_ref[...], preferred_element_type=jnp.float32)
        + b_blk_ref[...], 0.0)                                     # (HW, 2C) f32

    # Exact f32 [Fr | Fd] kept for the fusion stage (single aligned store).
    frfd32[...] = frfd

    # --- padded [Fr | Fd] buffer (bf16) for the 3x3 stage ---------------------
    # Halo-only zeroing: the interior is fully rewritten every grid step, so
    # only the 1-px border needs clearing (correct under "parallel" sharding).
    z_row = jnp.zeros((1, W + 2, C2), jnp.bfloat16)
    z_col = jnp.zeros((H + 2, 1, C2), jnp.bfloat16)
    pad_cat[0:1, :, :] = z_row
    pad_cat[H + 1:H + 2, :, :] = z_row
    pad_cat[:, 0:1, :] = z_col
    pad_cat[:, W + 1:W + 2, :] = z_col
    pad_cat[1:H + 1, 1:W + 1, :] = frfd.astype(jnp.bfloat16).reshape(H, W, C2)

    # --- conv_c1: 3x3, 2C -> C.  9 accumulating MXU matmuls, NO im2col --------
    acc1 = jnp.zeros((HW, C), jnp.float32)
    for dy in range(3):
        for dx in range(3):
            k = dy * 3 + dx
            patch = pad_cat[dy:dy + H, dx:dx + W, :].reshape(HW, C2)   # bf16
            acc1 = acc1 + jnp.dot(patch, w_c1_ref[k],
                                  preferred_element_type=jnp.float32)
    f1 = jnp.maximum(acc1 + b_c1_ref[...], 0.0)                    # (HW, C) f32

    # --- padded conv_c1 output (bf16) -----------------------------------------
    zf_row = jnp.zeros((1, W + 2, C), jnp.bfloat16)
    zf_col = jnp.zeros((H + 2, 1, C), jnp.bfloat16)
    pad_f[0:1, :, :] = zf_row
    pad_f[H + 1:H + 2, :, :] = zf_row
    pad_f[:, 0:1, :] = zf_col
    pad_f[:, W + 1:W + 2, :] = zf_col
    pad_f[1:H + 1, 1:W + 1, :] = f1.astype(jnp.bfloat16).reshape(H, W, C)

    # --- conv_c2: 3x3, C -> 2.  9 accumulating MXU matmuls, NO im2col ---------
    acc2 = jnp.zeros((HW, 2), jnp.float32)
    for dy in range(3):
        for dx in range(3):
            k = dy * 3 + dx
            patch = pad_f[dy:dy + H, dx:dx + W, :].reshape(HW, C)      # bf16
            acc2 = acc2 + jnp.dot(patch, w_c2_ref[k],
                                  preferred_element_type=jnp.float32)
    f2 = jnp.maximum(acc2 + b_c2_ref[...], 0.0)                    # (HW, 2) f32

    # --- fusion: out = w1*Fr + w2*Fd + (w1*Fr)*(w2*Fd) ------------------------
    Fr = frfd32[:, :C]                                             # exact f32
    Fd = frfd32[:, C:]
    w1 = f2[:, 0:1]
    w2 = f2[:, 1:2]
    a = w1 * Fr
    b = w2 * Fd
    out_cl = a + b + a * b                                         # (HW, C) f32

    # Lane-dense NCHW-flattened output: (HW, C) -> (C, HW) in-kernel (XLU),
    # stored as a fully lane-dense (C, H*W) block.
    out_ref[0] = jnp.transpose(out_cl).astype(out_ref.dtype)


# ----------------------------------------------------------------------------
# Wrapper (plain-JAX glue: layout prep + pallas_call plumbing)
# ----------------------------------------------------------------------------
def wcmf_pallas(rgb_nchw, depth_nchw, kernel_params):
    N, C, H, W = rgb_nchw.shape

    # One concatenated NHWC bf16 input: channels = [rgb | depth].  Inputs are
    # only ever consumed as bf16 MXU operands, so this halves input DMA.
    x = jnp.concatenate([rgb_nchw, depth_nchw], axis=1)            # (N, 2C, H, W)
    x = jnp.transpose(x, (0, 2, 3, 1)).astype(jnp.bfloat16)        # (N, H, W, 2C)

    (w_blk, b_blk, w_c1, b_c1, w_c2, b_c2) = kernel_params

    def full_spec(arr):
        r = arr.ndim
        return pl.BlockSpec(arr.shape, lambda n, _r=r: (0,) * _r)

    grid_spec = pltpu.PrefetchScalarGridSpec(
        num_scalar_prefetch=0,
        grid=(N,),
        in_specs=[
            pl.BlockSpec((1, H, W, 2 * C), lambda n: (n, 0, 0, 0)),
            full_spec(w_blk), full_spec(b_blk),
            full_spec(w_c1), full_spec(b_c1),
            full_spec(w_c2), full_spec(b_c2),
        ],
        # Output emitted directly as NCHW-flattened (N, C, H*W): 256-lane
        # dense stores, and no XLA output transpose afterwards.
        out_specs=pl.BlockSpec((1, C, H * W), lambda n: (n, 0, 0)),
        scratch_shapes=[
            pltpu.VMEM((H + 2, W + 2, 2 * C), jnp.bfloat16),   # padded [Fr|Fd]
            pltpu.VMEM((H + 2, W + 2, C), jnp.bfloat16),       # padded conv_c1 out
            pltpu.VMEM((H * W, 2 * C), jnp.float32),           # exact f32 [Fr|Fd]
        ],
    )

    out = pl.pallas_call(
        _wcmf_kernel,
        out_shape=jax.ShapeDtypeStruct((N, C, H * W), jnp.float32),
        grid_spec=grid_spec,
        compiler_params=pltpu.CompilerParams(
            dimension_semantics=("parallel",),          # batch elems independent
            vmem_limit_bytes=32 * 1024 * 1024),
    )(x, w_blk, b_blk, w_c1, b_c1, w_c2, b_c2)

    return out.reshape(N, C, H, W)                      # free reshape, no transpose


# ----------------------------------------------------------------------------
# Deterministic parameter construction (conv + inference-mode BN folded)
# ----------------------------------------------------------------------------
def init_params(key, C, eps=1e-5):
    keys = jax.random.split(key, 7)

    def conv_w(k, kh, kw, cin, cout):
        fan_in = kh * kw * cin
        return jax.random.normal(k, (kh, kw, cin, cout), jnp.float32) / jnp.sqrt(fan_in)

    def conv_b(k, cout):
        return 0.1 * jax.random.normal(k, (cout,), jnp.float32)

    def bn_params(k, c):
        k1, k2, k3, k4 = jax.random.split(k, 4)
        gamma = 1.0 + 0.1 * jax.random.normal(k1, (c,), jnp.float32)
        beta = 0.1 * jax.random.normal(k2, (c,), jnp.float32)
        mean = 0.1 * jax.random.normal(k3, (c,), jnp.float32)
        var = 1.0 + 0.5 * jax.random.uniform(k4, (c,), jnp.float32)
        return gamma, beta, mean, var

    def fold(w, b, bn):
        gamma, beta, mean, var = bn
        s = gamma / jnp.sqrt(var + eps)
        return w * s, (b - mean) * s + beta

    kbn = jax.random.split(keys[4], 4)
    kbias = jax.random.split(keys[5], 4)

    w_r1, b_r1 = fold(conv_w(keys[0], 1, 1, C, C), conv_b(kbias[0], C), bn_params(kbn[0], C))
    w_d1, b_d1 = fold(conv_w(keys[1], 1, 1, C, C), conv_b(kbias[1], C), bn_params(kbn[1], C))
    w_c1, b_c1 = fold(conv_w(keys[2], 3, 3, 2 * C, C), conv_b(kbias[2], C), bn_params(kbn[2], C))
    w_c2, b_c2 = fold(conv_w(keys[3], 3, 3, C, 2), conv_b(kbias[3], 2), bn_params(kbn[3], 2))

    ref_params = (w_r1, b_r1, w_d1, b_d1, w_c1, b_c1, w_c2, b_c2)

    # Block-diagonal 1x1 weight: input channel order [rgb | depth],
    # output channel order [Fr | Fd].
    w_blk = jnp.zeros((2 * C, 2 * C), jnp.float32)
    w_blk = w_blk.at[:C, :C].set(w_r1.reshape(C, C))
    w_blk = w_blk.at[C:, C:].set(w_d1.reshape(C, C))
    b_blk = jnp.concatenate([b_r1, b_d1]).reshape(1, 2 * C)

    kernel_params = (
        w_blk.astype(jnp.bfloat16), b_blk,
        # 3x3 taps as (9, Cin, Cout), (ky,kx)-major, matching the kernel's
        # dy*3+dx tap index; cin order is [Fr channels | Fd channels].
        w_c1.reshape(9, 2 * C, C).astype(jnp.bfloat16), b_c1.reshape(1, C),
        w_c2.reshape(9, C, 2).astype(jnp.bfloat16), b_c2.reshape(1, 2),
    )
    return kernel_params, ref_params


# ----------------------------------------------------------------------------
# Pure-JAX references (XLA convs) for correctness checking
#   mxu_bf16=True  : mirrors the kernel's bf16-operand / f32-accum precision
#   mxu_bf16=False : full-f32 HIGHEST reference (sanity bound only)
# ----------------------------------------------------------------------------
def wcmf_reference(rgb_nchw, depth_nchw, ref_params, mxu_bf16=False):
    (w_r1, b_r1, w_d1, b_d1, w_c1, b_c1, w_c2, b_c2) = ref_params
    rgb = jnp.transpose(rgb_nchw, (0, 2, 3, 1)).astype(jnp.float32)
    dep = jnp.transpose(depth_nchw, (0, 2, 3, 1)).astype(jnp.float32)

    def conv(x, w, b, padding):
        if mxu_bf16:
            y = jax.lax.conv_general_dilated(
                x.astype(jnp.bfloat16), w.astype(jnp.bfloat16),
                window_strides=(1, 1), padding=padding,
                dimension_numbers=('NHWC', 'HWIO', 'NHWC'),
                preferred_element_type=jnp.float32)
        else:
            y = jax.lax.conv_general_dilated(
                x, w, window_strides=(1, 1), padding=padding,
                dimension_numbers=('NHWC', 'HWIO', 'NHWC'),
                precision=jax.lax.Precision.HIGHEST)
        return jnp.maximum(y + b, 0.0)

    Fr = conv(rgb, w_r1, b_r1, 'VALID')
    Fd = conv(dep, w_d1, b_d1, 'VALID')
    f = jnp.concatenate([Fr, Fd], axis=-1)
    f = conv(f, w_c1, b_c1, [(1, 1), (1, 1)])
    f = conv(f, w_c2, b_c2, [(1, 1), (1, 1)])
    w1 = f[..., 0:1]
    w2 = f[..., 1:2]
    a = w1 * Fr
    b_ = w2 * Fd
    out = a + b_ + a * b_
    return jnp.transpose(out, (0, 3, 1, 2))


if __name__ == "__main__":
    key = jax.random.PRNGKey(0)
    k_rgb, k_dep, k_par = jax.random.split(key, 3)

    N, C, H, W = 2, 32, 16, 16            # small synthetic shapes (NCHW inputs)
    rgb = jax.random.normal(k_rgb, (N, C, H, W), jnp.float32)
    depth = jax.random.normal(k_dep, (N, C, H, W), jnp.float32)

    kernel_params, ref_params = init_params(k_par, C)

    out = jax.jit(wcmf_pallas)(rgb, depth, kernel_params)
    out = jax.block_until_ready(out)
    assert out.shape == (N, C, H, W), out.shape

    # Exact-math check against a reference with identical bf16-MXU precision.
    ref_mixed = wcmf_reference(rgb, depth, ref_params, mxu_bf16=True)
    err_exact = float(jnp.max(jnp.abs(out - ref_mixed)))
    assert err_exact < 2e-3, f"max abs error vs bf16-MXU reference: {err_exact}"

    # Loose sanity bound against the full-f32 reference (bf16 approximation).
    ref_f32 = wcmf_reference(rgb, depth, ref_params, mxu_bf16=False)
    err_f32 = float(jnp.max(jnp.abs(out - ref_f32)))
    assert err_f32 < 1e-1, f"max abs error vs f32 reference: {err_f32}"

    print("KERNEL_OK")
</pallas_src>

<mosaic_0001>
module attributes {stable_mosaic.version = 11 : i64} {
  func.func @_wcmf_kernel(%arg0: i32, %arg1: memref<1x16x16x64xbf16, #tpu.memory_space<vmem>>, %arg2: memref<64x64xbf16, #tpu.memory_space<vmem>>, %arg3: memref<1x64xf32, #tpu.memory_space<vmem>>, %arg4: memref<9x64x32xbf16, #tpu.memory_space<vmem>>, %arg5: memref<1x32xf32, #tpu.memory_space<vmem>>, %arg6: memref<9x32x2xbf16, #tpu.memory_space<vmem>>, %arg7: memref<1x2xf32, #tpu.memory_space<vmem>>, %arg8: memref<1x32x256xf32, #tpu.memory_space<vmem>>, %arg9: memref<18x18x64xbf16, #tpu.memory_space<vmem>>, %arg10: memref<18x18x32xbf16, #tpu.memory_space<vmem>>, %arg11: memref<256x64xf32, #tpu.memory_space<vmem>>) attributes {dimension_semantics = [#tpu.dimension_semantics<parallel>], iteration_bounds = array<i64: 2>, scalar_prefetch = 0 : i64, scratch_operands = 3 : i64, tpu.core_type = #tpu.core_type<tc>, window_params = [{transform_indices = @transform_0, window_bounds = array<i64: 1, 16, 16, 64>}, {pipeline_mode = #tpu.pipeline_mode<synchronous>, transform_indices = @transform_1, window_bounds = array<i64: 64, 64>}, {pipeline_mode = #tpu.pipeline_mode<synchronous>, transform_indices = @transform_2, window_bounds = array<i64: 1, 64>}, {pipeline_mode = #tpu.pipeline_mode<synchronous>, transform_indices = @transform_3, window_bounds = array<i64: 9, 64, 32>}, {pipeline_mode = #tpu.pipeline_mode<synchronous>, transform_indices = @transform_4, window_bounds = array<i64: 1, 32>}, {pipeline_mode = #tpu.pipeline_mode<synchronous>, transform_indices = @transform_5, window_bounds = array<i64: 9, 32, 2>}, {pipeline_mode = #tpu.pipeline_mode<synchronous>, transform_indices = @transform_6, window_bounds = array<i64: 1, 2>}, {transform_indices = @transform_7, window_bounds = array<i64: 1, 32, 256>}]} {
    %c0 = arith.constant 0 : index
    %c0_0 = arith.constant 0 : index
    %c0_1 = arith.constant 0 : index
    %c0_2 = arith.constant 0 : index
    %0 = vector.load %arg1[%c0, %c0_0, %c0_1, %c0_2] : memref<1x16x16x64xbf16, #tpu.memory_space<vmem>>, vector<1x16x16x64xbf16>
    %1 = vector.shape_cast %0 : vector<1x16x16x64xbf16> to vector<16x16x64xbf16>
    %2 = vector.shape_cast %1 : vector<16x16x64xbf16> to vector<256x64xbf16>
    %c0_3 = arith.constant 0 : index
    %c0_4 = arith.constant 0 : index
    %3 = vector.load %arg2[%c0_3, %c0_4] : memref<64x64xbf16, #tpu.memory_space<vmem>>, vector<64x64xbf16>
    %cst = arith.constant dense<0.000000e+00> : vector<256x64xf32>
    %4 = tpu.matmul %2, %3, %cst {dimension_numbers = #tpu.dot_dimension_numbers<[1], [0], [0], [1], [0, 0, 1, 1], [], []>} : vector<256x64xbf16>, vector<64x64xbf16>, vector<256x64xf32> -> vector<256x64xf32>
    %c0_5 = arith.constant 0 : index
    %c0_6 = arith.constant 0 : index
    %5 = vector.load %arg3[%c0_5, %c0_6] : memref<1x64xf32, #tpu.memory_space<vmem>>, vector<1x64xf32>
    %6 = vector.broadcast %5 : vector<1x64xf32> to vector<256x64xf32>
    %7 = arith.addf %4, %6 : vector<256x64xf32>
    %cst_7 = arith.constant 0.000000e+00 : f32
    %8 = vector.broadcast %cst_7 : f32 to vector<256x64xf32>
    %9 = arith.maximumf %7, %8 : vector<256x64xf32>
    %c0_8 = arith.constant 0 : index
    %c0_9 = arith.constant 0 : index
    %10 = vector.load %arg11[%c0_8, %c0_9] : memref<256x64xf32, #tpu.memory_space<vmem>>, vector<256x64xf32>
    tpu.vector_store %arg11[%c0_8, %c0_9], %9 {strides = array<i32>} : memref<256x64xf32, #tpu.memory_space<vmem>>, vector<256x64xf32>,
    %cst_10 = arith.constant 0.000000e+00 : bf16
    %11 = vector.broadcast %cst_10 : bf16 to vector<1x18x64xbf16>
    %cst_11 = arith.constant 0.000000e+00 : bf16
    %12 = vector.broadcast %cst_11 : bf16 to vector<18x1x64xbf16>
    %c0_12 = arith.constant 0 : index
    %c0_13 = arith.constant 0 : index
    %c0_14 = arith.constant 0 : index
    %13 = vector.load %arg9[%c0_12, %c0_13, %c0_14] : memref<18x18x64xbf16, #tpu.memory_space<vmem>>, vector<1x18x64xbf16>
    tpu.vector_store %arg9[%c0_12, %c0_13, %c0_14], %11 {strides = array<i32>} : memref<18x18x64xbf16, #tpu.memory_space<vmem>>, vector<1x18x64xbf16>,
    %c17 = arith.constant 17 : index
    %c0_15 = arith.constant 0 : index
    %c0_16 = arith.constant 0 : index
    %14 = vector.load %arg9[%c17, %c0_15, %c0_16] : memref<18x18x64xbf16, #tpu.memory_space<vmem>>, vector<1x18x64xbf16>
    tpu.vector_store %arg9[%c17, %c0_15, %c0_16], %11 {strides = array<i32>} : memref<18x18x64xbf16, #tpu.memory_space<vmem>>, vector<1x18x64xbf16>,
    %c0_17 = arith.constant 0 : index
    %c0_18 = arith.constant 0 : index
    %c0_19 = arith.constant 0 : index
    %15 = vector.load %arg9[%c0_17, %c0_18, %c0_19] : memref<18x18x64xbf16, #tpu.memory_space<vmem>>, vector<18x1x64xbf16>
    tpu.vector_store %arg9[%c0_17, %c0_18, %c0_19], %12 {strides = array<i32>} : memref<18x18x64xbf16, #tpu.memory_space<vmem>>, vector<18x1x64xbf16>,
    %c0_20 = arith.constant 0 : index
    %c17_21 = arith.constant 17 : index
    %c0_22 = arith.constant 0 : index
    %16 = vector.load %arg9[%c0_20, %c17_21, %c0_22] : memref<18x18x64xbf16, #tpu.memory_space<vmem>>, vector<18x1x64xbf16>
    tpu.vector_store %arg9[%c0_20, %c17_21, %c0_22], %12 {strides = array<i32>} : memref<18x18x64xbf16, #tpu.memory_space<vmem>>, vector<18x1x64xbf16>,
    %17 = arith.truncf %9 : vector<256x64xf32> to vector<256x64xbf16>
    %18 = vector.shape_cast %17 : vector<256x64xbf16> to vector<16x16x64xbf16>
    %c1 = arith.constant 1 : index
    %c1_23 = arith.constant 1 : index
    %c0_24 = arith.constant 0 : index
    %19 = vector.load %arg9[%c1, %c1_23, %c0_24] : memref<18x18x64xbf16, #tpu.memory_space<vmem>>, vector<16x16x64xbf16>
    tpu.vector_store %arg9[%c1, %c1_23, %c0_24], %18 {strides = array<i32>} : memref<18x18x64xbf16, #tpu.memory_space<vmem>>, vector<16x16x64xbf16>,
    %cst_25 = arith.constant 0.000000e+00 : f32
    %20 = vector.broadcast %cst_25 : f32 to vector<256x32xf32>
    %c0_26 = arith.constant 0 : index
    %c0_27 = arith.constant 0 : index
    %c0_28 = arith.constant 0 : index
    %21 = vector.load %arg9[%c0_26, %c0_27, %c0_28] : memref<18x18x64xbf16, #tpu.memory_space<vmem>>, vector<16x16x64xbf16>
    %22 = vector.shape_cast %21 : vector<16x16x64xbf16> to vector<256x64xbf16>
    %c0_29 = arith.constant 0 : index
    %c0_30 = arith.constant 0 : index
    %c0_31 = arith.constant 0 : index
    %23 = vector.load %arg4[%c0_29, %c0_30, %c0_31] : memref<9x64x32xbf16, #tpu.memory_space<vmem>>, vector<1x64x32xbf16>
    %24 = vector.shape_cast %23 : vector<1x64x32xbf16> to vector<64x32xbf16>
    %cst_32 = arith.constant dense<0.000000e+00> : vector<256x32xf32>
    %25 = tpu.matmul %22, %24, %cst_32 {dimension_numbers = #tpu.dot_dimension_numbers<[1], [0], [0], [1], [0, 0, 1, 1], [], []>} : vector<256x64xbf16>, vector<64x32xbf16>, vector<256x32xf32> -> vector<256x32xf32>
    %26 = arith.addf %20, %25 : vector<256x32xf32>
    %c0_33 = arith.constant 0 : index
    %c1_34 = arith.constant 1 : index
    %c0_35 = arith.constant 0 : index
    %27 = vector.load %arg9[%c0_33, %c1_34, %c0_35] : memref<18x18x64xbf16, #tpu.memory_space<vmem>>, vector<16x16x64xbf16>
    %28 = vector.shape_cast %27 : vector<16x16x64xbf16> to vector<256x64xbf16>
    %c1_36 = arith.constant 1 : index
    %c0_37 = arith.constant 0 : index
    %c0_38 = arith.constant 0 : index
    %29 = vector.load %arg4[%c1_36, %c0_37, %c0_38] : memref<9x64x32xbf16, #tpu.memory_space<vmem>>, vector<1x64x32xbf16>
    %30 = vector.shape_cast %29 : vector<1x64x32xbf16> to vector<64x32xbf16>
    %cst_39 = arith.constant dense<0.000000e+00> : vector<256x32xf32>
    %31 = tpu.matmul %28, %30, %cst_39 {dimension_numbers = #tpu.dot_dimension_numbers<[1], [0], [0], [1], [0, 0, 1, 1], [], []>} : vector<256x64xbf16>, vector<64x32xbf16>, vector<256x32xf32> -> vector<256x32xf32>
    %32 = arith.addf %26, %31 : vector<256x32xf32>
    %c0_40 = arith.constant 0 : index
    %c2 = arith.constant 2 : index
    %c0_41 = arith.constant 0 : index
    %33 = vector.load %arg9[%c0_40, %c2, %c0_41] : memref<18x18x64xbf16, #tpu.memory_space<vmem>>, vector<16x16x64xbf16>
    %34 = vector.shape_cast %33 : vector<16x16x64xbf16> to vector<256x64xbf16>
    %c2_42 = arith.constant 2 : index
    %c0_43 = arith.constant 0 : index
    %c0_44 = arith.constant 0 : index
    %35 = vector.load %arg4[%c2_42, %c0_43, %c0_44] : memref<9x64x32xbf16, #tpu.memory_space<vmem>>, vector<1x64x32xbf16>
    %36 = vector.shape_cast %35 : vector<1x64x32xbf16> to vector<64x32xbf16>
    %cst_45 = arith.constant dense<0.000000e+00> : vector<256x32xf32>
    %37 = tpu.matmul %34, %36, %cst_45 {dimension_numbers = #tpu.dot_dimension_numbers<[1], [0], [0], [1], [0, 0, 1, 1], [], []>} : vector<256x64xbf16>, vector<64x32xbf16>, vector<256x32xf32> -> vector<256x32xf32>
    %38 = arith.addf %32, %37 : vector<256x32xf32>
    %c1_46 = arith.constant 1 : index
    %c0_47 = arith.constant 0 : index
    %c0_48 = arith.constant 0 : index
    %39 = vector.load %arg9[%c1_46, %c0_47, %c0_48] : memref<18x18x64xbf16, #tpu.memory_space<vmem>>, vector<16x16x64xbf16>
    %40 = vector.shape_cast %39 : vector<16x16x64xbf16> to vector<256x64xbf16>
    %c3 = arith.constant 3 : index
    %c0_49 = arith.constant 0 : index
    %c0_50 = arith.constant 0 : index
    %41 = vector.load %arg4[%c3, %c0_49, %c0_50] : memref<9x64x32xbf16, #tpu.memory_space<vmem>>, vector<1x64x32xbf16>
    %42 = vector.shape_cast %41 : vector<1x64x32xbf16> to vector<64x32xbf16>
    %cst_51 = arith.constant dense<0.000000e+00> : vector<256x32xf32>
    %43 = tpu.matmul %40, %42, %cst_51 {dimension_numbers = #tpu.dot_dimension_numbers<[1], [0], [0], [1], [0, 0, 1, 1], [], []>} : vector<256x64xbf16>, vector<64x32xbf16>, vector<256x32xf32> -> vector<256x32xf32>
    %44 = arith.addf %38, %43 : vector<256x32xf32>
    %c1_52 = arith.constant 1 : index
    %c1_53 = arith.constant 1 : index
    %c0_54 = arith.constant 0 : index
    %45 = vector.load %arg9[%c1_52, %c1_53, %c0_54] : memref<18x18x64xbf16, #tpu.memory_space<vmem>>, vector<16x16x64xbf16>
    %46 = vector.shape_cast %45 : vector<16x16x64xbf16> to vector<256x64xbf16>
    %c4 = arith.constant 4 : index
    %c0_55 = arith.constant 0 : index
    %c0_56 = arith.constant 0 : index
    %47 = vector.load %arg4[%c4, %c0_55, %c0_56] : memref<9x64x32xbf16, #tpu.memory_space<vmem>>, vector<1x64x32xbf16>
    %48 = vector.shape_cast %47 : vector<1x64x32xbf16> to vector<64x32xbf16>
    %cst_57 = arith.constant dense<0.000000e+00> : vector<256x32xf32>
    %49 = tpu.matmul %46, %48, %cst_57 {dimension_numbers = #tpu.dot_dimension_numbers<[1], [0], [0], [1], [0, 0, 1, 1], [], []>} : vector<256x64xbf16>, vector<64x32xbf16>, vector<256x32xf32> -> vector<256x32xf32>
    %50 = arith.addf %44, %49 : vector<256x32xf32>
    %c1_58 = arith.constant 1 : index
    %c2_59 = arith.constant 2 : index
    %c0_60 = arith.constant 0 : index
    %51 = vector.load %arg9[%c1_58, %c2_59, %c0_60] : memref<18x18x64xbf16, #tpu.memory_space<vmem>>, vector<16x16x64xbf16>
    %52 = vector.shape_cast %51 : vector<16x16x64xbf16> to vector<256x64xbf16>
    %c5 = arith.constant 5 : index
    %c0_61 = arith.constant 0 : index
    %c0_62 = arith.constant 0 : index
    %53 = vector.load %arg4[%c5, %c0_61, %c0_62] : memref<9x64x32xbf16, #tpu.memory_space<vmem>>, vector<1x64x32xbf16>
    %54 = vector.shape_cast %53 : vector<1x64x32xbf16> to vector<64x32xbf16>
    %cst_63 = arith.constant dense<0.000000e+00> : vector<256x32xf32>
    %55 = tpu.matmul %52, %54, %cst_63 {dimension_numbers = #tpu.dot_dimension_numbers<[1], [0], [0], [1], [0, 0, 1, 1], [], []>} : vector<256x64xbf16>, vector<64x32xbf16>, vector<256x32xf32> -> vector<256x32xf32>
    %56 = arith.addf %50, %55 : vector<256x32xf32>
    %c2_64 = arith.constant 2 : index
    %c0_65 = arith.constant 0 : index
    %c0_66 = arith.constant 0 : index
    %57 = vector.load %arg9[%c2_64, %c0_65, %c0_66] : memref<18x18x64xbf16, #tpu.memory_space<vmem>>, vector<16x16x64xbf16>
    %58 = vector.shape_cast %57 : vector<16x16x64xbf16> to vector<256x64xbf16>
    %c6 = arith.constant 6 : index
    %c0_67 = arith.constant 0 : index
    %c0_68 = arith.constant 0 : index
    %59 = vector.load %arg4[%c6, %c0_67, %c0_68] : memref<9x64x32xbf16, #tpu.memory_space<vmem>>, vector<1x64x32xbf16>
    %60 = vector.shape_cast %59 : vector<1x64x32xbf16> to vector<64x32xbf16>
    %cst_69 = arith.constant dense<0.000000e+00> : vector<256x32xf32>
    %61 = tpu.matmul %58, %60, %cst_69 {dimension_numbers = #tpu.dot_dimension_numbers<[1], [0], [0], [1], [0, 0, 1, 1], [], []>} : vector<256x64xbf16>, vector<64x32xbf16>, vector<256x32xf32> -> vector<256x32xf32>
    %62 = arith.addf %56, %61 : vector<256x32xf32>
    %c2_70 = arith.constant 2 : index
    %c1_71 = arith.constant 1 : index
    %c0_72 = arith.constant 0 : index
    %63 = vector.load %arg9[%c2_70, %c1_71, %c0_72] : memref<18x18x64xbf16, #tpu.memory_space<vmem>>, vector<16x16x64xbf16>
    %64 = vector.shape_cast %63 : vector<16x16x64xbf16> to vector<256x64xbf16>
    %c7 = arith.constant 7 : index
    %c0_73 = arith.constant 0 : index
    %c0_74 = arith.constant 0 : index
    %65 = vector.load %arg4[%c7, %c0_73, %c0_74] : memref<9x64x32xbf16, #tpu.memory_space<vmem>>, vector<1x64x32xbf16>
    %66 = vector.shape_cast %65 : vector<1x64x32xbf16> to vector<64x32xbf16>
    %cst_75 = arith.constant dense<0.000000e+00> : vector<256x32xf32>
    %67 = tpu.matmul %64, %66, %cst_75 {dimension_numbers = #tpu.dot_dimension_numbers<[1], [0], [0], [1], [0, 0, 1, 1], [], []>} : vector<256x64xbf16>, vector<64x32xbf16>, vector<256x32xf32> -> vector<256x32xf32>
    %68 = arith.addf %62, %67 : vector<256x32xf32>
    %c2_76 = arith.constant 2 : index
    %c2_77 = arith.constant 2 : index
    %c0_78 = arith.constant 0 : index
    %69 = vector.load %arg9[%c2_76, %c2_77, %c0_78] : memref<18x18x64xbf16, #tpu.memory_space<vmem>>, vector<16x16x64xbf16>
    %70 = vector.shape_cast %69 : vector<16x16x64xbf16> to vector<256x64xbf16>
    %c8 = arith.constant 8 : index
    %c0_79 = arith.constant 0 : index
    %c0_80 = arith.constant 0 : index
    %71 = vector.load %arg4[%c8, %c0_79, %c0_80] : memref<9x64x32xbf16, #tpu.memory_space<vmem>>, vector<1x64x32xbf16>
    %72 = vector.shape_cast %71 : vector<1x64x32xbf16> to vector<64x32xbf16>
    %cst_81 = arith.constant dense<0.000000e+00> : vector<256x32xf32>
    %73 = tpu.matmul %70, %72, %cst_81 {dimension_numbers = #tpu.dot_dimension_numbers<[1], [0], [0], [1], [0, 0, 1, 1], [], []>} : vector<256x64xbf16>, vector<64x32xbf16>, vector<256x32xf32> -> vector<256x32xf32>
    %74 = arith.addf %68, %73 : vector<256x32xf32>
    %c0_82 = arith.constant 0 : index
    %c0_83 = arith.constant 0 : index
    %75 = vector.load %arg5[%c0_82, %c0_83] : memref<1x32xf32, #tpu.memory_space<vmem>>, vector<1x32xf32>
    %76 = vector.broadcast %75 : vector<1x32xf32> to vector<256x32xf32>
    %77 = arith.addf %74, %76 : vector<256x32xf32>
    %cst_84 = arith.constant 0.000000e+00 : f32
    %78 = vector.broadcast %cst_84 : f32 to vector<256x32xf32>
    %79 = arith.maximumf %77, %78 : vector<256x32xf32>
    %cst_85 = arith.constant 0.000000e+00 : bf16
    %80 = vector.broadcast %cst_85 : bf16 to vector<1x18x32xbf16>
    %cst_86 = arith.constant 0.000000e+00 : bf16
    %81 = vector.broadcast %cst_86 : bf16 to vector<18x1x32xbf16>
    %c0_87 = arith.constant 0 : index
    %c0_88 = arith.constant 0 : index
    %c0_89 = arith.constant 0 : index
    %82 = vector.load %arg10[%c0_87, %c0_88, %c0_89] : memref<18x18x32xbf16, #tpu.memory_space<vmem>>, vector<1x18x32xbf16>
    tpu.vector_store %arg10[%c0_87, %c0_88, %c0_89], %80 {strides = array<i32>} : memref<18x18x32xbf16, #tpu.memory_space<vmem>>, vector<1x18x32xbf16>,
    %c17_90 = arith.constant 17 : index
    %c0_91 = arith.constant 0 : index
    %c0_92 = arith.constant 0 : index
    %83 = vector.load %arg10[%c17_90, %c0_91, %c0_92] : memref<18x18x32xbf16, #tpu.memory_space<vmem>>, vector<1x18x32xbf16>
    tpu.vector_store %arg10[%c17_90, %c0_91, %c0_92], %80 {strides = array<i32>} : memref<18x18x32xbf16, #tpu.memory_space<vmem>>, vector<1x18x32xbf16>,
    %c0_93 = arith.constant 0 : index
    %c0_94 = arith.constant 0 : index
    %c0_95 = arith.constant 0 : index
    %84 = vector.load %arg10[%c0_93, %c0_94, %c0_95] : memref<18x18x32xbf16, #tpu.memory_space<vmem>>, vector<18x1x32xbf16>
    tpu.vector_store %arg10[%c0_93, %c0_94, %c0_95], %81 {strides = array<i32>} : memref<18x18x32xbf16, #tpu.memory_space<vmem>>, vector<18x1x32xbf16>,
    %c0_96 = arith.constant 0 : index
    %c17_97 = arith.constant 17 : index
    %c0_98 = arith.constant 0 : index
    %85 = vector.load %arg10[%c0_96, %c17_97, %c0_98] : memref<18x18x32xbf16, #tpu.memory_space<vmem>>, vector<18x1x32xbf16>
    tpu.vector_store %arg10[%c0_96, %c17_97, %c0_98], %81 {strides = array<i32>} : memref<18x18x32xbf16, #tpu.memory_space<vmem>>, vector<18x1x32xbf16>,
    %86 = arith.truncf %79 : vector<256x32xf32> to vector<256x32xbf16>
    %87 = vector.shape_cast %86 : vector<256x32xbf16> to vector<16x16x32xbf16>
    %c1_99 = arith.constant 1 : index
    %c1_100 = arith.constant 1 : index
    %c0_101 = arith.constant 0 : index
    %88 = vector.load %arg10[%c1_99, %c1_100, %c0_101] : memref<18x18x32xbf16, #tpu.memory_space<vmem>>, vector<16x16x32xbf16>
    tpu.vector_store %arg10[%c1_99, %c1_100, %c0_101], %87 {strides = array<i32>} : memref<18x18x32xbf16, #tpu.memory_space<vmem>>, vector<16x16x32xbf16>,
    %cst_102 = arith.constant 0.000000e+00 : f32
    %89 = vector.broadcast %cst_102 : f32 to vector<256x2xf32>
    %c0_103 = arith.constant 0 : index
    %c0_104 = arith.constant 0 : index
    %c0_105 = arith.constant 0 : index
    %90 = vector.load %arg10[%c0_103, %c0_104, %c0_105] : memref<18x18x32xbf16, #tpu.memory_space<vmem>>, vector<16x16x32xbf16>
    %91 = vector.shape_cast %90 : vector<16x16x32xbf16> to vector<256x32xbf16>
    %c0_106 = arith.constant 0 : index
    %c0_107 = arith.constant 0 : index
    %c0_108 = arith.constant 0 : index
    %92 = vector.load %arg6[%c0_106, %c0_107, %c0_108] : memref<9x32x2xbf16, #tpu.memory_space<vmem>>, vector<1x32x2xbf16>
    %93 = vector.shape_cast %92 : vector<1x32x2xbf16> to vector<32x2xbf16>
    %cst_109 = arith.constant dense<0.000000e+00> : vector<256x2xf32>
    %94 = tpu.matmul %91, %93, %cst_109 {dimension_numbers = #tpu.dot_dimension_numbers<[1], [0], [0], [1], [0, 0, 1, 1], [], []>} : vector<256x32xbf16>, vector<32x2xbf16>, vector<256x2xf32> -> vector<256x2xf32>
    %95 = arith.addf %89, %94 : vector<256x2xf32>
    %c0_110 = arith.constant 0 : index
    %c1_111 = arith.constant 1 : index
    %c0_112 = arith.constant 0 : index
    %96 = vector.load %arg10[%c0_110, %c1_111, %c0_112] : memref<18x18x32xbf16, #tpu.memory_space<vmem>>, vector<16x16x32xbf16>
    %97 = vector.shape_cast %96 : vector<16x16x32xbf16> to vector<256x32xbf16>
    %c1_113 = arith.constant 1 : index
    %c0_114 = arith.constant 0 : index
    %c0_115 = arith.constant 0 : index
    %98 = vector.load %arg6[%c1_113, %c0_114, %c0_115] : memref<9x32x2xbf16, #tpu.memory_space<vmem>>, vector<1x32x2xbf16>
    %99 = vector.shape_cast %98 : vector<1x32x2xbf16> to vector<32x2xbf16>
    %cst_116 = arith.constant dense<0.000000e+00> : vector<256x2xf32>
    %100 = tpu.matmul %97, %99, %cst_116 {dimension_numbers = #tpu.dot_dimension_numbers<[1], [0], [0], [1], [0, 0, 1, 1], [], []>} : vector<256x32xbf16>, vector<32x2xbf16>, vector<256x2xf32> -> vector<256x2xf32>
    %101 = arith.addf %95, %100 : vector<256x2xf32>
    %c0_117 = arith.constant 0 : index
    %c2_118 = arith.constant 2 : index
    %c0_119 = arith.constant 0 : index
    %102 = vector.load %arg10[%c0_117, %c2_118, %c0_119] : memref<18x18x32xbf16, #tpu.memory_space<vmem>>, vector<16x16x32xbf16>
    %103 = vector.shape_cast %102 : vector<16x16x32xbf16> to vector<256x32xbf16>
    %c2_120 = arith.constant 2 : index
    %c0_121 = arith.constant 0 : index
    %c0_122 = arith.constant 0 : index
    %104 = vector.load %arg6[%c2_120, %c0_121, %c0_122] : memref<9x32x2xbf16, #tpu.memory_space<vmem>>, vector<1x32x2xbf16>
    %105 = vector.shape_cast %104 : vector<1x32x2xbf16> to vector<32x2xbf16>
    %cst_123 = arith.constant dense<0.000000e+00> : vector<256x2xf32>
    %106 = tpu.matmul %103, %105, %cst_123 {dimension_numbers = #tpu.dot_dimension_numbers<[1], [0], [0], [1], [0, 0, 1, 1], [], []>} : vector<256x32xbf16>, vector<32x2xbf16>, vector<256x2xf32> -> vector<256x2xf32>
    %107 = arith.addf %101, %106 : vector<256x2xf32>
    %c1_124 = arith.constant 1 : index
    %c0_125 = arith.constant 0 : index
    %c0_126 = arith.constant 0 : index
    %108 = vector.load %arg10[%c1_124, %c0_125, %c0_126] : memref<18x18x32xbf16, #tpu.memory_space<vmem>>, vector<16x16x32xbf16>
    %109 = vector.shape_cast %108 : vector<16x16x32xbf16> to vector<256x32xbf16>
    %c3_127 = arith.constant 3 : index
    %c0_128 = arith.constant 0 : index
    %c0_129 = arith.constant 0 : index
    %110 = vector.load %arg6[%c3_127, %c0_128, %c0_129] : memref<9x32x2xbf16, #tpu.memory_space<vmem>>, vector<1x32x2xbf16>
    %111 = vector.shape_cast %110 : vector<1x32x2xbf16> to vector<32x2xbf16>
    %cst_130 = arith.constant dense<0.000000e+00> : vector<256x2xf32>
    %112 = tpu.matmul %109, %111, %cst_130 {dimension_numbers = #tpu.dot_dimension_numbers<[1], [0], [0], [1], [0, 0, 1, 1], [], []>} : vector<256x32xbf16>, vector<32x2xbf16>, vector<256x2xf32> -> vector<256x2xf32>
    %113 = arith.addf %107, %112 : vector<256x2xf32>
    %c1_131 = arith.constant 1 : index
    %c1_132 = arith.constant 1 : index
    %c0_133 = arith.constant 0 : index
    %114 = vector.load %arg10[%c1_131, %c1_132, %c0_133] : memref<18x18x32xbf16, #tpu.memory_space<vmem>>, vector<16x16x32xbf16>
    %115 = vector.shape_cast %114 : vector<16x16x32xbf16> to vector<256x32xbf16>
    %c4_134 = arith.constant 4 : index
    %c0_135 = arith.constant 0 : index
    %c0_136 = arith.constant 0 : index
    %116 = vector.load %arg6[%c4_134, %c0_135, %c0_136] : memref<9x32x2xbf16, #tpu.memory_space<vmem>>, vector<1x32x2xbf16>
    %117 = vector.shape_cast %116 : vector<1x32x2xbf16> to vector<32x2xbf16>
    %cst_137 = arith.constant dense<0.000000e+00> : vector<256x2xf32>
    %118 = tpu.matmul %115, %117, %cst_137 {dimension_numbers = #tpu.dot_dimension_numbers<[1], [0], [0], [1], [0, 0, 1, 1], [], []>} : vector<256x32xbf16>, vector<32x2xbf16>, vector<256x2xf32> -> vector<256x2xf32>
    %119 = arith.addf %113, %118 : vector<256x2xf32>
    %c1_138 = arith.constant 1 : index
    %c2_139 = arith.constant 2 : index
    %c0_140 = arith.constant 0 : index
    %120 = vector.load %arg10[%c1_138, %c2_139, %c0_140] : memref<18x18x32xbf16, #tpu.memory_space<vmem>>, vector<16x16x32xbf16>
    %121 = vector.shape_cast %120 : vector<16x16x32xbf16> to vector<256x32xbf16>
    %c5_141 = arith.constant 5 : index
    %c0_142 = arith.constant 0 : index
    %c0_143 = arith.constant 0 : index
    %122 = vector.load %arg6[%c5_141, %c0_142, %c0_143] : memref<9x32x2xbf16, #tpu.memory_space<vmem>>, vector<1x32x2xbf16>
    %123 = vector.shape_cast %122 : vector<1x32x2xbf16> to vector<32x2xbf16>
    %cst_144 = arith.constant dense<0.000000e+00> : vector<256x2xf32>
    %124 = tpu.matmul %121, %123, %cst_144 {dimension_numbers = #tpu.dot_dimension_numbers<[1], [0], [0], [1], [0, 0, 1, 1], [], []>} : vector<256x32xbf16>, vector<32x2xbf16>, vector<256x2xf32> -> vector<256x2xf32>
    %125 = arith.addf %119, %124 : vector<256x2xf32>
    %c2_145 = arith.constant 2 : index
    %c0_146 = arith.constant 0 : index
    %c0_147 = arith.constant 0 : index
    %126 = vector.load %arg10[%c2_145, %c0_146, %c0_147] : memref<18x18x32xbf16, #tpu.memory_space<vmem>>, vector<16x16x32xbf16>
    %127 = vector.shape_cast %126 : vector<16x16x32xbf16> to vector<256x32xbf16>
    %c6_148 = arith.constant 6 : index
    %c0_149 = arith.constant 0 : index
    %c0_150 = arith.constant 0 : index
    %128 = vector.load %arg6[%c6_148, %c0_149, %c0_150] : memref<9x32x2xbf16, #tpu.memory_space<vmem>>, vector<1x32x2xbf16>
    %129 = vector.shape_cast %128 : vector<1x32x2xbf16> to vector<32x2xbf16>
    %cst_151 = arith.constant dense<0.000000e+00> : vector<256x2xf32>
    %130 = tpu.matmul %127, %129, %cst_151 {dimension_numbers = #tpu.dot_dimension_numbers<[1], [0], [0], [1], [0, 0, 1, 1], [], []>} : vector<256x32xbf16>, vector<32x2xbf16>, vector<256x2xf32> -> vector<256x2xf32>
    %131 = arith.addf %125, %130 : vector<256x2xf32>
    %c2_152 = arith.constant 2 : index
    %c1_153 = arith.constant 1 : index
    %c0_154 = arith.constant 0 : index
    %132 = vector.load %arg10[%c2_152, %c1_153, %c0_154] : memref<18x18x32xbf16, #tpu.memory_space<vmem>>, vector<16x16x32xbf16>
    %133 = vector.shape_cast %132 : vector<16x16x32xbf16> to vector<256x32xbf16>
    %c7_155 = arith.constant 7 : index
    %c0_156 = arith.constant 0 : index
    %c0_157 = arith.constant 0 : index
    %134 = vector.load %arg6[%c7_155, %c0_156, %c0_157] : memref<9x32x2xbf16, #tpu.memory_space<vmem>>, vector<1x32x2xbf16>
    %135 = vector.shape_cast %134 : vector<1x32x2xbf16> to vector<32x2xbf16>
    %cst_158 = arith.constant dense<0.000000e+00> : vector<256x2xf32>
    %136 = tpu.matmul %133, %135, %cst_158 {dimension_numbers = #tpu.dot_dimension_numbers<[1], [0], [0], [1], [0, 0, 1, 1], [], []>} : vector<256x32xbf16>, vector<32x2xbf16>, vector<256x2xf32> -> vector<256x2xf32>
    %137 = arith.addf %131, %136 : vector<256x2xf32>
    %c2_159 = arith.constant 2 : index
    %c2_160 = arith.constant 2 : index
    %c0_161 = arith.constant 0 : index
    %138 = vector.load %arg10[%c2_159, %c2_160, %c0_161] : memref<18x18x32xbf16, #tpu.memory_space<vmem>>, vector<16x16x32xbf16>
    %139 = vector.shape_cast %138 : vector<16x16x32xbf16> to vector<256x32xbf16>
    %c8_162 = arith.constant 8 : index
    %c0_163 = arith.constant 0 : index
    %c0_164 = arith.constant 0 : index
    %140 = vector.load %arg6[%c8_162, %c0_163, %c0_164] : memref<9x32x2xbf16, #tpu.memory_space<vmem>>, vector<1x32x2xbf16>
    %141 = vector.shape_cast %140 : vector<1x32x2xbf16> to vector<32x2xbf16>
    %cst_165 = arith.constant dense<0.000000e+00> : vector<256x2xf32>
    %142 = tpu.matmul %139, %141, %cst_165 {dimension_numbers = #tpu.dot_dimension_numbers<[1], [0], [0], [1], [0, 0, 1, 1], [], []>} : vector<256x32xbf16>, vector<32x2xbf16>, vector<256x2xf32> -> vector<256x2xf32>
    %143 = arith.addf %137, %142 : vector<256x2xf32>
    %c0_166 = arith.constant 0 : index
    %c0_167 = arith.constant 0 : index
    %144 = vector.load %arg7[%c0_166, %c0_167] : memref<1x2xf32, #tpu.memory_space<vmem>>, vector<1x2xf32>
    %145 = vector.broadcast %144 : vector<1x2xf32> to vector<256x2xf32>
    %146 = arith.addf %143, %145 : vector<256x2xf32>
    %cst_168 = arith.constant 0.000000e+00 : f32
    %147 = vector.broadcast %cst_168 : f32 to vector<256x2xf32>
    %148 = arith.maximumf %146, %147 : vector<256x2xf32>
    %c0_169 = arith.constant 0 : index
    %c0_170 = arith.constant 0 : index
    %149 = vector.load %arg11[%c0_169, %c0_170] : memref<256x64xf32, #tpu.memory_space<vmem>>, vector<256x32xf32>
    %c0_171 = arith.constant 0 : index
    %c32 = arith.constant 32 : index
    %150 = vector.load %arg11[%c0_171, %c32] : memref<256x64xf32, #tpu.memory_space<vmem>>, vector<256x32xf32>
    %151 = vector.extract_strided_slice %148 {offsets = [0, 0], sizes = [256, 1], strides = [1, 1]} : vector<256x2xf32> to vector<256x1xf32>
    %152 = vector.extract_strided_slice %148 {offsets = [0, 1], sizes = [256, 1], strides = [1, 1]} : vector<256x2xf32> to vector<256x1xf32>
    %153 = vector.broadcast %151 : vector<256x1xf32> to vector<256x32xf32>
    %154 = arith.mulf %153, %149 : vector<256x32xf32>
    %155 = vector.broadcast %152 : vector<256x1xf32> to vector<256x32xf32>
    %156 = arith.mulf %155, %150 : vector<256x32xf32>
    %157 = arith.addf %154, %156 : vector<256x32xf32>
    %158 = arith.mulf %154, %156 : vector<256x32xf32>
    %159 = arith.addf %157, %158 : vector<256x32xf32>
    %160 = tpu.transpose %159, [1, 0] : vector<256x32xf32> -> vector<32x256xf32>
    %c0_172 = arith.constant 0 : index
    %c0_173 = arith.constant 0 : index
    %c0_174 = arith.constant 0 : index
    %161 = vector.load %arg8[%c0_172, %c0_173, %c0_174] : memref<1x32x256xf32, #tpu.memory_space<vmem>>, vector<1x32x256xf32>
    %162 = vector.shape_cast %161 : vector<1x32x256xf32> to vector<32x256xf32>
    %163 = vector.shape_cast %160 : vector<32x256xf32> to vector<1x32x256xf32>
    tpu.vector_store %arg8[%c0_172, %c0_173, %c0_174], %163 {strides = array<i32>} : memref<1x32x256xf32, #tpu.memory_space<vmem>>, vector<1x32x256xf32>,
    return
  }
  func.func @transform_0(%arg0: i32) -> (i32, i32, i32, i32) {
    %c0_i32 = arith.constant 0 : i32
    %c0_i32_0 = arith.constant 0 : i32
    %c0_i32_1 = arith.constant 0 : i32
    %c0_i32_2 = arith.constant 0 : i32
    return %arg0, %c0_i32, %c0_i32_0, %c0_i32_1 : i32, i32, i32, i32
  }
  func.func @transform_1(%arg0: i32) -> (i32, i32) {
    %c0_i32 = arith.constant 0 : i32
    %c0_i32_0 = arith.constant 0 : i32
    %c0_i32_1 = arith.constant 0 : i32
    return %c0_i32, %c0_i32_0 : i32, i32
  }
  func.func @transform_2(%arg0: i32) -> (i32, i32) {
    %c0_i32 = arith.constant 0 : i32
    %c0_i32_0 = arith.constant 0 : i32
    %c0_i32_1 = arith.constant 0 : i32
    return %c0_i32, %c0_i32_0 : i32, i32
  }
  func.func @transform_3(%arg0: i32) -> (i32, i32, i32) {
    %c0_i32 = arith.constant 0 : i32
    %c0_i32_0 = arith.constant 0 : i32
    %c0_i32_1 = arith.constant 0 : i32
    %c0_i32_2 = arith.constant 0 : i32
    return %c0_i32, %c0_i32_0, %c0_i32_1 : i32, i32, i32
  }
  func.func @transform_4(%arg0: i32) -> (i32, i32) {
    %c0_i32 = arith.constant 0 : i32
    %c0_i32_0 = arith.constant 0 : i32
    %c0_i32_1 = arith.constant 0 : i32
    return %c0_i32, %c0_i32_0 : i32, i32
  }
  func.func @transform_5(%arg0: i32) -> (i32, i32, i32) {
    %c0_i32 = arith.constant 0 : i32
    %c0_i32_0 = arith.constant 0 : i32
    %c0_i32_1 = arith.constant 0 : i32
    %c0_i32_2 = arith.constant 0 : i32
    return %c0_i32, %c0_i32_0, %c0_i32_1 : i32, i32, i32
  }
  func.func @transform_6(%arg0: i32) -> (i32, i32) {
    %c0_i32 = arith.constant 0 : i32
    %c0_i32_0 = arith.constant 0 : i32
    %c0_i32_1 = arith.constant 0 : i32
    return %c0_i32, %c0_i32_0 : i32, i32
  }
  func.func @transform_7(%arg0: i32) -> (i32, i32, i32) {
    %c0_i32 = arith.constant 0 : i32
    %c0_i32_0 = arith.constant 0 : i32
    %c0_i32_1 = arith.constant 0 : i32
    return %arg0, %c0_i32, %c0_i32_0 : i32, i32, i32
  }
}

</mosaic_0001>

<bundles_post_ra>
// kernel: wcmf_pallas.1
= control target key start
LH: loop header
LB: loop body
LE: loop exit
PB: predicated region body
PF: predicated region fallthrough
CT: control target
= control target key end

     0   :  { %s12382_s24 = smov 0   ;;  %s17185_s0 = inlined_call_operand.vmem [shape: bf16[2,16,16,64], index: 0, kind: input, shape index: {}]   ;;  %s17186_s1 = inlined_call_operand.vmem [shape: bf16[64,64], index: 1, kind: input, shape index: {}]   ;;  %s17187_s2 = inlined_call_operand.vmem [shape: f32[1,64], index: 2, kind: input, shape index: {}]   ;;  %s17188_s3 = inlined_call_operand.vmem [shape: bf16[9,64,32], index: 3, kind: input, shape index: {}]   ;;  %s17189_s4 = inlined_call_operand.vmem [shape: f32[1,32], index: 4, kind: input, shape index: {}]   ;;  %s17190_s5 = inlined_call_operand.vmem [shape: bf16[9,32,2], index: 5, kind: input, shape index: {}]   ;;  %s17191_s6 = inlined_call_operand.vmem [shape: f32[1,2], index: 6, kind: input, shape index: {}]   ;;  %s17192_s7 = inlined_call_operand.vmem [shape: f32[2,32,256], index: 7, kind: output, shape index: {}]  }
   0x1 LB: > { %s10850_s25 = sadd.s32 4294967295, %s12337_s24   ;;  %p10854_p0 = scmp.ge.s32.totalorder %s12337_s24, 1  ;;  %s12337_s24 = sphi %s12382_s24, %s17_s24  }
   0x2   : > { %p237_p1 = scmp.lt.s32.totalorder %s12337_s24, 3 }
   0x4   : > { %p238_p2 = pnand %p10854_p0, %p237_p1 }
   0x6   : > { %241 = sbr.rel (%p238_p2) target bundleno = 2163 (0x873), region = 48 }
   0xb   : > { %v12058_v0 = vld [vmem:[%s17186_s1 + $0x18] sm:$0xff]  ;;  %p269_p3 = scmp.lt.s32.totalorder %s10850_s25, 1  ;;  %v12057_v1 = vld [vmem:[%s17186_s1 + $0x10] sm:$0xff]  ;;  %v12056_v2 = vld [vmem:[%s17186_s1 + $0x8] sm:$0xff]  ;;  %vm428_vm0 = vcmask 523264   ;;  %vm630_vm1 = vcmask 519168  }
   0xc   : > { %481 = vmatpush.bf16.msra.mxu0 %v12058_v0  ;;  %12209 = vmatpush.bf16.msra.mxu3 %v12058_v0  ;;  %v12055_v3 = vld [vmem:[%s17186_s1] sm:$0xff]  ;;  %v12425_v10 = vld [vmem:[%s17188_s3 + $0x18] sm:$0xff]  ;;  %v17193_v11 = vmov 0   ;;  %vm633_vm2 = vcmask 516096   ;;  %vm640_vm3 = vsmask.f32 256 }
   0xd   : > { %s17799_s25 = smov (!%p269_p3, %s10850_s25), 1  ;;  %631 = vst.msk [vmem:[#allocation2] sm:$0xf] %vm630_vm1, %v17193_v11  ;;  %12232 = vset.pattern.permute.xlu0 %v17193_v11  ;;  %12235 = vset.pattern.permute.xlu1 %v17193_v11  ;;  %v12442_v13 = vld [vmem:[%s17188_s3 + $0x10] sm:$0xff]  ;;  %vm12449_vm4 = vmand %vm633_vm2, %vm640_vm3  ;;  %v17208_v14 = vmov 0  ;;  %v17211_v19 = vmov 0 }
   0xe   : > { %s12037_s9 = sshll.u32 %s17799_s25, 7  ;;  %632 = vst.msk [vmem:[#allocation2 + $0x4] sm:$0xf] %vm630_vm1, %v17193_v11  ;;  %2038 = vmatpush.bf16.msra.mxu2 %v12425_v10  ;;  %v17209_v14 = vsel %vm12449_vm4, 4294967295, %v17208_v14  ;;  %v645_v15 = vld [vmem:[#allocation2 + $0xc] sm:$0x1] }
   0xf   : > { %s12408_s14 = scalar_lea.vmem %s17185_s0, %s12037_s9  ;;  %636 = vst.msk [vmem:[#allocation2 + $0xcc] sm:$0xf] %vm630_vm1, %v17193_v11  ;;  %v646_v16 = vsel %vm12449_vm4, 0, %v645_v15  ;;  %vm696_vm5 = vsmask.f32 7938  ;;  %v12469_v20 = vld [vmem:[%s17188_s3 + $0x8] sm:$0xff] }
  0x10   : > { %482 = vmatpush.bf16.msra.mxu0 %v12057_v1  ;;  %12210 = vmatpush.bf16.msra.mxu3 %v12057_v1  ;;  %v12039_v4 = vld [vmem:[%s12408_s14] sm:$0xff]  ;;  %v12040_v5 = vld [vmem:[%s12408_s14 + $0x8] sm:$0xff]  ;;  %v12041_v6 = vld [vmem:[%s12408_s14 + $0x10] sm:$0xff]  ;;  %634 = vst.msk [vmem:[#allocation2 + $0x8] sm:$0x1] %vm633_vm2, %v17193_v11  ;;  %vm2171_vm10 = vcmask 1042432  }
  0x11   : > { %v12042_v7 = vld [vmem:[%s12408_s14 + $0x18] sm:$0xff]  ;;  %v12043_v8 = vld [vmem:[%s12408_s14 + $0x20] sm:$0xff]  ;;  %v12044_v9 = vld [vmem:[%s12408_s14 + $0x28] sm:$0xff]  ;;  %637 = vst.msk [vmem:[#allocation2 + $0xd0] sm:$0xf] %vm630_vm1, %v17193_v11  ;;  %vm2172_vm11 = vcmask 1046532  }
  0x12   : > { %v12045_v12 = vld [vmem:[%s12408_s14 + $0x30] sm:$0xff]  ;;  %17210 = vst [vmem:[#allocation5_spill] sm:$0xff] %v17209_v14  ;;  %2039 = vmatpush.bf16.msra.mxu2 %v12442_v13  ;;  %vm12462_vm6 = vmand %vm633_vm2, %vm696_vm5  ;;  %v12082_v24 = vld [vmem:[%s17188_s3 + $0x38] sm:$0xff]  ;;  %vm1277_vm7 = vsmask.f32 3328  ;;  %s12341_s11 = smov 96  }
  0x13   : > { %638 = vst.msk [vmem:[#allocation2 + $0xd4] sm:$0x1] %vm633_vm2, %v17193_v11  ;;  %v17212_v19 = vsel %vm12462_vm6, 4294967295, %v17211_v19  ;;  %v701_v23 = vld [vmem:[#allocation2 + $0x14] sm:$0x1]  ;;  %v12482_v26 = vld [vmem:[%s17188_s3] sm:$0xff]  ;;  %1797 = vmatpush.bf16.msra.mxu1 %v12082_v24  ;;  %vm12528_vm12 = vmand %vm630_vm1, %vm696_vm5 }
  0x14   : > { %483 = vmatpush.bf16.msra.mxu0 %v12056_v2  ;;  %12211 = vmatpush.bf16.msra.mxu3 %v12056_v2  ;;  %647 = vst [vmem:[#allocation2 + $0xc] sm:$0x1] %v646_v16  ;;  %v642_v17 = vld [vmem:[#allocation2] sm:$0x1]  ;;  %v702_v25 = vsel %vm12462_vm6, 0, %v701_v23  ;;  %v12046_v29 = vld [vmem:[%s12408_s14 + $0x38] sm:$0xff]  ;;  %vm12535_vm13 = vmor %vm2171_vm10, %vm2172_vm11 }
  0x15   : > { %v643_v18 = vsel %vm12449_vm4, 0, %v642_v17  ;;  %17213 = vst [vmem:[#allocation6_spill] sm:$0xff] %v17212_v19  ;;  %v12081_v30 = vld [vmem:[%s17188_s3 + $0x30] sm:$0xff]  ;;  %v12489_v31 = vld [vmem:[#allocation2 + $0x4] sm:$0xf]  ;;  %v12080_v41 = vld [vmem:[%s17188_s3 + $0x28] sm:$0xff] }
  0x16   : > { %644 = vst [vmem:[#allocation2] sm:$0x1] %v643_v18  ;;  %2040 = vmatpush.bf16.msra.mxu2 %v12469_v20  ;;  %v1290_v34 = vshll.u32 %v12489_v31, 16  ;;  %v1294_v35 = vshrl.u32 %v12489_v31, 16  ;;  %v648_v44 = vld [vmem:[#allocation2 + $0x18] sm:$0x1] }
  0x17   : > { %v698_v21 = vld [vmem:[#allocation2 + $0x8] sm:$0x1]  ;;  %703 = vst [vmem:[#allocation2 + $0x14] sm:$0x1] %v702_v25  ;;  %1798 = vmatpush.bf16.msra.mxu1 %v12081_v30  ;;  %v649_v46 = vsel %vm12449_vm4, 0, %v648_v44  ;;  %v12079_v51 = vld [vmem:[%s17188_s3 + $0x20] sm:$0xff] }
  0x18   : > { %484 = vmatpush.bf16.msra.mxu0 %v12055_v3  ;;  %12212 = vmatpush.bf16.msra.mxu3 %v12055_v3  ;;  %v699_v22 = vsel %vm12462_vm6, 0, %v698_v21  ;;  %v1292_v39 = vrot.slane %v1290_v34, 5  ;;  %v1296_v40 = vrot.slane %v1294_v35, 4  ;;  %vm1278_vm8 = vsmask.f32 7440  ;;  %v12047_v60 = vld [vmem:[%s12408_s14 + $0x40] sm:$0xff] }
  0x19   : > { %700 = vst [vmem:[#allocation2 + $0x8] sm:$0x1] %v699_v22  ;;  %vm12500_vm9 = vmor %vm1277_vm7, %vm1278_vm8  ;;  %v704_v57 = vld [vmem:[#allocation2 + $0x20] sm:$0x1]  ;;  %v651_v0 = vld [vmem:[#allocation2 + $0x24] sm:$0x1] }
  0x1a   : > { %2041 = vmatpush.bf16.msra.mxu2 %v12482_v26  ;;  %v1297_v45 = vor.u32 %v1296_v40, %v1292_v39  ;;  %650 = vst [vmem:[#allocation2 + $0x18] sm:$0x1] %v649_v46  ;;  %v12514_v58 = vld [vmem:[%s17187_s2] ss:$0 sm:$0xff]  ;;  %v705_v59 = vsel %vm12462_vm6, 0, %v704_v57  ;;  %v652_v2 = vsel %vm12449_vm4, 0, %v651_v0 }
  0x1b   : > { %10939 = vmatmul.msk.bf16.vlgmr.msra.gmra.mxu0 %vm428_vm0, %v12039_v4  ;;  %1799 = vmatpush.bf16.msra.mxu1 %v12080_v41  ;;  %706 = vst [vmem:[#allocation2 + $0x20] sm:$0x1] %v705_v59  ;;  %v17195_v4 = vrot.slane %v12489_v31, 5  ;;  %v1109_v16 = vld [vmem:[#allocation2 + $0xc] sm:$0xf]  ;;  %vm5452_vm2 = vcmask 253952  }
  0x1c   : > { %12213 = vmatpush.bf16.msrb.mxu3 %v12082_v24  ;;  %v1298_v49 = vrot.slane %v1297_v45, 4  ;;  %653 = vst [vmem:[#allocation2 + $0x24] sm:$0x1] %v652_v2  ;;  %v707_v23 = vld [vmem:[#allocation2 + $0x2c] sm:$0x1]  ;;  %vm14384_vm7 = vmand %vm5452_vm2, %vm640_vm3  ;;  %s12038_s15 = sshll.u32 %s17799_s25, 6 }
  0x1d   : > { %v12059_v27 = vld [vmem:[#allocation2] sm:$0xff]  ;;  %v2178_v15 = vrot.slane %v17195_v4, 4  ;;  %vm784_vm14 = vsmask.f32 4368  ;;  %s278_s18 = scalar_lea.vmem %s17192_s7, %s12038_s15 }
  0x1e   : > { %v1221_v28 = vld [vmem:[#allocation2] sm:$0xf]  ;;  %11075 = vmatmul.msk.bf16.vlgmr.msra.gmra.mxu2 %vm428_vm0, %v12059_v27  ;;  %v708_v27 = vsel %vm12462_vm6, 0, %v707_v23  ;;  %vm12554_vm15 = vmor %vm640_vm3, %vm784_vm14 }
  0x1f   : > { %v1281_v32 = vshrl.u32 %v1221_v28, 16  ;;  %v1284_v33 = vshll.u32 %v1221_v28, 16  ;;  %1800 = vmatpush.bf16.msra.mxu1 %v12079_v51  ;;  %v12051_v28 = vld [vmem:[%s12408_s14 + $0x60] sm:$0xff]  ;;  %709 = vst [vmem:[#allocation2 + $0x2c] sm:$0x1] %v708_v27  ;;  %vm14414_vm3 = vmand %vm5452_vm2, %vm696_vm5 }
  0x20   : > { %v1261_v38 = vld [vmem:[#allocation2 + $0x8] sm:$0x1]  ;;  %12214 = vmatpush.bf16.msrb.mxu3 %v12081_v30 }
  0x21   : > { %v1283_v36 = vrot.slane %v1281_v32, 4  ;;  %v1286_v37 = vrot.slane %v1284_v33, 5  ;;  %v1300_v43 = vshll.u32 %v1261_v38, 16  ;;  %v12048_v30 = vld [vmem:[%s12408_s14 + $0x48] sm:$0xff]  ;;  %10951 = vmatmul.msk.bf16.vlgmr.msra.gmra.mxu3 %vm428_vm0, %v12051_v28  ;;  %v1116_v57 = vld [vmem:[#allocation2 + $0x18] sm:$0xf] }
  0x23   : > { %v1287_v42 = vor.u32 %v1286_v37, %v1283_v36  ;;  %v1302_v50 = vrot.slane %v1300_v43, 5  ;;  %v17220_v36 = vmov 0  ;;  %v1113_v37 = vld [vmem:[#allocation2 + $0x14] sm:$0x1]  ;;  %v654_v43 = vld [vmem:[#allocation2 + $0x30] sm:$0x1] }
  0x24   : > { %12215 = vmatpush.bf16.msrb.mxu3 %v12080_v41  ;;  %v17221_v36 = vsel %vm12554_vm15, 4294967295, %v17220_v36 }
  0x25   : > { %v1288_v47 = vrot.slane %v1287_v42, 4  ;;  %v1303_v53 = vsel %vm12500_vm9, %v1298_v49, %v1302_v50  ;;  %17222 = vst [vmem:[#allocation7_spill] sm:$0xff] %v17221_v36  ;;  %v12106_v42 = vld [vmem:[%s17188_s3 + $0x78] sm:$0xff] }
  0x26   : > { %v1674_v55 = vunpack.c.l.b16 %v1303_v53  ;;  %2733 = vmatpush.bf16.msrb.mxu0 %v12106_v42 }
  0x27   : > { %v1293_v52 = vsel %vm12500_vm9, %v1288_v47, %v1292_v39  ;;  %v655_v47 = vsel %vm12449_vm4, 0, %v654_v43 }
  0x28   : > { %v1673_v54 = vunpack.c.l.b16 %v1293_v52  ;;  %12216 = vmatpush.bf16.msrb.mxu3 %v12079_v51  ;;  %v12105_v52 = vld [vmem:[%s17188_s3 + $0x70] sm:$0xff]  ;;  %656 = vst [vmem:[#allocation2 + $0x30] sm:$0x1] %v655_v47 }
  0x2a   : > { %v1705_v56 = vpack.c.b16 %v1674_v55, %v1673_v54  ;;  %2734 = vmatpush.bf16.msrb.mxu0 %v12105_v52 }
  0x2b   : > { %10940 = vmatmul.msk.bf16.gmra.mxu0 %vm428_vm0, %v12040_v5  ;;  %v2179_v5 = vrot.slane %v1261_v38, 5 }
  0x2c   : > { %10979 = vmatmul.msk.bf16.vlgmr.msra.gmra.mxu1 %vm428_vm0, %v1705_v56  ;;  %12217 = vmatpush.bf16.msra.mxu3 %v12425_v10 }
  0x2d   : > { %v12541_v22 = vsel %vm12535_vm13, %v2178_v15, %v2179_v5  ;;  %v12049_v15 = vld [vmem:[%s12408_s14 + $0x50] sm:$0xff] }
  0x30   : > { %12218 = vmatpush.bf16.msra.mxu3 %v12442_v13 }
  0x34   : > { %12219 = vmatpush.bf16.msra.mxu3 %v12469_v20 }
  0x38   : > { %12220 = vmatpush.bf16.msra.mxu3 %v12482_v26 }
  0x3b   : > { %10941 = vmatmul.msk.bf16.gmra.mxu0 %vm428_vm0, %v12041_v6 }
  0x4b   : > { %10942 = vmatmul.msk.bf16.gmra.mxu0 %vm428_vm0, %v12042_v7 }
  0x5b   : > { %10943 = vmatmul.msk.bf16.gmra.mxu0 %vm428_vm0, %v12043_v8 }
  0x6b   : > { %10944 = vmatmul.msk.bf16.gmra.mxu0 %vm428_vm0, %v12044_v9 }
  0x7b   : > { %10945 = vmatmul.msk.bf16.gmra.mxu0 %vm428_vm0, %v12045_v12 }
  0x8b   : > { %10946 = vmatmul.msk.bf16.gmra.mxu0 %vm428_vm0, %v12046_v29 }
  0x98   : > { %v486_v61 = vpop.f32.mrf.mxu0 }
  0x99   : > { %v487_v62 = vadd.f32 %v12514_v58, %v486_v61 }
  0x9b   : > { %v566_v63 = vmax.f32 %v487_v62, 0.0  ;;  %10947 = vmatmul.msk.bf16.gmra.mxu0 %vm428_vm0, %v12047_v60  ;;  %v12104_v62 = vld [vmem:[%s17188_s3 + $0x68] sm:$0xff] }
  0x9c   : > { %2735 = vmatpush.bf16.msrb.mxu0 %v12104_v62 }
  0x9d   : > { %598 = vst.msk [vmem:[#allocation4] sm:$0xff] %vm428_vm0, %v566_v63  ;;  %v752_v1 = vpack.c.bf16 %v566_v63, %v566_v63  ;;  %v710_v63 = vld [vmem:[#allocation2 + $0x38] sm:$0x1] }
  0x9e   : > { %v711_v5 = vsel %vm12462_vm6, 0, %v710_v63  ;;  %v713_v63 = vld [vmem:[#allocation2 + $0x44] sm:$0x1] }
  0x9f   : > { %v787_v3 = vshrl.u32 %v752_v1, 16  ;;  %v790_v8 = vshll.u32 %v752_v1, 16  ;;  %712 = vst [vmem:[#allocation2 + $0x38] sm:$0x1] %v711_v5  ;;  %v714_v5 = vsel %vm12462_vm6, 0, %v713_v63 }
  0xa0   : > { %v488_v6 = vpop.f32.mrf.mxu0  ;;  %715 = vst [vmem:[#allocation2 + $0x44] sm:$0x1] %v714_v5 }
  0xa1   : > { %v789_v7 = vrot.slane %v787_v3, 7  ;;  %v489_v12 = vadd.f32 %v12514_v58, %v488_v6 }
  0xa3   : > { %v792_v18 = vor.u32 %v790_v8, %v789_v7  ;;  %v567_v21 = vmax.f32 %v489_v12, 0.0  ;;  %v793_v38 = vrot.slane %v789_v7, 4 }
  0xa5   : > { %v1110_v24 = vsel %vm12528_vm12, %v792_v18, %v1109_v16  ;;  %599 = vst.msk [vmem:[#allocation4 + $0x8] sm:$0xff] %vm428_vm0, %v567_v21  ;;  %v753_v25 = vpack.c.bf16 %v567_v21, %v567_v21 }
  0xa6   : > { %1111 = vst [vmem:[#allocation2 + $0xc] sm:$0xf] %v1110_v24  ;;  %v12052_v24 = vld [vmem:[%s12408_s14 + $0x68] sm:$0xff] }
  0xa7   : > { %v795_v29 = vshrl.u32 %v753_v25, 16  ;;  %v798_v34 = vshll.u32 %v753_v25, 16  ;;  %v12103_v25 = vld [vmem:[%s17188_s3 + $0x60] sm:$0xff]  ;;  %10952 = vmatmul.msk.bf16.gmra.mxu3 %vm428_vm0, %v12052_v24  ;;  %v12053_v24 = vld [vmem:[%s12408_s14 + $0x70] sm:$0xff] }
  0xa8   : > { %v491_v32 = vpop.f32.mrf.mxu0  ;;  %2736 = vmatpush.bf16.msrb.mxu0 %v12103_v25 }
  0xa9   : > { %v797_v33 = vrot.slane %v795_v29, 7  ;;  %v492_v35 = vadd.f32 %v12514_v58, %v491_v32 }
  0xab   : > { %v800_v39 = vor.u32 %v798_v34, %v797_v33  ;;  %v802_v40 = vrot.slane %v797_v33, 4  ;;  %v568_v41 = vmax.f32 %v492_v35, 0.0  ;;  %10948 = vmatmul.msk.bf16.gmra.mxu0 %vm428_vm0, %v12048_v30  ;;  %v1120_v30 = vld [vmem:[#allocation2 + $0x20] sm:$0x1] }
  0xad   : > { %v801_v10 = vsel %vm12554_vm15, %v793_v38, %v800_v39  ;;  %v1114_v44 = vsel %vm12449_vm4, %v802_v40, %v1113_v37  ;;  %600 = vst.msk [vmem:[#allocation4 + $0x10] sm:$0xff] %vm428_vm0, %v568_v41  ;;  %v754_v45 = vpack.c.bf16 %v568_v41, %v568_v41  ;;  %v1223_v46 = vld [vmem:[#allocation2 + $0xc] sm:$0xf]  ;;  %v657_v41 = vld [vmem:[#allocation2 + $0x3c] sm:$0x1] }
  0xae   : > { %1112 = vst.msk [vmem:[#allocation2 + $0x10] sm:$0xf] %vm630_vm1, %v801_v10  ;;  %v1305_v49 = vshrl.u32 %v1223_v46, 16  ;;  %v1308_v50 = vshll.u32 %v1223_v46, 16 }
  0xaf   : > { %1115 = vst [vmem:[#allocation2 + $0x14] sm:$0x1] %v1114_v44  ;;  %v804_v51 = vshrl.u32 %v754_v45, 16  ;;  %v807_v55 = vshll.u32 %v754_v45, 16  ;;  %v658_v45 = vsel %vm12449_vm4, 0, %v657_v41 }
  0xb0   : > { %v493_v53 = vpop.f32.mrf.mxu0  ;;  %v1307_v59 = vrot.slane %v1305_v49, 4  ;;  %v1310_v60 = vrot.slane %v1308_v50, 5  ;;  %659 = vst [vmem:[#allocation2 + $0x3c] sm:$0x1] %v658_v45 }
  0xb1   : > { %v806_v54 = vrot.slane %v804_v51, 7  ;;  %v494_v56 = vadd.f32 %v12514_v58, %v493_v53 }
  0xb2   : > { %v1311_v6 = vor.u32 %v1310_v60, %v1307_v59  ;;  %v1123_v59 = vld [vmem:[#allocation2 + $0x24] sm:$0xf] }
  0xb3   : > { %v809_v61 = vor.u32 %v807_v55, %v806_v54  ;;  %v569_v13 = vmax.f32 %v494_v56, 0.0  ;;  %v810_v33 = vrot.slane %v806_v54, 4 }
  0xb4   : > { %v1312_v26 = vrot.slane %v1311_v6, 4 }
  0xb5   : > { %v1117_v0 = vsel %vm12528_vm12, %v809_v61, %v1116_v57  ;;  %601 = vst.msk [vmem:[#allocation4 + $0x18] sm:$0xff] %vm428_vm0, %v569_v13  ;;  %v755_v1 = vpack.c.bf16 %v569_v13, %v569_v13  ;;  %v12060_v2 = vld [vmem:[#allocation2 + $0xc] sm:$0xff] }
  0xb6   : > { %v1224_v3 = vld [vmem:[#allocation2 + $0x10] sm:$0xf]  ;;  %1118 = vst [vmem:[#allocation2 + $0x18] sm:$0xf] %v1117_v0  ;;  %v1262_v20 = vld [vmem:[#allocation2 + $0x14] sm:$0x1]  ;;  %11076 = vmatmul.msk.bf16.gmra.mxu2 %vm428_vm0, %v12060_v2 }
  0xb7   : > { %v1314_v7 = vshll.u32 %v1224_v3, 16  ;;  %v1318_v8 = vshrl.u32 %v1224_v3, 16  ;;  %v812_v12 = vshrl.u32 %v755_v1, 16  ;;  %v1324_v16 = vshll.u32 %v1262_v20, 16  ;;  %10953 = vmatmul.msk.bf16.gmra.mxu3 %vm428_vm0, %v12053_v24 }
  0xb8   : > { %v496_v18 = vpop.f32.mrf.mxu0  ;;  %v815_v28 = vshll.u32 %v755_v1, 16 }
  0xb9   : > { %v1316_v21 = vrot.slane %v1314_v7, 5  ;;  %v1320_v23 = vrot.slane %v1318_v8, 4  ;;  %v814_v27 = vrot.slane %v812_v12, 7  ;;  %v497_v29 = vadd.f32 %v12514_v58, %v496_v18 }
  0xba   : > { %v1326_v40 = vrot.slane %v1324_v16, 5 }
  0xbb   : > { %v1321_v32 = vor.u32 %v1320_v23, %v1316_v21  ;;  %v817_v34 = vor.u32 %v815_v28, %v814_v27  ;;  %v819_v35 = vrot.slane %v814_v27, 4  ;;  %v570_v37 = vmax.f32 %v497_v29, 0.0  ;;  %10949 = vmatmul.msk.bf16.gmra.mxu0 %vm428_vm0, %v12049_v15  ;;  %v12050_v15 = vld [vmem:[%s12408_s14 + $0x58] sm:$0xff]  ;;  %v1127_v29 = vld [vmem:[#allocation2 + $0x2c] sm:$0x1] }
  0xbc   : > { %v1317_v38 = vsel %vm12500_vm9, %v1312_v26, %v1316_v21 }
  0xbd   : > { %v1322_v39 = vrot.slane %v1321_v32, 4  ;;  %v818_v42 = vsel %vm12554_vm15, %v810_v33, %v817_v34  ;;  %v1121_v43 = vsel %vm12449_vm4, %v819_v35, %v1120_v30  ;;  %602 = vst.msk [vmem:[#allocation4 + $0x20] sm:$0xff] %vm428_vm0, %v570_v37  ;;  %v756_v10 = vpack.c.bf16 %v570_v37, %v570_v37  ;;  %v1225_v44 = vld [vmem:[#allocation2 + $0x18] sm:$0xf] }
  0xbe   : > { %1119 = vst.msk [vmem:[#allocation2 + $0x1c] sm:$0xf] %vm630_vm1, %v818_v42  ;;  %v1329_v47 = vshrl.u32 %v1225_v44, 16  ;;  %v1332_v49 = vshll.u32 %v1225_v44, 16  ;;  %v1675_v51 = vunpack.c.l.b16 %v1317_v38 }
  0xbf   : > { %v1327_v46 = vsel %vm12500_vm9, %v1322_v39, %v1326_v40  ;;  %1122 = vst [vmem:[#allocation2 + $0x20] sm:$0x1] %v1121_v43  ;;  %v821_v50 = vshrl.u32 %v756_v10, 16  ;;  %v824_v55 = vshll.u32 %v756_v10, 16  ;;  %v660_v40 = vld [vmem:[#allocation2 + $0x48] sm:$0x1] }
  0xc0   : > { %v1676_v52 = vunpack.c.l.b16 %v1327_v46  ;;  %v498_v53 = vpop.f32.mrf.mxu0  ;;  %v1331_v60 = vrot.slane %v1329_v47, 4  ;;  %v1334_v61 = vrot.slane %v1332_v49, 5  ;;  %v661_v44 = vsel %vm12449_vm4, 0, %v660_v40 }
  0xc1   : > { %v823_v54 = vrot.slane %v821_v50, 7  ;;  %v499_v56 = vadd.f32 %v12514_v58, %v498_v53  ;;  %662 = vst [vmem:[#allocation2 + $0x48] sm:$0x1] %v661_v44 }
  0xc2   : > { %v1706_v57 = vpack.c.b16 %v1676_v52, %v1675_v51  ;;  %v1335_v6 = vor.u32 %v1334_v61, %v1331_v60 }
  0xc3   : > { %v826_v13 = vor.u32 %v824_v55, %v823_v54  ;;  %v571_v62 = vmax.f32 %v499_v56, 0.0  ;;  %v827_v32 = vrot.slane %v823_v54, 4 }
  0xc4   : > { %10980 = vmatmul.msk.bf16.gmra.mxu1 %vm428_vm0, %v1706_v57  ;;  %v1336_v30 = vrot.slane %v1335_v6, 4  ;;  %v1130_v57 = vld [vmem:[#allocation2 + $0x30] sm:$0xf] }
  0xc5   : > { %v1124_v0 = vsel %vm12528_vm12, %v826_v13, %v1123_v59  ;;  %603 = vst.msk [vmem:[#allocation4 + $0x28] sm:$0xff] %vm428_vm0, %v571_v62  ;;  %v757_v1 = vpack.c.bf16 %v571_v62, %v571_v62  ;;  %v12061_v2 = vld [vmem:[#allocation2 + $0x18] sm:$0xff]  ;;  %v716_v62 = vld [vmem:[#allocation2 + $0x50] sm:$0x1] }
  0xc6   : > { %v1226_v3 = vld [vmem:[#allocation2 + $0x1c] sm:$0xf]  ;;  %1125 = vst [vmem:[#allocation2 + $0x24] sm:$0xf] %v1124_v0  ;;  %v1263_v20 = vld [vmem:[#allocation2 + $0x20] sm:$0x1]  ;;  %11077 = vmatmul.msk.bf16.gmra.mxu2 %vm428_vm0, %v12061_v2 }
  0xc7   : > { %v1338_v7 = vshll.u32 %v1226_v3, 16  ;;  %v1342_v8 = vshrl.u32 %v1226_v3, 16  ;;  %v829_v12 = vshrl.u32 %v757_v1, 16  ;;  %v1348_v23 = vshll.u32 %v1263_v20, 16 }
  0xc8   : > { %v501_v16 = vpop.f32.mrf.mxu0  ;;  %v832_v27 = vshll.u32 %v757_v1, 16  ;;  %v717_v3 = vsel %vm12462_vm6, 0, %v716_v62 }
  0xc9   : > { %v1340_v18 = vrot.slane %v1338_v7, 5  ;;  %v1344_v21 = vrot.slane %v1342_v8, 4  ;;  %v831_v25 = vrot.slane %v829_v12, 7  ;;  %v502_v28 = vadd.f32 %v12514_v58, %v501_v16  ;;  %718 = vst [vmem:[#allocation2 + $0x50] sm:$0x1] %v717_v3 }
  0xca   : > { %v1350_v39 = vrot.slane %v1348_v23, 5 }
  0xcb   : > { %v1345_v26 = vor.u32 %v1344_v21, %v1340_v18  ;;  %v834_v33 = vor.u32 %v832_v27, %v831_v25  ;;  %v836_v34 = vrot.slane %v831_v25, 4  ;;  %v572_v35 = vmax.f32 %v502_v28, 0.0  ;;  %10950 = vmatmul.msk.bf16.gmra.mxu0 %vm428_vm0, %v12050_v15  ;;  %v12087_v25 = vld [vmem:[#allocation2 + $0xc] sm:$0xff]  ;;  %v1134_v27 = vld [vmem:[#allocation2 + $0x38] sm:$0x1] }
  0xcc   : > { %v1341_v37 = vsel %vm12500_vm9, %v1336_v30, %v1340_v18 }
  0xcd   : > { %v1346_v38 = vrot.slane %v1345_v26, 4  ;;  %v835_v41 = vsel %vm12554_vm15, %v827_v32, %v834_v33  ;;  %v1128_v42 = vsel %vm12449_vm4, %v836_v34, %v1127_v29  ;;  %604 = vst.msk [vmem:[#allocation4 + $0x30] sm:$0xff] %vm428_vm0, %v572_v35  ;;  %v758_v43 = vpack.c.bf16 %v572_v35, %v572_v35  ;;  %v1227_v10 = vld [vmem:[#allocation2 + $0x24] sm:$0xf] }
  0xce   : > { %1126 = vst.msk [vmem:[#allocation2 + $0x28] sm:$0xf] %vm630_vm1, %v835_v41  ;;  %v1353_v46 = vshrl.u32 %v1227_v10, 16  ;;  %v1356_v47 = vshll.u32 %v1227_v10, 16  ;;  %v1677_v50 = vunpack.c.l.b16 %v1341_v37 }
  0xcf   : > { %v1351_v45 = vsel %vm12500_vm9, %v1346_v38, %v1350_v39  ;;  %1129 = vst [vmem:[#allocation2 + $0x2c] sm:$0x1] %v1128_v42  ;;  %v838_v49 = vshrl.u32 %v758_v43, 16  ;;  %v841_v54 = vshll.u32 %v758_v43, 16  ;;  %v663_v38 = vld [vmem:[#allocation2 + $0x54] sm:$0x1] }
  0xd0   : > { %v1678_v51 = vunpack.c.l.b16 %v1351_v45  ;;  %v503_v52 = vpop.f32.mrf.mxu0  ;;  %v1355_v59 = vrot.slane %v1353_v46, 4  ;;  %v1358_v60 = vrot.slane %v1356_v47, 5  ;;  %v664_v43 = vsel %vm12449_vm4, 0, %v663_v38 }
  0xd1   : > { %v840_v53 = vrot.slane %v838_v49, 7  ;;  %v504_v55 = vadd.f32 %v12514_v58, %v503_v52  ;;  %665 = vst [vmem:[#allocation2 + $0x54] sm:$0x1] %v664_v43 }
  0xd2   : > { %v1707_v56 = vpack.c.b16 %v1678_v51, %v1677_v50  ;;  %v1359_v20 = vor.u32 %v1358_v60, %v1355_v59 }
  0xd3   : > { %v843_v61 = vor.u32 %v841_v54, %v840_v53  ;;  %v573_v13 = vmax.f32 %v504_v55, 0.0  ;;  %v844_v30 = vrot.slane %v840_v53, 4  ;;  %v1137_v55 = vld [vmem:[#allocation2 + $0x3c] sm:$0xf] }
  0xd4   : > { %10981 = vmatmul.msk.bf16.gmra.mxu1 %vm428_vm0, %v1707_v56  ;;  %v1360_v28 = vrot.slane %v1359_v20, 4 }
  0xd5   : > { %v1131_v63 = vsel %vm12528_vm12, %v843_v61, %v1130_v57  ;;  %605 = vst.msk [vmem:[#allocation4 + $0x38] sm:$0xff] %vm428_vm0, %v573_v13  ;;  %v759_v0 = vpack.c.bf16 %v573_v13, %v573_v13  ;;  %v12062_v1 = vld [vmem:[#allocation2 + $0x24] sm:$0xff]  ;;  %v719_v61 = vld [vmem:[#allocation2 + $0x5c] sm:$0x1] }
  0xd6   : > { %v1228_v2 = vld [vmem:[#allocation2 + $0x28] sm:$0xf]  ;;  %1132 = vst [vmem:[#allocation2 + $0x30] sm:$0xf] %v1131_v63  ;;  %v1264_v5 = vld [vmem:[#allocation2 + $0x2c] sm:$0x1]  ;;  %11078 = vmatmul.msk.bf16.gmra.mxu2 %vm428_vm0, %v12062_v1 }
  0xd7   : > { %v1362_v6 = vshll.u32 %v1228_v2, 16  ;;  %v1366_v7 = vshrl.u32 %v1228_v2, 16  ;;  %v846_v8 = vshrl.u32 %v759_v0, 16  ;;  %v1372_v18 = vshll.u32 %v1264_v5, 16 }
  0xd8   : > { %v506_v12 = vpop.f32.mrf.mxu0  ;;  %v849_v23 = vshll.u32 %v759_v0, 16  ;;  %v720_v1 = vsel %vm12462_vm6, 0, %v719_v61 }
  0xd9   : > { %v1364_v15 = vrot.slane %v1362_v6, 5  ;;  %v1368_v16 = vrot.slane %v1366_v7, 4  ;;  %v848_v21 = vrot.slane %v846_v8, 7  ;;  %v507_v24 = vadd.f32 %v12514_v58, %v506_v12  ;;  %721 = vst [vmem:[#allocation2 + $0x5c] sm:$0x1] %v720_v1 }
  0xda   : > { %v1374_v37 = vrot.slane %v1372_v18, 5 }
  0xdb   : > { %v1369_v29 = vor.u32 %v1368_v16, %v1364_v15  ;;  %v851_v26 = vor.u32 %v849_v23, %v848_v21  ;;  %v853_v32 = vrot.slane %v848_v21, 4  ;;  %v574_v33 = vmax.f32 %v507_v24, 0.0  ;;  %11235 = vmatmul.msk.bf16.vlgmr.msrb.gmra.mxu0 %vm428_vm0, %v12087_v25  ;;  %v12088_v23 = vld [vmem:[#allocation2 + $0x18] sm:$0xff]  ;;  %v1141_v24 = vld [vmem:[#allocation2 + $0x44] sm:$0x1] }
  0xdc   : > { %v1365_v34 = vsel %vm12500_vm9, %v1360_v28, %v1364_v15 }
  0xdd   : > { %v1370_v35 = vrot.slane %v1369_v29, 4  ;;  %v852_v39 = vsel %vm12554_vm15, %v844_v30, %v851_v26  ;;  %v1135_v40 = vsel %vm12449_vm4, %v853_v32, %v1134_v27  ;;  %606 = vst.msk [vmem:[#allocation4 + $0x40] sm:$0xff] %vm428_vm0, %v574_v33  ;;  %v760_v41 = vpack.c.bf16 %v574_v33, %v574_v33  ;;  %v1229_v42 = vld [vmem:[#allocation2 + $0x30] sm:$0xf] }
  0xde   : > { %1133 = vst.msk [vmem:[#allocation2 + $0x34] sm:$0xf] %vm630_vm1, %v852_v39  ;;  %v1377_v44 = vshrl.u32 %v1229_v42, 16  ;;  %v1380_v45 = vshll.u32 %v1229_v42, 16  ;;  %v1679_v47 = vunpack.c.l.b16 %v1365_v34 }
  0xdf   : > { %v1375_v10 = vsel %vm12500_vm9, %v1370_v35, %v1374_v37  ;;  %1136 = vst [vmem:[#allocation2 + $0x38] sm:$0x1] %v1135_v40  ;;  %v855_v46 = vshrl.u32 %v760_v41, 16  ;;  %v858_v52 = vshll.u32 %v760_v41, 16  ;;  %v666_v35 = vld [vmem:[#allocation2 + $0x60] sm:$0x1] }
  0xe0   : > { %v1680_v49 = vunpack.c.l.b16 %v1375_v10  ;;  %v508_v50 = vpop.f32.mrf.mxu0  ;;  %v1379_v56 = vrot.slane %v1377_v44, 4  ;;  %v1382_v57 = vrot.slane %v1380_v45, 5  ;;  %v667_v41 = vsel %vm12449_vm4, 0, %v666_v35 }
  0xe1   : > { %v857_v51 = vrot.slane %v855_v46, 7  ;;  %v509_v53 = vadd.f32 %v12514_v58, %v508_v50  ;;  %668 = vst [vmem:[#allocation2 + $0x60] sm:$0x1] %v667_v41 }
  0xe2   : > { %v1708_v54 = vpack.c.b16 %v1680_v49, %v1679_v47  ;;  %v1383_v3 = vor.u32 %v1382_v57, %v1379_v56 }
  0xe3   : > { %v860_v59 = vor.u32 %v858_v52, %v857_v51  ;;  %v575_v60 = vmax.f32 %v509_v53, 0.0  ;;  %v861_v28 = vrot.slane %v857_v51, 4  ;;  %v1144_v53 = vld [vmem:[#allocation2 + $0x48] sm:$0xf] }
  0xe4   : > { %10982 = vmatmul.msk.bf16.gmra.mxu1 %vm428_vm0, %v1708_v54  ;;  %v1384_v25 = vrot.slane %v1383_v3, 4 }
  0xe5   : > { %v1138_v13 = vsel %vm12528_vm12, %v860_v59, %v1137_v55  ;;  %607 = vst.msk [vmem:[#allocation4 + $0x48] sm:$0xff] %vm428_vm0, %v575_v60  ;;  %v761_v62 = vpack.c.bf16 %v575_v60, %v575_v60  ;;  %v12063_v63 = vld [vmem:[#allocation2 + $0x30] sm:$0xff]  ;;  %v722_v59 = vld [vmem:[#allocation2 + $0x68] sm:$0x1] }
  0xe6   : > { %v1230_v0 = vld [vmem:[#allocation2 + $0x34] sm:$0xf]  ;;  %1139 = vst [vmem:[#allocation2 + $0x3c] sm:$0xf] %v1138_v13  ;;  %v1265_v2 = vld [vmem:[#allocation2 + $0x38] sm:$0x1]  ;;  %11079 = vmatmul.msk.bf16.gmra.mxu2 %vm428_vm0, %v12063_v63 }
  0xe7   : > { %v1386_v5 = vshll.u32 %v1230_v0, 16  ;;  %v1390_v20 = vshrl.u32 %v1230_v0, 16  ;;  %v863_v6 = vshrl.u32 %v761_v62, 16  ;;  %v1396_v15 = vshll.u32 %v1265_v2, 16 }
  0xe8   : > { %v511_v7 = vpop.f32.mrf.mxu0  ;;  %v866_v18 = vshll.u32 %v761_v62, 16  ;;  %v723_v63 = vsel %vm12462_vm6, 0, %v722_v59 }
  0xe9   : > { %v1388_v8 = vrot.slane %v1386_v5, 5  ;;  %v1392_v12 = vrot.slane %v1390_v20, 4  ;;  %v865_v16 = vrot.slane %v863_v6, 7  ;;  %v512_v21 = vadd.f32 %v12514_v58, %v511_v7  ;;  %724 = vst [vmem:[#allocation2 + $0x68] sm:$0x1] %v723_v63 }
  0xea   : > { %v1398_v34 = vrot.slane %v1396_v15, 5 }
  0xeb   : > { %v1393_v27 = vor.u32 %v1392_v12, %v1388_v8  ;;  %v868_v29 = vor.u32 %v866_v18, %v865_v16  ;;  %v870_v30 = vrot.slane %v865_v16, 4  ;;  %v576_v26 = vmax.f32 %v512_v21, 0.0  ;;  %11236 = vmatmul.msk.bf16.gmra.mxu0 %vm428_vm0, %v12088_v23  ;;  %v12089_v18 = vld [vmem:[#allocation2 + $0x24] sm:$0xff]  ;;  %v1148_v21 = vld [vmem:[#allocation2 + $0x50] sm:$0x1] }
  0xec   : > { %v1389_v32 = vsel %vm12500_vm9, %v1384_v25, %v1388_v8 }
  0xed   : > { %v1394_v33 = vrot.slane %v1393_v27, 4  ;;  %v869_v37 = vsel %vm12554_vm15, %v861_v28, %v868_v29  ;;  %v1142_v38 = vsel %vm12449_vm4, %v870_v30, %v1141_v24  ;;  %608 = vst.msk [vmem:[#allocation4 + $0x50] sm:$0xff] %vm428_vm0, %v576_v26  ;;  %v762_v39 = vpack.c.bf16 %v576_v26, %v576_v26  ;;  %v1231_v40 = vld [vmem:[#allocation2 + $0x3c] sm:$0xf] }
  0xee   : > { %1140 = vst.msk [vmem:[#allocation2 + $0x40] sm:$0xf] %vm630_vm1, %v869_v37  ;;  %v1401_v43 = vshrl.u32 %v1231_v40, 16  ;;  %v1404_v10 = vshll.u32 %v1231_v40, 16  ;;  %v1681_v45 = vunpack.c.l.b16 %v1389_v32 }
  0xef   : > { %v1399_v42 = vsel %vm12500_vm9, %v1394_v33, %v1398_v34  ;;  %1143 = vst [vmem:[#allocation2 + $0x44] sm:$0x1] %v1142_v38  ;;  %v872_v44 = vshrl.u32 %v762_v39, 16  ;;  %v875_v50 = vshll.u32 %v762_v39, 16  ;;  %v669_v33 = vld [vmem:[#allocation2 + $0x6c] sm:$0x1] }
  0xf0   : > { %v1682_v46 = vunpack.c.l.b16 %v1399_v42  ;;  %v513_v47 = vpop.f32.mrf.mxu0  ;;  %v1403_v54 = vrot.slane %v1401_v43, 4  ;;  %v1406_v55 = vrot.slane %v1404_v10, 5  ;;  %v670_v39 = vsel %vm12449_vm4, 0, %v669_v33 }
  0xf1   : > { %v874_v49 = vrot.slane %v872_v44, 7  ;;  %v514_v51 = vadd.f32 %v12514_v58, %v513_v47  ;;  %671 = vst [vmem:[#allocation2 + $0x6c] sm:$0x1] %v670_v39 }
  0xf2   : > { %v1709_v52 = vpack.c.b16 %v1682_v46, %v1681_v45  ;;  %v1407_v1 = vor.u32 %v1406_v55, %v1403_v54 }
  0xf3   : > { %v877_v56 = vor.u32 %v875_v50, %v874_v49  ;;  %v577_v57 = vmax.f32 %v514_v51, 0.0  ;;  %v878_v25 = vrot.slane %v874_v49, 4  ;;  %v1151_v51 = vld [vmem:[#allocation2 + $0x54] sm:$0xf] }
  0xf4   : > { %10983 = vmatmul.msk.bf16.gmra.mxu1 %vm428_vm0, %v1709_v52  ;;  %v1408_v23 = vrot.slane %v1407_v1, 4 }
  0xf5   : > { %v1145_v60 = vsel %vm12528_vm12, %v877_v56, %v1144_v53  ;;  %609 = vst.msk [vmem:[#allocation4 + $0x58] sm:$0xff] %vm428_vm0, %v577_v57  ;;  %v763_v61 = vpack.c.bf16 %v577_v57, %v577_v57  ;;  %v12064_v13 = vld [vmem:[#allocation2 + $0x3c] sm:$0xff]  ;;  %v725_v56 = vld [vmem:[#allocation2 + $0x74] sm:$0x1] }
  0xf6   : > { %v1232_v62 = vld [vmem:[#allocation2 + $0x40] sm:$0xf]  ;;  %1146 = vst [vmem:[#allocation2 + $0x48] sm:$0xf] %v1145_v60  ;;  %v1266_v0 = vld [vmem:[#allocation2 + $0x44] sm:$0x1]  ;;  %11080 = vmatmul.msk.bf16.gmra.mxu2 %vm428_vm0, %v12064_v13 }
  0xf7   : > { %v1410_v2 = vshll.u32 %v1232_v62, 16  ;;  %v1414_v3 = vshrl.u32 %v1232_v62, 16  ;;  %v880_v5 = vshrl.u32 %v763_v61, 16  ;;  %v1420_v8 = vshll.u32 %v1266_v0, 16  ;;  %v13100_v4 = vld [vmem:[#allocation2 + $0x44] sm:$0x1] }
  0xf8   : > { %v516_v20 = vpop.f32.mrf.mxu0  ;;  %v883_v15 = vshll.u32 %v763_v61, 16  ;;  %v726_v13 = vsel %vm12462_vm6, 0, %v725_v56 }
  0xf9   : > { %v1412_v6 = vrot.slane %v1410_v2, 5  ;;  %v1416_v7 = vrot.slane %v1414_v3, 4  ;;  %v882_v12 = vrot.slane %v880_v5, 7  ;;  %v517_v16 = vadd.f32 %v12514_v58, %v516_v20  ;;  %727 = vst [vmem:[#allocation2 + $0x74] sm:$0x1] %v726_v13 }
  0xfa   : > { %v1422_v32 = vrot.slane %v1420_v8, 5 }
  0xfb   : > { %v1417_v24 = vor.u32 %v1416_v7, %v1412_v6  ;;  %v885_v27 = vor.u32 %v883_v15, %v882_v12  ;;  %v887_v28 = vrot.slane %v882_v12, 4  ;;  %v578_v29 = vmax.f32 %v517_v16, 0.0  ;;  %11237 = vmatmul.msk.bf16.gmra.mxu0 %vm428_vm0, %v12089_v18  ;;  %v12054_v7 = vld [vmem:[%s12408_s14 + $0x78] sm:$0xff]  ;;  %v12090_v16 = vld [vmem:[#allocation2 + $0x30] sm:$0xff] }
  0xfc   : > { %v1413_v30 = vsel %vm12500_vm9, %v1408_v23, %v1412_v6  ;;  %v1155_v18 = vld [vmem:[#allocation2 + $0x5c] sm:$0x1]  ;;  %10954 = vmatmul.msk.bf16.gmra.mxu3 %vm428_vm0, %v12054_v7 }
  0xfd   : > { %v1418_v26 = vrot.slane %v1417_v24, 4  ;;  %v886_v34 = vsel %vm12554_vm15, %v878_v25, %v885_v27  ;;  %v1149_v35 = vsel %vm12449_vm4, %v887_v28, %v1148_v21  ;;  %610 = vst.msk [vmem:[#allocation4 + $0x60] sm:$0xff] %vm428_vm0, %v578_v29  ;;  %v764_v37 = vpack.c.bf16 %v578_v29, %v578_v29  ;;  %v1233_v38 = vld [vmem:[#allocation2 + $0x48] sm:$0xf] }
  0xfe   : > { %1147 = vst.msk [vmem:[#allocation2 + $0x4c] sm:$0xf] %vm630_vm1, %v886_v34  ;;  %v1425_v41 = vshrl.u32 %v1233_v38, 16  ;;  %v1428_v42 = vshll.u32 %v1233_v38, 16  ;;  %v1683_v10 = vunpack.c.l.b16 %v1413_v30 }
  0xff   : > { %v1423_v40 = vsel %vm12500_vm9, %v1418_v26, %v1422_v32  ;;  %1150 = vst [vmem:[#allocation2 + $0x50] sm:$0x1] %v1149_v35  ;;  %v889_v43 = vshrl.u32 %v764_v37, 16  ;;  %v892_v47 = vshll.u32 %v764_v37, 16  ;;  %v672_v32 = vld [vmem:[#allocation2 + $0x78] sm:$0x1] }
 0x100   : > { %v1684_v44 = vunpack.c.l.b16 %v1423_v40  ;;  %v518_v45 = vpop.f32.mrf.mxu0  ;;  %v1427_v52 = vrot.slane %v1425_v41, 4  ;;  %v1430_v53 = vrot.slane %v1428_v42, 5  ;;  %v673_v38 = vsel %vm12449_vm4, 0, %v672_v32 }
 0x101   : > { %v891_v46 = vrot.slane %v889_v43, 7  ;;  %v519_v49 = vadd.f32 %v12514_v58, %v518_v45  ;;  %674 = vst [vmem:[#allocation2 + $0x78] sm:$0x1] %v673_v38  ;;  %v1802_v38 = vpop.f32.mrf.mxu1 }
 0x102   : > { %v1710_v50 = vpack.c.b16 %v1684_v44, %v1683_v10  ;;  %v1431_v63 = vor.u32 %v1430_v53, %v1427_v52 }
 0x103   : > { %v894_v54 = vor.u32 %v892_v47, %v891_v46  ;;  %v579_v55 = vmax.f32 %v519_v49, 0.0  ;;  %v895_v24 = vrot.slane %v891_v46, 4 }
 0x104   : > { %10984 = vmatmul.msk.bf16.gmra.mxu1 %vm428_vm0, %v1710_v50  ;;  %v1432_v21 = vrot.slane %v1431_v63, 4  ;;  %v1158_v50 = vld [vmem:[#allocation2 + $0x60] sm:$0xf] }
 0x105   : > { %v1152_v57 = vsel %vm12528_vm12, %v894_v54, %v1151_v51  ;;  %611 = vst.msk [vmem:[#allocation4 + $0x68] sm:$0xff] %vm428_vm0, %v579_v55  ;;  %v765_v59 = vpack.c.bf16 %v579_v55, %v579_v55  ;;  %v12065_v60 = vld [vmem:[#allocation2 + $0x48] sm:$0xff]  ;;  %v728_v55 = vld [vmem:[#allocation2 + $0x80] sm:$0x1] }
 0x106   : > { %v1234_v61 = vld [vmem:[#allocation2 + $0x4c] sm:$0xf]  ;;  %1153 = vst [vmem:[#allocation2 + $0x54] sm:$0xf] %v1152_v57  ;;  %v1267_v62 = vld [vmem:[#allocation2 + $0x50] sm:$0x1]  ;;  %11081 = vmatmul.msk.bf16.gmra.mxu2 %vm428_vm0, %v12065_v60 }
 0x107   : > { %v1434_v0 = vshll.u32 %v1234_v61, 16  ;;  %v1438_v1 = vshrl.u32 %v1234_v61, 16  ;;  %v897_v2 = vshrl.u32 %v765_v59, 16  ;;  %v1444_v6 = vshll.u32 %v1267_v62, 16 }
 0x108   : > { %v521_v3 = vpop.f32.mrf.mxu0  ;;  %v900_v12 = vshll.u32 %v765_v59, 16  ;;  %v729_v61 = vsel %vm12462_vm6, 0, %v728_v55 }
 0x109   : > { %v1436_v5 = vrot.slane %v1434_v0, 5  ;;  %v1440_v20 = vrot.slane %v1438_v1, 4  ;;  %v899_v8 = vrot.slane %v897_v2, 7  ;;  %v522_v15 = vadd.f32 %v12514_v58, %v521_v3  ;;  %730 = vst [vmem:[#allocation2 + $0x80] sm:$0x1] %v729_v61 }
 0x10a   : > { %v1446_v26 = vrot.slane %v1444_v6, 5 }
 0x10b   : > { %v1441_v23 = vor.u32 %v1440_v20, %v1436_v5  ;;  %v902_v25 = vor.u32 %v900_v12, %v899_v8  ;;  %v904_v27 = vrot.slane %v899_v8, 4  ;;  %v580_v28 = vmax.f32 %v522_v15, 0.0  ;;  %11238 = vmatmul.msk.bf16.gmra.mxu0 %vm428_vm0, %v12090_v16  ;;  %v12091_v12 = vld [vmem:[#allocation2 + $0x3c] sm:$0xff]  ;;  %v1162_v15 = vld [vmem:[#allocation2 + $0x68] sm:$0x1] }
 0x10c   : > { %v1437_v29 = vsel %vm12500_vm9, %v1432_v21, %v1436_v5 }
 0x10d   : > { %v1442_v30 = vrot.slane %v1441_v23, 4  ;;  %v903_v33 = vsel %vm12554_vm15, %v895_v24, %v902_v25  ;;  %v1156_v34 = vsel %vm12449_vm4, %v904_v27, %v1155_v18  ;;  %612 = vst.msk [vmem:[#allocation4 + $0x70] sm:$0xff] %vm428_vm0, %v580_v28  ;;  %v766_v35 = vpack.c.bf16 %v580_v28, %v580_v28  ;;  %v1235_v37 = vld [vmem:[#allocation2 + $0x54] sm:$0xf] }
 0x10e   : > { %1154 = vst.msk [vmem:[#allocation2 + $0x58] sm:$0xf] %vm630_vm1, %v903_v33  ;;  %v1449_v40 = vshrl.u32 %v1235_v37, 16  ;;  %v1452_v41 = vshll.u32 %v1235_v37, 16  ;;  %v1685_v43 = vunpack.c.l.b16 %v1437_v29  ;;  %v2043_v37 = vpop.f32.mrf.mxu2 }
 0x10f   : > { %v1447_v39 = vsel %vm12500_vm9, %v1442_v30, %v1446_v26  ;;  %1157 = vst [vmem:[#allocation2 + $0x5c] sm:$0x1] %v1156_v34  ;;  %v906_v42 = vshrl.u32 %v766_v35, 16  ;;  %v909_v46 = vshll.u32 %v766_v35, 16  ;;  %v675_v30 = vld [vmem:[#allocation2 + $0x84] sm:$0x1] }
 0x110   : > { %v1686_v10 = vunpack.c.l.b16 %v1447_v39  ;;  %v523_v44 = vpop.f32.mrf.mxu0  ;;  %v1451_v51 = vrot.slane %v1449_v40, 4  ;;  %v1454_v52 = vrot.slane %v1452_v41, 5  ;;  %v676_v34 = vsel %vm12449_vm4, 0, %v675_v30 }
 0x111   : > { %v908_v45 = vrot.slane %v906_v42, 7  ;;  %v524_v47 = vadd.f32 %v12514_v58, %v523_v44  ;;  %677 = vst [vmem:[#allocation2 + $0x84] sm:$0x1] %v676_v34 }
 0x112   : > { %v1711_v49 = vpack.c.b16 %v1686_v10, %v1685_v43  ;;  %v1455_v62 = vor.u32 %v1454_v52, %v1451_v51  ;;  %v12743_v10 = vadd.f32 %v2043_v37, %v1802_v38  ;;  %v1165_v51 = vld [vmem:[#allocation2 + $0x6c] sm:$0xf] }
 0x113   : > { %v911_v53 = vor.u32 %v909_v46, %v908_v45  ;;  %v581_v54 = vmax.f32 %v524_v47, 0.0  ;;  %v912_v21 = vrot.slane %v908_v45, 4  ;;  %v12748_v47 = vld [vmem:[%s17187_s2] ss:$0 sm:$0xff] }
 0x114   : > { %10985 = vmatmul.msk.bf16.gmra.mxu1 %vm428_vm0, %v1711_v49  ;;  %v1456_v16 = vrot.slane %v1455_v62, 4 }
 0x115   : > { %v1159_v56 = vsel %vm12528_vm12, %v911_v53, %v1158_v50  ;;  %613 = vst.msk [vmem:[#allocation4 + $0x78] sm:$0xff] %vm428_vm0, %v581_v54  ;;  %v767_v57 = vpack.c.bf16 %v581_v54, %v581_v54  ;;  %v12066_v59 = vld [vmem:[#allocation2 + $0x54] sm:$0xff] }
 0x116   : > { %v1236_v60 = vld [vmem:[#allocation2 + $0x58] sm:$0xf]  ;;  %1160 = vst [vmem:[#allocation2 + $0x60] sm:$0xf] %v1159_v56  ;;  %v1268_v13 = vld [vmem:[#allocation2 + $0x5c] sm:$0x1]  ;;  %11082 = vmatmul.msk.bf16.gmra.mxu2 %vm428_vm0, %v12066_v59 }
 0x117   : > { %v1458_v63 = vshll.u32 %v1236_v60, 16  ;;  %v1462_v0 = vshrl.u32 %v1236_v60, 16  ;;  %v914_v1 = vshrl.u32 %v767_v57, 16  ;;  %v1468_v20 = vshll.u32 %v1268_v13, 16  ;;  %v731_v56 = vld [vmem:[#allocation2 + $0x8c] sm:$0x1] }
 0x118   : > { %v526_v2 = vpop.f32.mrf.mxu0  ;;  %v917_v7 = vshll.u32 %v767_v57, 16  ;;  %v732_v13 = vsel %vm12462_vm6, 0, %v731_v56 }
 0x119   : > { %v1460_v3 = vrot.slane %v1458_v63, 5  ;;  %v1464_v5 = vrot.slane %v1462_v0, 4  ;;  %v916_v6 = vrot.slane %v914_v1, 7  ;;  %v527_v8 = vadd.f32 %v12514_v58, %v526_v2  ;;  %733 = vst [vmem:[#allocation2 + $0x8c] sm:$0x1] %v732_v13 }
 0x11a   : > { %v1470_v29 = vrot.slane %v1468_v20, 5 }
 0x11b   : > { %v1465_v18 = vor.u32 %v1464_v5, %v1460_v3  ;;  %v919_v23 = vor.u32 %v917_v7, %v916_v6  ;;  %v921_v24 = vrot.slane %v916_v6, 4  ;;  %v582_v25 = vmax.f32 %v527_v8, 0.0  ;;  %11239 = vmatmul.msk.bf16.gmra.mxu0 %vm428_vm0, %v12091_v12  ;;  %v12110_v7 = vld [vmem:[%s17188_s3 + $0x98] sm:$0xff] }
 0x11c   : > { %v1461_v27 = vsel %vm12500_vm9, %v1456_v16, %v1460_v3  ;;  %v12092_v16 = vld [vmem:[#allocation2 + $0x48] sm:$0xff]  ;;  %3415 = vmatpush.bf16.msrb.mxu1 %v12110_v7 }
 0x11d   : > { %v1466_v28 = vrot.slane %v1465_v18, 4  ;;  %v920_v26 = vsel %vm12554_vm15, %v912_v21, %v919_v23  ;;  %v1163_v58 = vsel %vm12449_vm4, %v921_v24, %v1162_v15  ;;  %614 = vst.msk [vmem:[#allocation4 + $0x80] sm:$0xff] %vm428_vm0, %v582_v25  ;;  %v768_v32 = vpack.c.bf16 %v582_v25, %v582_v25  ;;  %v1237_v33 = vld [vmem:[#allocation2 + $0x60] sm:$0xf]  ;;  %v1169_v18 = vld [vmem:[#allocation2 + $0x74] sm:$0x1] }
 0x11e   : > { %1161 = vst.msk [vmem:[#allocation2 + $0x64] sm:$0xf] %vm630_vm1, %v920_v26  ;;  %v1473_v39 = vshrl.u32 %v1237_v33, 16  ;;  %v1476_v40 = vshll.u32 %v1237_v33, 16  ;;  %v1687_v42 = vunpack.c.l.b16 %v1461_v27  ;;  %v2850_v33 = vld [vmem:[#allocation2 + $0xc] sm:$0xf] }
 0x11f   : > { %v1471_v35 = vsel %vm12500_vm9, %v1466_v28, %v1470_v29  ;;  %1164 = vst [vmem:[#allocation2 + $0x68] sm:$0x1] %v1163_v58  ;;  %v923_v41 = vshrl.u32 %v768_v32, 16  ;;  %v926_v46 = vshll.u32 %v768_v32, 16  ;;  %v546_v29 = vpop.f32.mrf.mxu3  ;;  %v678_v32 = vld [vmem:[#allocation2 + $0x90] sm:$0x1] }
 0x120   : > { %v1688_v43 = vunpack.c.l.b16 %v1471_v35  ;;  %v528_v44 = vpop.f32.mrf.mxu0  ;;  %v1475_v52 = vrot.slane %v1473_v39, 4  ;;  %v1478_v53 = vrot.slane %v1476_v40, 5  ;;  %v679_v39 = vsel %vm12449_vm4, 0, %v678_v32 }
 0x121   : > { %v925_v45 = vrot.slane %v923_v41, 7  ;;  %v529_v49 = vadd.f32 %v12748_v47, %v528_v44  ;;  %680 = vst [vmem:[#allocation2 + $0x90] sm:$0x1] %v679_v39 }
 0x122   : > { %v1712_v50 = vpack.c.b16 %v1688_v43, %v1687_v42  ;;  %v1479_v63 = vor.u32 %v1478_v53, %v1475_v52 }
 0x123   : > { %v928_v54 = vor.u32 %v926_v46, %v925_v45  ;;  %v583_v55 = vmax.f32 %v529_v49, 0.0  ;;  %v929_v24 = vrot.slane %v925_v45, 4  ;;  %v12775_v46 = vld [vmem:[#allocation2 + $0xc] sm:$0xe]  ;;  %v2899_v49 = vshrl.u32 %v2850_v33, 16 }
 0x124   : > { %10986 = vmatmul.msk.bf16.gmra.mxu1 %vm428_vm0, %v1712_v50  ;;  %v1480_v21 = vrot.slane %v1479_v63, 4  ;;  %v11291_v13 = vrot.slane %v12775_v46, 9 }
 0x125   : > { %v1166_v57 = vsel %vm12528_vm12, %v928_v54, %v1165_v51  ;;  %615 = vst.msk [vmem:[#allocation4 + $0x88] sm:$0xff] %vm428_vm0, %v583_v55  ;;  %v769_v59 = vpack.c.bf16 %v583_v55, %v583_v55  ;;  %v12067_v60 = vld [vmem:[#allocation2 + $0x60] sm:$0xff]  ;;  %v12777_v51 = vpop.f32.mrf.mxu2  ;;  %v2902_v54 = vshll.u32 %v2850_v33, 16 }
 0x126   : > { %v1238_v61 = vld [vmem:[#allocation2 + $0x64] sm:$0xf]  ;;  %1167 = vst [vmem:[#allocation2 + $0x6c] sm:$0xf] %v1166_v57  ;;  %v1269_v62 = vld [vmem:[#allocation2 + $0x68] sm:$0x1]  ;;  %11083 = vmatmul.msk.bf16.gmra.mxu2 %vm428_vm0, %v12067_v60 }
 0x127   : > { %v1482_v0 = vshll.u32 %v1238_v61, 16  ;;  %v1486_v1 = vshrl.u32 %v1238_v61, 16  ;;  %v931_v2 = vshrl.u32 %v769_v59, 16  ;;  %v1492_v6 = vshll.u32 %v1269_v62, 16  ;;  %17223 = vst [vmem:[#allocation8_spill] sm:$0xff] %v12777_v51 }
 0x128   : > { %v531_v3 = vpop.f32.mrf.mxu0  ;;  %v934_v12 = vshll.u32 %v769_v59, 16  ;;  %v12782_v60 = vld [vmem:[#allocation2 + $0x10] sm:$0xf]  ;;  %v1172_v61 = vld [vmem:[#allocation2 + $0x78] sm:$0xf]  ;;  %v12792_v7 = vrot.slane %v2902_v54, 5 }
 0x129   : > { %v1484_v5 = vrot.slane %v1482_v0, 5  ;;  %v1488_v20 = vrot.slane %v1486_v1, 4  ;;  %v933_v8 = vrot.slane %v931_v2, 7  ;;  %v532_v15 = vadd.f32 %v12748_v47, %v531_v3  ;;  %v548_v1 = vpop.f32.mrf.mxu3  ;;  %v12114_v54 = vld [vmem:[%s17188_s3 + $0xb8] sm:$0xff] }
 0x12a   : > { %v1494_v58 = vrot.slane %v1492_v6, 5  ;;  %v12787_v2 = vrot.slane %v2899_v49, 4  ;;  %v547_v3 = vadd.f32 %v12748_v47, %v546_v29  ;;  %v3598_v6 = vrot.slane %v12782_v60, 5  ;;  %3841 = vmatpush.bf16.msrb.mxu2 %v12114_v54  ;;  %v740_v54 = vld [vmem:[#allocation2 + $0xb0] sm:$0x1] }
 0x12b   : > { %v1489_v23 = vor.u32 %v1488_v20, %v1484_v5  ;;  %v936_v25 = vor.u32 %v934_v12, %v933_v8  ;;  %v938_v27 = vrot.slane %v933_v8, 4  ;;  %v584_v28 = vmax.f32 %v532_v15, 0.0  ;;  %11240 = vmatmul.msk.bf16.gmra.mxu0 %vm428_vm0, %v12092_v16 }
 0x12c   : > { %v1485_v30 = vsel %vm12500_vm9, %v1480_v21, %v1484_v5  ;;  %v734_v5 = vld [vmem:[#allocation2 + $0x98] sm:$0x1]  ;;  %v549_v20 = vadd.f32 %v12748_v47, %v548_v1 }
 0x12d   : > { %v1490_v26 = vrot.slane %v1489_v23, 4  ;;  %v937_v34 = vsel %vm12554_vm15, %v929_v24, %v936_v25  ;;  %v1170_v35 = vsel %vm12449_vm4, %v938_v27, %v1169_v18  ;;  %616 = vst.msk [vmem:[#allocation4 + $0x90] sm:$0xff] %vm428_vm0, %v584_v28  ;;  %v770_v37 = vpack.c.bf16 %v584_v28, %v584_v28  ;;  %v1239_v38 = vld [vmem:[#allocation2 + $0x6c] sm:$0xf]  ;;  %v12800_v23 = vpop.f32.mrf.mxu1 }
 0x12e   : > { %1168 = vst.msk [vmem:[#allocation2 + $0x70] sm:$0xf] %vm630_vm1, %v937_v34  ;;  %v1497_v41 = vshrl.u32 %v1239_v38, 16  ;;  %v1500_v42 = vshll.u32 %v1239_v38, 16  ;;  %v1689_v44 = vunpack.c.l.b16 %v1485_v30  ;;  %v735_v21 = vsel %vm12462_vm6, 0, %v734_v5 }
 0x12f   : > { %v1495_v40 = vsel %vm12500_vm9, %v1490_v26, %v1494_v58  ;;  %1171 = vst [vmem:[#allocation2 + $0x74] sm:$0x1] %v1170_v35  ;;  %v940_v43 = vshrl.u32 %v770_v37, 16  ;;  %v943_v56 = vshll.u32 %v770_v37, 16  ;;  %v590_v34 = vmax.f32 %v547_v3, 0.0 }
 0x130   : > { %v1690_v45 = vunpack.c.l.b16 %v1495_v40  ;;  %v533_v50 = vpop.f32.mrf.mxu0  ;;  %v1499_v52 = vrot.slane %v1497_v41, 4  ;;  %v1502_v53 = vrot.slane %v1500_v42, 5  ;;  %17224 = vst [vmem:[#allocation9_spill] sm:$0xff] %v12800_v23  ;;  %v681_v35 = vld [vmem:[#allocation2 + $0x9c] sm:$0x1]  ;;  %v591_v37 = vmax.f32 %v549_v20, 0.0 }
 0x131   : > { %v12779_v55 = vrot.slane %v940_v43, 7  ;;  %v534_v57 = vadd.f32 %v12748_v47, %v533_v50  ;;  %v12093_v40 = vld [vmem:[#allocation2 + $0x54] sm:$0xff]  ;;  %v682_v42 = vsel %vm12449_vm4, 0, %v681_v35  ;;  %736 = vst [vmem:[#allocation2 + $0x98] sm:$0x1] %v735_v21  ;;  %v776_v50 = vpack.c.bf16 %v590_v34, %v590_v34 }
 0x132   : > { %v1713_v59 = vpack.c.b16 %v1690_v45, %v1689_v44  ;;  %v1503_v0 = vor.u32 %v1502_v53, %v1499_v52  ;;  %v1176_v43 = vld [vmem:[#allocation2 + $0x80] sm:$0x1]  ;;  %622 = vst.msk [vmem:[#allocation4 + $0xc0] sm:$0xff] %vm428_vm0, %v590_v34  ;;  %v737_v52 = vld [vmem:[#allocation2 + $0xa4] sm:$0x1]  ;;  %v777_v53 = vpack.c.bf16 %v591_v37, %v591_v37 }
 0x133   : > { %v945_v62 = vor.u32 %v943_v56, %v12779_v55  ;;  %v585_v63 = vmax.f32 %v534_v57, 0.0  ;;  %v946_v8 = vrot.slane %v12779_v55, 4  ;;  %683 = vst [vmem:[#allocation2 + $0x9c] sm:$0x1] %v682_v42  ;;  %v12828_v35 = vld [vmem:[#allocation2 + $0x14] sm:$0x1] }
 0x134   : > { %10987 = vmatmul.msk.bf16.gmra.mxu1 %vm428_vm0, %v1713_v59  ;;  %v1504_v30 = vrot.slane %v1503_v0, 4  ;;  %623 = vst.msk [vmem:[#allocation4 + $0xc8] sm:$0xff] %vm428_vm0, %v591_v37  ;;  %v738_v0 = vsel %vm12462_vm6, 0, %v737_v52  ;;  %v999_v20 = vshrl.u32 %v777_v53, 16  ;;  %v684_v42 = vld [vmem:[#allocation2 + $0xa8] sm:$0x1] }
 0x135   : > { %v1173_v12 = vsel %vm12528_vm12, %v945_v62, %v1172_v61  ;;  %617 = vst.msk [vmem:[#allocation4 + $0x98] sm:$0xff] %vm428_vm0, %v585_v63  ;;  %v771_v15 = vpack.c.bf16 %v585_v63, %v585_v63  ;;  %v12068_v16 = vld [vmem:[#allocation2 + $0x6c] sm:$0xff]  ;;  %v991_v62 = vshrl.u32 %v776_v50, 16  ;;  %v994_v63 = vshll.u32 %v776_v50, 16 }
 0x136   : > { %v1240_v18 = vld [vmem:[#allocation2 + $0x70] sm:$0xf]  ;;  %1174 = vst [vmem:[#allocation2 + $0x78] sm:$0xf] %v1173_v12  ;;  %v1270_v24 = vld [vmem:[#allocation2 + $0x74] sm:$0x1]  ;;  %11084 = vmatmul.msk.bf16.gmra.mxu2 %vm428_vm0, %v12068_v16 }
 0x137   : > { %v1506_v25 = vshll.u32 %v1240_v18, 16  ;;  %v1510_v27 = vshrl.u32 %v1240_v18, 16  ;;  %v948_v28 = vshrl.u32 %v771_v15, 16  ;;  %v951_v29 = vshll.u32 %v771_v15, 16  ;;  %739 = vst [vmem:[#allocation2 + $0xa4] sm:$0x1] %v738_v0 }
 0x138   : > { %v1516_v26 = vshll.u32 %v1270_v24, 16  ;;  %v536_v58 = vpop.f32.mrf.mxu0  ;;  %v993_v16 = vrot.slane %v991_v62, 7  ;;  %v1002_v18 = vshll.u32 %v777_v53, 16  ;;  %v551_v24 = vpop.f32.mrf.mxu3  ;;  %v12850_v0 = vrot.slane %v3598_v6, 4 }
 0x139   : > { %v1508_v32 = vrot.slane %v1506_v25, 5  ;;  %v1512_v33 = vrot.slane %v1510_v27, 4  ;;  %v950_v38 = vrot.slane %v948_v28, 7  ;;  %v537_v39 = vadd.f32 %v12748_v47, %v536_v58  ;;  %v2048_v44 = vpop.f32.mrf.mxu2 }
 0x13a   : > { %v1518_v41 = vrot.slane %v1516_v26, 5  ;;  %v996_v58 = vor.u32 %v994_v63, %v993_v16  ;;  %v552_v34 = vadd.f32 %v12748_v47, %v551_v24  ;;  %v12111_v63 = vld [vmem:[%s17188_s3 + $0xa0] sm:$0xff] }
 0x13b   : > { %v1509_v45 = vsel %vm12500_vm9, %v1504_v30, %v1508_v32  ;;  %v1513_v49 = vor.u32 %v1512_v33, %v1508_v32  ;;  %v953_v55 = vor.u32 %v951_v29, %v950_v38  ;;  %v955_v56 = vrot.slane %v950_v38, 4  ;;  %11241 = vmatmul.msk.bf16.gmra.mxu0 %vm428_vm0, %v12093_v40  ;;  %v1179_v38 = vld [vmem:[#allocation2 + $0x84] sm:$0xf] }
 0x13c   : > { %v586_v57 = vmax.f32 %v537_v39, 0.0  ;;  %v1691_v59 = vunpack.c.l.b16 %v1509_v45  ;;  %v1001_v29 = vrot.slane %v999_v20, 7  ;;  %v997_v32 = vrot.slane %v993_v16, 4 }
 0x13d   : > { %v1514_v61 = vrot.slane %v1513_v49, 4  ;;  %v954_v1 = vsel %vm12554_vm15, %v946_v8, %v953_v55  ;;  %v1177_v3 = vsel %vm12449_vm4, %v955_v56, %v1176_v43  ;;  %v1241_v12 = vld [vmem:[#allocation2 + $0x78] sm:$0xf]  ;;  %v12113_v8 = vld [vmem:[%s17188_s3 + $0xb0] sm:$0xff]  ;;  %v12112_v43 = vld [vmem:[%s17188_s3 + $0xa8] sm:$0xff]  ;;  %v592_v53 = vmax.f32 %v552_v34, 0.0 }
 0x13e   : > { %618 = vst.msk [vmem:[#allocation4 + $0xa0] sm:$0xff] %vm428_vm0, %v586_v57  ;;  %v772_v5 = vpack.c.bf16 %v586_v57, %v586_v57  ;;  %v1521_v21 = vshrl.u32 %v1241_v12, 16  ;;  %3842 = vmatpush.bf16.msrb.mxu2 %v12113_v8  ;;  %v1193_v49 = vld [vmem:[#allocation2 + $0x9c] sm:$0xf]  ;;  %v1004_v50 = vor.u32 %v1002_v18, %v1001_v29  ;;  %v1524_v52 = vshll.u32 %v1241_v12, 16 }
 0x13f   : > { %1175 = vst.msk [vmem:[#allocation2 + $0x7c] sm:$0xf] %vm630_vm1, %v954_v1  ;;  %v1519_v15 = vsel %vm12500_vm9, %v1514_v61, %v1518_v41  ;;  %v3601_v57 = vrot.slane %v12828_v35, 5  ;;  %v1006_v61 = vrot.slane %v1001_v29, 4  ;;  %v685_v12 = vsel %vm12449_vm4, 0, %v684_v42 }
 0x140   : > { %1178 = vst [vmem:[#allocation2 + $0x80] sm:$0x1] %v1177_v3  ;;  %v957_v25 = vshrl.u32 %v772_v5, 16  ;;  %v960_v27 = vshll.u32 %v772_v5, 16  ;;  %v1692_v28 = vunpack.c.l.b16 %v1519_v15  ;;  %v538_v30 = vpop.f32.mrf.mxu0  ;;  %v1523_v33 = vrot.slane %v1521_v21, 4 }
 0x141   : > { %v1807_v26 = vpop.f32.mrf.mxu1  ;;  %v539_v39 = vadd.f32 %v12748_v47, %v538_v30  ;;  %v2050_v45 = vpop.f32.mrf.mxu2  ;;  %v1526_v62 = vrot.slane %v1524_v52, 5  ;;  %v741_v15 = vsel %vm12462_vm6, 0, %v740_v54  ;;  %v778_v8 = vpack.c.bf16 %v592_v53, %v592_v53  ;;  %v1197_v29 = vld [vmem:[#allocation2 + $0xa4] sm:$0x1]  ;;  %624 = vst.msk [vmem:[#allocation4 + $0xd0] sm:$0xff] %vm428_vm0, %v592_v53 }
 0x142   : > { %v12830_v37 = vrot.slane %v957_v25, 7  ;;  %v12833_v40 = vadd.f32 %v2048_v44, %v1807_v26  ;;  %v1714_v41 = vpack.c.b16 %v1692_v28, %v1691_v59  ;;  %v1194_v44 = vsel %vm12528_vm12, %v996_v58, %v1193_v49  ;;  %3843 = vmatpush.bf16.msrb.mxu2 %v12112_v43  ;;  %v553_v25 = vpop.f32.mrf.mxu3  ;;  %v12094_v43 = vld [vmem:[#allocation2 + $0x60] sm:$0xff]  ;;  %v1183_v54 = vld [vmem:[#allocation2 + $0x8c] sm:$0x1]  ;;  %686 = vst [vmem:[#allocation2 + $0xa8] sm:$0x1] %v685_v12 }
 0x143   : > { %v587_v56 = vmax.f32 %v539_v39, 0.0  ;;  %1195 = vst [vmem:[#allocation2 + $0x9c] sm:$0xf] %v1194_v44  ;;  %v1005_v59 = vsel %vm12554_vm15, %v997_v32, %v1004_v50  ;;  %v1527_v18 = vor.u32 %v1526_v62, %v1523_v33  ;;  %v554_v30 = vadd.f32 %v12748_v47, %v553_v25  ;;  %v12109_v50 = vld [vmem:[%s17188_s3 + $0x90] sm:$0xff]  ;;  %v12108_v62 = vld [vmem:[%s17188_s3 + $0x88] sm:$0xff] }
 0x144   : > { %v962_v55 = vor.u32 %v960_v27, %v12830_v37  ;;  %10988 = vmatmul.msk.bf16.gmra.mxu1 %vm428_vm0, %v1714_v41  ;;  %1196 = vst.msk [vmem:[#allocation2 + $0xa0] sm:$0xf] %vm630_vm1, %v1005_v59  ;;  %v1198_v32 = vsel %vm12449_vm4, %v1006_v61, %v1197_v29  ;;  %v963_v52 = vrot.slane %v12830_v37, 4  ;;  %v1008_v53 = vshrl.u32 %v778_v8, 16 }
 0x145   : > { %619 = vst.msk [vmem:[#allocation4 + $0xa8] sm:$0xff] %vm428_vm0, %v587_v56  ;;  %v773_v3 = vpack.c.bf16 %v587_v56, %v587_v56  ;;  %v1528_v34 = vrot.slane %v1527_v18, 4  ;;  %3416 = vmatpush.bf16.msrb.mxu1 %v12109_v50  ;;  %v687_v18 = vld [vmem:[#allocation2 + $0xb4] sm:$0x1] }
 0x146   : > { %v1180_v1 = vsel %vm12528_vm12, %v962_v55, %v1179_v38  ;;  %v12069_v5 = vld [vmem:[#allocation2 + $0x78] sm:$0xff]  ;;  %3844 = vmatpush.bf16.msrb.mxu2 %v12111_v63  ;;  %1199 = vst [vmem:[#allocation2 + $0xa4] sm:$0x1] %v1198_v32 }
 0x147   : > { %v1242_v20 = vld [vmem:[#allocation2 + $0x7c] sm:$0xf]  ;;  %1181 = vst [vmem:[#allocation2 + $0x84] sm:$0xf] %v1180_v1  ;;  %v1271_v16 = vld [vmem:[#allocation2 + $0x80] sm:$0x1]  ;;  %11085 = vmatmul.msk.bf16.gmra.mxu2 %vm428_vm0, %v12069_v5 }
 0x148   : > { %v1530_v21 = vshll.u32 %v1242_v20, 16  ;;  %v1534_v24 = vshrl.u32 %v1242_v20, 16  ;;  %v965_v27 = vshrl.u32 %v773_v3, 16  ;;  %v968_v28 = vshll.u32 %v773_v3, 16  ;;  %v541_v26 = vpop.f32.mrf.mxu0  ;;  %742 = vst [vmem:[#allocation2 + $0xb0] sm:$0x1] %v741_v15 }
 0x149   : > { %v1809_v58 = vpop.f32.mrf.mxu1  ;;  %v542_v41 = vadd.f32 %v12748_v47, %v541_v26  ;;  %v1540_v49 = vshll.u32 %v1271_v16, 16  ;;  %v2053_v55 = vpop.f32.mrf.mxu2  ;;  %v12878_v1 = vrot.slane %v1008_v53, 7  ;;  %v1011_v3 = vshll.u32 %v778_v8, 16  ;;  %3417 = vmatpush.bf16.msrb.mxu1 %v12108_v62 }
 0x14a   : > { %v1532_v33 = vrot.slane %v1530_v21, 5  ;;  %v1536_v38 = vrot.slane %v1534_v24, 4  ;;  %v967_v39 = vrot.slane %v965_v27, 7  ;;  %v12866_v42 = vadd.f32 %v2050_v45, %v1809_v58  ;;  %v556_v27 = vpop.f32.mrf.mxu3 }
 0x14b   : > { %v588_v61 = vmax.f32 %v542_v41, 0.0  ;;  %11242 = vmatmul.msk.bf16.gmra.mxu0 %vm428_vm0, %v12094_v43  ;;  %v1542_v63 = vrot.slane %v1540_v49, 5  ;;  %v593_v15 = vmax.f32 %v554_v30, 0.0  ;;  %v1013_v8 = vor.u32 %v1011_v3, %v12878_v1 }
 0x14c   : > { %v1537_v56 = vor.u32 %v1536_v38, %v1532_v33  ;;  %v970_v44 = vor.u32 %v968_v28, %v967_v39  ;;  %v972_v59 = vrot.slane %v967_v39, 4  ;;  %v1533_v45 = vsel %vm12500_vm9, %v1528_v34, %v1532_v33 }
 0x14d   : > { %620 = vst.msk [vmem:[#allocation4 + $0xb0] sm:$0xff] %vm428_vm0, %v588_v61  ;;  %v774_v12 = vpack.c.bf16 %v588_v61, %v588_v61  ;;  %v1693_v24 = vunpack.c.l.b16 %v1533_v45  ;;  %v779_v58 = vpack.c.bf16 %v593_v15, %v593_v15  ;;  %v557_v38 = vadd.f32 %v12748_v47, %v556_v27 }
 0x14e   : > { %v1538_v37 = vrot.slane %v1537_v56, 4  ;;  %v971_v5 = vsel %vm12554_vm15, %v963_v52, %v970_v44  ;;  %v1184_v20 = vsel %vm12449_vm4, %v972_v59, %v1183_v54  ;;  %v1243_v16 = vld [vmem:[#allocation2 + $0x84] sm:$0xf]  ;;  %625 = vst.msk [vmem:[#allocation4 + $0xd8] sm:$0xff] %vm428_vm0, %v593_v15  ;;  %v688_v39 = vsel %vm12449_vm4, 0, %v687_v18 }
 0x14f   : > { %1182 = vst.msk [vmem:[#allocation2 + $0x88] sm:$0xf] %vm630_vm1, %v971_v5  ;;  %v1545_v25 = vshrl.u32 %v1243_v16, 16  ;;  %v974_v28 = vshrl.u32 %v774_v12, 16  ;;  %v977_v29 = vshll.u32 %v774_v12, 16  ;;  %v1548_v33 = vshll.u32 %v1243_v16, 16 }
 0x150   : > { %v1543_v21 = vsel %vm12500_vm9, %v1538_v37, %v1542_v63  ;;  %1185 = vst [vmem:[#allocation2 + $0x8c] sm:$0x1] %v1184_v20  ;;  %v543_v32 = vpop.f32.mrf.mxu0  ;;  %v1200_v52 = vld [vmem:[#allocation2 + $0xa8] sm:$0xf]  ;;  %v12107_v54 = vld [vmem:[%s17188_s3 + $0x80] sm:$0xff]  ;;  %v1016_v59 = vshrl.u32 %v779_v58, 16  ;;  %v12914_v12 = vsel %vm12535_vm13, %v12850_v0, %v3601_v57  ;;  %v2905_v16 = vor.u32 %v12792_v7, %v12787_v2 }
 0x151   : > { %v1694_v26 = vunpack.c.l.b16 %v1543_v21  ;;  %v1812_v30 = vpop.f32.mrf.mxu1  ;;  %v12890_v34 = vrot.slane %v1545_v25, 4  ;;  %v12895_v41 = vrot.slane %v974_v28, 7  ;;  %v544_v43 = vadd.f32 %v12748_v47, %v543_v32  ;;  %689 = vst [vmem:[#allocation2 + $0xb4] sm:$0x1] %v688_v39  ;;  %v1186_v56 = vld [vmem:[#allocation2 + $0x90] sm:$0xf]  ;;  %v2055_v53 = vpop.f32.mrf.mxu2  ;;  %3418 = vmatpush.bf16.msrb.mxu1 %v12107_v54 }
 0x152   : > { %v12898_v49 = vadd.f32 %v2053_v55, %v1812_v30  ;;  %v1201_v44 = vsel %vm12528_vm12, %v1013_v8, %v1200_v52  ;;  %v1019_v61 = vshll.u32 %v779_v58, 16  ;;  %v1550_v45 = vrot.slane %v1548_v33, 5  ;;  %v1204_v20 = vld [vmem:[#allocation2 + $0xb0] sm:$0x1]  ;;  %v743_v15 = vld [vmem:[#allocation2 + $0xbc] sm:$0x1]  ;;  %v558_v30 = vpop.f32.mrf.mxu3 }
 0x153   : > { %v1715_v50 = vpack.c.b16 %v1694_v26, %v1693_v24  ;;  %v979_v62 = vor.u32 %v977_v29, %v12895_v41  ;;  %v589_v37 = vmax.f32 %v544_v43, 0.0  ;;  %1202 = vst [vmem:[#allocation2 + $0xa8] sm:$0xf] %v1201_v44  ;;  %v594_v55 = vmax.f32 %v557_v38, 0.0  ;;  %v1190_v39 = vld [vmem:[#allocation2 + $0x98] sm:$0x1] }
 0x154   : > { %v2908_v63 = vshll.u32 %v12782_v60, 16  ;;  %v1014_v3 = vrot.slane %v12878_v1, 4  ;;  %v1018_v5 = vrot.slane %v1016_v59, 7  ;;  %v744_v8 = vsel %vm12462_vm6, 0, %v743_v15  ;;  %v12095_v59 = vld [vmem:[#allocation2 + $0x6c] sm:$0xff] }
 0x155   : > { %10989 = vmatmul.msk.bf16.gmra.mxu1 %vm428_vm0, %v1715_v50  ;;  %v1187_v18 = vsel %vm12528_vm12, %v979_v62, %v1186_v56  ;;  %621 = vst.msk [vmem:[#allocation4 + $0xb8] sm:$0xff] %vm428_vm0, %v589_v37  ;;  %v775_v1 = vpack.c.bf16 %v589_v37, %v589_v37  ;;  %v2912_v25 = vshrl.u32 %v12782_v60, 16  ;;  %v1551_v28 = vor.u32 %v1550_v45, %v12890_v34 }
 0x156   : > { %v12070_v21 = vld [vmem:[#allocation2 + $0x84] sm:$0xff]  ;;  %1188 = vst [vmem:[#allocation2 + $0x90] sm:$0xf] %v1187_v18  ;;  %v1021_v57 = vor.u32 %v1019_v61, %v1018_v5  ;;  %v1023_v0 = vrot.slane %v1018_v5, 4  ;;  %v780_v29 = vpack.c.bf16 %v594_v55, %v594_v55  ;;  %v12927_v33 = vrot.slane %v2908_v63, 5 }
 0x157   : > { %v1244_v24 = vld [vmem:[#allocation2 + $0x88] sm:$0xf]  ;;  %v1272_v27 = vld [vmem:[#allocation2 + $0x8c] sm:$0x1]  ;;  %v982_v26 = vshrl.u32 %v775_v1, 16  ;;  %11086 = vmatmul.msk.bf16.gmra.mxu2 %vm428_vm0, %v12070_v21  ;;  %626 = vst.msk [vmem:[#allocation4 + $0xe0] sm:$0xff] %vm428_vm0, %v594_v55 }
 0x158   : > { %v1554_v58 = vshll.u32 %v1244_v24, 16  ;;  %v1558_v32 = vshrl.u32 %v1244_v24, 16  ;;  %v985_v38 = vshll.u32 %v775_v1, 16  ;;  %v12929_v50 = vpop.f32.mrf.mxu0  ;;  %v1022_v52 = vsel %vm12554_vm15, %v1014_v3, %v1021_v57  ;;  %745 = vst [vmem:[#allocation2 + $0xbc] sm:$0x1] %v744_v8 }
 0x159   : > { %v1814_v43 = vpop.f32.mrf.mxu1  ;;  %17225 = vst [vmem:[#allocation10_spill] sm:$0xff] %v12929_v50  ;;  %v1205_v34 = vsel %vm12449_vm4, %v1023_v0, %v1204_v20  ;;  %v1564_v54 = vshll.u32 %v1272_v27, 16  ;;  %v984_v56 = vrot.slane %v982_v26, 7  ;;  %v2058_v62 = vpop.f32.mrf.mxu2  ;;  %v1552_v37 = vrot.slane %v1551_v28, 4 }
 0x15a   : > { %v12935_v44 = vadd.f32 %v2055_v53, %v1814_v43  ;;  %1203 = vst.msk [vmem:[#allocation2 + $0xac] sm:$0xf] %vm630_vm1, %v1022_v52  ;;  %v1556_v61 = vrot.slane %v1554_v58, 5  ;;  %v1560_v45 = vrot.slane %v1558_v32, 4  ;;  %v1025_v55 = vshrl.u32 %v780_v29, 16 }
 0x15b   : > { %1206 = vst [vmem:[#allocation2 + $0xb0] sm:$0x1] %v1205_v34  ;;  %v1028_v63 = vshll.u32 %v780_v29, 16  ;;  %v559_v3 = vadd.f32 %v12748_v47, %v558_v30  ;;  %v980_v5 = vrot.slane %v12895_v41, 4  ;;  %v987_v20 = vor.u32 %v985_v38, %v984_v56  ;;  %11243 = vmatmul.msk.bf16.gmra.mxu0 %vm428_vm0, %v12095_v59  ;;  %v1207_v41 = vld [vmem:[#allocation2 + $0xb4] sm:$0xf] }
 0x15c   : > { %v989_v15 = vrot.slane %v984_v56, 4  ;;  %v1561_v53 = vor.u32 %v1560_v45, %v1556_v61  ;;  %v1557_v18 = vsel %vm12500_vm9, %v1552_v37, %v1556_v61  ;;  %v1027_v1 = vrot.slane %v1025_v55, 7  ;;  %v12965_v37 = vld [vmem:[#allocation2 + $0x1c] sm:$0xf] }
 0x15d   : > { %v595_v21 = vmax.f32 %v559_v3, 0.0  ;;  %v2914_v24 = vrot.slane %v2912_v25, 4  ;;  %v988_v8 = vsel %vm12554_vm15, %v980_v5, %v987_v20  ;;  %v1566_v0 = vrot.slane %v1564_v54, 5  ;;  %v1245_v27 = vld [vmem:[#allocation2 + $0x90] sm:$0xf] }
 0x15e   : > { %v1191_v57 = vsel %vm12449_vm4, %v989_v15, %v1190_v39  ;;  %v1562_v47 = vrot.slane %v1561_v53, 4  ;;  %1189 = vst.msk [vmem:[#allocation2 + $0x94] sm:$0xf] %vm630_vm1, %v988_v8  ;;  %v3599_v28 = vsel %vm12535_vm13, %v11291_v13, %v3598_v6  ;;  %v1030_v25 = vor.u32 %v1028_v63, %v1027_v1  ;;  %v1247_v15 = vld [vmem:[#allocation2 + $0x9c] sm:$0xf] }
 0x15f   : > { %v781_v29 = vpack.c.bf16 %v595_v21, %v595_v21  ;;  %v1569_v26 = vshrl.u32 %v1245_v27, 16  ;;  %1192 = vst [vmem:[#allocation2 + $0x98] sm:$0x1] %v1191_v57  ;;  %v1695_v32 = vunpack.c.l.b16 %v1557_v18  ;;  %v3718_v30 = vunpack.c.l.b16 %v12914_v12  ;;  %v1211_v63 = vld [vmem:[#allocation2 + $0xbc] sm:$0x1] }
 0x160   : > { %v1567_v58 = vsel %vm12500_vm9, %v1562_v47, %v1566_v0  ;;  %v1572_v38 = vshll.u32 %v1245_v27, 16  ;;  %v12957_v43 = vpop.f32.mrf.mxu0  ;;  %v1208_v46 = vsel %vm12528_vm12, %v1030_v25, %v1207_v41  ;;  %627 = vst.msk [vmem:[#allocation4 + $0xe8] sm:$0xff] %vm428_vm0, %v595_v21  ;;  %v2915_v56 = vor.u32 %v2914_v24, %v12927_v33  ;;  %v1248_v53 = vld [vmem:[#allocation2 + $0xa0] sm:$0xf] }
 0x161   : > { %v1817_v39 = vpop.f32.mrf.mxu1  ;;  %17226 = vst [vmem:[#allocation11_spill] sm:$0xff] %v12957_v43  ;;  %v1696_v60 = vunpack.c.l.b16 %v1567_v58  ;;  %v1033_v13 = vshrl.u32 %v781_v29, 16  ;;  %v1036_v6 = vshll.u32 %v781_v29, 16  ;;  %v1571_v34 = vrot.slane %v1569_v26, 4  ;;  %v2060_v59 = vpop.f32.mrf.mxu2  ;;  %v12977_v27 = vld [vmem:[#allocation2 + $0x20] sm:$0x1] }
 0x162   : > { %v12962_v52 = vadd.f32 %v2058_v62, %v1817_v39  ;;  %1209 = vst [vmem:[#allocation2 + $0xb4] sm:$0xf] %v1208_v46  ;;  %v1574_v54 = vrot.slane %v1572_v38, 5  ;;  %v1031_v61 = vrot.slane %v1027_v1, 4  ;;  %v3717_v55 = vunpack.c.l.b16 %v3599_v28  ;;  %v12096_v39 = vld [vmem:[#allocation2 + $0x78] sm:$0xff] }
 0x163   : > { %v1716_v12 = vpack.c.b16 %v1696_v60, %v1695_v32  ;;  %v1035_v45 = vrot.slane %v1033_v13, 7  ;;  %v2918_v3 = vshll.u32 %v12828_v35, 16  ;;  %v2906_v20 = vrot.slane %v2905_v16, 4  ;;  %v3533_v13 = vld [vmem:[#allocation2 + $0x18] sm:$0xe] }
 0x164   : > { %v3749_v18 = vpack.c.b16 %v3718_v30, %v3717_v55  ;;  %v1575_v1 = vor.u32 %v1574_v54, %v1571_v34  ;;  %v2916_v24 = vrot.slane %v2915_v56, 4  ;;  %v3605_v8 = vrot.slane %v12965_v37, 5 }
 0x165   : > { %10990 = vmatmul.msk.bf16.gmra.mxu1 %vm428_vm0, %v1716_v12  ;;  %v1038_v5 = vor.u32 %v1036_v6, %v1035_v45  ;;  %v1040_v62 = vrot.slane %v1035_v45, 4  ;;  %v1246_v21 = vld [vmem:[#allocation2 + $0x94] sm:$0xf]  ;;  %v2920_v2 = vrot.slane %v2918_v3, 5  ;;  %v1593_v7 = vshrl.u32 %v1247_v15, 16 }
 0x166   : > { %v1273_v47 = vld [vmem:[#allocation2 + $0x98] sm:$0x1]  ;;  %v1578_v0 = vshll.u32 %v1246_v21, 16  ;;  %v1582_v41 = vshrl.u32 %v1246_v21, 16  ;;  %v1596_v16 = vshll.u32 %v1247_v15, 16  ;;  %v1602_v28 = vshll.u32 %v1248_v53, 16 }
 0x167   : > { %v1039_v57 = vsel %vm12554_vm15, %v1031_v61, %v1038_v5  ;;  %v1212_v35 = vsel %vm12449_vm4, %v1040_v62, %v1211_v63  ;;  %11331 = vmatmul.msk.bf16.vlgmr.msrb.gmra.mxu2 %vm428_vm0, %v3749_v18  ;;  %v1588_v32 = vshll.u32 %v1273_v47, 16  ;;  %v1606_v30 = vshrl.u32 %v1248_v53, 16  ;;  %v2853_v12 = vld [vmem:[#allocation2 + $0x18] sm:$0xf]  ;;  %v1274_v18 = vld [vmem:[#allocation2 + $0xa4] sm:$0x1] }
 0x168   : > { %1210 = vst.msk [vmem:[#allocation2 + $0xb8] sm:$0xf] %vm630_vm1, %v1039_v57  ;;  %v12981_v29 = vpop.f32.mrf.mxu0  ;;  %v1580_v26 = vrot.slane %v1578_v0, 5  ;;  %v1584_v58 = vrot.slane %v1582_v41, 4  ;;  %v2911_v60 = vsel %vm12500_vm9, %v2906_v20, %v12927_v33  ;;  %v2921_v46 = vsel %vm12500_vm9, %v2916_v24, %v2920_v2 }
 0x169   : > { %v1819_v25 = vpop.f32.mrf.mxu1  ;;  %17227 = vst [vmem:[#allocation12_spill] sm:$0xff] %v12981_v29  ;;  %v3607_v6 = vrot.slane %v3605_v8, 4  ;;  %v2063_v34 = vpop.f32.mrf.mxu2  ;;  %v1576_v54 = vrot.slane %v1575_v1, 4  ;;  %v2932_v61 = vshll.u32 %v12965_v37, 16  ;;  %v2936_v45 = vshrl.u32 %v12965_v37, 16 }
 0x16a   : > { %1213 = vst [vmem:[#allocation2 + $0xbc] sm:$0x1] %v1212_v35  ;;  %v12983_v38 = vadd.f32 %v2060_v59, %v1819_v25  ;;  %v1585_v56 = vor.u32 %v1584_v58, %v1580_v26  ;;  %v3608_v59 = vrot.slane %v12977_v27, 5  ;;  %v1595_v55 = vrot.slane %v1593_v7, 4  ;;  %v2857_v58 = vld [vmem:[#allocation2 + $0x28] sm:$0xf] }
 0x16b   : > { %11244 = vmatmul.msk.bf16.gmra.mxu0 %vm428_vm0, %v12096_v39  ;;  %v1598_v63 = vrot.slane %v1596_v16, 5  ;;  %v12994_v33 = vrot.slane %v1602_v28, 5  ;;  %v1581_v3 = vsel %vm12500_vm9, %v1576_v54, %v1580_v26  ;;  %v1590_v62 = vrot.slane %v1588_v32, 5 }
 0x16c   : > { %v1586_v5 = vrot.slane %v1585_v56, 4  ;;  %v1608_v20 = vrot.slane %v1606_v30, 4  ;;  %v3292_v15 = vunpack.c.l.b16 %v2921_v46  ;;  %v11292_v53 = vrot.slane %v3533_v13, 9 }
 0x16d   : > { %v2923_v21 = vshrl.u32 %v2853_v12, 16  ;;  %v2926_v1 = vshll.u32 %v2853_v12, 16  ;;  %v3609_v24 = vsel %vm12535_vm13, %v3607_v6, %v3608_v59  ;;  %v13002_v57 = vrot.slane %v2932_v61, 5  ;;  %v2856_v61 = vld [vmem:[#allocation2 + $0x24] sm:$0xf] }
 0x16e   : > { %v1591_v37 = vsel %vm12500_vm9, %v1586_v5, %v1590_v62  ;;  %v2938_v35 = vrot.slane %v2936_v45, 4  ;;  %v1697_v47 = vunpack.c.l.b16 %v1581_v3  ;;  %v3291_v41 = vunpack.c.l.b16 %v2911_v60  ;;  %v1249_v3 = vld [vmem:[#allocation2 + $0xa8] sm:$0xf] }
 0x16f   : > { %v1698_v0 = vunpack.c.l.b16 %v1591_v37  ;;  %v3606_v16 = vsel %vm12535_vm13, %v11292_v53, %v3605_v8  ;;  %v1599_v28 = vor.u32 %v1598_v63, %v1595_v55  ;;  %v1609_v25 = vor.u32 %v1608_v20, %v12994_v33  ;;  %v13015_v63 = vld [vmem:[#allocation2 + $0x2c] sm:$0x1] }
 0x170   : > { %v13004_v7 = vpop.f32.mrf.mxu0  ;;  %v1612_v26 = vshll.u32 %v1274_v18, 16  ;;  %v3720_v39 = vunpack.c.l.b16 %v3609_v24  ;;  %v3323_v13 = vpack.c.b16 %v3292_v15, %v3291_v41  ;;  %v2925_v6 = vrot.slane %v2923_v21, 4  ;;  %v1250_v20 = vld [vmem:[#allocation2 + $0xac] sm:$0xf] }
 0x171   : > { %v1822_v2 = vpop.f32.mrf.mxu1  ;;  %17228 = vst [vmem:[#allocation13_spill] sm:$0xff] %v13004_v7  ;;  %v1717_v30 = vpack.c.b16 %v1698_v0, %v1697_v47  ;;  %v2065_v46 = vpop.f32.mrf.mxu2  ;;  %v2928_v54 = vrot.slane %v2926_v1, 5  ;;  %v2939_v60 = vor.u32 %v2938_v35, %v13002_v57  ;;  %v3719_v56 = vunpack.c.l.b16 %v3606_v16 }
 0x172   : > { %v13009_v32 = vadd.f32 %v2063_v34, %v1822_v2  ;;  %v2942_v8 = vshll.u32 %v12977_v27, 16  ;;  %v3612_v12 = vrot.slane %v2857_v58, 5  ;;  %v1600_v45 = vrot.slane %v1599_v28, 4  ;;  %v3534_v27 = vld [vmem:[#allocation2 + $0x24] sm:$0xe] }
 0x173   : > { %10991 = vmatmul.msk.bf16.vlgmr.msrb.gmra.mxu3 %vm428_vm0, %v1717_v30  ;;  %v1610_v34 = vrot.slane %v1609_v25, 4  ;;  %v1614_v59 = vrot.slane %v1612_v26, 5  ;;  %v3750_v55 = vpack.c.b16 %v3720_v39, %v3719_v56  ;;  %v2929_v5 = vor.u32 %v2928_v54, %v2925_v6  ;;  %v12097_v28 = vld [vmem:[#allocation2 + $0x84] sm:$0xff] }
 0x174   : > { %v2940_v62 = vrot.slane %v2939_v60, 4  ;;  %v2947_v15 = vshrl.u32 %v2856_v61, 16  ;;  %v2950_v53 = vshll.u32 %v2856_v61, 16  ;;  %v2944_v18 = vrot.slane %v2942_v8, 5 }
 0x175   : > { %11275 = vmatmul.msk.bf16.vlgmr.msrb.gmra.mxu1 %vm428_vm0, %v3323_v13  ;;  %v3614_v21 = vrot.slane %v3612_v12, 4  ;;  %v2956_v1 = vshll.u32 %v2857_v58, 16  ;;  %v2960_v37 = vshrl.u32 %v2857_v58, 16  ;;  %v1605_v47 = vsel %vm12500_vm9, %v1600_v45, %v12994_v33 }
 0x176   : > { %v1615_v0 = vsel %vm12500_vm9, %v1610_v34, %v1614_v59  ;;  %v3615_v41 = vrot.slane %v13015_v63, 5  ;;  %v1617_v2 = vshrl.u32 %v1249_v3, 16  ;;  %v1620_v25 = vshll.u32 %v1249_v3, 16  ;;  %v2860_v59 = vld [vmem:[#allocation2 + $0x34] sm:$0xf] }
 0x177   : > { %11332 = vmatmul.msk.bf16.gmra.mxu2 %vm428_vm0, %v3750_v55  ;;  %v1626_v26 = vshll.u32 %v1250_v20, 16  ;;  %v1630_v30 = vshrl.u32 %v1250_v20, 16  ;;  %v2930_v39 = vrot.slane %v2929_v5, 4  ;;  %v11293_v13 = vrot.slane %v3534_v27, 9 }
 0x178   : > { %v13018_v35 = vpop.f32.mrf.mxu0  ;;  %v2949_v6 = vrot.slane %v2947_v15, 4  ;;  %v2952_v54 = vrot.slane %v2950_v53, 5  ;;  %v2945_v33 = vsel %vm12500_vm9, %v2940_v62, %v2944_v18  ;;  %v3616_v60 = vsel %vm12535_vm13, %v3614_v21, %v3615_v41  ;;  %v1275_v53 = vld [vmem:[#allocation2 + $0xb0] sm:$0x1] }
 0x179   : > { %v1824_v24 = vpop.f32.mrf.mxu1  ;;  %17229 = vst [vmem:[#allocation14_spill] sm:$0xff] %v13018_v35  ;;  %v2068_v58 = vpop.f32.mrf.mxu2  ;;  %v13033_v56 = vrot.slane %v2956_v1, 5  ;;  %v1699_v8 = vunpack.c.l.b16 %v1605_v47  ;;  %v1700_v61 = vunpack.c.l.b16 %v1615_v0  ;;  %v2935_v45 = vsel %vm12500_vm9, %v2930_v39, %v13002_v57  ;;  %v3535_v0 = vld [vmem:[#allocation2 + $0x30] sm:$0xe] }
 0x17a   : > { %v13026_v16 = vadd.f32 %v2065_v46, %v1824_v24  ;;  %v2962_v46 = vrot.slane %v2960_v37, 4  ;;  %v3613_v34 = vsel %vm12535_vm13, %v11293_v13, %v3612_v12  ;;  %v1619_v55 = vrot.slane %v1617_v2, 4 }
 0x17b   : > { %11245 = vmatmul.msk.bf16.gmra.mxu0 %vm428_vm0, %v12097_v28  ;;  %v1622_v3 = vrot.slane %v1620_v25, 5  ;;  %v13040_v5 = vrot.slane %v1626_v26, 5  ;;  %v1632_v62 = vrot.slane %v1630_v30, 4  ;;  %v3294_v20 = vunpack.c.l.b16 %v2945_v33  ;;  %v2859_v26 = vld [vmem:[#allocation2 + $0x30] sm:$0xf] }
 0x17c   : > { %v3722_v15 = vunpack.c.l.b16 %v3616_v60  ;;  %v2953_v18 = vor.u32 %v2952_v54, %v2949_v6  ;;  %v2963_v27 = vor.u32 %v2962_v46, %v13033_v56  ;;  %v2966_v21 = vshll.u32 %v13015_v63, 16  ;;  %v13049_v63 = vld [vmem:[#allocation2 + $0x38] sm:$0x1] }
 0x17d   : > { %v3619_v1 = vrot.slane %v2860_v59, 5  ;;  %v1718_v24 = vpack.c.b16 %v1700_v61, %v1699_v8  ;;  %v3293_v12 = vunpack.c.l.b16 %v2935_v45  ;;  %v3721_v47 = vunpack.c.l.b16 %v3613_v34 }
 0x17e   : > { %v1623_v2 = vor.u32 %v1622_v3, %v1619_v55  ;;  %v1633_v28 = vor.u32 %v1632_v62, %v13040_v5  ;;  %v1636_v25 = vshll.u32 %v1275_v53, 16  ;;  %v2954_v6 = vrot.slane %v2953_v18, 4 }
 0x17f   : > { %v3324_v39 = vpack.c.b16 %v3294_v20, %v3293_v12  ;;  %v3751_v13 = vpack.c.b16 %v3722_v15, %v3721_v47  ;;  %v2964_v54 = vrot.slane %v2963_v27, 4  ;;  %v2968_v33 = vrot.slane %v2966_v21, 5  ;;  %v1251_v20 = vld [vmem:[#allocation2 + $0xb4] sm:$0xf]  ;;  %v1252_v27 = vld [vmem:[#allocation2 + $0xb8] sm:$0xf] }
 0x180   : > { %v13044_v57 = vpop.f32.mrf.mxu0  ;;  %v11294_v60 = vrot.slane %v3535_v0, 9  ;;  %v3621_v46 = vrot.slane %v3619_v1, 4  ;;  %v2974_v8 = vshll.u32 %v2859_v26, 16  ;;  %v2980_v61 = vshll.u32 %v2860_v59, 16 }
 0x181   : > { %v1827_v37 = vpop.f32.mrf.mxu1  ;;  %17230 = vst [vmem:[#allocation15_spill] sm:$0xff] %v13044_v57  ;;  %v2070_v30 = vpop.f32.mrf.mxu2  ;;  %v2984_v45 = vshrl.u32 %v2860_v59, 16  ;;  %v1624_v34 = vrot.slane %v1623_v2, 4  ;;  %v1634_v55 = vrot.slane %v1633_v28, 4  ;;  %v1638_v3 = vrot.slane %v1636_v25, 5 }
 0x182   : > { %v13046_v41 = vadd.f32 %v2068_v58, %v1827_v37  ;;  %v2971_v58 = vshrl.u32 %v2859_v26, 16  ;;  %v3622_v62 = vrot.slane %v13049_v63, 5  ;;  %v2959_v15 = vsel %vm12500_vm9, %v2954_v6, %v13033_v56  ;;  %v12098_v56 = vld [vmem:[#allocation2 + $0x90] sm:$0xff]  ;;  %v690_v26 = vld [vmem:[#allocation2 + $0xc0] sm:$0x1] }
 0x183   : > { %10992 = vmatmul.msk.bf16.gmra.mxu3 %vm428_vm0, %v1718_v24  ;;  %v2969_v53 = vsel %vm12500_vm9, %v2964_v54, %v2968_v33  ;;  %v3620_v18 = vsel %vm12535_vm13, %v11294_v60, %v3619_v1  ;;  %v2976_v12 = vrot.slane %v2974_v8, 5  ;;  %v13066_v47 = vrot.slane %v2980_v61, 5  ;;  %v13079_v61 = vld [vmem:[#allocation2 + $0x40] sm:$0xf] }
 0x184   : > { %17231 = vst [vmem:[#allocation16_spill] sm:$0xff] %v13046_v41  ;;  %v3623_v59 = vsel %vm12535_vm13, %v3621_v46, %v3622_v62  ;;  %v2973_v24 = vrot.slane %v2971_v58, 4  ;;  %v2986_v0 = vrot.slane %v2984_v45, 4  ;;  %v1629_v28 = vsel %vm12500_vm9, %v1624_v34, %v13040_v5 }
 0x185   : > { %11276 = vmatmul.msk.bf16.gmra.mxu1 %vm428_vm0, %v3324_v39  ;;  %v1639_v1 = vsel %vm12500_vm9, %v1634_v55, %v1638_v3  ;;  %v1641_v25 = vshrl.u32 %v1251_v20, 16  ;;  %v1650_v6 = vshll.u32 %v1252_v27, 16  ;;  %v1654_v54 = vshrl.u32 %v1252_v27, 16  ;;  %v1276_v55 = vld [vmem:[#allocation2 + $0xbc] sm:$0x1]  ;;  %v561_v27 = vpop.f32.mrf.mxu3 }
 0x186   : > { %v691_v33 = vsel %vm12449_vm4, 0, %v690_v26  ;;  %v3724_v60 = vunpack.c.l.b16 %v3623_v59  ;;  %v3295_v46 = vunpack.c.l.b16 %v2959_v15  ;;  %v3723_v58 = vunpack.c.l.b16 %v3620_v18  ;;  %v12297_v15 = vld [vmem:[%s17187_s2] ss:$0 sm:$0xff]  ;;  %v13123_v26 = vld [vmem:[#allocation2 + $0x2c] sm:$0x1] }
 0x187   : > { %11333 = vmatmul.msk.bf16.gmra.mxu2 %vm428_vm0, %v3751_v13  ;;  %v1644_v13 = vshll.u32 %v1251_v20, 16  ;;  %692 = vst [vmem:[#allocation2 + $0xc0] sm:$0x1] %v691_v33  ;;  %v2977_v5 = vor.u32 %v2976_v12, %v2973_v24  ;;  %v2987_v8 = vor.u32 %v2986_v0, %v13066_v47  ;;  %v1701_v45 = vunpack.c.l.b16 %v1629_v28  ;;  %v13082_v20 = vld [vmem:[#allocation2 + $0x3c] sm:$0xe] }
 0x188   : > { %v13064_v37 = vpop.f32.mrf.mxu0  ;;  %v1702_v34 = vunpack.c.l.b16 %v1639_v1  ;;  %v1643_v3 = vrot.slane %v1641_v25, 4  ;;  %v2990_v62 = vshll.u32 %v13049_v63, 16  ;;  %v1656_v59 = vrot.slane %v1654_v54, 4 }
 0x189   : > { %v1829_v21 = vpop.f32.mrf.mxu1  ;;  %17232 = vst [vmem:[#allocation17_spill] sm:$0xff] %v13064_v37  ;;  %v2073_v39 = vpop.f32.mrf.mxu2  ;;  %v562_v18 = vadd.f32 %v12297_v15, %v561_v27  ;;  %v3752_v12 = vpack.c.b16 %v3724_v60, %v3723_v58  ;;  %v17196_v0 = vrot.slane %v13079_v61, 5  ;;  %v1660_v1 = vshll.u32 %v1276_v55, 16  ;;  %v746_v60 = vld [vmem:[#allocation2 + $0xc8] sm:$0x1] }
 0x18a   : > { %v13068_v2 = vadd.f32 %v2070_v30, %v1829_v21  ;;  %v3296_v30 = vunpack.c.l.b16 %v2969_v53  ;;  %v1646_v21 = vrot.slane %v1644_v13, 5  ;;  %v13084_v53 = vrot.slane %v1650_v6, 5  ;;  %v4955_v6 = vld [vmem:[#allocation2 + $0x18] sm:$0xe] }
 0x18b   : > { %11246 = vmatmul.msk.bf16.gmra.mxu0 %vm428_vm0, %v12098_v56  ;;  %v13090_v56 = vld [vmem:[#allocation2 + $0x1c] sm:$0xf]  ;;  %v2988_v25 = vrot.slane %v2987_v8, 4  ;;  %v596_v13 = vmax.f32 %v562_v18, 0.0  ;;  %v1719_v33 = vpack.c.b16 %v1702_v34, %v1701_v45  ;;  %v13097_v11 = vrot.slane %v2977_v5, 4 }
 0x18c   : > { %17233 = vst [vmem:[#allocation18_spill] sm:$0xff] %v13068_v2  ;;  %v3325_v24 = vpack.c.b16 %v3296_v30, %v3295_v46  ;;  %v2992_v30 = vrot.slane %v2990_v62, 5  ;;  %v1647_v58 = vor.u32 %v1646_v21, %v1643_v3  ;;  %v1657_v27 = vor.u32 %v1656_v59, %v13084_v53  ;;  %v13105_v18 = vld [vmem:[#allocation2 + $0x20] sm:$0x1]  ;;  %v12086_v34 = vld [vmem:[%s17188_s3 + $0x58] sm:$0xff] }
 0x18d   : > { %628 = vst.msk [vmem:[#allocation4 + $0xf0] sm:$0xff] %vm428_vm0, %v596_v13  ;;  %v782_v8 = vpack.c.bf16 %v596_v13, %v596_v13  ;;  %v747_v55 = vsel %vm12462_vm6, 0, %v746_v60  ;;  %v3628_v45 = vrot.slane %v17196_v0, 4  ;;  %v11491_v3 = vrot.slane %v4955_v6, 9  ;;  %v563_v60 = vpop.f32.mrf.mxu3  ;;  %2419 = vmatpush.bf16.msrb.mxu3 %v12086_v34 }
 0x18e   : > { %748 = vst [vmem:[#allocation2 + $0xc8] sm:$0x1] %v747_v55  ;;  %v5021_v62 = vrot.slane %v13090_v56, 5  ;;  %v1662_v21 = vrot.slane %v1660_v1, 5  ;;  %v2993_v59 = vsel %vm12500_vm9, %v2988_v25, %v2992_v30  ;;  %v5024_v6 = vrot.slane %v13105_v18, 5 }
 0x18f   : > { %v1045_v13 = vshll.u32 %v782_v8, 16  ;;  %v1658_v1 = vrot.slane %v1657_v27, 4  ;;  %v564_v25 = vadd.f32 %v12297_v15, %v563_v60  ;;  %v13132_v30 = vunpack.c.l.b16 %v2993_v59  ;;  %v1214_v34 = vld [vmem:[#allocation2 + $0xc0] sm:$0xf] }
 0x190   : > { %v13092_v63 = vpop.f32.mrf.mxu0  ;;  %v5022_v55 = vsel %vm12535_vm13, %v11491_v3, %v5021_v62  ;;  %v5023_v0 = vrot.slane %v5021_v62, 4  ;;  %v5031_v15 = vrot.slane %v13123_v26, 5 }
 0x191   : > { %v1832_v28 = vpop.f32.mrf.mxu1  ;;  %17234 = vst [vmem:[#allocation19_spill] sm:$0xff] %v13092_v63  ;;  %v2075_v46 = vpop.f32.mrf.mxu2  ;;  %v597_v27 = vmax.f32 %v564_v25, 0.0 }
 0x192   : > { %v13095_v54 = vadd.f32 %v2073_v39, %v1832_v28  ;;  %v13107_v39 = vld [vmem:[#allocation2 + $0x28] sm:$0xf]  ;;  %v1042_v28 = vshrl.u32 %v782_v8, 16  ;;  %v3629_v8 = vrot.slane %v13100_v4, 5  ;;  %v5025_v3 = vsel %vm12535_vm13, %v5023_v0, %v5024_v6 }
 0x193   : > { %10993 = vmatmul.msk.bf16.gmra.mxu3 %vm428_vm0, %v1719_v33  ;;  %v4956_v33 = vld [vmem:[#allocation2 + $0x24] sm:$0xe]  ;;  %v5028_v5 = vrot.slane %v13107_v39, 5  ;;  %v5141_v59 = vunpack.c.l.b16 %v5025_v3  ;;  %629 = vst.msk [vmem:[#allocation4 + $0xf8] sm:$0xff] %vm428_vm0, %v597_v27 }
 0x194   : > { %17235 = vst [vmem:[#allocation20_spill] sm:$0xff] %v13095_v54  ;;  %v13129_v63 = vrot.slane %v1042_v28, 7  ;;  %v11492_v62 = vrot.slane %v4956_v33, 9  ;;  %v5140_v28 = vunpack.c.l.b16 %v5022_v55  ;;  %v3008_v55 = vshrl.u32 %v13079_v61, 16 }
 0x195   : > { %11277 = vmatmul.msk.bf16.gmra.mxu1 %vm428_vm0, %v3325_v24  ;;  %v1648_v24 = vrot.slane %v1647_v58, 4  ;;  %v5030_v7 = vrot.slane %v5028_v5, 4  ;;  %v3630_v3 = vsel %vm12535_vm13, %v3628_v45, %v3629_v8  ;;  %v17239_v45 = vrot.slane %v13079_v61, 5 }
 0x196   : > { %v1047_v58 = vor.u32 %v1045_v13, %v13129_v63  ;;  %v5029_v35 = vsel %vm12535_vm13, %v11492_v62, %v5028_v5  ;;  %v1663_v13 = vsel %vm12500_vm9, %v1658_v1, %v1662_v21  ;;  %v3004_v5 = vshll.u32 %v13079_v61, 16 }
 0x197   : > { %11334 = vmatmul.msk.bf16.gmra.mxu2 %vm428_vm0, %v3752_v12  ;;  %v12099_v12 = vld [vmem:[#allocation2 + $0x9c] sm:$0xff]  ;;  %v1653_v0 = vsel %vm12500_vm9, %v1648_v24, %v13084_v53  ;;  %v13156_v6 = vpack.c.b16 %v5141_v59, %v5140_v28  ;;  %v5032_v53 = vsel %vm12535_vm13, %v5030_v7, %v5031_v15  ;;  %v5142_v9 = vunpack.c.l.b16 %v5029_v35  ;;  %v1218_v35 = vld [vmem:[#allocation2 + $0xc8] sm:$0x1] }
 0x198   : > { %v13137_v57 = vpop.f32.mrf.mxu0  ;;  %v1215_v33 = vsel %vm12528_vm12, %v1047_v58, %v1214_v34  ;;  %v5143_v1 = vunpack.c.l.b16 %v5032_v53  ;;  %v1703_v25 = vunpack.c.l.b16 %v1653_v0  ;;  %v1704_v34 = vunpack.c.l.b16 %v1663_v13 }
 0x199   : > { %v1834_v37 = vpop.f32.mrf.mxu1  ;;  %17236 = vst [vmem:[#allocation21_spill] sm:$0xff] %v13137_v57  ;;  %v2078_v29 = vpop.f32.mrf.mxu2  ;;  %v1048_v58 = vrot.slane %v13129_v63, 4  ;;  %v17238_v7 = vsel %vm12500_vm9, %v13097_v11, %v13066_v47  ;;  %v13170_v15 = vrot.slane %v3004_v5, 5  ;;  %v3010_v59 = vrot.slane %v3008_v55, 4  ;;  %v13181_v5 = vld [vmem:[#allocation2 + $0x34] sm:$0xf] }
 0x19a   : > { %v13141_v60 = vadd.f32 %v2075_v46, %v1834_v37  ;;  %v783_v37 = vpack.c.bf16 %v597_v27, %v597_v27  ;;  %v2862_v46 = vld [vmem:[#allocation2 + $0x3c] sm:$0xf]  ;;  %1216 = vst [vmem:[#allocation2 + $0xc0] sm:$0xf] %v1215_v33  ;;  %v13163_v33 = vpack.c.b16 %v5143_v1, %v5142_v9  ;;  %v3297_v28 = vunpack.c.l.b16 %v17238_v7  ;;  %v4957_v55 = vld [vmem:[#allocation2 + $0x30] sm:$0xe] }
 0x19b   : > { %11247 = vmatmul.msk.bf16.gmra.mxu0 %vm428_vm0, %v12099_v12  ;;  %v2995_v62 = vshrl.u32 %v2862_v46, 16  ;;  %v2998_v12 = vshll.u32 %v2862_v46, 16  ;;  %v17240_v8 = vrot.slane %v13082_v20, 9  ;;  %v1720_v53 = vpack.c.b16 %v1704_v34, %v1703_v25  ;;  %v12085_v34 = vld [vmem:[%s17188_s3 + $0x50] sm:$0xff] }
 0x19c   : > { %17237 = vst [vmem:[#allocation22_spill] sm:$0xff] %v13141_v60  ;;  %v1050_v21 = vshrl.u32 %v783_v37, 16  ;;  %v1053_v24 = vshll.u32 %v783_v37, 16  ;;  %v3326_v11 = vpack.c.b16 %v13132_v30, %v3297_v28  ;;  %v3726_v47 = vunpack.c.l.b16 %v3630_v3  ;;  %v13195_v3 = vld [vmem:[#allocation2 + $0x38] sm:$0x1]  ;;  %2420 = vmatpush.bf16.msrb.mxu3 %v12085_v34 }
 0x19d   : > { %v3627_v63 = vsel %vm12535_vm13, %v17240_v8, %v17239_v45  ;;  %v2997_v1 = vrot.slane %v2995_v62, 4  ;;  %v3011_v30 = vor.u32 %v3010_v59, %v13170_v15  ;;  %v2867_v8 = vld [vmem:[#allocation2 + $0x50] sm:$0x1] }
 0x19e   : > { %v1052_v27 = vrot.slane %v1050_v21, 7  ;;  %v2866_v21 = vld [vmem:[#allocation2 + $0x4c] sm:$0xf]  ;;  %v3725_v25 = vunpack.c.l.b16 %v3627_v63  ;;  %v3636_v34 = vrot.slane %v2867_v8, 5 }
 0x19f   : > { %v3633_v62 = vrot.slane %v2866_v21, 5  ;;  %v3012_v45 = vrot.slane %v3011_v30, 4 }
 0x1a0   : > { %v1055_v13 = vor.u32 %v1053_v24, %v1052_v27  ;;  %v1057_v37 = vrot.slane %v1052_v27, 4  ;;  %v13183_v9 = vpop.f32.mrf.mxu0  ;;  %v11493_v27 = vrot.slane %v4957_v55, 9  ;;  %v3753_v7 = vpack.c.b16 %v3726_v47, %v3725_v25  ;;  %v12100_v47 = vld [vmem:[#allocation2 + $0xa8] sm:$0xff] }
 0x1a1   : > { %v1837_v0 = vpop.f32.mrf.mxu1  ;;  %17242 = vst [vmem:[#allocation24_spill] sm:$0xff] %v13183_v9  ;;  %v2080_v61 = vpop.f32.mrf.mxu2  ;;  %v3537_v55 = vld [vmem:[#allocation2 + $0x48] sm:$0xe] }
 0x1a2   : > { %v13178_v46 = vadd.f32 %v2078_v29, %v1837_v0  ;;  %v1056_v20 = vsel %vm12554_vm15, %v1048_v58, %v1055_v13  ;;  %v1219_v24 = vsel %vm12449_vm4, %v1057_v37, %v1218_v35  ;;  %v3000_v29 = vrot.slane %v2998_v12, 5 }
 0x1a3   : > { %10994 = vmatmul.msk.bf16.gmra.mxu3 %vm428_vm0, %v1720_v53  ;;  %1217 = vst.msk [vmem:[#allocation2 + $0xc4] sm:$0xf] %vm630_vm1, %v1056_v20  ;;  %v3014_v58 = vshll.u32 %v13100_v4, 16  ;;  %v5035_v12 = vrot.slane %v13181_v5, 5  ;;  %v5038_v0 = vrot.slane %v13195_v3, 5  ;;  %v3635_v4 = vrot.slane %v3633_v62, 4 }
 0x1a4   : > { %17241 = vst [vmem:[#allocation23_spill] sm:$0xff] %v13178_v46  ;;  %v3001_v28 = vor.u32 %v3000_v29, %v2997_v1  ;;  %v3028_v37 = vshll.u32 %v2866_v21, 16  ;;  %v3032_v20 = vshrl.u32 %v2866_v21, 16  ;;  %vm5449_vm1 = vcmask 257024  }
 0x1a5   : > { %11278 = vmatmul.msk.bf16.gmra.mxu1 %vm428_vm0, %v3326_v11  ;;  %1220 = vst [vmem:[#allocation2 + $0xc8] sm:$0x1] %v1219_v24  ;;  %v5036_v35 = vsel %vm12535_vm13, %v11493_v27, %v5035_v12  ;;  %v5037_v59 = vrot.slane %v5035_v12, 4  ;;  %v3016_v13 = vrot.slane %v3014_v58, 5  ;;  %v2865_v27 = vld [vmem:[#allocation2 + $0x48] sm:$0xf] }
 0x1a6   : > { %v5144_v24 = vunpack.c.l.b16 %v5036_v35  ;;  %v3002_v25 = vrot.slane %v3001_v28, 4  ;;  %v12138_v58 = vld [vmem:[%s17188_s3 + $0xf8] sm:$0xff]  ;;  %v3637_v28 = vsel %vm12535_vm13, %v3635_v4, %v3636_v34  ;;  %v3019_v35 = vshrl.u32 %v2865_v27, 16 }
 0x1a7   : > { %11335 = vmatmul.msk.bf16.gmra.mxu2 %vm428_vm0, %v3753_v7  ;;  %v5039_v53 = vsel %vm12535_vm13, %v5037_v59, %v5038_v0  ;;  %v3017_v30 = vsel %vm12500_vm9, %v3012_v45, %v3016_v13  ;;  %v11296_v7 = vrot.slane %v3537_v55, 9  ;;  %v3022_v59 = vshll.u32 %v2865_v27, 16  ;;  %4838 = vmatpush.bf16.msra.mxu0 %v12138_v58  ;;  %v13237_v58 = vld [vmem:[#allocation2 + $0x40] sm:$0xf] }
 0x1a8   : > { %v5145_v1 = vunpack.c.l.b16 %v5039_v53  ;;  %v13216_v12 = vpop.f32.mrf.mxu0  ;;  %v3007_v21 = vsel %vm12500_vm9, %v3002_v25, %v13170_v15  ;;  %v13223_v0 = vrot.slane %v3028_v37, 5  ;;  %v3034_v45 = vrot.slane %v3032_v20, 4  ;;  %v12071_v15 = vld [vmem:[#allocation2 + $0x90] sm:$0xff] }
 0x1a9   : > { %v1839_v63 = vpop.f32.mrf.mxu1  ;;  %v2083_v29 = vpop.f32.mrf.mxu2  ;;  %17244 = vst [vmem:[#allocation26_spill] sm:$0xff] %v13216_v12  ;;  %v3634_v13 = vsel %vm12535_vm13, %v11296_v7, %v3633_v62  ;;  %v3021_v55 = vrot.slane %v3019_v35, 4  ;;  %v3024_v25 = vrot.slane %v3022_v59, 5  ;;  %v12137_v37 = vld [vmem:[%s17188_s3 + $0xf0] sm:$0xff]  ;;  %v3038_v62 = vshll.u32 %v2867_v8, 16 }
 0x1aa   : > { %v13206_v11 = vadd.f32 %v2080_v61, %v1839_v63  ;;  %v13214_v61 = vpack.c.b16 %v5145_v1, %v5144_v24  ;;  %v3300_v63 = vunpack.c.l.b16 %v3017_v30  ;;  %v3728_v24 = vunpack.c.l.b16 %v3637_v28  ;;  %v2869_v30 = vld [vmem:[#allocation2 + $0x58] sm:$0xf]  ;;  %v12136_v28 = vld [vmem:[%s17188_s3 + $0xe8] sm:$0xff]  ;;  %v13243_v8 = vld [vmem:[#allocation2 + $0x44] sm:$0x1] }
 0x1ab   : > { %11248 = vmatmul.msk.bf16.gmra.mxu0 %vm428_vm0, %v12100_v47  ;;  %v3299_v47 = vunpack.c.l.b16 %v3007_v21  ;;  %v3035_v4 = vor.u32 %v3034_v45, %v13223_v0  ;;  %v3727_v27 = vunpack.c.l.b16 %v3634_v13  ;;  %v4958_v21 = vld [vmem:[#allocation2 + $0x3c] sm:$0xe]  ;;  %v3025_v35 = vor.u32 %v3024_v25, %v3021_v55 }
 0x1ac   : > { %17243 = vst [vmem:[#allocation25_spill] sm:$0xff] %v13206_v11  ;;  %4839 = vmatpush.bf16.msra.mxu0 %v12137_v37  ;;  %v3640_v45 = vrot.slane %v2869_v30, 5 }
 0x1ad   : > { %v3327_v34 = vpack.c.b16 %v3300_v63, %v3299_v47  ;;  %v3754_v7 = vpack.c.b16 %v3728_v24, %v3727_v27  ;;  %v3036_v59 = vrot.slane %v3035_v4, 4  ;;  %v5042_v63 = vrot.slane %v13237_v58, 5  ;;  %v2868_v24 = vld [vmem:[#allocation2 + $0x54] sm:$0xf] }
 0x1ae   : > { %v3040_v47 = vrot.slane %v3038_v62, 5  ;;  %v5045_v4 = vrot.slane %v13243_v8, 5  ;;  %v12101_v27 = vld [vmem:[#allocation2 + $0xb4] sm:$0xff]  ;;  %v12135_v62 = vld [vmem:[%s17188_s3 + $0xe0] sm:$0xff] }
 0x1af   : > { %v5044_v25 = vrot.slane %v5042_v63, 4 }
 0x1b0   : > { %v13246_v13 = vpop.f32.mrf.mxu0  ;;  %4840 = vmatpush.bf16.msra.mxu0 %v12136_v28 }
 0x1b1   : > { %v1842_v53 = vpop.f32.mrf.mxu1  ;;  %v2085_v20 = vpop.f32.mrf.mxu2  ;;  %17246 = vst [vmem:[#allocation28_spill] sm:$0xff] %v13246_v13  ;;  %v3538_v13 = vld [vmem:[#allocation2 + $0x54] sm:$0xe] }
 0x1b2   : > { %v13227_v1 = vadd.f32 %v2083_v29, %v1842_v53  ;;  %v12084_v29 = vld [vmem:[%s17188_s3 + $0x48] sm:$0xff]  ;;  %v11494_v53 = vrot.slane %v4958_v21, 9  ;;  %v3041_v21 = vsel %vm12500_vm9, %v3036_v59, %v3040_v47  ;;  %v11297_v57 = vrot.slane %v3538_v13, 9  ;;  %v12072_v13 = vld [vmem:[#allocation2 + $0x9c] sm:$0xff] }
 0x1b3   : > { %11087 = vmatmul.msk.bf16.vlgmr.msra.gmra.mxu3 %vm428_vm0, %v12071_v15  ;;  %v13249_v15 = vld [vmem:[#allocation2 + $0x5c] sm:$0x1] }
 0x1b4   : > { %17245 = vst [vmem:[#allocation27_spill] sm:$0xff] %v13227_v1  ;;  %2421 = vmatpush.bf16.msrb.mxu3 %v12084_v29  ;;  %v5043_v55 = vsel %vm12535_vm13, %v11494_v53, %v5042_v63  ;;  %v3026_v29 = vrot.slane %v3025_v35, 4  ;;  %v3643_v12 = vrot.slane %v13249_v15, 5  ;;  %v3043_v53 = vshrl.u32 %v2868_v24, 16  ;;  %4841 = vmatpush.bf16.msra.mxu0 %v12135_v62 }
 0x1b5   : > { %11279 = vmatmul.msk.bf16.gmra.mxu1 %vm428_vm0, %v3327_v34  ;;  %v3046_v63 = vshll.u32 %v2868_v24, 16  ;;  %v3052_v35 = vshll.u32 %v2869_v30, 16  ;;  %v5146_v9 = vunpack.c.l.b16 %v5043_v55  ;;  %v3302_v24 = vunpack.c.l.b16 %v3041_v21 }
 0x1b6   : > { %v3031_v47 = vsel %vm12500_vm9, %v3026_v29, %v13223_v0  ;;  %v3045_v14 = vrot.slane %v3043_v53, 4  ;;  %v4273_v29 = vld [vmem:[#allocation2 + $0x18] sm:$0xf] }
 0x1b7   : > { %11336 = vmatmul.msk.bf16.gmra.mxu2 %vm428_vm0, %v3754_v7  ;;  %v3642_v7 = vrot.slane %v3640_v45, 4 }
 0x1b9   : > { %v1844_v37 = vpop.f32.mrf.mxu1  ;;  %v2088_v28 = vpop.f32.mrf.mxu2  ;;  %v3644_v36 = vsel %vm12535_vm13, %v3642_v7, %v3643_v12  ;;  %v4335_v12 = vshrl.u32 %v13090_v56, 16 }
 0x1ba   : > { %v13254_v34 = vadd.f32 %v2085_v20, %v1844_v37  ;;  %v5046_v20 = vsel %vm12535_vm13, %v5044_v25, %v5045_v4  ;;  %v3056_v37 = vshrl.u32 %v2869_v30, 16  ;;  %v3048_v25 = vrot.slane %v3046_v63, 5 }
 0x1bb   : > { %11249 = vmatmul.msk.bf16.gmra.mxu0 %vm428_vm0, %v12101_v27  ;;  %v5147_v59 = vunpack.c.l.b16 %v5046_v20  ;;  %v3641_v4 = vsel %vm12535_vm13, %v11297_v57, %v3640_v45  ;;  %v3054_v30 = vrot.slane %v3052_v35, 5  ;;  %v13274_v27 = vpop.f32.mrf.mxu0  ;;  %v3301_v20 = vunpack.c.l.b16 %v3031_v47  ;;  %v2872_v57 = vld [vmem:[#allocation2 + $0x64] sm:$0xf] }
 0x1bc   : > { %17247 = vst [vmem:[#allocation29_spill] sm:$0xff] %v13254_v34  ;;  %v3058_v55 = vrot.slane %v3056_v37, 4  ;;  %v3730_v43 = vunpack.c.l.b16 %v3644_v36  ;;  %v3729_v53 = vunpack.c.l.b16 %v3641_v4  ;;  %v3049_v63 = vor.u32 %v3048_v25, %v3045_v14  ;;  %v12083_v36 = vld [vmem:[%s17188_s3 + $0x40] sm:$0xff] }
 0x1bd   : > { %v13270_v19 = vpack.c.b16 %v5147_v59, %v5146_v9  ;;  %17248 = vst [vmem:[#allocation30_spill] sm:$0xff] %v13274_v27  ;;  %v4331_v9 = vshll.u32 %v13090_v56, 16  ;;  %v3328_v7 = vpack.c.b16 %v3302_v24, %v3301_v20  ;;  %v4322_v35 = vshrl.u32 %v4273_v29, 16  ;;  %v3539_v56 = vld [vmem:[#allocation2 + $0x60] sm:$0xe]  ;;  %2422 = vmatpush.bf16.msrb.mxu3 %v12083_v36 }
 0x1be   : > { %v3059_v45 = vor.u32 %v3058_v55, %v3054_v30  ;;  %v4325_v37 = vshll.u32 %v4273_v29, 16  ;;  %v3062_v59 = vshll.u32 %v13249_v15, 16  ;;  %v3647_v47 = vrot.slane %v2872_v57, 5  ;;  %v12102_v4 = vld [vmem:[#allocation2 + $0xc0] sm:$0xff]  ;;  %v13306_v36 = vld [vmem:[#allocation2 + $0x4c] sm:$0xf] }
 0x1bf   : > { %v13286_v24 = vrot.slane %v4331_v9, 5  ;;  %v4337_v14 = vrot.slane %v4335_v12, 4  ;;  %v3050_v25 = vrot.slane %v3049_v63, 4  ;;  %v4324_v29 = vrot.slane %v4322_v35, 4  ;;  %v4276_v63 = vld [vmem:[#allocation2 + $0x24] sm:$0xf] }
 0x1c0   : > { %v3060_v55 = vrot.slane %v3059_v45, 4  ;;  %v4327_v15 = vrot.slane %v4325_v37, 5  ;;  %v3064_v9 = vrot.slane %v3062_v59, 5  ;;  %v2871_v45 = vld [vmem:[#allocation2 + $0x60] sm:$0xf]  ;;  %v3076_v27 = vshll.u32 %v2872_v57, 16 }
 0x1c1   : > { %v1847_v62 = vpop.f32.mrf.mxu1  ;;  %v2090_v21 = vpop.f32.mrf.mxu2  ;;  %v3055_v20 = vsel %vm12500_vm9, %v3050_v25, %v3054_v30  ;;  %v4338_v12 = vor.u32 %v4337_v14, %v13286_v24  ;;  %v3080_v51 = vshrl.u32 %v2872_v57, 16  ;;  %v4341_v59 = vshll.u32 %v13105_v18, 16 }
 0x1c2   : > { %v13276_v0 = vadd.f32 %v2088_v28, %v1847_v62  ;;  %v3755_v28 = vpack.c.b16 %v3730_v43, %v3729_v53  ;;  %v13291_v43 = vld [vmem:[#allocation2 + $0x68] sm:$0x1]  ;;  %v3649_v53 = vrot.slane %v3647_v47, 4  ;;  %v3065_v35 = vsel %vm12500_vm9, %v3060_v55, %v3064_v9 }
 0x1c3   : > { %11088 = vmatmul.msk.bf16.gmra.mxu3 %vm428_vm0, %v12072_v13  ;;  %v11298_v13 = vrot.slane %v3539_v56, 9  ;;  %v3650_v37 = vrot.slane %v13291_v43, 5  ;;  %v3303_v56 = vunpack.c.l.b16 %v3055_v20  ;;  %v4328_v14 = vor.u32 %v4327_v15, %v4324_v29 }
 0x1c4   : > { %17249 = vst [vmem:[#allocation31_spill] sm:$0xff] %v13276_v0  ;;  %v4346_v25 = vshrl.u32 %v4276_v63, 16  ;;  %v3070_v23 = vshll.u32 %v2871_v45, 16  ;;  %v3304_v55 = vunpack.c.l.b16 %v3065_v35  ;;  %v13310_v50 = vrot.slane %v3076_v27, 5  ;;  %v2123_v35 = vld [vmem:[#allocation2] sm:$0xe] }
 0x1c5   : > { %11280 = vmatmul.msk.bf16.gmra.mxu1 %vm428_vm0, %v3328_v7  ;;  %v3651_v57 = vsel %vm12535_vm13, %v3649_v53, %v3650_v37  ;;  %v4355_v18 = vshll.u32 %v13107_v39, 16  ;;  %v4359_v20 = vshrl.u32 %v13107_v39, 16  ;;  %v5049_v29 = vrot.slane %v13306_v36, 5 }
 0x1c6   : > { %v4329_v0 = vrot.slane %v4328_v14, 4  ;;  %v4348_v53 = vrot.slane %v4346_v25, 4  ;;  %v4365_v34 = vshll.u32 %v13123_v26, 16  ;;  %v11091_v1 = vrot.slane %v2123_v35, 9  ;;  %v13327_v14 = vld [vmem:[#allocation2 + $0x70] sm:$0xf] }
 0x1c7   : > { %11337 = vmatmul.msk.bf16.gmra.mxu2 %vm428_vm0, %v3755_v28  ;;  %v13297_v28 = vpop.f32.mrf.mxu0  ;;  %v13329_v25 = vrot.slane %v4355_v18, 5  ;;  %v3086_v26 = vshll.u32 %v13291_v43, 16 }
 0x1c8   : > { %17251 = vst [vmem:[#allocation33_spill] sm:$0xff] %v13297_v28  ;;  %v3067_v28 = vshrl.u32 %v2871_v45, 16 }
 0x1c9   : > { %v1849_v62 = vpop.f32.mrf.mxu1 }
 0x1ca   : > { %v13293_v7 = vadd.f32 %v2090_v21, %v1849_v62  ;;  %v2093_v30 = vpop.f32.mrf.mxu2  ;;  %v3648_v21 = vsel %vm12535_vm13, %v11298_v13, %v3647_v47  ;;  %v4349_v62 = vshll.u32 %v4276_v63, 16  ;;  %v3082_v47 = vrot.slane %v3080_v51, 4  ;;  %v12073_v63 = vld [vmem:[#allocation2 + $0xa8] sm:$0xff] }
 0x1cb   : > { %11250 = vmatmul.msk.bf16.gmra.mxu0 %vm428_vm0, %v12102_v4  ;;  %v4339_v4 = vrot.slane %v4338_v12, 4  ;;  %v3731_v9 = vunpack.c.l.b16 %v3648_v21  ;;  %v4343_v13 = vrot.slane %v4341_v59, 5  ;;  %v3069_v45 = vrot.slane %v3067_v28, 4  ;;  %v13319_v21 = vld [vmem:[#allocation2 + $0x50] sm:$0x1] }
 0x1cc   : > { %17250 = vst [vmem:[#allocation32_spill] sm:$0xff] %v13293_v7  ;;  %v3732_v7 = vunpack.c.l.b16 %v3651_v57  ;;  %v4351_v12 = vrot.slane %v4349_v62, 5  ;;  %v3072_v51 = vrot.slane %v3070_v23, 5  ;;  %v3329_v59 = vpack.c.b16 %v3304_v55, %v3303_v56 }
 0x1cd   : > { %v4344_v27 = vsel %vm12500_vm9, %v4339_v4, %v4343_v13  ;;  %v3083_v39 = vor.u32 %v3082_v47, %v13310_v50  ;;  %v4361_v23 = vrot.slane %v4359_v20, 4  ;;  %v5051_v28 = vrot.slane %v5049_v29, 4 }
 0x1ce   : > { %v4715_v56 = vunpack.c.l.b16 %v4344_v27  ;;  %v17254_v57 = vrot.slane %v12489_v31, 5  ;;  %v5052_v55 = vrot.slane %v13319_v21, 5  ;;  %v3756_v13 = vpack.c.b16 %v3732_v7, %v3731_v9 }
 0x1cf   : > { %v13331_v62 = vpop.f32.mrf.mxu0  ;;  %v3073_v18 = vor.u32 %v3072_v51, %v3069_v45  ;;  %v4352_v20 = vor.u32 %v4351_v12, %v4348_v53  ;;  %v3084_v43 = vrot.slane %v3083_v39, 4  ;;  %v3654_v31 = vrot.slane %v13327_v14, 5 }
 0x1d0   : > { %17253 = vst [vmem:[#allocation35_spill] sm:$0xff] %v13331_v62  ;;  %v2177_v4 = vsel %vm12535_vm13, %v11091_v1, %v17254_v57  ;;  %v5053_v1 = vsel %vm12535_vm13, %v5051_v28, %v5052_v55  ;;  %v4362_v35 = vor.u32 %v4361_v23, %v13329_v25  ;;  %v17255_v57 = vunpack.c.l.b16 %v12541_v22  ;;  %v3540_v28 = vld [vmem:[#allocation2 + $0x6c] sm:$0xe] }
 0x1d1   : > { %v3088_v45 = vrot.slane %v3086_v26, 5  ;;  %v4353_v55 = vrot.slane %v4352_v20, 4  ;;  %v3656_v23 = vrot.slane %v3654_v31, 4  ;;  %v3104_v26 = vshrl.u32 %v13327_v14, 16 }
 0x1d2   : > { %v1852_v15 = vpop.f32.mrf.mxu1  ;;  %v2095_v47 = vpop.f32.mrf.mxu2  ;;  %v5149_v20 = vunpack.c.l.b16 %v5053_v1 }
 0x1d3   : > { %v13315_v37 = vadd.f32 %v2093_v30, %v1852_v15  ;;  %11089 = vmatmul.msk.bf16.gmra.mxu3 %vm428_vm0, %v12073_v63  ;;  %v4334_v30 = vsel %vm12500_vm9, %v4329_v0, %v13286_v24  ;;  %v12134_v0 = vld [vmem:[%s17188_s3 + $0xd8] sm:$0xff]  ;;  %v4959_v24 = vld [vmem:[#allocation2 + $0x48] sm:$0xe]  ;;  %v2295_v15 = vunpack.c.l.b16 %v2177_v4  ;;  %v4279_v63 = vld [vmem:[#allocation2 + $0x30] sm:$0xf]  ;;  %v3074_v4 = vrot.slane %v3073_v18, 4 }
 0x1d4   : > { %v4714_v27 = vunpack.c.l.b16 %v4334_v30  ;;  %4156 = vmatpush.bf16.msra.mxu3 %v12134_v0  ;;  %v11495_v9 = vrot.slane %v4959_v24, 9  ;;  %v4370_v51 = vshrl.u32 %v4279_v63, 16  ;;  %v4373_v39 = vshll.u32 %v4279_v63, 16  ;;  %v13354_v0 = vld [vmem:[#allocation2 + $0x74] sm:$0x1] }
 0x1d5   : > { %17252 = vst [vmem:[#allocation34_spill] sm:$0xff] %v13315_v37  ;;  %11281 = vmatmul.msk.bf16.gmra.mxu1 %vm428_vm0, %v3329_v59  ;;  %v4367_v59 = vrot.slane %v4365_v34, 5  ;;  %v13350_v7 = vpack.c.b16 %v17255_v57, %v2295_v15  ;;  %v3089_v22 = vsel %vm12500_vm9, %v3084_v43, %v3088_v45  ;;  %v2874_v24 = vld [vmem:[#allocation2 + $0x6c] sm:$0xf]  ;;  %v4379_v18 = vshll.u32 %v13181_v5, 16 }
 0x1d6   : > { %v4746_v12 = vpack.c.b16 %v4715_v56, %v4714_v27  ;;  %v5050_v34 = vsel %vm12535_vm13, %v11495_v9, %v5049_v29  ;;  %v3100_v56 = vshll.u32 %v13327_v14, 16  ;;  %v12142_v29 = vld [vmem:[%s17188_s3 + $0x118] sm:$0xff]  ;;  %v3079_v15 = vsel %vm12500_vm9, %v3074_v4, %v13310_v50 }
 0x1d7   : > { %11338 = vmatmul.msk.bf16.gmra.mxu2 %vm428_vm0, %v3756_v13  ;;  %v4363_v13 = vrot.slane %v4362_v35, 4  ;;  %v3657_v14 = vrot.slane %v13354_v0, 5  ;;  %v4383_v63 = vshrl.u32 %v13181_v5, 16  ;;  %v5148_v27 = vunpack.c.l.b16 %v5050_v34  ;;  %5264 = vmatpush.bf16.msra.mxu1 %v12142_v29  ;;  %v13375_v9 = vld [vmem:[#allocation2 + $0x58] sm:$0xf] }
 0x1d8   : > { %v3306_v43 = vunpack.c.l.b16 %v3089_v22  ;;  %v11299_v57 = vrot.slane %v3540_v28, 9  ;;  %v3094_v35 = vshll.u32 %v2874_v24, 16  ;;  %v3106_v50 = vrot.slane %v3104_v26, 4  ;;  %v13387_v22 = vld [vmem:[#allocation2 + $0x5c] sm:$0x1] }
 0x1d9   : > { %v3658_v1 = vsel %vm12535_vm13, %v3656_v23, %v3657_v14  ;;  %v13383_v45 = vpack.c.b16 %v5149_v20, %v5148_v27  ;;  %v3305_v5 = vunpack.c.l.b16 %v3079_v15  ;;  %v4368_v28 = vsel %vm12500_vm9, %v4363_v13, %v4367_v59  ;;  %v12074_v20 = vld [vmem:[#allocation2 + $0xb4] sm:$0xff] }
 0x1da   : > { %v1854_v53 = vpop.f32.mrf.mxu1  ;;  %v2098_v4 = vpop.f32.mrf.mxu2  ;;  %v4375_v34 = vrot.slane %v4373_v39, 5  ;;  %v13391_v29 = vrot.slane %v4379_v18, 5  ;;  %v4385_v23 = vrot.slane %v4383_v63, 4  ;;  %v3734_v27 = vunpack.c.l.b16 %v3658_v1  ;;  %v13401_v18 = vld [vmem:[#allocation2 + $0x7c] sm:$0xf] }
 0x1db   : > { %v13352_v30 = vadd.f32 %v2095_v47, %v1854_v53  ;;  %11475 = vmatmul.msk.bf16.vlgmr.msra.gmra.mxu0 %vm428_vm0, %v4746_v12  ;;  %v4358_v47 = vsel %vm12500_vm9, %v4353_v55, %v13329_v25  ;;  %v3091_v25 = vshrl.u32 %v2874_v24, 16  ;;  %v13377_v53 = vpop.f32.mrf.mxu0  ;;  %v13381_v12 = vrot.slane %v3100_v56, 5 }
 0x1dc   : > { %17257 = vst [vmem:[#allocation37_spill] sm:$0xff] %v13377_v53  ;;  %v4372_v55 = vrot.slane %v4370_v51, 4  ;;  %v3655_v24 = vsel %vm12535_vm13, %v11299_v57, %v3654_v31  ;;  %v17201_v56 = vrot.slane %v13375_v9, 5  ;;  %v3330_v14 = vpack.c.b16 %v3306_v43, %v3305_v5  ;;  %v13411_v5 = vld [vmem:[#allocation2 + $0xc] sm:$0xe] }
 0x1dd   : > { %17256 = vst [vmem:[#allocation36_spill] sm:$0xff] %v13352_v30  ;;  %v3093_v15 = vrot.slane %v3091_v25, 4  ;;  %v3096_v53 = vrot.slane %v3094_v35, 5  ;;  %v3107_v59 = vor.u32 %v3106_v50, %v13381_v12  ;;  %v5059_v31 = vrot.slane %v13387_v22, 5 }
 0x1de   : > { %v5058_v51 = vrot.slane %v17201_v56, 4  ;;  %v3733_v39 = vunpack.c.l.b16 %v3655_v24  ;;  %v4717_v13 = vunpack.c.l.b16 %v4368_v28  ;;  %v4376_v63 = vor.u32 %v4375_v34, %v4372_v55  ;;  %v13413_v28 = vld [vmem:[#allocation2 + $0x10] sm:$0xf]  ;;  %v13418_v34 = vld [vmem:[#allocation2 + $0x14] sm:$0x1] }
 0x1df   : > { %v4389_v43 = vshll.u32 %v13195_v3, 16  ;;  %v4716_v57 = vunpack.c.l.b16 %v4358_v47  ;;  %v3110_v25 = vshll.u32 %v13354_v0, 16  ;;  %v3097_v50 = vor.u32 %v3096_v53, %v3093_v15  ;;  %v13416_v3 = vld [vmem:[#allocation2 + $0x18] sm:$0xe]  ;;  %v4960_v15 = vld [vmem:[#allocation2 + $0x54] sm:$0xe] }
 0x1e0   : > { %v13408_v35 = vsel %vm12535_vm13, %v5058_v51, %v5059_v31  ;;  %v3757_v1 = vpack.c.b16 %v3734_v27, %v3733_v39  ;;  %v3108_v47 = vrot.slane %v3107_v59, 4  ;;  %v3661_v24 = vrot.slane %v13401_v18, 5  ;;  %v13434_v0 = vld [vmem:[#allocation2 + $0x1c] sm:$0xf]  ;;  %v2877_v56 = vld [vmem:[#allocation2 + $0x78] sm:$0xf] }
 0x1e1   : > { %v13428_v27 = vrot.slane %v4389_v43, 5  ;;  %v3112_v31 = vrot.slane %v3110_v25, 5  ;;  %v11092_v59 = vrot.slane %v13411_v5, 9  ;;  %v17260_v43 = vrot.slane %v13413_v28, 5  ;;  %v3541_v5 = vld [vmem:[#allocation2 + $0x78] sm:$0xe] }
 0x1e2   : > { %v1857_v26 = vpop.f32.mrf.mxu1  ;;  %v2100_v53 = vpop.f32.mrf.mxu2  ;;  %v3663_v39 = vrot.slane %v3661_v24, 4  ;;  %v11496_v30 = vrot.slane %v4960_v15, 9  ;;  %v3128_v37 = vshrl.u32 %v13401_v18, 16 }
 0x1e3   : > { %v13394_v62 = vadd.f32 %v2098_v4, %v1857_v26  ;;  %11090 = vmatmul.msk.bf16.gmra.mxu3 %vm428_vm0, %v12074_v20  ;;  %v4386_v4 = vor.u32 %v4385_v23, %v13391_v29  ;;  %v4282_v26 = vld [vmem:[#allocation2 + $0x3c] sm:$0xf]  ;;  %v13422_v20 = vld [vmem:[#allocation2 + $0x20] sm:$0x1]  ;;  %v4747_v23 = vpack.c.b16 %v4717_v13, %v4716_v57  ;;  %v13430_v51 = vpop.f32.mrf.mxu0  ;;  %v2185_v57 = vrot.slane %v17260_v43, 4 }
 0x1e4   : > { %17259 = vst [vmem:[#allocation39_spill] sm:$0xff] %v13430_v51  ;;  %v13437_v13 = vld [vmem:[#allocation2 + $0x80] sm:$0x1]  ;;  %v3113_v25 = vsel %vm12500_vm9, %v3108_v47, %v3112_v31  ;;  %v4397_v43 = vshll.u32 %v4282_v26, 16  ;;  %v17262_v47 = vrot.slane %v13375_v9, 5  ;;  %v11300_v31 = vrot.slane %v3541_v5, 9 }
 0x1e5   : > { %17258 = vst [vmem:[#allocation38_spill] sm:$0xff] %v13394_v62  ;;  %11282 = vmatmul.msk.bf16.gmra.mxu1 %vm428_vm0, %v3330_v14  ;;  %v13426_v14 = vrot.slane %v4376_v63, 4  ;;  %v4387_v63 = vrot.slane %v4386_v4, 4  ;;  %v4394_v62 = vshrl.u32 %v4282_v26, 16  ;;  %v13448_v4 = vld [vmem:[#allocation2 + $0x64] sm:$0xf] }
 0x1e6   : > { %v5057_v15 = vsel %vm12535_vm13, %v11496_v30, %v17262_v47  ;;  %v5063_v26 = vrot.slane %v13448_v4, 5  ;;  %v3130_v54 = vrot.slane %v3128_v37, 4  ;;  %v13467_v30 = vld [vmem:[#allocation2 + $0x68] sm:$0x1]  ;;  %v3662_v5 = vsel %vm12535_vm13, %v11300_v31, %v3661_v24 }
 0x1e7   : > { %11339 = vmatmul.msk.bf16.gmra.mxu2 %vm428_vm0, %v3757_v1  ;;  %v3098_v1 = vrot.slane %v3097_v50, 4  ;;  %v3124_v50 = vshll.u32 %v13401_v18, 16  ;;  %v4392_v18 = vsel %vm12500_vm9, %v4387_v63, %v13428_v27  ;;  %v4396_v27 = vrot.slane %v4394_v62, 4 }
 0x1e8   : > { %v4399_v63 = vrot.slane %v4397_v43, 5  ;;  %v5066_v2 = vrot.slane %v13467_v30, 5  ;;  %v3735_v62 = vunpack.c.l.b16 %v3662_v5  ;;  %v2881_v43 = vld [vmem:[#allocation2 + $0x88] sm:$0xf]  ;;  %v17267_v31 = vrot.slane %v13413_v28, 5 }
 0x1e9   : > { %v13465_v60 = vrot.slane %v3124_v50, 5  ;;  %v3668_v28 = vrot.slane %v2881_v43, 5 }
 0x1ea   : > { %v1859_v55 = vpop.f32.mrf.mxu1 }
 0x1eb   : > { %v13441_v51 = vadd.f32 %v2100_v53, %v1859_v55  ;;  %11476 = vmatmul.msk.bf16.gmra.mxu0 %vm428_vm0, %v4747_v23  ;;  %v3103_v55 = vsel %vm12500_vm9, %v3098_v1, %v13381_v12  ;;  %v3664_v53 = vrot.slane %v13437_v13, 5  ;;  %v3308_v23 = vunpack.c.l.b16 %v3113_v25  ;;  %v13480_v24 = vpop.f32.mrf.mxu0 }
 0x1ec   : > { %v3115_v12 = vshrl.u32 %v2877_v56, 16  ;;  %v3118_v1 = vshll.u32 %v2877_v56, 16  ;;  %v3307_v46 = vunpack.c.l.b16 %v3103_v55  ;;  %v5150_v25 = vunpack.c.l.b16 %v5057_v15  ;;  %17265 = vst [vmem:[#allocation43_spill] sm:$0xff] %v13480_v24  ;;  %v4288_v24 = vld [vmem:[#allocation2 + $0x54] sm:$0xf] }
 0x1ed   : > { %17261 = vst [vmem:[#allocation40_spill] sm:$0xff] %v13441_v51  ;;  %v5151_v51 = vunpack.c.l.b16 %v13408_v35  ;;  %v3665_v11 = vsel %vm12535_vm13, %v3663_v39, %v3664_v53  ;;  %v4403_v35 = vshll.u32 %v13237_v58, 16  ;;  %v4407_v53 = vshrl.u32 %v13237_v58, 16 }
 0x1ee   : > { %v3331_v39 = vpack.c.b16 %v3308_v23, %v3307_v46  ;;  %v3736_v56 = vunpack.c.l.b16 %v3665_v11  ;;  %v3117_v50 = vrot.slane %v3115_v12, 4  ;;  %v3120_v37 = vrot.slane %v3118_v1, 5 }
 0x1ef   : > { %v13475_v55 = vpack.c.b16 %v5151_v51, %v5150_v25  ;;  %v5065_v15 = vrot.slane %v5063_v26, 4  ;;  %v4382_v46 = vsel %vm12500_vm9, %v13426_v14, %v13391_v29  ;;  %v17266_v11 = vrot.slane %v13418_v34, 5 }
 0x1f0   : > { %v3131_v51 = vor.u32 %v3130_v54, %v13465_v60  ;;  %v4719_v23 = vunpack.c.l.b16 %v4392_v18  ;;  %v17268_v12 = vrot.slane %v13434_v0, 5  ;;  %v3758_v34 = vpack.c.b16 %v3736_v56, %v3735_v62 }
 0x1f1   : > { %17264 = vst [vmem:[#allocation42_spill] sm:$0xff] %v13475_v55  ;;  %v2187_v58 = vsel %vm12535_vm13, %v2185_v57, %v17266_v11  ;;  %v5067_v29 = vsel %vm12535_vm13, %v5065_v15, %v5066_v2  ;;  %v3134_v14 = vshll.u32 %v13437_v13, 16  ;;  %v13503_v57 = vrot.slane %v4403_v35, 5  ;;  %v4961_v11 = vld [vmem:[#allocation2 + $0x60] sm:$0xe] }
 0x1f2   : > { %v13472_v47 = vpop.f32.mrf.mxu1  ;;  %v2192_v1 = vrot.slane %v17268_v12, 4  ;;  %v4409_v54 = vrot.slane %v4407_v53, 4  ;;  %v2298_v18 = vunpack.c.l.b16 %v2187_v58  ;;  %v3121_v5 = vor.u32 %v3120_v37, %v3117_v50  ;;  %v13528_v58 = vld [vmem:[#allocation2 + $0x8c] sm:$0x1] }
 0x1f3   : > { %17263 = vst [vmem:[#allocation41_spill] sm:$0xff] %v13472_v47  ;;  %11131 = vmatmul.msk.bf16.vlgmr.msrb.gmra.mxu3 %vm428_vm0, %v13350_v7  ;;  %v2184_v7 = vsel %vm12535_vm13, %v11092_v59, %v17267_v31  ;;  %v13507_v59 = vld [vmem:[#allocation2 + $0x2c] sm:$0x1]  ;;  %v4718_v2 = vunpack.c.l.b16 %v4382_v46  ;;  %v3132_v56 = vrot.slane %v3131_v51, 4  ;;  %v4413_v13 = vshll.u32 %v13243_v8, 16 }
 0x1f4   : > { %v2297_v15 = vunpack.c.l.b16 %v2184_v7  ;;  %v17269_v35 = vmov %v17268_v12  ;;  %v17270_v53 = vrot.slane %v13416_v3, 9  ;;  %v3136_v46 = vrot.slane %v3134_v14, 5  ;;  %v3542_v8 = vld [vmem:[#allocation2 + $0x84] sm:$0xe]  ;;  %v13557_v31 = vld [vmem:[#allocation2 + $0x70] sm:$0xf] }
 0x1f5   : > { %11283 = vmatmul.msk.bf16.gmra.mxu1 %vm428_vm0, %v3331_v39  ;;  %v4400_v39 = vor.u32 %v4399_v63, %v4396_v27  ;;  %v17271_v27 = vrot.slane %v13422_v20, 5  ;;  %v4748_v62 = vpack.c.b16 %v4719_v23, %v4718_v2  ;;  %v4410_v0 = vor.u32 %v4409_v54, %v13503_v57  ;;  %v13539_v2 = vpop.f32.mrf.mxu0 }
 0x1f6   : > { %v13505_v25 = vpop.f32.mrf.mxu3  ;;  %v13518_v50 = vsel %vm12535_vm13, %v17270_v53, %v17269_v35  ;;  %v11497_v3 = vrot.slane %v4961_v11, 9  ;;  %v2328_v51 = vpack.c.b16 %v2298_v18, %v2297_v15  ;;  %v3122_v7 = vrot.slane %v3121_v5, 4  ;;  %v2880_v18 = vld [vmem:[#allocation2 + $0x84] sm:$0xf]  ;;  %17273 = vst [vmem:[#allocation45_spill] sm:$0xff] %v13539_v2 }
 0x1f7   : > { %11340 = vmatmul.msk.bf16.gmra.mxu2 %vm428_vm0, %v3758_v34  ;;  %v13524_v63 = vsel %vm12535_vm13, %v2192_v1, %v17271_v27  ;;  %v3670_v12 = vrot.slane %v3668_v28, 4  ;;  %v4401_v34 = vrot.slane %v4400_v39, 4  ;;  %v3137_v20 = vsel %vm12500_vm9, %v3132_v56, %v3136_v46 }
 0x1f8   : > { %v3148_v1 = vshll.u32 %v2881_v43, 16  ;;  %v3152_v35 = vshrl.u32 %v2881_v43, 16  ;;  %v5064_v23 = vsel %vm12535_vm13, %v11497_v3, %v5063_v26  ;;  %v11301_v14 = vrot.slane %v3542_v8, 9 }
 0x1f9   : > { %v3671_v54 = vrot.slane %v13528_v58, 5  ;;  %v4415_v11 = vrot.slane %v4413_v13, 5  ;;  %v5153_v5 = vunpack.c.l.b16 %v5067_v29  ;;  %v3127_v39 = vsel %vm12500_vm9, %v3122_v7, %v13465_v60  ;;  %v4285_v13 = vld [vmem:[#allocation2 + $0x48] sm:$0xf] }
 0x1fa   : > { %v13526_v37 = vpop.f32.mrf.mxu1  ;;  %v4411_v56 = vrot.slane %v4410_v0, 4  ;;  %v4427_v43 = vshll.u32 %v13306_v36, 16  ;;  %v4431_v15 = vshrl.u32 %v13306_v36, 16  ;;  %v3310_v26 = vunpack.c.l.b16 %v3137_v20  ;;  %v12303_v7 = vld [vmem:[#allocation2 + $0x28] sm:$0xf] }
 0x1fb   : > { %17272 = vst [vmem:[#allocation44_spill] sm:$0xff] %v13526_v37  ;;  %11477 = vmatmul.msk.bf16.gmra.mxu0 %vm428_vm0, %v4748_v62  ;;  %v3669_v27 = vsel %vm12535_vm13, %v11301_v14, %v3668_v28  ;;  %v3672_v29 = vsel %vm12535_vm13, %v3670_v12, %v3671_v54  ;;  %v5152_v62 = vunpack.c.l.b16 %v5064_v23  ;;  %v3139_v46 = vshrl.u32 %v2880_v18, 16  ;;  %v2883_v37 = vld [vmem:[#allocation2 + $0x90] sm:$0xf] }
 0x1fc   : > { %v3142_v8 = vshll.u32 %v2880_v18, 16  ;;  %v13552_v3 = vrot.slane %v3148_v1, 5  ;;  %v3154_v60 = vrot.slane %v3152_v35, 4  ;;  %v3309_v0 = vunpack.c.l.b16 %v3127_v39  ;;  %v2126_v35 = vld [vmem:[#allocation2 + $0x24] sm:$0xe] }
 0x1fd   : > { %v4406_v36 = vsel %vm12500_vm9, %v4401_v34, %v13503_v57  ;;  %v2197_v20 = vrot.slane %v12303_v7, 5  ;;  %v13559_v28 = vpack.c.b16 %v5153_v5, %v5152_v62  ;;  %v3738_v12 = vunpack.c.l.b16 %v3672_v29  ;;  %v13569_v62 = vld [vmem:[#allocation2 + $0x94] sm:$0xf]  ;;  %v13582_v29 = vpop.f32.mrf.mxu0 }
 0x1fe   : > { %v13546_v53 = vpop.f32.mrf.mxu3  ;;  %v4416_v23 = vsel %vm12500_vm9, %v4411_v56, %v4415_v11  ;;  %v4418_v1 = vshrl.u32 %v4285_v13, 16  ;;  %v4421_v54 = vshll.u32 %v4285_v13, 16  ;;  %v3332_v18 = vpack.c.b16 %v3310_v26, %v3309_v0  ;;  %17276 = vst [vmem:[#allocation48_spill] sm:$0xff] %v13582_v29 }
 0x1ff   : > { %17274 = vst [vmem:[#allocation46_spill] sm:$0xff] %v13559_v28  ;;  %v3737_v39 = vunpack.c.l.b16 %v3669_v27  ;;  %v13565_v2 = vrot.slane %v4427_v43, 5  ;;  %v4433_v57 = vrot.slane %v4431_v15, 4  ;;  %v3141_v34 = vrot.slane %v3139_v46, 4  ;;  %v13575_v27 = vld [vmem:[#allocation2 + $0x74] sm:$0x1] }
 0x200   : > { %v3144_v7 = vrot.slane %v3142_v8, 5  ;;  %v3155_v5 = vor.u32 %v3154_v60, %v13552_v3  ;;  %v4721_v11 = vunpack.c.l.b16 %v4416_v23  ;;  %v2300_v56 = vunpack.c.l.b16 %v13524_v63 }
 0x201   : > { %v3158_v26 = vshll.u32 %v13528_v58, 16  ;;  %v11094_v43 = vrot.slane %v2126_v35, 9  ;;  %v3759_v15 = vpack.c.b16 %v3738_v12, %v3737_v39  ;;  %v4420_v13 = vrot.slane %v4418_v1, 4 }
 0x202   : > { %v13561_v14 = vpop.f32.mrf.mxu1  ;;  %v4423_v46 = vrot.slane %v4421_v54, 5  ;;  %v4720_v60 = vunpack.c.l.b16 %v4406_v36  ;;  %v3675_v0 = vrot.slane %v13569_v62, 5  ;;  %v2199_v23 = vrot.slane %v2197_v20, 4 }
 0x203   : > { %17275 = vst [vmem:[#allocation47_spill] sm:$0xff] %v13561_v14  ;;  %11132 = vmatmul.msk.bf16.gmra.mxu3 %vm428_vm0, %v2328_v51  ;;  %v2299_v51 = vunpack.c.l.b16 %v13518_v50  ;;  %v3145_v63 = vor.u32 %v3144_v7, %v3141_v34  ;;  %v3156_v58 = vrot.slane %v3155_v5, 4  ;;  %v17277_v12 = vrot.slane %v13557_v31, 5 }
 0x204   : > { %v5073_v50 = vrot.slane %v13575_v27, 5  ;;  %v4749_v1 = vpack.c.b16 %v4721_v11, %v4720_v60  ;;  %v3160_v39 = vrot.slane %v3158_v26, 5  ;;  %v4437_v36 = vshll.u32 %v13319_v21, 16 }
 0x205   : > { %11284 = vmatmul.msk.bf16.gmra.mxu1 %vm428_vm0, %v3332_v18  ;;  %v4434_v18 = vor.u32 %v4433_v57, %v13565_v2  ;;  %v5072_v35 = vrot.slane %v17277_v12, 4  ;;  %v2329_v54 = vpack.c.b16 %v2300_v56, %v2299_v51  ;;  %v13591_v57 = vld [vmem:[#allocation2 + $0x98] sm:$0x1]  ;;  %v4424_v29 = vor.u32 %v4423_v46, %v4420_v13  ;;  %v3543_v13 = vld [vmem:[#allocation2 + $0x90] sm:$0xe] }
 0x206   : > { %v13578_v8 = vpop.f32.mrf.mxu3  ;;  %v3172_v34 = vshll.u32 %v13569_v62, 16  ;;  %v3176_v7 = vshrl.u32 %v13569_v62, 16  ;;  %v3677_v11 = vrot.slane %v3675_v0, 4  ;;  %v13601_v21 = vsel %vm12535_vm13, %v11094_v43, %v2197_v20 }
 0x207   : > { %11341 = vmatmul.msk.bf16.gmra.mxu2 %vm428_vm0, %v3759_v15  ;;  %v13597_v5 = vsel %vm12535_vm13, %v5072_v35, %v5073_v50  ;;  %v4435_v56 = vrot.slane %v4434_v18, 4  ;;  %v17279_v26 = vrot.slane %v13507_v59, 5  ;;  %v3146_v51 = vrot.slane %v3145_v63, 4 }
 0x208   : > { %v3161_v62 = vsel %vm12500_vm9, %v3156_v58, %v3160_v39  ;;  %v4442_v46 = vshrl.u32 %v4288_v24, 16  ;;  %v4445_v60 = vshll.u32 %v4288_v24, 16  ;;  %v3678_v18 = vrot.slane %v13591_v57, 5 }
 0x209   : > { %v2201_v15 = vsel %vm12535_vm13, %v2199_v23, %v17279_v26  ;;  %v4439_v12 = vrot.slane %v4437_v36, 5  ;;  %v3163_v35 = vshrl.u32 %v2883_v37, 16  ;;  %v3166_v20 = vshll.u32 %v2883_v37, 16 }
 0x20a   : > { %v13589_v14 = vpop.f32.mrf.mxu1  ;;  %v3151_v59 = vsel %vm12500_vm9, %v3146_v51, %v13552_v3  ;;  %v4425_v43 = vrot.slane %v4424_v29, 4  ;;  %v13614_v23 = vrot.slane %v3172_v34, 5  ;;  %v3178_v50 = vrot.slane %v3176_v7, 4  ;;  %v4962_v29 = vld [vmem:[#allocation2 + $0x6c] sm:$0xe]  ;;  %v13624_v34 = vpop.f32.mrf.mxu2 }
 0x20b   : > { %17278 = vst [vmem:[#allocation49_spill] sm:$0xff] %v13589_v14  ;;  %11478 = vmatmul.msk.bf16.gmra.mxu0 %vm428_vm0, %v4749_v1  ;;  %v3312_v1 = vunpack.c.l.b16 %v3161_v62  ;;  %v11302_v58 = vrot.slane %v3543_v13, 9  ;;  %v3679_v24 = vsel %vm12535_vm13, %v3677_v11, %v3678_v18  ;;  %v4440_v39 = vsel %vm12500_vm9, %v4435_v56, %v4439_v12  ;;  %v13628_v14 = vpop.f32.mrf.mxu0 }
 0x20c   : > { %v4444_v36 = vrot.slane %v4442_v46, 4  ;;  %v4447_v37 = vrot.slane %v4445_v60, 5  ;;  %v4451_v26 = vshll.u32 %v13375_v9, 16  ;;  %v4455_v3 = vshrl.u32 %v13375_v9, 16  ;;  %17280 = vst [vmem:[#allocation50_spill] sm:$0xff] %v13624_v34 }
 0x20d   : > { %v3311_v7 = vunpack.c.l.b16 %v3151_v59  ;;  %v3676_v51 = vsel %vm12535_vm13, %v11302_v58, %v3675_v0  ;;  %v3165_v62 = vrot.slane %v3163_v35, 4  ;;  %v3168_v13 = vrot.slane %v3166_v20, 5  ;;  %17281 = vst [vmem:[#allocation51_spill] sm:$0xff] %v13628_v14 }
 0x20e   : > { %v13616_v63 = vpop.f32.mrf.mxu3  ;;  %v3740_v56 = vunpack.c.l.b16 %v3679_v24  ;;  %v4430_v46 = vsel %vm12500_vm9, %v4425_v43, %v13565_v2  ;;  %v2301_v9 = vunpack.c.l.b16 %v13601_v21  ;;  %v3179_v60 = vor.u32 %v3178_v50, %v13614_v23  ;;  %v13641_v24 = vld [vmem:[#allocation2 + $0x30] sm:$0xe]  ;;  %v2887_v43 = vld [vmem:[#allocation2 + $0xa0] sm:$0xf] }
 0x20f   : > { %v3333_v18 = vpack.c.b16 %v3312_v1, %v3311_v7  ;;  %v4723_v12 = vunpack.c.l.b16 %v4440_v39  ;;  %v2302_v59 = vunpack.c.l.b16 %v2201_v15  ;;  %v11498_v34 = vrot.slane %v4962_v29, 9  ;;  %v12133_v15 = vld [vmem:[%s17188_s3 + $0xd0] sm:$0xff]  ;;  %v13653_v29 = vld [vmem:[#allocation2 + $0x7c] sm:$0xf] }
 0x210   : > { %v3739_v0 = vunpack.c.l.b16 %v3676_v51  ;;  %v3182_v35 = vshll.u32 %v13591_v57, 16  ;;  %v13639_v20 = vrot.slane %v4451_v26, 5  ;;  %v4457_v58 = vrot.slane %v4455_v3, 4  ;;  %v13651_v26 = vld [vmem:[#allocation2 + $0xa4] sm:$0x1]  ;;  %4157 = vmatpush.bf16.msra.mxu3 %v12133_v15 }
 0x211   : > { %v4722_v2 = vunpack.c.l.b16 %v4430_v46  ;;  %v3169_v21 = vor.u32 %v3168_v13, %v3165_v62  ;;  %v4448_v50 = vor.u32 %v4447_v37, %v4444_v36  ;;  %v3180_v39 = vrot.slane %v3179_v60, 4  ;;  %v3544_v62 = vld [vmem:[#allocation2 + $0x9c] sm:$0xe]  ;;  %v13661_v46 = vld [vmem:[#allocation2 + $0x34] sm:$0xf] }
 0x212   : > { %v13630_v11 = vpop.f32.mrf.mxu1  ;;  %v3760_v1 = vpack.c.b16 %v3740_v56, %v3739_v0  ;;  %v3682_v3 = vrot.slane %v2887_v43, 5  ;;  %v5155_v7 = vunpack.c.l.b16 %v13597_v5  ;;  %v13658_v37 = vpack.c.b16 %v2302_v59, %v2301_v9 }
 0x213   : > { %17282 = vst [vmem:[#allocation52_spill] sm:$0xff] %v13630_v11  ;;  %11133 = vmatmul.msk.bf16.gmra.mxu3 %vm428_vm0, %v2329_v54  ;;  %v17283_v54 = vrot.slane %v13557_v31, 5  ;;  %v4750_v36 = vpack.c.b16 %v4723_v12, %v4722_v2  ;;  %v3184_v56 = vrot.slane %v3182_v35, 5  ;;  %v4458_v60 = vor.u32 %v4457_v58, %v13639_v20  ;;  %v4963_v2 = vld [vmem:[#allocation2 + $0x78] sm:$0xe]  ;;  %v13675_v58 = vpop.f32.mrf.mxu2 }
 0x214   : > { %v4461_v5 = vshll.u32 %v13387_v22, 16  ;;  %v3170_v12 = vrot.slane %v3169_v21, 4  ;;  %v3685_v9 = vrot.slane %v13651_v26, 5  ;;  %v4449_v59 = vrot.slane %v4448_v50, 4  ;;  %17286 = vst [vmem:[#allocation55_spill] sm:$0xff] %v13675_v58  ;;  %v13679_v50 = vpop.f32.mrf.mxu0 }
 0x215   : > { %11285 = vmatmul.msk.bf16.gmra.mxu1 %vm428_vm0, %v3333_v18  ;;  %v5071_v57 = vsel %vm12535_vm13, %v11498_v34, %v17283_v54  ;;  %v2886_v18 = vld [vmem:[#allocation2 + $0x9c] sm:$0xf]  ;;  %v5077_v54 = vrot.slane %v13653_v29, 5  ;;  %v3185_v15 = vsel %vm12500_vm9, %v3180_v39, %v3184_v56  ;;  %v3684_v35 = vrot.slane %v3682_v3, 4  ;;  %v13677_v11 = vld [vmem:[#allocation2 + $0x80] sm:$0x1] }
 0x216   : > { %v13656_v51 = vpop.f32.mrf.mxu3  ;;  %v5154_v0 = vunpack.c.l.b16 %v5071_v57  ;;  %v3187_v22 = vshrl.u32 %v2886_v18, 16  ;;  %v3190_v57 = vshll.u32 %v2886_v18, 16  ;;  %v3196_v21 = vshll.u32 %v2887_v43, 16  ;;  %17287 = vst [vmem:[#allocation56_spill] sm:$0xff] %v13679_v50  ;;  %v4291_v18 = vld [vmem:[#allocation2 + $0x60] sm:$0xf] }
 0x217   : > { %11342 = vmatmul.msk.bf16.gmra.mxu2 %vm428_vm0, %v3760_v1  ;;  %v11303_v1 = vrot.slane %v3544_v62, 9  ;;  %v3200_v14 = vshrl.u32 %v2887_v43, 16  ;;  %v4463_v47 = vrot.slane %v4461_v5, 5  ;;  %v4475_v39 = vshll.u32 %v13448_v4, 16 }
 0x218   : > { %v13673_v34 = vpack.c.b16 %v5155_v7, %v5154_v0  ;;  %v12141_v7 = vld [vmem:[%s17188_s3 + $0x110] sm:$0xff]  ;;  %v11499_v62 = vrot.slane %v4963_v2, 9  ;;  %v3175_v56 = vsel %vm12500_vm9, %v3170_v12, %v13614_v23  ;;  %v3314_v43 = vunpack.c.l.b16 %v3185_v15 }
 0x219   : > { %v4479_v0 = vshrl.u32 %v13448_v4, 16  ;;  %v5079_v50 = vrot.slane %v5077_v54, 4  ;;  %5265 = vmatpush.bf16.msra.mxu1 %v12141_v7  ;;  %v5080_v2 = vrot.slane %v13677_v11, 5  ;;  %v3189_v23 = vrot.slane %v3187_v22, 4 }
 0x21a   : > { %v13669_v13 = vpop.f32.mrf.mxu1  ;;  %17285 = vst [vmem:[#allocation54_spill] sm:$0xff] %v13673_v34  ;;  %v5078_v5 = vsel %vm12535_vm13, %v11499_v62, %v5077_v54  ;;  %v3192_v12 = vrot.slane %v3190_v57, 5  ;;  %v13699_v15 = vrot.slane %v3196_v21, 5  ;;  %v3202_v4 = vrot.slane %v3200_v14, 4 }
 0x21b   : > { %17284 = vst [vmem:[#allocation53_spill] sm:$0xff] %v13669_v13  ;;  %11479 = vmatmul.msk.bf16.gmra.mxu0 %vm428_vm0, %v4750_v36  ;;  %v4459_v13 = vrot.slane %v4458_v60, 4  ;;  %v3683_v36 = vsel %vm12535_vm13, %v11303_v1, %v3682_v3  ;;  %v3686_v60 = vsel %vm12535_vm13, %v3684_v35, %v3685_v9  ;;  %v4454_v3 = vsel %vm12500_vm9, %v4449_v59, %v13639_v20 }
 0x21c   : > { %v4466_v1 = vshrl.u32 %v4291_v18, 16  ;;  %v4469_v35 = vshll.u32 %v4291_v18, 16  ;;  %v3313_v7 = vunpack.c.l.b16 %v3175_v56  ;;  %v13706_v54 = vrot.slane %v4475_v39, 5 }
 0x21d   : > { %v4464_v9 = vsel %vm12500_vm9, %v4459_v13, %v4463_v47  ;;  %v4481_v62 = vrot.slane %v4479_v0, 4  ;;  %v5081_v22 = vsel %vm12535_vm13, %v5079_v50, %v5080_v2  ;;  %v3741_v21 = vunpack.c.l.b16 %v3683_v36  ;;  %v12305_v13 = vld [vmem:[#allocation2 + $0x38] sm:$0x1]  ;;  %v12306_v2 = vld [vmem:[#allocation2 + $0x40] sm:$0xf] }
 0x21e   : > { %v13697_v58 = vpop.f32.mrf.mxu3  ;;  %v3742_v14 = vunpack.c.l.b16 %v3686_v60  ;;  %v5156_v34 = vunpack.c.l.b16 %v5078_v5  ;;  %v5157_v28 = vunpack.c.l.b16 %v5081_v22  ;;  %v3334_v41 = vpack.c.b16 %v3314_v43, %v3313_v7  ;;  %v13728_v60 = vpop.f32.mrf.mxu2 }
 0x21f   : > { %v3193_v20 = vor.u32 %v3192_v12, %v3189_v23  ;;  %v3203_v59 = vor.u32 %v3202_v4, %v13699_v15  ;;  %v3206_v47 = vshll.u32 %v13651_v26, 16  ;;  %v2207_v56 = vrot.slane %v12305_v13, 5  ;;  %17293 = vst [vmem:[#allocation59_spill] sm:$0xff] %v13728_v60  ;;  %v13731_v12 = vpop.f32.mrf.mxu0  ;;  %v2890_v4 = vld [vmem:[#allocation2 + $0xac] sm:$0xf] }
 0x220   : > { %v17289_v39 = vrot.slane %v13661_v46, 5  ;;  %v17290_v50 = vrot.slane %v13641_v24, 9  ;;  %v13726_v36 = vpack.c.b16 %v5157_v28, %v5156_v34  ;;  %v4724_v26 = vunpack.c.l.b16 %v4454_v3  ;;  %17294 = vst [vmem:[#allocation60_spill] sm:$0xff] %v13731_v12  ;;  %v2128_v28 = vld [vmem:[#allocation2 + $0x3c] sm:$0xe] }
 0x221   : > { %v4725_v5 = vunpack.c.l.b16 %v4464_v9  ;;  %v2211_v23 = vrot.slane %v12306_v2, 5  ;;  %v3761_v24 = vpack.c.b16 %v3742_v14, %v3741_v21  ;;  %v4471_v7 = vrot.slane %v4469_v35, 5  ;;  %v13737_v3 = vld [vmem:[#allocation2 + $0xb0] sm:$0x1] }
 0x222   : > { %v13710_v57 = vpop.f32.mrf.mxu1  ;;  %v13722_v18 = vsel %vm12535_vm13, %v17290_v50, %v17289_v39  ;;  %v17291_v43 = vmov %v17289_v39  ;;  %17292 = vst [vmem:[#allocation58_spill] sm:$0xff] %v13726_v36  ;;  %v4482_v22 = vor.u32 %v4481_v62, %v13706_v54  ;;  %v4485_v46 = vshll.u32 %v13467_v30, 16  ;;  %v3545_v30 = vld [vmem:[#allocation2 + $0xa8] sm:$0xe] }
 0x223   : > { %17288 = vst [vmem:[#allocation57_spill] sm:$0xff] %v13710_v57  ;;  %11134 = vmatmul.msk.bf16.gmra.mxu3 %vm428_vm0, %v13658_v37  ;;  %v2206_v0 = vrot.slane %v17291_v43, 4  ;;  %v4468_v37 = vrot.slane %v4466_v1, 4  ;;  %v3194_v13 = vrot.slane %v3193_v20, 4  ;;  %v3204_v39 = vrot.slane %v3203_v59, 4 }
 0x224   : > { %v3689_v9 = vrot.slane %v2890_v4, 5  ;;  %v12307_v1 = vld [vmem:[#allocation2 + $0x44] sm:$0x1]  ;;  %v13739_v43 = vld [vmem:[#allocation2 + $0x50] sm:$0x1]  ;;  %v2303_v35 = vunpack.c.l.b16 %v13722_v18  ;;  %v4751_v62 = vpack.c.b16 %v4725_v5, %v4724_v26  ;;  %v11096_v20 = vrot.slane %v2128_v28, 9 }
 0x225   : > { %11286 = vmatmul.msk.bf16.gmra.mxu1 %vm428_vm0, %v3334_v41  ;;  %v3208_v41 = vrot.slane %v3206_v47, 5  ;;  %v2214_v50 = vrot.slane %v12307_v1, 5  ;;  %v2208_v14 = vsel %vm12535_vm13, %v2206_v0, %v2207_v56  ;;  %v2213_v59 = vrot.slane %v2211_v23, 4  ;;  %v2889_v47 = vld [vmem:[#allocation2 + $0xa8] sm:$0xf] }
 0x226   : > { %v13735_v34 = vpop.f32.mrf.mxu3  ;;  %v3692_v1 = vrot.slane %v13737_v3, 5  ;;  %v4472_v12 = vor.u32 %v4471_v7, %v4468_v37  ;;  %v4483_v57 = vrot.slane %v4482_v22, 4  ;;  %v4487_v60 = vrot.slane %v4485_v46, 5  ;;  %v13759_v22 = vld [vmem:[#allocation2 + $0x4c] sm:$0xf] }
 0x227   : > { %11343 = vmatmul.msk.bf16.gmra.mxu2 %vm428_vm0, %v3761_v24  ;;  %v3199_v24 = vsel %vm12500_vm9, %v3194_v13, %v13699_v15  ;;  %v3209_v18 = vsel %vm12500_vm9, %v3204_v39, %v3208_v41  ;;  %v11304_v26 = vrot.slane %v3545_v30, 9  ;;  %v3691_v5 = vrot.slane %v3689_v9, 4 }
 0x228   : > { %v3211_v56 = vshrl.u32 %v2889_v47, 16  ;;  %v3214_v0 = vshll.u32 %v2889_v47, 16  ;;  %v3220_v28 = vshll.u32 %v2890_v4, 16  ;;  %v3224_v21 = vshrl.u32 %v2890_v4, 16  ;;  %v13766_v4 = vpop.f32.mrf.mxu2 }
 0x229   : > { %v2212_v37 = vsel %vm12535_vm13, %v11096_v20, %v2211_v23  ;;  %v2215_v7 = vsel %vm12535_vm13, %v2213_v59, %v2214_v50  ;;  %v17202_v15 = vrot.slane %v13759_v22, 5  ;;  %v4473_v46 = vrot.slane %v4472_v12, 4  ;;  %17296 = vst [vmem:[#allocation62_spill] sm:$0xff] %v13766_v4  ;;  %v4294_v12 = vld [vmem:[#allocation2 + $0x6c] sm:$0xf]  ;;  %v13774_v20 = vpop.f32.mrf.mxu0 }
 0x22a   : > { %v13746_v2 = vpop.f32.mrf.mxu1  ;;  %v4488_v13 = vsel %vm12500_vm9, %v4483_v57, %v4487_v60  ;;  %v4499_v39 = vshll.u32 %v13557_v31, 16  ;;  %v4503_v41 = vshrl.u32 %v13557_v31, 16  ;;  %v3315_v23 = vunpack.c.l.b16 %v3199_v24  ;;  %17297 = vst [vmem:[#allocation63_spill] sm:$0xff] %v13774_v20 }
 0x22b   : > { %17295 = vst [vmem:[#allocation61_spill] sm:$0xff] %v13746_v2  ;;  %11480 = vmatmul.msk.bf16.gmra.mxu0 %vm428_vm0, %v4751_v62  ;;  %v2304_v2 = vunpack.c.l.b16 %v2208_v14  ;;  %v3316_v62 = vunpack.c.l.b16 %v3209_v18  ;;  %v3690_v50 = vsel %vm12535_vm13, %v11304_v26, %v3689_v9  ;;  %v3693_v14 = vsel %vm12535_vm13, %v3691_v5, %v3692_v1 }
 0x22c   : > { %v3213_v57 = vrot.slane %v3211_v56, 4  ;;  %v3216_v60 = vrot.slane %v3214_v0, 5  ;;  %v13776_v59 = vrot.slane %v3220_v28, 5  ;;  %v3226_v31 = vrot.slane %v3224_v21, 4  ;;  %v13785_v56 = vld [vmem:[#allocation2 + $0x48] sm:$0xe] }
 0x22d   : > { %v2331_v47 = vpack.c.b16 %v2304_v2, %v2303_v35  ;;  %v4478_v24 = vsel %vm12500_vm9, %v4473_v46, %v13706_v54  ;;  %v2306_v18 = vunpack.c.l.b16 %v2215_v7  ;;  %v2220_v9 = vrot.slane %v17202_v15, 4 }
 0x22e   : > { %v13768_v30 = vpop.f32.mrf.mxu3  ;;  %v3743_v1 = vunpack.c.l.b16 %v3690_v50  ;;  %v3744_v5 = vunpack.c.l.b16 %v3693_v14  ;;  %v4490_v4 = vshrl.u32 %v4294_v12, 16  ;;  %v4493_v20 = vshll.u32 %v4294_v12, 16 }
 0x22f   : > { %v3335_v0 = vpack.c.b16 %v3316_v62, %v3315_v23  ;;  %v4727_v28 = vunpack.c.l.b16 %v4488_v13  ;;  %v2305_v21 = vunpack.c.l.b16 %v2212_v37  ;;  %v3230_v35 = vshll.u32 %v13737_v3, 16  ;;  %v2893_v13 = vld [vmem:[#allocation2 + $0xb8] sm:$0xf] }
 0x230   : > { %v3217_v54 = vor.u32 %v3216_v60, %v3213_v57  ;;  %v3227_v2 = vor.u32 %v3226_v31, %v13776_v59  ;;  %v13790_v7 = vrot.slane %v4499_v39, 5  ;;  %v4505_v46 = vrot.slane %v4503_v41, 4  ;;  %v2892_v39 = vld [vmem:[#allocation2 + $0xb4] sm:$0xf] }
 0x231   : > { %v4726_v50 = vunpack.c.l.b16 %v4478_v24  ;;  %v13793_v14 = vpack.c.b16 %v2306_v18, %v2305_v21  ;;  %v11097_v12 = vrot.slane %v13785_v56, 9  ;;  %v3762_v23 = vpack.c.b16 %v3744_v5, %v3743_v1  ;;  %v4297_v18 = vld [vmem:[#allocation2 + $0x78] sm:$0xf]  ;;  %v3546_v1 = vld [vmem:[#allocation2 + $0xb4] sm:$0xe]  ;;  %v13808_v5 = vpop.f32.mrf.mxu2 }
 0x232   : > { %v13783_v26 = vpop.f32.mrf.mxu1  ;;  %v4492_v37 = vrot.slane %v4490_v4, 4  ;;  %v4495_v62 = vrot.slane %v4493_v20, 5  ;;  %v17299_v3 = vrot.slane %v13739_v43, 5  ;;  %v3232_v31 = vrot.slane %v3230_v35, 5  ;;  %v2894_v43 = vld [vmem:[#allocation2 + $0xbc] sm:$0x1] }
 0x233   : > { %17298 = vst [vmem:[#allocation64_spill] sm:$0xff] %v13783_v26  ;;  %11135 = vmatmul.msk.bf16.gmra.mxu3 %vm428_vm0, %v2331_v47  ;;  %v4752_v41 = vpack.c.b16 %v4727_v28, %v4726_v50  ;;  %v3696_v47 = vrot.slane %v2893_v13, 5  ;;  %v4509_v24 = vshll.u32 %v13575_v27, 16  ;;  %v3218_v4 = vrot.slane %v3217_v54, 4  ;;  %v13810_v50 = vpop.f32.mrf.mxu0 }
 0x234   : > { %v13800_v57 = vsel %vm12535_vm13, %v2220_v9, %v17299_v3  ;;  %v3228_v20 = vrot.slane %v3227_v2, 4  ;;  %v4506_v9 = vor.u32 %v4505_v46, %v13790_v7  ;;  %17301 = vst [vmem:[#allocation66_spill] sm:$0xff] %v13808_v5  ;;  %v3238_v28 = vshll.u32 %v2892_v39, 16 }
 0x235   : > { %11287 = vmatmul.msk.bf16.gmra.mxu1 %vm428_vm0, %v3335_v0  ;;  %v3235_v0 = vshrl.u32 %v2892_v39, 16  ;;  %v3244_v21 = vshll.u32 %v2893_v13, 16  ;;  %v3248_v35 = vshrl.u32 %v2893_v13, 16  ;;  %17302 = vst [vmem:[#allocation67_spill] sm:$0xff] %v13810_v50  ;;  %v4517_v3 = vshll.u32 %v4297_v18, 16 }
 0x236   : > { %v2103_v60 = vpop.f32.mrf.mxu3  ;;  %v4527_v54 = vshrl.u32 %v13653_v29, 16  ;;  %v11305_v2 = vrot.slane %v3546_v1, 9  ;;  %v3699_v15 = vrot.slane %v2894_v43, 5  ;;  %v4496_v46 = vor.u32 %v4495_v62, %v4492_v37 }
 0x237   : > { %v13804_v56 = vadd.f32 %v2103_v60, %v13505_v25  ;;  %11344 = vmatmul.msk.bf16.gmra.mxu2 %vm428_vm0, %v3762_v23  ;;  %v4514_v25 = vshrl.u32 %v4297_v18, 16  ;;  %v4523_v23 = vshll.u32 %v13653_v29, 16  ;;  %v3698_v60 = vrot.slane %v3696_v47, 4 }
 0x238   : > { %v3223_v13 = vsel %vm12500_vm9, %v3218_v4, %v13776_v59  ;;  %v3233_v39 = vsel %vm12500_vm9, %v3228_v20, %v3232_v31  ;;  %v4507_v50 = vrot.slane %v4506_v9, 4  ;;  %v3237_v18 = vrot.slane %v3235_v0, 4 }
 0x239   : > { %17300 = vst [vmem:[#allocation65_spill] sm:$0xff] %v13804_v56  ;;  %v3240_v26 = vrot.slane %v3238_v28, 5  ;;  %v13822_v5 = vrot.slane %v3244_v21, 5  ;;  %v3250_v29 = vrot.slane %v3248_v35, 4  ;;  %v4516_v1 = vrot.slane %v4514_v25, 4 }
 0x23a   : > { %v13812_v27 = vpop.f32.mrf.mxu1  ;;  %v4519_v56 = vrot.slane %v4517_v3, 5  ;;  %v13824_v36 = vrot.slane %v4523_v23, 5  ;;  %v4529_v37 = vrot.slane %v4527_v54, 4  ;;  %v3318_v55 = vunpack.c.l.b16 %v3233_v39  ;;  %v13852_v54 = vpop.f32.mrf.mxu2 }
 0x23b   : > { %17303 = vst [vmem:[#allocation68_spill] sm:$0xff] %v13812_v27  ;;  %11481 = vmatmul.msk.bf16.gmra.mxu0 %vm428_vm0, %v4752_v41  ;;  %v4511_v27 = vrot.slane %v4509_v24, 5  ;;  %v3317_v41 = vunpack.c.l.b16 %v3223_v13  ;;  %v3697_v59 = vsel %vm12535_vm13, %v11305_v2, %v3696_v47  ;;  %v3700_v31 = vsel %vm12535_vm13, %v3698_v60, %v3699_v15  ;;  %v13840_v47 = vld [vmem:[#allocation2 + $0x58] sm:$0xf]  ;;  %v13854_v2 = vpop.f32.mrf.mxu0 }
 0x23c   : > { %v4497_v4 = vrot.slane %v4496_v46, 4  ;;  %v3254_v9 = vshll.u32 %v2894_v43, 16  ;;  %v17304_v0 = vrot.slane %v13759_v22, 5  ;;  %v3241_v21 = vor.u32 %v3240_v26, %v3237_v18  ;;  %v13849_v26 = vld [vmem:[#allocation2 + $0xc4] sm:$0xf]  ;;  %17306 = vst [vmem:[#allocation70_spill] sm:$0xff] %v13852_v54 }
 0x23d   : > { %v4512_v20 = vsel %vm12500_vm9, %v4507_v50, %v4511_v27  ;;  %v3251_v35 = vor.u32 %v3250_v29, %v13822_v5  ;;  %v17203_v15 = vrot.slane %v13840_v47, 5  ;;  %v3746_v3 = vunpack.c.l.b16 %v3700_v31  ;;  %17307 = vst [vmem:[#allocation71_spill] sm:$0xff] %v13854_v2  ;;  %v13863_v18 = vld [vmem:[#allocation2 + $0xc8] sm:$0x1]  ;;  %v3547_v29 = vld [vmem:[#allocation2 + $0xc0] sm:$0xe] }
 0x23e   : > { %v2105_v62 = vpop.f32.mrf.mxu3  ;;  %v2219_v28 = vsel %vm12535_vm13, %v11097_v12, %v17304_v0  ;;  %v4502_v43 = vsel %vm12500_vm9, %v4497_v4, %v13790_v7  ;;  %v4520_v50 = vor.u32 %v4519_v56, %v4516_v1  ;;  %v3336_v22 = vpack.c.b16 %v3318_v55, %v3317_v41  ;;  %v13860_v55 = vld [vmem:[#allocation2 + $0x88] sm:$0xf]  ;;  %v13865_v1 = vld [vmem:[#allocation2 + $0x5c] sm:$0x1] }
 0x23f   : > { %v13831_v24 = vadd.f32 %v2105_v62, %v13546_v53  ;;  %v3745_v53 = vunpack.c.l.b16 %v3697_v59  ;;  %v4729_v27 = vunpack.c.l.b16 %v4512_v20  ;;  %v2308_v12 = vunpack.c.l.b16 %v13800_v57  ;;  %v2895_v20 = vld [vmem:[#allocation2 + $0xc0] sm:$0xf] }
 0x240   : > { %v4530_v23 = vor.u32 %v4529_v37, %v13824_v36  ;;  %v3256_v60 = vrot.slane %v3254_v9, 5  ;;  %v3703_v46 = vrot.slane %v13849_v26, 5  ;;  %v4533_v7 = vshll.u32 %v13677_v11, 16  ;;  %v13874_v9 = vld [vmem:[#allocation2 + $0x84] sm:$0xf] }
 0x241   : > { %v4728_v57 = vunpack.c.l.b16 %v4502_v43  ;;  %v2307_v56 = vunpack.c.l.b16 %v2219_v28  ;;  %v3242_v13 = vrot.slane %v3241_v21, 4  ;;  %v3252_v39 = vrot.slane %v3251_v35, 4 }
 0x242   : > { %v13843_v25 = vpop.f32.mrf.mxu1  ;;  %v3763_v37 = vpack.c.b16 %v3746_v3, %v3745_v53  ;;  %v4521_v62 = vrot.slane %v4520_v50, 4  ;;  %v13870_v11 = vrot.slane %v17203_v15, 4  ;;  %v4531_v4 = vrot.slane %v4530_v23, 4  ;;  %v4964_v3 = vld [vmem:[#allocation2 + $0x84] sm:$0xe] }
 0x243   : > { %17305 = vst [vmem:[#allocation69_spill] sm:$0xff] %v13843_v25  ;;  %11136 = vmatmul.msk.bf16.gmra.mxu3 %vm428_vm0, %v13793_v14  ;;  %v4753_v59 = vpack.c.b16 %v4729_v27, %v4728_v57  ;;  %v13872_v31 = vpack.c.b16 %v2308_v12, %v2307_v56  ;;  %v5084_v0 = vrot.slane %v13860_v55, 5  ;;  %v11306_v21 = vrot.slane %v3547_v29, 9  ;;  %v13894_v29 = vld [vmem:[#allocation2 + $0x8c] sm:$0x1] }
 0x244   : > { %v3705_v35 = vrot.slane %v3703_v46, 4  ;;  %v3706_v53 = vrot.slane %v13863_v18, 5  ;;  %v3247_v43 = vsel %vm12500_vm9, %v3242_v13, %v13822_v5  ;;  %v3257_v50 = vsel %vm12500_vm9, %v3252_v39, %v3256_v60 }
 0x245   : > { %11288 = vmatmul.msk.bf16.gmra.mxu1 %vm428_vm0, %v3336_v22  ;;  %v4526_v22 = vsel %vm12500_vm9, %v4521_v62, %v13824_v36  ;;  %v3259_v12 = vshrl.u32 %v2895_v20, 16  ;;  %v3262_v23 = vshll.u32 %v2895_v20, 16  ;;  %v3268_v57 = vshll.u32 %v13849_v26, 16  ;;  %v12140_v62 = vld [vmem:[%s17188_s3 + $0x108] sm:$0xff] }
 0x246   : > { %v2108_v41 = vpop.f32.mrf.mxu3  ;;  %v3272_v56 = vshrl.u32 %v13849_v26, 16  ;;  %v4538_v60 = vshrl.u32 %v13874_v9, 16  ;;  %v11500_v13 = vrot.slane %v4964_v3, 9  ;;  %v5086_v39 = vrot.slane %v5084_v0, 4  ;;  %v13912_v3 = vpop.f32.mrf.mxu2  ;;  %5266 = vmatpush.bf16.msra.mxu1 %v12140_v62 }
 0x247   : > { %v13878_v28 = vadd.f32 %v2108_v41, %v13578_v8  ;;  %11345 = vmatmul.msk.bf16.gmra.mxu2 %vm428_vm0, %v3763_v37  ;;  %v4535_v8 = vrot.slane %v4533_v7, 5  ;;  %v3704_v36 = vsel %vm12535_vm13, %v11306_v21, %v3703_v46  ;;  %v3707_v7 = vsel %vm12535_vm13, %v3705_v35, %v3706_v53  ;;  %17309 = vst [vmem:[#allocation73_spill] sm:$0xff] %v13912_v3  ;;  %v13914_v46 = vpop.f32.mrf.mxu0 }
 0x248   : > { %v4547_v37 = vshll.u32 %v13860_v55, 16  ;;  %v4551_v26 = vshrl.u32 %v13860_v55, 16  ;;  %v3319_v41 = vunpack.c.l.b16 %v3247_v43  ;;  %v5085_v20 = vsel %vm12535_vm13, %v11500_v13, %v5084_v0  ;;  %17310 = vst [vmem:[#allocation74_spill] sm:$0xff] %v13914_v46 }
 0x249   : > { %v4536_v5 = vsel %vm12500_vm9, %v4531_v4, %v4535_v8  ;;  %v3320_v4 = vunpack.c.l.b16 %v3257_v50  ;;  %v3261_v21 = vrot.slane %v3259_v12, 4  ;;  %v3264_v35 = vrot.slane %v3262_v23, 5  ;;  %v13929_v23 = vld [vmem:[#allocation2 + $0x94] sm:$0xf] }
 0x24a   : > { %v13890_v27 = vpop.f32.mrf.mxu1  ;;  %v13916_v53 = vrot.slane %v3268_v57, 5  ;;  %v3274_v55 = vrot.slane %v3272_v56, 4  ;;  %v3747_v15 = vunpack.c.l.b16 %v3704_v36  ;;  %v3748_v14 = vunpack.c.l.b16 %v3707_v7  ;;  %v4965_v57 = vld [vmem:[#allocation2 + $0x90] sm:$0xe] }
 0x24b   : > { %17308 = vst [vmem:[#allocation72_spill] sm:$0xff] %v13890_v27  ;;  %11482 = vmatmul.msk.bf16.gmra.mxu0 %vm428_vm0, %v4753_v59  ;;  %v5087_v59 = vrot.slane %v13894_v29, 5  ;;  %v3278_v43 = vshll.u32 %v13863_v18, 16  ;;  %v13924_v13 = vunpack.c.l.b16 %v4526_v22  ;;  %v13926_v46 = vrot.slane %v4538_v60, 4 }
 0x24c   : > { %v4541_v12 = vshll.u32 %v13874_v9, 16  ;;  %v3337_v56 = vpack.c.b16 %v3320_v4, %v3319_v41  ;;  %v13931_v36 = vunpack.c.l.b16 %v4536_v5  ;;  %v13933_v7 = vrot.slane %v4547_v37, 5  ;;  %v12139_v9 = vld [vmem:[%s17188_s3 + $0x100] sm:$0xff] }
 0x24d   : > { %v5088_v0 = vsel %vm12535_vm13, %v5086_v39, %v5087_v59  ;;  %v13935_v18 = vrot.slane %v4551_v26, 4  ;;  %v13937_v39 = vld [vmem:[#allocation2 + $0x98] sm:$0x1]  ;;  %v3265_v22 = vor.u32 %v3264_v35, %v3261_v21  ;;  %v3275_v60 = vor.u32 %v3274_v55, %v13916_v53  ;;  %v13945_v59 = vld [vmem:[#allocation2 + $0xa0] sm:$0xf]  ;;  %5267 = vmatpush.bf16.msra.mxu1 %v12139_v9  ;;  %v12132_v21 = vld [vmem:[%s17188_s3 + $0xc8] sm:$0xff] }
 0x24e   : > { %v2110_v8 = vpop.f32.mrf.mxu3  ;;  %v13947_v5 = vld [vmem:[#allocation2 + $0xa4] sm:$0x1]  ;;  %v5158_v37 = vunpack.c.l.b16 %v5085_v20  ;;  %v5159_v41 = vunpack.c.l.b16 %v5088_v0  ;;  %v3764_v26 = vpack.c.b16 %v3748_v14, %v3747_v15  ;;  %v3280_v4 = vrot.slane %v3278_v43, 5  ;;  %v4967_v14 = vld [vmem:[#allocation2 + $0xa8] sm:$0xe]  ;;  %4158 = vmatpush.bf16.msra.mxu3 %v12132_v21  ;;  %v13973_v54 = vpop.f32.mrf.mxu2 }
 0x24f   : > { %v13922_v50 = vadd.f32 %v2110_v8, %v13616_v63  ;;  %v4966_v63 = vld [vmem:[#allocation2 + $0x9c] sm:$0xe]  ;;  %v13949_v8 = vld [vmem:[#allocation2 + $0xb0] sm:$0x1]  ;;  %v11501_v2 = vrot.slane %v4965_v57, 9  ;;  %v5094_v20 = vrot.slane %v13937_v39, 5 }
 0x250   : > { %v13957_v35 = vpack.c.b16 %v5159_v41, %v5158_v37  ;;  %v11502_v55 = vrot.slane %v4966_v63, 9  ;;  %v5098_v15 = vrot.slane %v13945_v59, 5  ;;  %v11503_v57 = vrot.slane %v4967_v14, 9  ;;  %v13965_v37 = vld [vmem:[#allocation2 + $0xac] sm:$0xf]  ;;  %17313 = vst [vmem:[#allocation77_spill] sm:$0xff] %v13973_v54 }
 0x251   : > { %17311 = vst [vmem:[#allocation75_spill] sm:$0xff] %v13922_v50  ;;  %v3266_v9 = vrot.slane %v3265_v22, 4  ;;  %v3276_v27 = vrot.slane %v3275_v60, 4  ;;  %v13975_v22 = vpop.f32.mrf.mxu0  ;;  %v2130_v21 = vld [vmem:[#allocation2 + $0x54] sm:$0xe]  ;;  %v4543_v14 = vrot.slane %v4541_v12, 5 }
 0x252   : > { %v13939_v62 = vpop.f32.mrf.mxu1  ;;  %v5099_v63 = vsel %vm12535_vm13, %v11502_v55, %v5098_v15  ;;  %v5100_v41 = vrot.slane %v5098_v15, 4  ;;  %17314 = vst [vmem:[#allocation78_spill] sm:$0xff] %v13975_v22 }
 0x253   : > { %17312 = vst [vmem:[#allocation76_spill] sm:$0xff] %v13939_v62  ;;  %v5091_v62 = vrot.slane %v13929_v23, 5  ;;  %11137 = vmatmul.msk.bf16.gmra.mxu3 %vm428_vm0, %v13872_v31  ;;  %v5101_v31 = vrot.slane %v13947_v5, 5  ;;  %v5162_v3 = vunpack.c.l.b16 %v5099_v63 }
 0x255   : > { %11289 = vmatmul.msk.bf16.gmra.mxu1 %vm428_vm0, %v3337_v56  ;;  %v5092_v43 = vsel %vm12535_vm13, %v11501_v2, %v5091_v62  ;;  %v5093_v0 = vrot.slane %v5091_v62, 4  ;;  %v5105_v2 = vrot.slane %v13965_v37, 5  ;;  %v5108_v62 = vrot.slane %v13949_v8, 5 }
 0x256   : > { %v2113_v25 = vpop.f32.mrf.mxu3  ;;  %v5160_v55 = vunpack.c.l.b16 %v5092_v43 }
 0x257   : > { %v5095_v56 = vsel %vm12535_vm13, %v5093_v0, %v5094_v20  ;;  %v13978_v60 = vadd.f32 %v2113_v25, %v13656_v51  ;;  %11346 = vmatmul.msk.bf16.gmra.mxu2 %vm428_vm0, %v3764_v26  ;;  %v5102_v20 = vsel %vm12535_vm13, %v5100_v41, %v5101_v31  ;;  %v5106_v63 = vsel %vm12535_vm13, %v11503_v57, %v5105_v2 }
 0x258   : > { %v5161_v15 = vunpack.c.l.b16 %v5095_v56  ;;  %v5163_v0 = vunpack.c.l.b16 %v5102_v20  ;;  %v5107_v50 = vrot.slane %v5105_v2, 4  ;;  %v4754_v51 = vpack.c.b16 %v13931_v36, %v13924_v13 }
 0x259   : > { %v4554_v25 = vor.u32 %v13935_v18, %v13933_v7  ;;  %v5164_v43 = vunpack.c.l.b16 %v5106_v63  ;;  %v11098_v56 = vrot.slane %v2130_v21, 9  ;;  %v17316_v31 = vrot.slane %v13865_v1, 5 }
 0x25a   : > { %v13985_v54 = vpop.f32.mrf.mxu1  ;;  %v13991_v26 = vpack.c.b16 %v5161_v15, %v5160_v55  ;;  %v13998_v57 = vpack.c.b16 %v5163_v0, %v5162_v3  ;;  %v5109_v41 = vsel %vm12535_vm13, %v5107_v50, %v5108_v62  ;;  %v3271_v13 = vsel %vm12500_vm9, %v3266_v9, %v13916_v53 }
 0x25b   : > { %17315 = vst [vmem:[#allocation79_spill] sm:$0xff] %v13985_v54  ;;  %v2229_v12 = vsel %vm12535_vm13, %v13870_v11, %v17316_v31  ;;  %11483 = vmatmul.msk.bf16.gmra.mxu0 %vm428_vm0, %v4754_v51  ;;  %v3281_v36 = vsel %vm12500_vm9, %v3276_v27, %v3280_v4  ;;  %v4557_v1 = vshll.u32 %v13894_v29, 16  ;;  %v5165_v18 = vunpack.c.l.b16 %v5109_v41  ;;  %v14019_v4 = vpop.f32.mrf.mxu0  ;;  %v14025_v51 = vld [vmem:[#allocation2 + $0xb8] sm:$0xf]  ;;  %v4968_v41 = vld [vmem:[#allocation2 + $0xb4] sm:$0xe] }
 0x25c   : > { %v17317_v2 = vrot.slane %v13840_v47, 5  ;;  %v2310_v3 = vunpack.c.l.b16 %v2229_v12  ;;  %v4544_v50 = vor.u32 %v4543_v14, %v13926_v46  ;;  %v4555_v62 = vrot.slane %v4554_v25, 4  ;;  %17318 = vst [vmem:[#allocation80_spill] sm:$0xff] %v14019_v4  ;;  %v12312_v14 = vld [vmem:[#allocation2 + $0x64] sm:$0xf] }
 0x25d   : > { %v14014_v21 = vpack.c.b16 %v5165_v18, %v5164_v43  ;;  %v3321_v15 = vunpack.c.l.b16 %v3271_v13  ;;  %v3322_v53 = vunpack.c.l.b16 %v3281_v36  ;;  %v4559_v29 = vrot.slane %v4557_v1, 5  ;;  %v14027_v25 = vld [vmem:[#allocation2 + $0xbc] sm:$0x1] }
 0x25e   : > { %v2226_v11 = vsel %vm12535_vm13, %v11098_v56, %v17317_v2  ;;  %v2115_v55 = vpop.f32.mrf.mxu3  ;;  %v4545_v0 = vrot.slane %v4544_v50, 4  ;;  %v2232_v63 = vrot.slane %v12312_v14, 5  ;;  %v4571_v56 = vshll.u32 %v13929_v23, 16 }
 0x25f   : > { %v14017_v9 = vadd.f32 %v2115_v55, %v13697_v58  ;;  %v2309_v27 = vunpack.c.l.b16 %v2226_v11  ;;  %v4560_v46 = vsel %vm12500_vm9, %v4555_v62, %v4559_v29  ;;  %v3338_v43 = vpack.c.b16 %v3322_v53, %v3321_v15  ;;  %v4303_v58 = vld [vmem:[#allocation2 + $0x90] sm:$0xf]  ;;  %v2131_v29 = vld [vmem:[#allocation2 + $0x60] sm:$0xe] }
 0x260   : > { %v4575_v31 = vshrl.u32 %v13929_v23, 16  ;;  %v5112_v12 = vrot.slane %v14025_v51, 5  ;;  %v4550_v13 = vsel %vm12500_vm9, %v4545_v0, %v13933_v7  ;;  %v11504_v36 = vrot.slane %v4968_v41, 9 }
 0x261   : > { %v2334_v20 = vpack.c.b16 %v2310_v3, %v2309_v27  ;;  %v5115_v18 = vrot.slane %v14027_v25, 5  ;;  %v4733_v2 = vunpack.c.l.b16 %v4560_v46  ;;  %v2234_v11 = vrot.slane %v2232_v63, 4  ;;  %v12313_v46 = vld [vmem:[#allocation2 + $0x68] sm:$0x1] }
 0x262   : > { %v14021_v47 = vpop.f32.mrf.mxu1  ;;  %v5114_v1 = vrot.slane %v5112_v12, 4  ;;  %v4562_v3 = vshrl.u32 %v4303_v58, 16  ;;  %v4565_v50 = vshll.u32 %v4303_v58, 16  ;;  %v4573_v62 = vrot.slane %v4571_v56, 5 }
 0x263   : > { %17319 = vst [vmem:[#allocation81_spill] sm:$0xff] %v14021_v47  ;;  %11138 = vmatmul.msk.bf16.gmra.mxu3 %vm428_vm0, %v2334_v20  ;;  %v4577_v55 = vrot.slane %v4575_v31, 4  ;;  %v5113_v15 = vsel %vm12535_vm13, %v11504_v36, %v5112_v12  ;;  %v4732_v7 = vunpack.c.l.b16 %v4550_v13  ;;  %v2235_v14 = vrot.slane %v12313_v46, 5 }
 0x264   : > { %v5116_v53 = vsel %vm12535_vm13, %v5114_v1, %v5115_v18  ;;  %v5166_v20 = vunpack.c.l.b16 %v5113_v15  ;;  %v4564_v56 = vrot.slane %v4562_v3, 4  ;;  %v4567_v31 = vrot.slane %v4565_v50, 5  ;;  %v4306_v15 = vld [vmem:[#allocation2 + $0x9c] sm:$0xf] }
 0x265   : > { %11290 = vmatmul.msk.bf16.gmra.mxu1 %vm428_vm0, %v3338_v43  ;;  %v5167_v0 = vunpack.c.l.b16 %v5116_v53  ;;  %v4755_v58 = vpack.c.b16 %v4733_v2, %v4732_v7  ;;  %v11099_v12 = vrot.slane %v2131_v29, 9  ;;  %v2236_v36 = vsel %vm12535_vm13, %v2234_v11, %v2235_v14 }
 0x266   : > { %v2118_v23 = vpop.f32.mrf.mxu3  ;;  %v4578_v1 = vor.u32 %v4577_v55, %v4573_v62  ;;  %v4581_v18 = vshll.u32 %v13937_v39, 16  ;;  %v4568_v2 = vor.u32 %v4567_v31, %v4564_v56  ;;  %v4586_v14 = vshrl.u32 %v4306_v15, 16 }
 0x267   : > { %v14043_v27 = vadd.f32 %v2118_v23, %v13735_v34  ;;  %v14047_v41 = vpack.c.b16 %v5167_v0, %v5166_v20  ;;  %v14051_v34 = vpop.f32.mrf.mxu0  ;;  %v2233_v13 = vsel %vm12535_vm13, %v11099_v12, %v2232_v63  ;;  %v2312_v23 = vunpack.c.l.b16 %v2236_v36  ;;  %v12314_v0 = vld [vmem:[#allocation2 + $0x70] sm:$0xf] }
 0x268   : > { %17321 = vst [vmem:[#allocation83_spill] sm:$0xff] %v14051_v34  ;;  %v4579_v50 = vrot.slane %v4578_v1, 4  ;;  %v2311_v7 = vunpack.c.l.b16 %v2233_v13  ;;  %v4583_v11 = vrot.slane %v4581_v18, 5  ;;  %v4569_v20 = vrot.slane %v4568_v2, 4  ;;  %v2132_v13 = vld [vmem:[#allocation2 + $0x6c] sm:$0xe] }
 0x269   : > { %v2239_v46 = vrot.slane %v12314_v0, 5  ;;  %v4589_v63 = vshll.u32 %v4306_v15, 16  ;;  %v4599_v56 = vshrl.u32 %v13945_v59, 16  ;;  %v4588_v18 = vrot.slane %v4586_v14, 4  ;;  %v12315_v15 = vld [vmem:[#allocation2 + $0x74] sm:$0x1] }
 0x26a   : > { %v14045_v43 = vpop.f32.mrf.mxu1  ;;  %v2335_v29 = vpack.c.b16 %v2312_v23, %v2311_v7  ;;  %v4584_v39 = vsel %vm12500_vm9, %v4579_v50, %v4583_v11  ;;  %v2242_v7 = vrot.slane %v12315_v15, 5 }
 0x26b   : > { %17320 = vst [vmem:[#allocation82_spill] sm:$0xff] %v14045_v43  ;;  %11484 = vmatmul.msk.bf16.gmra.mxu0 %vm428_vm0, %v4755_v58  ;;  %v4595_v58 = vshll.u32 %v13945_v59, 16  ;;  %v4735_v12 = vunpack.c.l.b16 %v4584_v39  ;;  %v2241_v36 = vrot.slane %v2239_v46, 4  ;;  %v4591_v23 = vrot.slane %v4589_v63, 5 }
 0x26c   : > { %v4605_v39 = vshll.u32 %v13947_v5, 16  ;;  %v4619_v5 = vshll.u32 %v13965_v37, 16 }
 0x26d   : > { %v4597_v2 = vrot.slane %v4595_v58, 5  ;;  %v4592_v0 = vor.u32 %v4591_v23, %v4588_v18  ;;  %v4309_v58 = vld [vmem:[#allocation2 + $0xa8] sm:$0xf] }
 0x26e   : > { %v2120_v3 = vpop.f32.mrf.mxu3  ;;  %v4610_v18 = vshrl.u32 %v4309_v58, 16  ;;  %v4613_v23 = vshll.u32 %v4309_v58, 16  ;;  %v2133_v58 = vld [vmem:[#allocation2 + $0x78] sm:$0xe] }
 0x26f   : > { %v14058_v53 = vadd.f32 %v2120_v3, %v13768_v30  ;;  %v4574_v30 = vsel %vm12500_vm9, %v4569_v20, %v4573_v62  ;;  %v14071_v31 = vpop.f32.mrf.mxu0  ;;  %v4601_v3 = vrot.slane %v4599_v56, 4  ;;  %v11100_v62 = vrot.slane %v2132_v13, 9 }
 0x270   : > { %17323 = vst [vmem:[#allocation85_spill] sm:$0xff] %v14071_v31  ;;  %v4734_v50 = vunpack.c.l.b16 %v4574_v30  ;;  %v2243_v20 = vsel %vm12535_vm13, %v2241_v36, %v2242_v7  ;;  %v4593_v30 = vrot.slane %v4592_v0, 4  ;;  %v4621_v0 = vrot.slane %v4619_v5, 5 }
 0x271   : > { %v4602_v14 = vor.u32 %v4601_v3, %v4597_v2  ;;  %v2314_v63 = vunpack.c.l.b16 %v2243_v20  ;;  %v4623_v3 = vshrl.u32 %v13965_v37, 16  ;;  %v4615_v20 = vrot.slane %v4613_v23, 5 }
 0x272   : > { %v14060_v55 = vpop.f32.mrf.mxu1  ;;  %v4756_v11 = vpack.c.b16 %v4735_v12, %v4734_v50  ;;  %v11101_v23 = vrot.slane %v2133_v58, 9 }
 0x273   : > { %17322 = vst [vmem:[#allocation84_spill] sm:$0xff] %v14060_v55  ;;  %11139 = vmatmul.msk.bf16.gmra.mxu3 %vm428_vm0, %v2335_v29  ;;  %v12162_v29 = vld [vmem:[%s17190_s5 + $0x18] sm:$0xff]  ;;  %v4603_v12 = vrot.slane %v4602_v14, 4  ;;  %v4625_v37 = vrot.slane %v4623_v3, 4 }
 0x274   : > { %6592 = vmatpush.bf16.msra.mxu2 %v12162_v29  ;;  %v4612_v29 = vrot.slane %v4610_v18, 4 }
 0x275   : > { %11531 = vmatmul.msk.bf16.vlgmr.msra.gmra.mxu1 %vm428_vm0, %v13156_v6 }
 0x276   : > { %v2424_v1 = vpop.f32.mrf.mxu3 }
 0x277   : > { %v14074_v59 = vadd.f32 %v2424_v1, %v12743_v10  ;;  %v2240_v10 = vsel %vm12535_vm13, %v11100_v62, %v2239_v46  ;;  %v4607_v1 = vrot.slane %v4605_v39, 5  ;;  %v14089_v13 = vpop.f32.mrf.mxu0  ;;  %v12316_v46 = vld [vmem:[#allocation2 + $0x7c] sm:$0xf] }
 0x278   : > { %17325 = vst [vmem:[#allocation87_spill] sm:$0xff] %v14089_v13  ;;  %v2313_v36 = vunpack.c.l.b16 %v2240_v10  ;;  %v2246_v7 = vrot.slane %v12316_v46, 5 }
 0x279   : > { %v4608_v62 = vsel %vm12500_vm9, %v4603_v12, %v4607_v1  ;;  %v4626_v12 = vor.u32 %v4625_v37, %v4621_v0  ;;  %v4629_v1 = vshll.u32 %v13949_v8, 16  ;;  %v4312_v37 = vld [vmem:[#allocation2 + $0xb4] sm:$0xf] }
 0x27a   : > { %v14076_v6 = vpop.f32.mrf.mxu1  ;;  %v2336_v15 = vpack.c.b16 %v2314_v63, %v2313_v36  ;;  %v4737_v39 = vunpack.c.l.b16 %v4608_v62  ;;  %v2248_v10 = vrot.slane %v2246_v7, 4  ;;  %v12317_v36 = vld [vmem:[#allocation2 + $0x80] sm:$0x1]  ;;  %v2247_v3 = vsel %vm12535_vm13, %v11101_v23, %v2246_v7 }
 0x27b   : > { %17324 = vst [vmem:[#allocation86_spill] sm:$0xff] %v14076_v6  ;;  %11485 = vmatmul.msk.bf16.gmra.mxu0 %vm428_vm0, %v4756_v11  ;;  %v4598_v11 = vsel %vm12500_vm9, %v4593_v30, %v4597_v2  ;;  %v2249_v46 = vrot.slane %v12317_v36, 5  ;;  %v4616_v30 = vor.u32 %v4615_v20, %v4612_v29  ;;  %v4627_v62 = vrot.slane %v4626_v12, 4  ;;  %v12318_v12 = vld [vmem:[#allocation2 + $0x88] sm:$0xf]  ;;  %v12120_v6 = vld [vmem:[#allocation2 + $0x54] sm:$0xff] }
 0x27c   : > { %v4736_v14 = vunpack.c.l.b16 %v4598_v11  ;;  %v4631_v29 = vrot.slane %v4629_v1, 5  ;;  %v2315_v8 = vunpack.c.l.b16 %v2247_v3  ;;  %v4634_v7 = vshrl.u32 %v4312_v37, 16 }
 0x27d   : > { %v2250_v5 = vsel %vm12535_vm13, %v2248_v10, %v2249_v46  ;;  %v4617_v11 = vrot.slane %v4616_v30, 4  ;;  %v4637_v36 = vshll.u32 %v4312_v37, 16  ;;  %v4643_v46 = vshll.u32 %v14025_v51, 16 }
 0x27e   : > { %v14087_v56 = vpop.f32.mrf.mxu3  ;;  %v4757_v18 = vpack.c.b16 %v4737_v39, %v4736_v14  ;;  %v4632_v10 = vsel %vm12500_vm9, %v4627_v62, %v4631_v29  ;;  %v4647_v30 = vshrl.u32 %v14025_v51, 16  ;;  %v2253_v1 = vrot.slane %v12318_v12, 5 }
 0x27f   : > { %v4622_v39 = vsel %vm12500_vm9, %v4617_v11, %v4621_v0  ;;  %v4739_v23 = vunpack.c.l.b16 %v4632_v10  ;;  %v4639_v3 = vrot.slane %v4637_v36, 5 }
 0x280   : > { %v4738_v0 = vunpack.c.l.b16 %v4622_v39  ;;  %v4649_v11 = vrot.slane %v4647_v30, 4  ;;  %v2255_v62 = vrot.slane %v2253_v1, 4  ;;  %v4653_v39 = vshll.u32 %v14027_v25, 16 }
 0x282   : > { %v14093_v50 = vpop.f32.mrf.mxu1  ;;  %v4758_v12 = vpack.c.b16 %v4739_v23, %v4738_v0 }
 0x283   : > { %17326 = vst [vmem:[#allocation88_spill] sm:$0xff] %v14093_v50  ;;  %11140 = vmatmul.msk.bf16.gmra.mxu3 %vm428_vm0, %v2336_v15  ;;  %v14106_v15 = vpop.f32.mrf.mxu0 }
 0x285   : > { %11532 = vmatmul.msk.bf16.gmra.mxu1 %vm428_vm0, %v13163_v33 }
 0x286   : > { %v2429_v63 = vpop.f32.mrf.mxu3 }
 0x287   : > { %v14103_v2 = vadd.f32 %v2429_v63, %v12833_v40  ;;  %v2316_v40 = vunpack.c.l.b16 %v2250_v5  ;;  %v4636_v5 = vrot.slane %v4634_v7, 4 }
 0x289   : > { %v2337_v14 = vpack.c.b16 %v2316_v40, %v2315_v8  ;;  %v4645_v40 = vrot.slane %v4643_v46, 5  ;;  %v12319_v8 = vld [vmem:[#allocation2 + $0x8c] sm:$0x1]  ;;  %v4640_v13 = vor.u32 %v4639_v3, %v4636_v5  ;;  %v4315_v5 = vld [vmem:[#allocation2 + $0xc0] sm:$0xf] }
 0x28a   : > { %v14108_v33 = vpop.f32.mrf.mxu1  ;;  %v2256_v37 = vrot.slane %v12319_v8, 5  ;;  %v14150_v3 = vld [vmem:[#allocation2 + $0xc4] sm:$0xf] }
 0x28b   : > { %17327 = vst [vmem:[#allocation89_spill] sm:$0xff] %v14108_v33  ;;  %11486 = vmatmul.msk.bf16.gmra.mxu0 %vm428_vm0, %v4757_v18  ;;  %v14126_v18 = vpop.f32.mrf.mxu0  ;;  %v4641_v30 = vrot.slane %v4640_v13, 4  ;;  %v12320_v13 = vld [vmem:[#allocation2 + $0x94] sm:$0xf]  ;;  %v14323_v33 = vpop.f32.mrf.mxu2 }
 0x28c   : > { %v2257_v7 = vsel %vm12535_vm13, %v2255_v62, %v2256_v37  ;;  %v2260_v8 = vrot.slane %v12320_v13, 5  ;;  %v4658_v37 = vshrl.u32 %v4315_v5, 16 }
 0x28d   : > { %v2318_v46 = vunpack.c.l.b16 %v2257_v7 }
 0x28e   : > { %v2431_v20 = vpop.f32.mrf.mxu3  ;;  %v2262_v7 = vrot.slane %v2260_v8, 4 }
 0x28f   : > { %v14116_v63 = vadd.f32 %v2431_v20, %v12866_v42  ;;  %v12131_v42 = vld [vmem:[%s17188_s3 + $0xc0] sm:$0xff] }
 0x290   : > { %4159 = vmatpush.bf16.msra.mxu3 %v12131_v42  ;;  %v2134_v20 = vld [vmem:[#allocation2 + $0x84] sm:$0xe] }
 0x291   : > { %v11102_v10 = vrot.slane %v2134_v20, 9 }
 0x292   : > { %v14122_v58 = vpop.f32.mrf.mxu1 }
 0x293   : > { %17328 = vst [vmem:[#allocation90_spill] sm:$0xff] %v14122_v58  ;;  %11141 = vmatmul.msk.bf16.gmra.mxu3 %vm428_vm0, %v2337_v14  ;;  %v14145_v36 = vpop.f32.mrf.mxu0 }
 0x295   : > { %11533 = vmatmul.msk.bf16.gmra.mxu1 %vm428_vm0, %v13214_v61  ;;  %v4650_v61 = vor.u32 %v4649_v11, %v4645_v40 }
 0x296   : > { %v2434_v51 = vpop.f32.mrf.mxu3 }
 0x297   : > { %v14135_v29 = vadd.f32 %v2434_v51, %v12898_v49  ;;  %v2254_v49 = vsel %vm12535_vm13, %v11102_v10, %v2253_v1  ;;  %v4651_v42 = vrot.slane %v4650_v61, 4  ;;  %v4655_v51 = vrot.slane %v4653_v39, 5 }
 0x298   : > { %v2317_v25 = vunpack.c.l.b16 %v2254_v49  ;;  %v4646_v1 = vsel %vm12500_vm9, %v4641_v30, %v4645_v40  ;;  %v4671_v61 = vshrl.u32 %v14150_v3, 16  ;;  %v2135_v49 = vld [vmem:[#allocation2 + $0x90] sm:$0xe] }
 0x299   : > { %v4656_v20 = vsel %vm12500_vm9, %v4651_v42, %v4655_v51  ;;  %v4740_v39 = vunpack.c.l.b16 %v4646_v1  ;;  %v11103_v1 = vrot.slane %v2135_v49, 9 }
 0x29a   : > { %v14137_v14 = vpop.f32.mrf.mxu1  ;;  %v2338_v62 = vpack.c.b16 %v2318_v46, %v2317_v25  ;;  %v4741_v10 = vunpack.c.l.b16 %v4656_v20  ;;  %v4660_v46 = vrot.slane %v4658_v37, 4  ;;  %v4673_v51 = vrot.slane %v4671_v61, 4 }
 0x29b   : > { %17329 = vst [vmem:[#allocation91_spill] sm:$0xff] %v14137_v14  ;;  %11487 = vmatmul.msk.bf16.gmra.mxu0 %vm428_vm0, %v4758_v12  ;;  %v4661_v12 = vshll.u32 %v4315_v5, 16  ;;  %v14168_v5 = vld [vmem:[#allocation2 + $0xc8] sm:$0x1] }
 0x29d   : > { %v4663_v30 = vrot.slane %v4661_v12, 5 }
 0x29e   : > { %v2436_v0 = vpop.f32.mrf.mxu3 }
 0x29f   : > { %v14148_v23 = vadd.f32 %v2436_v0, %v12935_v44  ;;  %v4667_v44 = vshll.u32 %v14150_v3, 16  ;;  %v14163_v0 = vpop.f32.mrf.mxu0  ;;  %v4664_v37 = vor.u32 %v4663_v30, %v4660_v46 }
 0x2a1   : > { %v4669_v42 = vrot.slane %v4667_v44, 5  ;;  %v4677_v44 = vshll.u32 %v14168_v5, 16  ;;  %v4665_v34 = vrot.slane %v4664_v37, 4 }
 0x2a2   : > { %v14152_v11 = vpop.f32.mrf.mxu1 }
 0x2a3   : > { %17330 = vst [vmem:[#allocation92_spill] sm:$0xff] %v14152_v11  ;;  %11142 = vmatmul.msk.bf16.gmra.mxu3 %vm428_vm0, %v2338_v62  ;;  %v12321_v62 = vld [vmem:[#allocation2 + $0x98] sm:$0x1]  ;;  %v4674_v12 = vor.u32 %v4673_v51, %v4669_v42  ;;  %v4679_v4 = vrot.slane %v4677_v44, 5  ;;  %v4670_v30 = vsel %vm12500_vm9, %v4665_v34, %v4669_v42  ;;  %v12322_v51 = vld [vmem:[#allocation2 + $0xa0] sm:$0xf] }
 0x2a4   : > { %v2263_v13 = vrot.slane %v12321_v62, 5  ;;  %v12118_v11 = vld [vmem:[#allocation2 + $0x3c] sm:$0xff] }
 0x2a5   : > { %11534 = vmatmul.msk.bf16.gmra.mxu1 %vm428_vm0, %v13270_v19  ;;  %v4759_v19 = vpack.c.b16 %v4741_v10, %v4740_v39  ;;  %v4675_v62 = vrot.slane %v4674_v12, 4 }
 0x2a6   : > { %v2439_v40 = vpop.f32.mrf.mxu3  ;;  %v2264_v20 = vsel %vm12535_vm13, %v2262_v7, %v2263_v13  ;;  %v2267_v13 = vrot.slane %v12322_v51, 5  ;;  %v12324_v51 = vld [vmem:[#allocation2 + $0xac] sm:$0xf] }
 0x2a7   : > { %v14166_v25 = vadd.f32 %v2439_v40, %v12962_v52  ;;  %v2261_v52 = vsel %vm12535_vm13, %v11103_v1, %v2260_v8  ;;  %v2320_v61 = vunpack.c.l.b16 %v2264_v20  ;;  %v14181_v49 = vpop.f32.mrf.mxu0  ;;  %v4680_v8 = vsel %vm12500_vm9, %v4675_v62, %v4679_v4  ;;  %v12323_v20 = vld [vmem:[#allocation2 + $0xa4] sm:$0x1] }
 0x2a8   : > { %v2319_v10 = vunpack.c.l.b16 %v2261_v52  ;;  %v4743_v1 = vunpack.c.l.b16 %v4680_v8  ;;  %v2270_v37 = vrot.slane %v12323_v20, 5  ;;  %v2269_v52 = vrot.slane %v2267_v13, 4 }
 0x2aa   : > { %v14170_v31 = vpop.f32.mrf.mxu1  ;;  %v2339_v46 = vpack.c.b16 %v2320_v61, %v2319_v10 }
 0x2ab   : > { %17331 = vst [vmem:[#allocation93_spill] sm:$0xff] %v14170_v31  ;;  %11488 = vmatmul.msk.bf16.gmra.mxu0 %vm428_vm0, %v4759_v19  ;;  %v2136_v19 = vld [vmem:[#allocation2 + $0x9c] sm:$0xe]  ;;  %v17363_v31 = vld [vmem:[#allocation36_spill] sm:$0xff] }
 0x2ac   : > { %v11104_v44 = vrot.slane %v2136_v19, 9  ;;  %v2274_v19 = vrot.slane %v12324_v51, 5 }
 0x2ae   : > { %v2441_v40 = vpop.f32.mrf.mxu3  ;;  %v2268_v61 = vsel %vm12535_vm13, %v11104_v44, %v2267_v13  ;;  %v2137_v13 = vld [vmem:[#allocation2 + $0xa8] sm:$0xe]  ;;  %v2276_v44 = vrot.slane %v2274_v19, 4 }
 0x2af   : > { %v14179_v39 = vadd.f32 %v2441_v40, %v12983_v38  ;;  %v4742_v38 = vunpack.c.l.b16 %v4670_v30  ;;  %v2271_v40 = vsel %vm12535_vm13, %v2269_v52, %v2270_v37  ;;  %v2321_v62 = vunpack.c.l.b16 %v2268_v61  ;;  %v17336_v52 = vld [vmem:[#allocation16_spill] sm:$0xff] }
 0x2b0   : > { %v2322_v10 = vunpack.c.l.b16 %v2271_v40 }
 0x2b1   : > { %v4760_v4 = vpack.c.b16 %v4743_v1, %v4742_v38  ;;  %v17335_v38 = vld [vmem:[#allocation42_spill] sm:$0xff]  ;;  %v12325_v1 = vld [vmem:[#allocation2 + $0xb0] sm:$0x1] }
 0x2b2   : > { %v14183_v7 = vpop.f32.mrf.mxu1  ;;  %v2340_v8 = vpack.c.b16 %v2322_v10, %v2321_v62  ;;  %v2277_v20 = vrot.slane %v12325_v1, 5 }
 0x2b3   : > { %17332 = vst [vmem:[#allocation94_spill] sm:$0xff] %v14183_v7  ;;  %11143 = vmatmul.msk.bf16.gmra.mxu3 %vm428_vm0, %v2339_v46 }
 0x2b4   : > { %v2278_v40 = vsel %vm12535_vm13, %v2276_v44, %v2277_v20  ;;  %v2138_v20 = vld [vmem:[#allocation2 + $0xb4] sm:$0xe] }
 0x2b5   : > { %11535 = vmatmul.msk.bf16.gmra.mxu1 %vm428_vm0, %v13383_v45  ;;  %v14201_v45 = vpop.f32.mrf.mxu0  ;;  %v2324_v10 = vunpack.c.l.b16 %v2278_v40 }
 0x2b6   : > { %v2444_v12 = vpop.f32.mrf.mxu3 }
 0x2b7   : > { %v14193_v34 = vadd.f32 %v2444_v12, %v13009_v32  ;;  %v11105_v12 = vrot.slane %v2137_v13, 9  ;;  %v5119_v13 = vrot.slane %v14150_v3, 5 }
 0x2b9   : > { %v2275_v61 = vsel %vm12535_vm13, %v11105_v12, %v2274_v19  ;;  %v5121_v22 = vrot.slane %v5119_v13, 4  ;;  %v5122_v19 = vrot.slane %v14168_v5, 5  ;;  %v17340_v12 = vld [vmem:[#allocation46_spill] sm:$0xff]  ;;  %v17341_v5 = vld [vmem:[#allocation20_spill] sm:$0xff] }
 0x2ba   : > { %v14195_v42 = vpop.f32.mrf.mxu1  ;;  %v2323_v62 = vunpack.c.l.b16 %v2275_v61 }
 0x2bb   : > { %17333 = vst [vmem:[#allocation95_spill] sm:$0xff] %v14195_v42  ;;  %11489 = vmatmul.msk.bf16.gmra.mxu0 %vm428_vm0, %v4760_v4  ;;  %v5123_v3 = vsel %vm12535_vm13, %v5121_v22, %v5122_v19 }
 0x2bc   : > { %v2341_v1 = vpack.c.b16 %v2324_v10, %v2323_v62  ;;  %v5169_v40 = vunpack.c.l.b16 %v5123_v3  ;;  %v12327_v62 = vld [vmem:[#allocation2 + $0xbc] sm:$0x1] }
 0x2bd   : > { %v2284_v10 = vrot.slane %v12327_v62, 5 }
 0x2be   : > { %v2446_v46 = vpop.f32.mrf.mxu3 }
 0x2bf   : > { %v14205_v30 = vadd.f32 %v2446_v46, %v13026_v16 }
 0x2c2   : > { %v14207_v32 = vpop.f32.mrf.mxu1 }
 0x2c3   : > { %17334 = vst [vmem:[#allocation96_spill] sm:$0xff] %v14207_v32  ;;  %11144 = vmatmul.msk.bf16.gmra.mxu3 %vm428_vm0, %v2340_v8  ;;  %v17338_v8 = vld [vmem:[#allocation18_spill] sm:$0xff] }
 0x2c5   : > { %11536 = vmatmul.msk.bf16.gmra.mxu1 %vm428_vm0, %v17335_v38 }
 0x2c6   : > { %v2449_v37 = vpop.f32.mrf.mxu3 }
 0x2c7   : > { %v14213_v4 = vadd.f32 %v2449_v37, %v17336_v52  ;;  %v4969_v37 = vld [vmem:[#allocation2 + $0xc0] sm:$0xe]  ;;  %v12326_v52 = vld [vmem:[#allocation2 + $0xb8] sm:$0xf] }
 0x2c8   : > { %v11505_v32 = vrot.slane %v4969_v37, 9 }
 0x2ca   : > { %v14215_v16 = vpop.f32.mrf.mxu1  ;;  %v5120_v44 = vsel %vm12535_vm13, %v11505_v32, %v5119_v13 }
 0x2cb   : > { %17337 = vst [vmem:[#allocation42_spill] sm:$0xff] %v14215_v16  ;;  %v2281_v16 = vrot.slane %v12326_v52, 5  ;;  %v5168_v61 = vunpack.c.l.b16 %v5120_v44  ;;  %v17343_v44 = vld [vmem:[#allocation22_spill] sm:$0xff] }
 0x2cd   : > { %v2283_v37 = vrot.slane %v2281_v16, 4 }
 0x2ce   : > { %v2451_v46 = vpop.f32.mrf.mxu3 }
 0x2cf   : > { %v14222_v51 = vadd.f32 %v2451_v46, %v17338_v8  ;;  %v11106_v8 = vrot.slane %v2138_v20, 9  ;;  %v2285_v22 = vsel %vm12535_vm13, %v2283_v37, %v2284_v10  ;;  %v17350_v37 = vld [vmem:[#allocation25_spill] sm:$0xff] }
 0x2d0   : > { %v2326_v19 = vunpack.c.l.b16 %v2285_v22  ;;  %v12115_v22 = vld [vmem:[#allocation2 + $0x18] sm:$0xff] }
 0x2d1   : > { %v2282_v32 = vsel %vm12535_vm13, %v11106_v8, %v2281_v16 }
 0x2d2   : > { %v14225_v38 = vpop.f32.mrf.mxu1  ;;  %v2325_v13 = vunpack.c.l.b16 %v2282_v32 }
 0x2d3   : > { %17339 = vst [vmem:[#allocation16_spill] sm:$0xff] %v14225_v38  ;;  %11145 = vmatmul.msk.bf16.gmra.mxu3 %vm428_vm0, %v2341_v1  ;;  %v14238_v1 = vpack.c.b16 %v5169_v40, %v5168_v61  ;;  %v17346_v61 = vld [vmem:[#allocation54_spill] sm:$0xff] }
 0x2d4   : > { %v2342_v62 = vpack.c.b16 %v2326_v19, %v2325_v13  ;;  %v17352_v13 = vld [vmem:[#allocation58_spill] sm:$0xff] }
 0x2d5   : > { %11537 = vmatmul.msk.bf16.gmra.mxu1 %vm428_vm0, %v17340_v12 }
 0x2d6   : > { %v2454_v46 = vpop.f32.mrf.mxu3 }
 0x2d7   : > { %v14236_v52 = vadd.f32 %v2454_v46, %v17341_v5  ;;  %v17347_v46 = vld [vmem:[#allocation23_spill] sm:$0xff] }
 0x2da   : > { %v14240_v38 = vpop.f32.mrf.mxu1 }
 0x2db   : > { %17342 = vst [vmem:[#allocation18_spill] sm:$0xff] %v14240_v38 }
 0x2de   : > { %v2456_v12 = vpop.f32.mrf.mxu3 }
 0x2df   : > { %v14247_v3 = vadd.f32 %v2456_v12, %v17343_v44  ;;  %v17353_v12 = vld [vmem:[#allocation27_spill] sm:$0xff] }
 0x2e1   : > { %17344 = vst [vmem:[#allocation46_spill] sm:$0xff] %v14247_v3 }
 0x2e2   : > { %v14249_v20 = vpop.f32.mrf.mxu1 }
 0x2e3   : > { %17345 = vst [vmem:[#allocation20_spill] sm:$0xff] %v14249_v20  ;;  %11146 = vmatmul.msk.bf16.gmra.mxu3 %vm428_vm0, %v2342_v62 }
 0x2e5   : > { %11538 = vmatmul.msk.bf16.gmra.mxu1 %vm428_vm0, %v17346_v61  ;;  %v12161_v61 = vld [vmem:[%s17190_s5 + $0x10] sm:$0xff] }
 0x2e6   : > { %v2459_v40 = vpop.f32.mrf.mxu3  ;;  %6593 = vmatpush.bf16.msra.mxu2 %v12161_v61  ;;  %v17359_v61 = vld [vmem:[#allocation32_spill] sm:$0xff] }
 0x2e7   : > { %v14255_v16 = vadd.f32 %v2459_v40, %v17347_v46  ;;  %v17355_v46 = vld [vmem:[#allocation29_spill] sm:$0xff] }
 0x2e9   : > { %17348 = vst [vmem:[#allocation22_spill] sm:$0xff] %v14255_v16 }
 0x2ea   : > { %v14257_v8 = vpop.f32.mrf.mxu1 }
 0x2eb   : > { %17349 = vst [vmem:[#allocation54_spill] sm:$0xff] %v14257_v8 }
 0x2ee   : > { %v2461_v10 = vpop.f32.mrf.mxu3 }
 0x2ef   : > { %v14260_v5 = vadd.f32 %v2461_v10, %v17350_v37 }
 0x2f1   : > { %17351 = vst [vmem:[#allocation23_spill] sm:$0xff] %v14260_v5  ;;  %v17404_v5 = vld [vmem:[#allocation41_spill] sm:$0xff] }
 0x2f2   : > { %v14262_v32 = vpop.f32.mrf.mxu1 }
 0x2f3   : > { %11435 = vmatmul.msk.bf16.vlgmr.msra.gmra.mxu3 %vm428_vm0, %v12115_v22  ;;  %v12116_v22 = vld [vmem:[#allocation2 + $0x24] sm:$0xff] }
 0x2f5   : > { %11539 = vmatmul.msk.bf16.gmra.mxu1 %vm428_vm0, %v17352_v13 }
 0x2f6   : > { %v2464_v19 = vpop.f32.mrf.mxu3 }
 0x2f7   : > { %v14268_v44 = vadd.f32 %v2464_v19, %v17353_v12  ;;  %v17357_v19 = vld [vmem:[#allocation31_spill] sm:$0xff] }
 0x2f9   : > { %17354 = vst [vmem:[#allocation25_spill] sm:$0xff] %v14268_v44 }
 0x2fa   : > { %v14270_v62 = vpop.f32.mrf.mxu1 }
 0x2fe   : > { %v2466_v40 = vpop.f32.mrf.mxu3 }
 0x2ff   : > { %v14276_v10 = vadd.f32 %v2466_v40, %v17355_v46  ;;  %v12117_v46 = vld [vmem:[#allocation2 + $0x30] sm:$0xff] }
 0x301   : > { %17356 = vst [vmem:[#allocation58_spill] sm:$0xff] %v14276_v10 }
 0x302   : > { %v14278_v37 = vpop.f32.mrf.mxu1 }
 0x303   : > { %11436 = vmatmul.msk.bf16.gmra.mxu3 %vm428_vm0, %v12116_v22 }
 0x305   : > { %11540 = vmatmul.msk.bf16.gmra.mxu1 %vm428_vm0, %v13957_v35  ;;  %v17361_v35 = vld [vmem:[#allocation34_spill] sm:$0xff] }
 0x306   : > { %v2469_v13 = vpop.f32.mrf.mxu3 }
 0x307   : > { %v14284_v12 = vadd.f32 %v2469_v13, %v17357_v19  ;;  %v14299_v13 = vpop.f32.mrf.mxu0 }
 0x309   : > { %17358 = vst [vmem:[#allocation27_spill] sm:$0xff] %v14284_v12  ;;  %v17378_v12 = vld [vmem:[#allocation75_spill] sm:$0xff] }
 0x30a   : > { %v14286_v20 = vpop.f32.mrf.mxu1 }
 0x30e   : > { %v2471_v8 = vpop.f32.mrf.mxu3 }
 0x30f   : > { %v14289_v38 = vadd.f32 %v2471_v8, %v17359_v61  ;;  %v14308_v14 = vpop.f32.mrf.mxu0 }
 0x311   : > { %17360 = vst [vmem:[#allocation29_spill] sm:$0xff] %v14289_v38 }
 0x312   : > { %v14291_v40 = vpop.f32.mrf.mxu1 }
 0x313   : > { %11437 = vmatmul.msk.bf16.gmra.mxu3 %vm428_vm0, %v12117_v46  ;;  %v17365_v46 = vld [vmem:[#allocation38_spill] sm:$0xff] }
 0x315   : > { %11541 = vmatmul.msk.bf16.gmra.mxu1 %vm428_vm0, %v13991_v26 }
 0x316   : > { %v2474_v22 = vpop.f32.mrf.mxu3 }
 0x317   : > { %v14297_v42 = vadd.f32 %v2474_v22, %v17361_v35  ;;  %v14318_v58 = vpop.f32.mrf.mxu0 }
 0x319   : > { %17362 = vst [vmem:[#allocation31_spill] sm:$0xff] %v14297_v42 }
 0x31a   : > { %v14301_v19 = vpop.f32.mrf.mxu1 }
 0x31e   : > { %v2476_v7 = vpop.f32.mrf.mxu3 }
 0x31f   : > { %v14304_v8 = vadd.f32 %v2476_v7, %v17363_v31  ;;  %v17367_v7 = vld [vmem:[#allocation40_spill] sm:$0xff] }
 0x321   : > { %17364 = vst [vmem:[#allocation32_spill] sm:$0xff] %v14304_v8 }
 0x322   : > { %v14306_v61 = vpop.f32.mrf.mxu1 }
 0x323   : > { %11438 = vmatmul.msk.bf16.gmra.mxu3 %vm428_vm0, %v12118_v11  ;;  %v12119_v11 = vld [vmem:[#allocation2 + $0x48] sm:$0xff] }
 0x325   : > { %11542 = vmatmul.msk.bf16.gmra.mxu1 %vm428_vm0, %v13998_v57 }
 0x326   : > { %v2479_v26 = vpop.f32.mrf.mxu3 }
 0x327   : > { %v14314_v22 = vadd.f32 %v2479_v26, %v17365_v46  ;;  %v14330_v26 = vpop.f32.mrf.mxu0  ;;  %v17369_v46 = vld [vmem:[#allocation65_spill] sm:$0xff] }
 0x329   : > { %17366 = vst [vmem:[#allocation34_spill] sm:$0xff] %v14314_v22 }
 0x32a   : > { %v14316_v35 = vpop.f32.mrf.mxu1 }
 0x32e   : > { %v2481_v31 = vpop.f32.mrf.mxu3 }
 0x32f   : > { %v14321_v8 = vadd.f32 %v2481_v31, %v17367_v7  ;;  %v14337_v31 = vpop.f32.mrf.mxu2  ;;  %v14342_v38 = vpop.f32.mrf.mxu0 }
 0x330   : > { %17372 = vst [vmem:[#allocation65_spill] sm:$0xff] %v14342_v38 }
 0x331   : > { %17368 = vst [vmem:[#allocation36_spill] sm:$0xff] %v14321_v8 }
 0x332   : > { %v14325_v42 = vpop.f32.mrf.mxu1 }
 0x333   : > { %11439 = vmatmul.msk.bf16.gmra.mxu3 %vm428_vm0, %v12119_v11 }
 0x335   : > { %11543 = vmatmul.msk.bf16.gmra.mxu1 %vm428_vm0, %v14014_v21 }
 0x336   : > { %v2484_v57 = vpop.f32.mrf.mxu3 }
 0x337   : > { %v14333_v22 = vadd.f32 %v2484_v57, %v17369_v46  ;;  %v14347_v21 = vpop.f32.mrf.mxu2 }
 0x339   : > { %17370 = vst [vmem:[#allocation38_spill] sm:$0xff] %v14333_v22 }
 0x33a   : > { %v14335_v50 = vpop.f32.mrf.mxu1 }
 0x33e   : > { %v2486_v7 = vpop.f32.mrf.mxu3 }
 0x33f   : > { %v14340_v8 = vadd.f32 %v2486_v7, %v13831_v24  ;;  %v14356_v24 = vpop.f32.mrf.mxu0  ;;  %v14358_v7 = vpop.f32.mrf.mxu2 }
 0x340   : > { %17376 = vst [vmem:[#allocation100_spill] sm:$0xff] %v14356_v24 }
 0x341   : > { %17371 = vst [vmem:[#allocation40_spill] sm:$0xff] %v14340_v8 }
 0x342   : > { %v14344_v11 = vpop.f32.mrf.mxu1  ;;  %17377 = vst [vmem:[#allocation101_spill] sm:$0xff] %v14358_v7 }
 0x343   : > { %17373 = vst [vmem:[#allocation97_spill] sm:$0xff] %v14344_v11  ;;  %11440 = vmatmul.msk.bf16.gmra.mxu3 %vm428_vm0, %v12120_v6  ;;  %v12121_v6 = vld [vmem:[#allocation2 + $0x60] sm:$0xff] }
 0x345   : > { %11544 = vmatmul.msk.bf16.gmra.mxu1 %vm428_vm0, %v14047_v41 }
 0x346   : > { %v2489_v57 = vpop.f32.mrf.mxu3 }
 0x347   : > { %v14352_v46 = vadd.f32 %v2489_v57, %v13878_v28  ;;  %v14368_v28 = vpop.f32.mrf.mxu0 }
 0x348   : > { %17381 = vst [vmem:[#allocation103_spill] sm:$0xff] %v14368_v28  ;;  %v12123_v28 = vld [vmem:[#allocation2 + $0x78] sm:$0xff] }
 0x349   : > { %17374 = vst [vmem:[#allocation98_spill] sm:$0xff] %v14352_v46  ;;  %v14373_v46 = vpop.f32.mrf.mxu2 }
 0x34a   : > { %v14354_v22 = vpop.f32.mrf.mxu1  ;;  %17383 = vst [vmem:[#allocation105_spill] sm:$0xff] %v14373_v46 }
 0x34b   : > { %17375 = vst [vmem:[#allocation99_spill] sm:$0xff] %v14354_v22 }
 0x34e   : > { %v2491_v8 = vpop.f32.mrf.mxu3 }
 0x34f   : > { %v14361_v55 = vadd.f32 %v2491_v8, %v17378_v12  ;;  %v14377_v8 = vpop.f32.mrf.mxu0 }
 0x350   : > { %17385 = vst [vmem:[#allocation107_spill] sm:$0xff] %v14377_v8 }
 0x351   : > { %17379 = vst [vmem:[#allocation75_spill] sm:$0xff] %v14361_v55 }
 0x352   : > { %v14363_v10 = vpop.f32.mrf.mxu1 }
 0x353   : > { %17380 = vst [vmem:[#allocation102_spill] sm:$0xff] %v14363_v10  ;;  %11441 = vmatmul.msk.bf16.gmra.mxu3 %vm428_vm0, %v12121_v6  ;;  %v5463_v6 = vld [vmem:[#allocation3 + $0xc] sm:$0x1] }
 0x355   : > { %11545 = vmatmul.msk.bf16.gmra.mxu1 %vm428_vm0, %v14238_v1  ;;  %v17387_v1 = vmov 0 }
 0x356   : > { %v2494_v41 = vpop.f32.mrf.mxu3  ;;  %v17388_v1 = vsel %vm14384_vm7, 4294967295, %v17387_v1 }
 0x357   : > { %v14371_v57 = vadd.f32 %v2494_v41, %v13978_v60  ;;  %17389 = vst [vmem:[#allocation109_spill] sm:$0xff] %v17388_v1  ;;  %v17390_v60 = vmov 0   ;;  %v12122_v41 = vld [vmem:[#allocation2 + $0x6c] sm:$0xff] }
 0x358   : > { %5450 = vst.msk [vmem:[#allocation3] sm:$0xf] %vm5449_vm1, %v17390_v60 }
 0x359   : > { %17382 = vst [vmem:[#allocation104_spill] sm:$0xff] %v14371_v57  ;;  %v5464_v57 = vsel %vm14384_vm7, 0, %v5463_v6 }
 0x35a   : > { %v14375_v43 = vpop.f32.mrf.mxu1  ;;  %5451 = vst.msk [vmem:[#allocation3 + $0x4] sm:$0xf] %vm5449_vm1, %v17390_v60 }
 0x35b   : > { %17384 = vst [vmem:[#allocation106_spill] sm:$0xff] %v14375_v43  ;;  %v5518_v43 = vld [vmem:[#allocation3 + $0x14] sm:$0x1] }
 0x35c   : > { %5465 = vst [vmem:[#allocation3 + $0xc] sm:$0x1] %v5464_v57  ;;  %v14410_v57 = vpop.f32.mrf.mxu0  ;;  %v5519_v44 = vsel %vm14414_vm3, 0, %v5518_v43 }
 0x35d   : > { %5453 = vst.msk [vmem:[#allocation3 + $0x8] sm:$0x1] %vm5452_vm2, %v17390_v60 }
 0x35e   : > { %v2496_v12 = vpop.f32.mrf.mxu3  ;;  %5455 = vst.msk [vmem:[#allocation3 + $0xcc] sm:$0xf] %vm5449_vm1, %v17390_v60 }
 0x35f   : > { %v14380_v55 = vadd.f32 %v2496_v12, %v14017_v9  ;;  %v14394_v9 = vpop.f32.mrf.mxu2  ;;  %5456 = vst.msk [vmem:[#allocation3 + $0xd0] sm:$0xf] %vm5449_vm1, %v17390_v60 }
 0x360   : > { %17391 = vst [vmem:[#allocation110_spill] sm:$0xff] %v14394_v9 }
 0x361   : > { %17386 = vst [vmem:[#allocation108_spill] sm:$0xff] %v14380_v55 }
 0x362   : > { %v14403_v12 = vpop.f32.mrf.mxu1  ;;  %5457 = vst.msk [vmem:[#allocation3 + $0xd4] sm:$0x1] %vm5452_vm2, %v17390_v60  ;;  %v17399_v60 = vld [vmem:[#allocation10_spill] sm:$0xff] }
 0x363   : > { %11442 = vmatmul.msk.bf16.gmra.mxu3 %vm428_vm0, %v12122_v41  ;;  %17392 = vst [vmem:[#allocation111_spill] sm:$0xff] %v14403_v12  ;;  %v17395_v41 = vmov 0  ;;  %v2818_v8 = vadd.f32 %v17399_v60, %v14074_v59  ;;  %v749_v59 = vld [vmem:[#allocation2 + $0xd4] sm:$0x1]  ;;  %v17406_v60 = vld [vmem:[#allocation11_spill] sm:$0xff] }
 0x364   : > { %17394 = vst [vmem:[#allocation113_spill] sm:$0xff] %v14410_v57  ;;  %v17396_v41 = vsel %vm14414_vm3, 4294967295, %v17395_v41  ;;  %v14433_v54 = vpop.f32.mrf.mxu0 }
 0x365   : > { %17397 = vst [vmem:[#allocation114_spill] sm:$0xff] %v17396_v41  ;;  %v3500_v43 = vadd.f32 %v17404_v5, %v2818_v8 }
 0x366   : > { %v2499_v6 = vpop.f32.mrf.mxu3  ;;  %5520 = vst [vmem:[#allocation3 + $0x14] sm:$0x1] %v5519_v44  ;;  %v693_v44 = vld [vmem:[#allocation2 + $0xcc] sm:$0x1] }
 0x367   : > { %v14408_v55 = vadd.f32 %v2499_v6, %v14043_v27  ;;  %v14420_v12 = vpop.f32.mrf.mxu2  ;;  %v17400_v27 = vld [vmem:[#allocation9_spill] sm:$0xff]  ;;  %v17401_v6 = vld [vmem:[#allocation8_spill] sm:$0xff] }
 0x368   : > { %17398 = vst [vmem:[#allocation115_spill] sm:$0xff] %v14420_v12 }
 0x369   : > { %17393 = vst [vmem:[#allocation112_spill] sm:$0xff] %v14408_v55  ;;  %v2046_v55 = vadd.f32 %v17401_v6, %v17400_v27  ;;  %v694_v6 = vsel %vm12449_vm4, 0, %v693_v44  ;;  %vm14508_vm4 = vmand %vm5449_vm1, %vm696_vm5  ;;  %vm6537_vm5 = vcmask 261120  }
 0x36a   : > { %v14430_v47 = vpop.f32.mrf.mxu1  ;;  %17405 = vst [vmem:[#allocation8_spill] sm:$0xff] %v14433_v54 }
 0x36b   : > { %v2505_v9 = vadd.f32 %v14087_v56, %v2046_v55  ;;  %17403 = vst [vmem:[#allocation9_spill] sm:$0xff] %v14430_v47  ;;  %v4319_v55 = vld [vmem:[#allocation2 + $0xd0] sm:$0xf] }
 0x36c   : > { %v5466_v56 = vld [vmem:[#allocation3 + $0x18] sm:$0x1]  ;;  %695 = vst [vmem:[#allocation2 + $0xcc] sm:$0x1] %v694_v6  ;;  %v4691_v5 = vshll.u32 %v4319_v55, 16  ;;  %v4695_v8 = vshrl.u32 %v4319_v55, 16 }
 0x36d   : > { %v2819_v12 = vadd.f32 %v17406_v60, %v2505_v9 }
 0x36e   : > { %v2501_v57 = vpop.f32.mrf.mxu3  ;;  %v14446_v60 = vrot.slane %v4691_v5, 5  ;;  %v4697_v44 = vrot.slane %v4695_v8, 4  ;;  %v17413_v8 = vld [vmem:[#allocation12_spill] sm:$0xff] }
 0x36f   : > { %v14427_v10 = vadd.f32 %v2501_v57, %v14058_v53  ;;  %v750_v57 = vsel %vm12462_vm6, 0, %v749_v59  ;;  %v14444_v54 = vpop.f32.mrf.mxu2  ;;  %v17411_v59 = vld [vmem:[#allocation44_spill] sm:$0xff] }
 0x370   : > { %17410 = vst [vmem:[#allocation41_spill] sm:$0xff] %v14444_v54  ;;  %v3501_v27 = vadd.f32 %v17411_v59, %v2819_v12  ;;  %v4698_v6 = vor.u32 %v4697_v44, %v14446_v60 }
 0x371   : > { %17402 = vst [vmem:[#allocation10_spill] sm:$0xff] %v14427_v10  ;;  %v17409_v10 = vld [vmem:[#allocation50_spill] sm:$0xff] }
 0x372   : > { %v3926_v47 = vadd.f32 %v17409_v10, %v3500_v43  ;;  %751 = vst [vmem:[#allocation2 + $0xd4] sm:$0x1] %v750_v57  ;;  %v14453_v10 = vld [vmem:[%s17189_s4] ss:$0 sm:$0xff]  ;;  %v14455_v43 = vpop.f32.mrf.mxu1  ;;  %v5126_v57 = vrot.slane %v4319_v55, 5  ;;  %v14467_v55 = vpop.f32.mrf.mxu0 }
 0x373   : > { %11443 = vmatmul.msk.bf16.gmra.mxu3 %vm428_vm0, %v12123_v28  ;;  %v5467_v28 = vsel %vm14384_vm7, 0, %v5466_v56  ;;  %17412 = vst [vmem:[#allocation11_spill] sm:$0xff] %v14455_v43  ;;  %v4970_v56 = vld [vmem:[#allocation2 + $0xcc] sm:$0xe] }
 0x374   : > { %5468 = vst [vmem:[#allocation3 + $0x18] sm:$0x1] %v5467_v28  ;;  %v11506_v5 = vrot.slane %v4970_v56, 9  ;;  %v2820_v28 = vadd.f32 %v17413_v8, %v14103_v2  ;;  %v4318_v43 = vld [vmem:[#allocation2 + $0xcc] sm:$0xf]  ;;  %v5128_v44 = vrot.slane %v5126_v57, 4 }
 0x375   : > { %17415 = vst [vmem:[#allocation5_spill] sm:$0xff] %v14467_v55  ;;  %v4682_v16 = vshrl.u32 %v4318_v43, 16  ;;  %v17416_v55 = vld [vmem:[#allocation47_spill] sm:$0xff] }
 0x376   : > { %v4161_v46 = vpop.f32.mrf.mxu3  ;;  %v3502_v7 = vadd.f32 %v17416_v55, %v2820_v28  ;;  %v12163_v28 = vld [vmem:[%s17190_s5 + $0x20] sm:$0xff] }
 0x377   : > { %v4241_v9 = vadd.f32 %v4161_v46, %v3926_v47  ;;  %v12164_v47 = vld [vmem:[%s17190_s5 + $0x28] sm:$0xff]  ;;  %v5521_v46 = vld [vmem:[#allocation3 + $0x20] sm:$0x1]  ;;  %v5924_v55 = vld [vmem:[#allocation3 + $0xc] sm:$0xf] }
 0x378   : > { %7183 = vmatpush.bf16.msrb.mxu0 %v12164_v47  ;;  %v14472_v47 = vpop.f32.mrf.mxu2 }
 0x379   : > { %v4923_v53 = vadd.f32 %v14106_v15, %v4241_v9  ;;  %v5522_v15 = vsel %vm14414_vm3, 0, %v5521_v46  ;;  %v17414_v9 = vld [vmem:[#allocation55_spill] sm:$0xff]  ;;  %v4320_v22 = vld [vmem:[#allocation2 + $0xd4] sm:$0x1]  ;;  %v4699_v46 = vrot.slane %v4698_v6, 4 }
 0x37a   : > { %v3927_v59 = vadd.f32 %v17414_v9, %v3501_v27  ;;  %5523 = vst [vmem:[#allocation3 + $0x20] sm:$0x1] %v5522_v15  ;;  %v4701_v24 = vshll.u32 %v4320_v22, 16  ;;  %v5129_v2 = vrot.slane %v4320_v22, 5  ;;  %v4684_v9 = vrot.slane %v4682_v16, 4 }
 0x37b   : > { %v5349_v12 = vadd.f32 %v14262_v32, %v4923_v53  ;;  %v4685_v32 = vshll.u32 %v4318_v43, 16  ;;  %v5127_v53 = vsel %vm12535_vm13, %v11506_v5, %v5126_v57  ;;  %v12124_v5 = vld [vmem:[#allocation2 + $0x84] sm:$0xff] }
 0x37c   : > { %v4703_v15 = vrot.slane %v4701_v24, 5  ;;  %v5170_v43 = vunpack.c.l.b16 %v5127_v53  ;;  %v17419_v53 = vld [vmem:[#allocation59_spill] sm:$0xff]  ;;  %7184 = vmatpush.bf16.msrb.mxu0 %v12163_v28  ;;  %v5469_v28 = vld [vmem:[#allocation3 + $0x24] sm:$0x1] }
 0x37d   : > { %v5385_v54 = vadd.f32 %v14453_v10, %v5349_v12  ;;  %v4687_v11 = vrot.slane %v4685_v32, 5  ;;  %v5130_v12 = vsel %vm12535_vm13, %v5128_v44, %v5129_v2  ;;  %v17417_v44 = vld [vmem:[#allocation13_spill] sm:$0xff]  ;;  %v5515_v2 = vld [vmem:[#allocation3 + $0x8] sm:$0x1] }
 0x37e   : > { %v4163_v56 = vpop.f32.mrf.mxu3  ;;  %v5171_v3 = vunpack.c.l.b16 %v5130_v12  ;;  %v12206_v12 = vld [vmem:[%s17190_s5 + $0x78] sm:$0xff] }
 0x37f   : > { %v5417_v8 = vmax.f32 %v5385_v54, 0.0  ;;  %v4242_v27 = vadd.f32 %v4163_v56, %v3927_v59  ;;  %v4688_v6 = vor.u32 %v4687_v11, %v4684_v9  ;;  %v4704_v54 = vsel %vm12500_vm9, %v4699_v46, %v4703_v15  ;;  %v14487_v11 = vpop.f32.mrf.mxu1  ;;  %v12182_v15 = vld [vmem:[%s17190_s5 + $0x38] sm:$0xff] }
 0x380   : > { %17418 = vst [vmem:[#allocation6_spill] sm:$0xff] %v14487_v11  ;;  %v4745_v32 = vunpack.c.l.b16 %v4704_v54  ;;  %v3928_v56 = vadd.f32 %v17419_v53, %v3502_v7  ;;  %v5187_v46 = vpack.c.b16 %v5171_v3, %v5170_v43  ;;  %v12160_v3 = vld [vmem:[%s17190_s5 + $0x8] sm:$0xff]  ;;  %v6904_v7 = vld [vmem:[#allocation3] sm:$0xe]  ;;  %v14517_v54 = vpop.f32.mrf.mxu0  ;;  %7481 = vmatpush.bf16.msrb.mxu1 %v12182_v15  ;;  %v17423_v53 = vld [vmem:[#allocation49_spill] sm:$0xff] }
 0x381   : > { %v5569_v38 = vpack.c.bf16 %v5417_v8, %v5417_v8  ;;  %v4924_v57 = vadd.f32 %v14126_v18, %v4242_v27  ;;  %v4689_v24 = vrot.slane %v4688_v6, 4  ;;  %v2821_v18 = vadd.f32 %v17417_v44, %v14116_v63  ;;  %17422 = vst [vmem:[#allocation50_spill] sm:$0xff] %v14517_v54  ;;  %6821 = vmatpush.bf16.msrb.mxu3 %v12160_v3 }
 0x382   : > { %11546 = vmatmul.msk.bf16.gmra.mxu1 %vm428_vm0, %v5187_v46  ;;  %v5470_v3 = vsel %vm14384_vm7, 0, %v5469_v28 }
 0x383   : > { %v5602_v16 = vshrl.u32 %v5569_v38, 16  ;;  %v5605_v22 = vshll.u32 %v5569_v38, 16  ;;  %v5350_v59 = vadd.f32 %v14270_v62, %v4924_v57  ;;  %11444 = vmatmul.msk.bf16.gmra.mxu3 %vm428_vm0, %v12124_v5  ;;  %v5460_v38 = vld [vmem:[#allocation3] sm:$0x1]  ;;  %v14490_v62 = vld [vmem:[#allocation3 + $0x4] sm:$0xf]  ;;  %v4694_v9 = vsel %vm12500_vm9, %v4689_v24, %v14446_v60 }
 0x384   : > { %v5461_v63 = vsel %vm14384_vm7, 0, %v5460_v38  ;;  %v4744_v60 = vunpack.c.l.b16 %v4694_v9  ;;  %v5516_v57 = vsel %vm14414_vm3, 0, %v5515_v2  ;;  %v6098_v5 = vshll.u32 %v14490_v62, 16  ;;  %v17424_v9 = vld [vmem:[#allocation14_spill] sm:$0xff]  ;;  %5471 = vst [vmem:[#allocation3 + $0x24] sm:$0x1] %v5470_v3 }
 0x385   : > { %v14492_v8 = vrot.slane %v5602_v16, 7  ;;  %v5386_v27 = vadd.f32 %v14453_v10, %v5350_v59  ;;  %5462 = vst [vmem:[#allocation3] sm:$0x1] %v5461_v63  ;;  %v6102_v6 = vshrl.u32 %v14490_v62, 16  ;;  %v3503_v46 = vadd.f32 %v17423_v53, %v2821_v18 }
 0x386   : > { %v4166_v43 = vpop.f32.mrf.mxu3  ;;  %5517 = vst [vmem:[#allocation3 + $0x8] sm:$0x1] %v5516_v57  ;;  %v4761_v44 = vpack.c.b16 %v4745_v32, %v4744_v60  ;;  %v14521_v38 = vrot.slane %v6098_v5, 5  ;;  %v2822_v63 = vadd.f32 %v17424_v9, %v14135_v29  ;;  %v11663_v18 = vrot.slane %v6904_v7, 9  ;;  %v17426_v29 = vld [vmem:[#allocation15_spill] sm:$0xff]  ;;  %v17427_v57 = vld [vmem:[#allocation62_spill] sm:$0xff] }
 0x387   : > { %v5607_v16 = vor.u32 %v5605_v22, %v14492_v8  ;;  %v5418_v59 = vmax.f32 %v5386_v27, 0.0  ;;  %v4243_v24 = vadd.f32 %v4166_v43, %v3928_v56  ;;  %v6104_v2 = vrot.slane %v6102_v6, 4  ;;  %v14528_v56 = vpop.f32.mrf.mxu2  ;;  %v5928_v43 = vld [vmem:[#allocation3 + $0x14] sm:$0x1] }
 0x388   : > { %17425 = vst [vmem:[#allocation44_spill] sm:$0xff] %v14528_v56  ;;  %11490 = vmatmul.msk.bf16.gmra.mxu0 %vm428_vm0, %v4761_v44  ;;  %v6954_v27 = vrot.slane %v14490_v62, 5  ;;  %v2823_v15 = vadd.f32 %v17426_v29, %v14148_v23  ;;  %v5608_v62 = vrot.slane %v14492_v8, 4  ;;  %v3929_v5 = vadd.f32 %v17427_v57, %v3503_v46  ;;  %v5524_v23 = vld [vmem:[#allocation3 + $0x2c] sm:$0x1]  ;;  %v14549_v44 = vpop.f32.mrf.mxu1  ;;  %v17429_v9 = vld [vmem:[#allocation52_spill] sm:$0xff] }
 0x389   : > { %v5925_v11 = vsel %vm14508_vm4, %v5607_v16, %v5924_v55  ;;  %v5570_v54 = vpack.c.bf16 %v5418_v59, %v5418_v59  ;;  %v4925_v22 = vadd.f32 %v14145_v36, %v4243_v24  ;;  %v6105_v32 = vor.u32 %v6104_v2, %v14521_v38  ;;  %v12184_v36 = vld [vmem:[%s17190_s5 + $0x48] sm:$0xff]  ;;  %17428 = vst [vmem:[#allocation12_spill] sm:$0xff] %v14549_v44 }
 0x38a   : > { %5926 = vst [vmem:[#allocation3 + $0xc] sm:$0xf] %v5925_v11  ;;  %v12181_v11 = vld [vmem:[%s17190_s5 + $0x30] sm:$0xff]  ;;  %v6956_v24 = vrot.slane %v6954_v27, 4  ;;  %8147 = vmatpush.bf16.msrb.mxu2 %v12184_v36  ;;  %v5525_v28 = vsel %vm14414_vm3, 0, %v5524_v23  ;;  %v6955_v46 = vsel %vm12535_vm13, %v11663_v18, %v6954_v27  ;;  %v14554_v23 = vpop.f32.mrf.mxu0 }
 0x38b   : > { %v5610_v55 = vshrl.u32 %v5570_v54, 16  ;;  %v5351_v60 = vadd.f32 %v14278_v37, %v4925_v22  ;;  %v5613_v7 = vshll.u32 %v5570_v54, 16  ;;  %v6106_v6 = vrot.slane %v6105_v32, 4  ;;  %7482 = vmatpush.bf16.msrb.mxu1 %v12181_v11  ;;  %5526 = vst [vmem:[#allocation3 + $0x2c] sm:$0x1] %v5525_v28  ;;  %v12125_v27 = vld [vmem:[#allocation2 + $0x90] sm:$0xff] }
 0x38c   : > { %v6036_v59 = vld [vmem:[#allocation3] sm:$0xf]  ;;  %v3504_v22 = vadd.f32 %v17429_v9, %v2822_v63 }
 0x38d   : > { %v5612_v16 = vrot.slane %v5610_v55, 7  ;;  %v5387_v37 = vadd.f32 %v14453_v10, %v5351_v60  ;;  %v6072_v8 = vld [vmem:[#allocation3 + $0x8] sm:$0x1]  ;;  %v6089_v54 = vshrl.u32 %v6036_v59, 16  ;;  %v6092_v2 = vshll.u32 %v6036_v59, 16 }
 0x38e   : > { %v4168_v53 = vpop.f32.mrf.mxu3  ;;  %v6108_v11 = vshll.u32 %v6072_v8, 16  ;;  %v6957_v57 = vrot.slane %v6072_v8, 5 }
 0x38f   : > { %v5615_v32 = vor.u32 %v5613_v7, %v5612_v16  ;;  %v5617_v3 = vrot.slane %v5612_v16, 4  ;;  %v5419_v29 = vmax.f32 %v5387_v37, 0.0  ;;  %v4244_v55 = vadd.f32 %v4168_v53, %v3929_v5  ;;  %9522 = vmatpush.bf16.msra.mxu1 %v12206_v12 }
 0x390   : > { %v6091_v60 = vrot.slane %v6089_v54, 4  ;;  %v6094_v36 = vrot.slane %v6092_v2, 5  ;;  %v6110_v5 = vrot.slane %v6108_v11, 5  ;;  %v6958_v16 = vsel %vm12535_vm13, %v6956_v24, %v6957_v57  ;;  %v17432_v2 = vld [vmem:[#allocation53_spill] sm:$0xff]  ;;  %v5472_v24 = vld [vmem:[#allocation3 + $0x30] sm:$0x1] }
 0x391   : > { %v5616_v56 = vsel %vm12554_vm15, %v5608_v62, %v5615_v32  ;;  %v5929_v59 = vsel %vm14384_vm7, %v5617_v3, %v5928_v43  ;;  %v5571_v18 = vpack.c.bf16 %v5419_v29, %v5419_v29  ;;  %v4926_v63 = vadd.f32 %v14163_v0, %v4244_v55  ;;  %v14566_v43 = vpop.f32.mrf.mxu2  ;;  %v17431_v0 = vld [vmem:[#allocation17_spill] sm:$0xff] }
 0x392   : > { %5927 = vst.msk [vmem:[#allocation3 + $0x10] sm:$0xf] %vm5449_vm1, %v5616_v56  ;;  %v6095_v7 = vor.u32 %v6094_v36, %v6091_v60  ;;  %v7069_v37 = vunpack.c.l.b16 %v6955_v46  ;;  %v7070_v62 = vunpack.c.l.b16 %v6958_v16  ;;  %v2824_v8 = vadd.f32 %v17431_v0, %v14166_v25  ;;  %v5931_v29 = vld [vmem:[#allocation3 + $0x18] sm:$0xf]  ;;  %v17433_v25 = vld [vmem:[#allocation66_spill] sm:$0xff] }
 0x393   : > { %5930 = vst [vmem:[#allocation3 + $0x14] sm:$0x1] %v5929_v59  ;;  %v5619_v28 = vshrl.u32 %v5571_v18, 16  ;;  %v5352_v53 = vadd.f32 %v14286_v20, %v4926_v63  ;;  %11445 = vmatmul.msk.bf16.gmra.mxu3 %vm428_vm0, %v12125_v27  ;;  %v6111_v56 = vsel %vm12500_vm9, %v6106_v6, %v6110_v5  ;;  %v3505_v9 = vadd.f32 %v17432_v2, %v2823_v15  ;;  %v14587_v27 = vpop.f32.mrf.mxu1 }
 0x394   : > { %v6096_v54 = vrot.slane %v6095_v7, 4  ;;  %v5622_v32 = vshll.u32 %v5571_v18, 16  ;;  %v6478_v3 = vunpack.c.l.b16 %v6111_v56  ;;  %v7101_v60 = vpack.c.b16 %v7070_v62, %v7069_v37  ;;  %v17434_v18 = vld [vmem:[#allocation19_spill] sm:$0xff]  ;;  %v17436_v56 = vld [vmem:[#allocation57_spill] sm:$0xff] }
 0x395   : > { %v14573_v46 = vrot.slane %v5619_v28, 7  ;;  %v5388_v20 = vadd.f32 %v14453_v10, %v5352_v53  ;;  %v3930_v36 = vadd.f32 %v17433_v25, %v3504_v22  ;;  %v5473_v6 = vsel %vm14384_vm7, 0, %v5472_v24  ;;  %v6905_v7 = vld [vmem:[#allocation3 + $0xc] sm:$0xe]  ;;  %v17435_v28 = vld [vmem:[#allocation70_spill] sm:$0xff] }
 0x396   : > { %v6101_v55 = vsel %vm12500_vm9, %v6096_v54, %v14521_v38  ;;  %v4171_v11 = vpop.f32.mrf.mxu3  ;;  %5474 = vst [vmem:[#allocation3 + $0x30] sm:$0x1] %v5473_v6  ;;  %v14585_v63 = vadd.f32 %v17434_v18, %v14179_v39  ;;  %v3931_v53 = vadd.f32 %v17435_v28, %v3505_v9  ;;  %v3506_v2 = vadd.f32 %v17436_v56, %v2824_v8 }
 0x397   : > { %v5624_v15 = vor.u32 %v5622_v32, %v14573_v46  ;;  %v5420_v57 = vmax.f32 %v5388_v20, 0.0  ;;  %v6477_v59 = vunpack.c.l.b16 %v6101_v55  ;;  %v4245_v38 = vadd.f32 %v4171_v11, %v3930_v36  ;;  %v14595_v32 = vpop.f32.mrf.mxu0 }
 0x398   : > { %11691 = vmatmul.msk.bf16.vlgmr.msrb.gmra.mxu0 %vm6537_vm5, %v7101_v60  ;;  %v5625_v20 = vrot.slane %v14573_v46, 4  ;;  %v11664_v9 = vrot.slane %v6905_v7, 9  ;;  %v5935_v46 = vld [vmem:[#allocation3 + $0x20] sm:$0x1] }
 0x399   : > { %v5932_v22 = vsel %vm14508_vm4, %v5624_v15, %v5931_v29  ;;  %v5572_v5 = vpack.c.bf16 %v5420_v57, %v5420_v57  ;;  %v6509_v16 = vpack.c.b16 %v6478_v3, %v6477_v59  ;;  %v12165_v37 = vld [vmem:[#allocation3 + $0xc] sm:$0xff]  ;;  %v4927_v39 = vadd.f32 %v14181_v49, %v4245_v38  ;;  %v14601_v57 = vpop.f32.mrf.mxu2 }
 0x39a   : > { %v6039_v62 = vld [vmem:[#allocation3 + $0x10] sm:$0xf]  ;;  %5933 = vst [vmem:[#allocation3 + $0x18] sm:$0xf] %v5932_v22  ;;  %v6073_v0 = vld [vmem:[#allocation3 + $0x14] sm:$0x1]  ;;  %11783 = vmatmul.msk.bf16.vlgmr.msrb.gmra.mxu1 %vm6537_vm5, %v12165_v37 }
 0x39b   : > { %v6961_v54 = vrot.slane %v6039_v62, 5  ;;  %v6122_v24 = vshll.u32 %v6039_v62, 16  ;;  %v5627_v29 = vshrl.u32 %v5572_v5, 16  ;;  %11559 = vmatmul.msk.bf16.vlgmr.msra.gmra.mxu2 %vm6537_vm5, %v6509_v16  ;;  %v6038_v3 = vld [vmem:[#allocation3 + $0xc] sm:$0xf]  ;;  %v6126_v55 = vshrl.u32 %v6039_v62, 16 }
 0x39c   : > { %v5353_v60 = vadd.f32 %v14291_v40, %v4927_v39  ;;  %v6964_v25 = vrot.slane %v6073_v0, 5  ;;  %v6113_v36 = vshrl.u32 %v6038_v3, 16  ;;  %v5630_v8 = vshll.u32 %v5572_v5, 16 }
 0x39d   : > { %v6963_v49 = vrot.slane %v6961_v54, 4  ;;  %v5629_v11 = vrot.slane %v5627_v29, 7  ;;  %v6116_v6 = vshll.u32 %v6038_v3, 16  ;;  %v6124_v15 = vrot.slane %v6122_v24, 5  ;;  %v5527_v24 = vld [vmem:[#allocation3 + $0x38] sm:$0x1] }
 0x39e   : > { %v5389_v59 = vadd.f32 %v14453_v10, %v5353_v60  ;;  %v4173_v18 = vpop.f32.mrf.mxu3  ;;  %v6115_v7 = vrot.slane %v6113_v36, 4  ;;  %v6128_v22 = vrot.slane %v6126_v55, 4  ;;  %v6962_v28 = vsel %vm12535_vm13, %v11664_v9, %v6961_v54  ;;  %v12126_v55 = vld [vmem:[#allocation2 + $0x9c] sm:$0xff] }
 0x39f   : > { %v6965_v38 = vsel %vm12535_vm13, %v6963_v49, %v6964_v25  ;;  %v5632_v16 = vor.u32 %v5630_v8, %v5629_v11  ;;  %v5634_v40 = vrot.slane %v5629_v11, 4  ;;  %v4246_v37 = vadd.f32 %v4173_v18, %v3931_v53  ;;  %v14614_v53 = vpop.f32.mrf.mxu1  ;;  %v17437_v8 = vld [vmem:[#allocation73_spill] sm:$0xff]  ;;  %v14623_v18 = vpop.f32.mrf.mxu0 }
 0x3a0   : > { %v5421_v5 = vmax.f32 %v5389_v59, 0.0  ;;  %v6118_v62 = vrot.slane %v6116_v6, 5  ;;  %v6129_v39 = vor.u32 %v6128_v22, %v6124_v15  ;;  %v6132_v56 = vshll.u32 %v6073_v0, 16  ;;  %v17438_v22 = vld [vmem:[#allocation61_spill] sm:$0xff] }
 0x3a1   : > { %v5633_v29 = vsel %vm12554_vm15, %v5625_v20, %v5632_v16  ;;  %v5936_v3 = vsel %vm14384_vm7, %v5634_v40, %v5935_v46  ;;  %v4928_v60 = vadd.f32 %v14201_v45, %v4246_v37  ;;  %v7072_v49 = vunpack.c.l.b16 %v6965_v38  ;;  %v5475_v40 = vld [vmem:[#allocation3 + $0x3c] sm:$0x1] }
 0x3a2   : > { %5934 = vst.msk [vmem:[#allocation3 + $0x1c] sm:$0xf] %vm5449_vm1, %v5633_v29  ;;  %v5573_v54 = vpack.c.bf16 %v5421_v5, %v5421_v5  ;;  %v6119_v9 = vor.u32 %v6118_v62, %v6115_v7  ;;  %v6130_v25 = vrot.slane %v6129_v39, 4  ;;  %v6134_v36 = vrot.slane %v6132_v56, 5  ;;  %v17439_v39 = vld [vmem:[#allocation21_spill] sm:$0xff] }
 0x3a3   : > { %5937 = vst [vmem:[#allocation3 + $0x20] sm:$0x1] %v5936_v3  ;;  %v5354_v0 = vadd.f32 %v14301_v19, %v4928_v60  ;;  %11446 = vmatmul.msk.bf16.gmra.mxu3 %vm428_vm0, %v12126_v55  ;;  %v7071_v20 = vunpack.c.l.b16 %v6962_v28  ;;  %v5528_v11 = vsel %vm14414_vm3, 0, %v5527_v24  ;;  %v3932_v6 = vadd.f32 %v17437_v8, %v3506_v2  ;;  %v5938_v24 = vld [vmem:[#allocation3 + $0x24] sm:$0xf]  ;;  %v14634_v55 = vpop.f32.mrf.mxu2 }
 0x3a4   : > { %v5636_v45 = vshrl.u32 %v5573_v54, 16  ;;  %v6120_v46 = vrot.slane %v6119_v9, 4  ;;  %v6135_v59 = vsel %vm12500_vm9, %v6130_v25, %v6134_v36  ;;  %5529 = vst [vmem:[#allocation3 + $0x38] sm:$0x1] %v5528_v11  ;;  %v3507_v16 = vadd.f32 %v17438_v22, %v14585_v63  ;;  %v17441_v11 = vld [vmem:[#allocation77_spill] sm:$0xff] }
 0x3a5   : > { %v5390_v38 = vadd.f32 %v14453_v10, %v5354_v0  ;;  %v7102_v7 = vpack.c.b16 %v7072_v49, %v7071_v20  ;;  %v6480_v19 = vunpack.c.l.b16 %v6135_v59  ;;  %v5639_v28 = vshll.u32 %v5573_v54, 16  ;;  %v6906_v49 = vld [vmem:[#allocation3 + $0x18] sm:$0xe]  ;;  %v17440_v54 = vld [vmem:[#allocation24_spill] sm:$0xff] }
 0x3a6   : > { %v5638_v37 = vrot.slane %v5636_v45, 7  ;;  %v4176_v5 = vpop.f32.mrf.mxu3  ;;  %v6125_v2 = vsel %vm12500_vm9, %v6120_v46, %v6124_v15  ;;  %v5476_v62 = vsel %vm14384_vm7, 0, %v5475_v40  ;;  %v2826_v56 = vadd.f32 %v17439_v39, %v14193_v34  ;;  %v6040_v46 = vld [vmem:[#allocation3 + $0x18] sm:$0xf] }
 0x3a7   : > { %v5422_v29 = vmax.f32 %v5390_v38, 0.0  ;;  %v4247_v3 = vadd.f32 %v4176_v5, %v3932_v6  ;;  %v6479_v60 = vunpack.c.l.b16 %v6125_v2  ;;  %5477 = vst [vmem:[#allocation3 + $0x3c] sm:$0x1] %v5476_v62  ;;  %v14638_v9 = vadd.f32 %v17440_v54, %v14205_v30 }
 0x3a8   : > { %v5641_v63 = vor.u32 %v5639_v28, %v5638_v37  ;;  %11692 = vmatmul.msk.bf16.gmra.mxu0 %vm6537_vm5, %v7102_v7  ;;  %v3933_v45 = vadd.f32 %v17441_v11, %v3507_v16  ;;  %v5642_v40 = vrot.slane %v5638_v37, 4  ;;  %v14649_v28 = vpop.f32.mrf.mxu1  ;;  %v6137_v5 = vshrl.u32 %v6040_v46, 16 }
 0x3a9   : > { %v5574_v15 = vpack.c.bf16 %v5422_v29, %v5422_v29  ;;  %v4929_v25 = vadd.f32 %v14299_v13, %v4247_v3  ;;  %v6510_v36 = vpack.c.b16 %v6480_v19, %v6479_v60  ;;  %v12166_v0 = vld [vmem:[#allocation3 + $0x18] sm:$0xff]  ;;  %v11665_v13 = vrot.slane %v6906_v49, 9  ;;  %v17442_v19 = vld [vmem:[#allocation64_spill] sm:$0xff]  ;;  %v5942_v29 = vld [vmem:[#allocation3 + $0x2c] sm:$0x1] }
 0x3aa   : > { %v6041_v20 = vld [vmem:[#allocation3 + $0x1c] sm:$0xf]  ;;  %v5939_v34 = vsel %vm14508_vm4, %v5641_v63, %v5938_v24  ;;  %v6074_v8 = vld [vmem:[#allocation3 + $0x20] sm:$0x1]  ;;  %11784 = vmatmul.msk.bf16.gmra.mxu1 %vm6537_vm5, %v12166_v0  ;;  %v3508_v22 = vadd.f32 %v17442_v19, %v2826_v56  ;;  %v6140_v24 = vshll.u32 %v6040_v46, 16  ;;  %v6139_v60 = vrot.slane %v6137_v5, 4  ;;  %v14654_v56 = vpop.f32.mrf.mxu0 }
 0x3ab   : > { %v6968_v6 = vrot.slane %v6041_v20, 5  ;;  %v6146_v59 = vshll.u32 %v6041_v20, 16  ;;  %5940 = vst [vmem:[#allocation3 + $0x24] sm:$0xf] %v5939_v34  ;;  %v5644_v30 = vshrl.u32 %v5574_v15, 16  ;;  %v5355_v38 = vadd.f32 %v14306_v61, %v4929_v25  ;;  %11560 = vmatmul.msk.bf16.gmra.mxu2 %vm6537_vm5, %v6510_v36  ;;  %v12127_v19 = vld [vmem:[#allocation2 + $0xa8] sm:$0xff] }
 0x3ac   : > { %v6971_v16 = vrot.slane %v6074_v8, 5  ;;  %v5647_v62 = vshll.u32 %v5574_v15, 16  ;;  %v6150_v49 = vshrl.u32 %v6041_v20, 16  ;;  %v6142_v0 = vrot.slane %v6140_v24, 5  ;;  %v5530_v46 = vld [vmem:[#allocation3 + $0x44] sm:$0x1] }
 0x3ad   : > { %v6970_v7 = vrot.slane %v6968_v6, 4  ;;  %v5646_v2 = vrot.slane %v5644_v30, 7  ;;  %v5391_v39 = vadd.f32 %v14453_v10, %v5355_v38  ;;  %v6148_v63 = vrot.slane %v6146_v59, 5 }
 0x3ae   : > { %v4178_v61 = vpop.f32.mrf.mxu3  ;;  %v6969_v15 = vsel %vm12535_vm13, %v11665_v13, %v6968_v6  ;;  %v6152_v34 = vrot.slane %v6150_v49, 4  ;;  %v6156_v11 = vshll.u32 %v6074_v8, 16  ;;  %v6143_v8 = vor.u32 %v6142_v0, %v6139_v60  ;;  %v17444_v60 = vld [vmem:[#allocation68_spill] sm:$0xff]  ;;  %v5478_v49 = vld [vmem:[#allocation3 + $0x48] sm:$0x1] }
 0x3af   : > { %v6972_v3 = vsel %vm12535_vm13, %v6970_v7, %v6971_v16  ;;  %v5649_v37 = vor.u32 %v5647_v62, %v5646_v2  ;;  %v5651_v54 = vrot.slane %v5646_v2, 4  ;;  %v5423_v25 = vmax.f32 %v5391_v39, 0.0  ;;  %v14663_v7 = vpop.f32.mrf.mxu2 }
 0x3b0   : > { %v4248_v36 = vadd.f32 %v4178_v61, %v3933_v45  ;;  %v17443_v45 = vld [vmem:[#allocation26_spill] sm:$0xff]  ;;  %v7074_v6 = vunpack.c.l.b16 %v6972_v3  ;;  %v6153_v13 = vor.u32 %v6152_v34, %v6148_v63  ;;  %v3934_v2 = vadd.f32 %v14323_v33, %v3508_v22  ;;  %v5945_v33 = vld [vmem:[#allocation3 + $0x30] sm:$0xf] }
 0x3b1   : > { %v5650_v30 = vsel %vm12554_vm15, %v5642_v40, %v5649_v37  ;;  %v5943_v59 = vsel %vm14384_vm7, %v5651_v54, %v5942_v29  ;;  %v5575_v20 = vpack.c.bf16 %v5423_v25, %v5423_v25  ;;  %v2828_v16 = vadd.f32 %v17443_v45, %v14213_v4  ;;  %v14678_v37 = vpop.f32.mrf.mxu1 }
 0x3b2   : > { %v4930_v38 = vadd.f32 %v14308_v14, %v4248_v36  ;;  %5941 = vst.msk [vmem:[#allocation3 + $0x28] sm:$0xf] %vm5449_vm1, %v5650_v30  ;;  %v5531_v14 = vsel %vm14414_vm3, 0, %v5530_v46  ;;  %v7073_v62 = vunpack.c.l.b16 %v6969_v15  ;;  %v6144_v39 = vrot.slane %v6143_v8, 4 }
 0x3b3   : > { %5944 = vst [vmem:[#allocation3 + $0x2c] sm:$0x1] %v5943_v59  ;;  %v5653_v5 = vshrl.u32 %v5575_v20, 16  ;;  %11447 = vmatmul.msk.bf16.gmra.mxu3 %vm428_vm0, %v12127_v19  ;;  %v6154_v24 = vrot.slane %v6153_v13, 4  ;;  %v6158_v4 = vrot.slane %v6156_v11, 5  ;;  %v5656_v61 = vshll.u32 %v5575_v20, 16 }
 0x3b4   : > { %v5356_v40 = vadd.f32 %v14316_v35, %v4930_v38  ;;  %5532 = vst [vmem:[#allocation3 + $0x44] sm:$0x1] %v5531_v14  ;;  %v3509_v35 = vadd.f32 %v17444_v60, %v14638_v9  ;;  %v7103_v22 = vpack.c.b16 %v7074_v6, %v7073_v62  ;;  %v6149_v25 = vsel %vm12500_vm9, %v6144_v39, %v6148_v63  ;;  %v17445_v9 = vld [vmem:[#allocation28_spill] sm:$0xff]  ;;  %v6907_v20 = vld [vmem:[#allocation3 + $0x24] sm:$0xe]  ;;  %v14691_v38 = vpop.f32.mrf.mxu0  ;;  %v17446_v13 = vld [vmem:[#allocation69_spill] sm:$0xff] }
 0x3b5   : > { %v14673_v29 = vrot.slane %v5653_v5, 7  ;;  %v6159_v36 = vsel %vm12500_vm9, %v6154_v24, %v6158_v4  ;;  %v5479_v15 = vsel %vm14384_vm7, 0, %v5478_v49  ;;  %v14689_v46 = vadd.f32 %v17445_v9, %v14222_v51  ;;  %v6042_v60 = vld [vmem:[#allocation3 + $0x24] sm:$0xf] }
 0x3b6   : > { %v5392_v3 = vadd.f32 %v14453_v10, %v5356_v40  ;;  %v4181_v54 = vpop.f32.mrf.mxu3  ;;  %5480 = vst [vmem:[#allocation3 + $0x48] sm:$0x1] %v5479_v15  ;;  %v6481_v30 = vunpack.c.l.b16 %v6149_v25  ;;  %v6482_v59 = vunpack.c.l.b16 %v6159_v36  ;;  %v3510_v5 = vadd.f32 %v17446_v13, %v2828_v16 }
 0x3b7   : > { %v5658_v0 = vor.u32 %v5656_v61, %v14673_v29  ;;  %v4249_v11 = vadd.f32 %v4181_v54, %v3934_v2  ;;  %v3935_v40 = vadd.f32 %v14337_v31, %v3509_v35  ;;  %v5659_v39 = vrot.slane %v14673_v29, 4  ;;  %v14702_v61 = vpop.f32.mrf.mxu2  ;;  %v5949_v54 = vld [vmem:[#allocation3 + $0x38] sm:$0x1] }
 0x3b8   : > { %v5424_v34 = vmax.f32 %v5392_v3, 0.0  ;;  %11693 = vmatmul.msk.bf16.gmra.mxu0 %vm6537_vm5, %v7103_v22  ;;  %v6511_v51 = vpack.c.b16 %v6482_v59, %v6481_v30  ;;  %v6161_v29 = vshrl.u32 %v6042_v60, 16  ;;  %v6164_v36 = vshll.u32 %v6042_v60, 16 }
 0x3b9   : > { %v5946_v63 = vsel %vm14508_vm4, %v5658_v0, %v5945_v33  ;;  %v4931_v45 = vadd.f32 %v14318_v58, %v4249_v11  ;;  %v12167_v6 = vld [vmem:[#allocation3 + $0x24] sm:$0xff]  ;;  %v11666_v58 = vrot.slane %v6907_v20, 9  ;;  %v14708_v59 = vpop.f32.mrf.mxu1 }
 0x3ba   : > { %v5576_v19 = vpack.c.bf16 %v5424_v34, %v5424_v34  ;;  %v6043_v8 = vld [vmem:[#allocation3 + $0x28] sm:$0xf]  ;;  %5947 = vst [vmem:[#allocation3 + $0x30] sm:$0xf] %v5946_v63  ;;  %v6075_v2 = vld [vmem:[#allocation3 + $0x2c] sm:$0x1]  ;;  %11785 = vmatmul.msk.bf16.gmra.mxu1 %vm6537_vm5, %v12167_v6 }
 0x3bb   : > { %v6975_v14 = vrot.slane %v6043_v8, 5  ;;  %v6170_v62 = vshll.u32 %v6043_v8, 16  ;;  %v5357_v4 = vadd.f32 %v14325_v42, %v4931_v45  ;;  %11561 = vmatmul.msk.bf16.gmra.mxu2 %vm6537_vm5, %v6511_v51  ;;  %v6978_v3 = vrot.slane %v6075_v2, 5  ;;  %v5533_v6 = vld [vmem:[#allocation3 + $0x50] sm:$0x1] }
 0x3bc   : > { %v5661_v24 = vshrl.u32 %v5576_v19, 16  ;;  %v6174_v31 = vshrl.u32 %v6043_v8, 16  ;;  %v5664_v33 = vshll.u32 %v5576_v19, 16  ;;  %v6180_v0 = vshll.u32 %v6075_v2, 16 }
 0x3bd   : > { %v6977_v16 = vrot.slane %v6975_v14, 4  ;;  %v6172_v49 = vrot.slane %v6170_v62, 5  ;;  %v5393_v22 = vadd.f32 %v14453_v10, %v5357_v4  ;;  %v6976_v20 = vsel %vm12535_vm13, %v11666_v58, %v6975_v14  ;;  %v12128_v62 = vld [vmem:[#allocation2 + $0xb4] sm:$0xff] }
 0x3be   : > { %v5663_v35 = vrot.slane %v5661_v24, 7  ;;  %v4183_v25 = vpop.f32.mrf.mxu3  ;;  %v6176_v15 = vrot.slane %v6174_v31, 4  ;;  %v6163_v63 = vrot.slane %v6161_v29, 4  ;;  %v6166_v19 = vrot.slane %v6164_v36, 5  ;;  %v17447_v58 = vld [vmem:[#allocation30_spill] sm:$0xff] }
 0x3bf   : > { %v6979_v42 = vsel %vm12535_vm13, %v6977_v16, %v6978_v3  ;;  %v5425_v9 = vmax.f32 %v5393_v22, 0.0  ;;  %v4250_v30 = vadd.f32 %v4183_v25, %v3935_v40  ;;  %v6182_v14 = vrot.slane %v6180_v0, 5  ;;  %v14720_v3 = vpop.f32.mrf.mxu0  ;;  %v14734_v36 = vpop.f32.mrf.mxu2 }
 0x3c0   : > { %v5666_v34 = vor.u32 %v5664_v33, %v5663_v35  ;;  %v5668_v11 = vrot.slane %v5663_v35, 4  ;;  %v6177_v45 = vor.u32 %v6176_v15, %v6172_v49  ;;  %v7076_v40 = vunpack.c.l.b16 %v6979_v42  ;;  %v5481_v42 = vld [vmem:[#allocation3 + $0x54] sm:$0x1]  ;;  %v5952_v15 = vld [vmem:[#allocation3 + $0x3c] sm:$0xf] }
 0x3c1   : > { %v5577_v51 = vpack.c.bf16 %v5425_v9, %v5425_v9  ;;  %v4932_v2 = vadd.f32 %v14330_v26, %v4250_v30  ;;  %v6167_v24 = vor.u32 %v6166_v19, %v6163_v63  ;;  %v2830_v16 = vadd.f32 %v17447_v58, %v14236_v52  ;;  %v17449_v63 = vld [vmem:[#allocation46_spill] sm:$0xff] }
 0x3c2   : > { %v5667_v8 = vsel %vm12554_vm15, %v5659_v39, %v5666_v34  ;;  %v5950_v13 = vsel %vm14384_vm7, %v5668_v11, %v5949_v54  ;;  %v6178_v4 = vrot.slane %v6177_v45, 4  ;;  %v5534_v26 = vsel %vm14414_vm3, 0, %v5533_v6  ;;  %v6908_v6 = vld [vmem:[#allocation3 + $0x30] sm:$0xe] }
 0x3c3   : > { %5948 = vst.msk [vmem:[#allocation3 + $0x34] sm:$0xf] %vm5449_vm1, %v5667_v8  ;;  %v5670_v39 = vshrl.u32 %v5577_v51, 16  ;;  %v5358_v60 = vadd.f32 %v14335_v50, %v4932_v2  ;;  %11448 = vmatmul.msk.bf16.gmra.mxu3 %vm428_vm0, %v12128_v62  ;;  %v7075_v31 = vunpack.c.l.b16 %v6976_v20  ;;  %v3936_v35 = vadd.f32 %v14347_v21, %v3510_v5  ;;  %v17448_v50 = vld [vmem:[#allocation72_spill] sm:$0xff]  ;;  %v17452_v62 = vld [vmem:[#allocation101_spill] sm:$0xff] }
 0x3c4   : > { %5951 = vst [vmem:[#allocation3 + $0x38] sm:$0x1] %v5950_v13  ;;  %v6168_v33 = vrot.slane %v6167_v24, 4  ;;  %v6183_v22 = vsel %vm12500_vm9, %v6178_v4, %v6182_v14  ;;  %v5673_v29 = vshll.u32 %v5577_v51, 16  ;;  %v3511_v25 = vadd.f32 %v17448_v50, %v14689_v46  ;;  %v17450_v46 = vld [vmem:[#allocation33_spill] sm:$0xff]  ;;  %v14749_v4 = vpop.f32.mrf.mxu1 }
 0x3c5   : > { %5535 = vst [vmem:[#allocation3 + $0x50] sm:$0x1] %v5534_v26  ;;  %v14729_v52 = vrot.slane %v5670_v39, 7  ;;  %v5394_v54 = vadd.f32 %v14453_v10, %v5358_v60  ;;  %v7104_v0 = vpack.c.b16 %v7076_v40, %v7075_v31  ;;  %v6484_v5 = vunpack.c.l.b16 %v6183_v22  ;;  %v17453_v60 = vld [vmem:[#allocation76_spill] sm:$0xff]  ;;  %v17454_v22 = vld [vmem:[#allocation97_spill] sm:$0xff] }
 0x3c6   : > { %v4186_v34 = vpop.f32.mrf.mxu3  ;;  %v6173_v21 = vsel %vm12500_vm9, %v6168_v33, %v6172_v49  ;;  %v5482_v11 = vsel %vm14384_vm7, 0, %v5481_v42  ;;  %v14743_v19 = vadd.f32 %v17450_v46, %v17449_v63  ;;  %v17451_v49 = vld [vmem:[#allocation65_spill] sm:$0xff]  ;;  %v3937_v40 = vadd.f32 %v17452_v62, %v3511_v25  ;;  %v6044_v42 = vld [vmem:[#allocation3 + $0x30] sm:$0xf] }
 0x3c7   : > { %v5675_v9 = vor.u32 %v5673_v29, %v14729_v52  ;;  %v5426_v30 = vmax.f32 %v5394_v54, 0.0  ;;  %v4251_v20 = vadd.f32 %v4186_v34, %v3936_v35  ;;  %5483 = vst [vmem:[#allocation3 + $0x54] sm:$0x1] %v5482_v11  ;;  %v6483_v45 = vunpack.c.l.b16 %v6173_v21  ;;  %v14757_v34 = vpop.f32.mrf.mxu0  ;;  %v5956_v11 = vld [vmem:[#allocation3 + $0x44] sm:$0x1] }
 0x3c8   : > { %11694 = vmatmul.msk.bf16.gmra.mxu0 %vm6537_vm5, %v7104_v0  ;;  %v3512_v26 = vadd.f32 %v17453_v60, %v2830_v16  ;;  %v5676_v35 = vrot.slane %v14729_v52, 4  ;;  %v11667_v54 = vrot.slane %v6908_v6, 9  ;;  %v6185_v52 = vshrl.u32 %v6044_v42, 16 }
 0x3c9   : > { %v5953_v8 = vsel %vm14508_vm4, %v5675_v9, %v5952_v15  ;;  %v5578_v13 = vpack.c.bf16 %v5426_v30, %v5426_v30  ;;  %v4933_v51 = vadd.f32 %v17451_v49, %v4251_v20  ;;  %v6512_v14 = vpack.c.b16 %v6484_v5, %v6483_v45 }
 0x3ca   : > { %v12168_v2 = vld [vmem:[#allocation3 + $0x30] sm:$0xff]  ;;  %5954 = vst [vmem:[#allocation3 + $0x3c] sm:$0xf] %v5953_v8  ;;  %v6188_v20 = vshll.u32 %v6044_v42, 16  ;;  %v17457_v42 = vld [vmem:[#allocation35_spill] sm:$0xff] }
 0x3cb   : > { %v6045_v24 = vld [vmem:[#allocation3 + $0x34] sm:$0xf]  ;;  %v6076_v58 = vld [vmem:[#allocation3 + $0x38] sm:$0x1]  ;;  %v5678_v33 = vshrl.u32 %v5578_v13, 16  ;;  %v5359_v29 = vadd.f32 %v17454_v22, %v4933_v51  ;;  %11786 = vmatmul.msk.bf16.gmra.mxu1 %vm6537_vm5, %v12168_v2  ;;  %11562 = vmatmul.msk.bf16.gmra.mxu2 %vm6537_vm5, %v6512_v14  ;;  %v5681_v16 = vshll.u32 %v5578_v13, 16  ;;  %v14762_v51 = vpop.f32.mrf.mxu2 }
 0x3cc   : > { %v6982_v39 = vrot.slane %v6045_v24, 5  ;;  %v6194_v31 = vshll.u32 %v6045_v24, 16  ;;  %v6985_v25 = vrot.slane %v6076_v58, 5  ;;  %v6198_v0 = vshrl.u32 %v6045_v24, 16  ;;  %v5536_v14 = vld [vmem:[#allocation3 + $0x5c] sm:$0x1] }
 0x3cd   : > { %v5680_v21 = vrot.slane %v5678_v33, 7  ;;  %v5395_v5 = vadd.f32 %v14453_v10, %v5359_v29  ;;  %v6204_v46 = vshll.u32 %v6076_v58, 16  ;;  %v6187_v2 = vrot.slane %v6185_v52, 4  ;;  %v17455_v33 = vld [vmem:[#allocation100_spill] sm:$0xff]  ;;  %v12129_v29 = vld [vmem:[#allocation2 + $0xc0] sm:$0xff]  ;;  %v14778_v52 = vpop.f32.mrf.mxu1 }
 0x3ce   : > { %v6984_v50 = vrot.slane %v6982_v39, 4  ;;  %v6196_v15 = vrot.slane %v6194_v31, 5  ;;  %v4188_v9 = vpop.f32.mrf.mxu3  ;;  %v6200_v63 = vrot.slane %v6198_v0, 4  ;;  %v6983_v13 = vsel %vm12535_vm13, %v11667_v54, %v6982_v39  ;;  %v17456_v54 = vld [vmem:[#allocation22_spill] sm:$0xff] }
 0x3cf   : > { %v5683_v45 = vor.u32 %v5681_v16, %v5680_v21  ;;  %v5685_v6 = vrot.slane %v5680_v21, 4  ;;  %v5427_v8 = vmax.f32 %v5395_v5, 0.0  ;;  %v4252_v49 = vadd.f32 %v4188_v9, %v3937_v40  ;;  %v17458_v16 = vld [vmem:[#allocation99_spill] sm:$0xff]  ;;  %v17459_v9 = vld [vmem:[#allocation105_spill] sm:$0xff] }
 0x3d0   : > { %v6986_v30 = vsel %vm12535_vm13, %v6984_v50, %v6985_v25  ;;  %v6190_v62 = vrot.slane %v6188_v20, 5  ;;  %v6201_v24 = vor.u32 %v6200_v63, %v6196_v15  ;;  %v6206_v39 = vrot.slane %v6204_v46, 5 }
 0x3d1   : > { %v5684_v60 = vsel %vm12554_vm15, %v5676_v35, %v5683_v45  ;;  %v5957_v31 = vsel %vm14384_vm7, %v5685_v6, %v5956_v11  ;;  %v5579_v58 = vpack.c.bf16 %v5427_v8, %v5427_v8  ;;  %v4934_v22 = vadd.f32 %v17455_v33, %v4252_v49  ;;  %v17460_v8 = vld [vmem:[#allocation79_spill] sm:$0xff] }
 0x3d2   : > { %5955 = vst.msk [vmem:[#allocation3 + $0x40] sm:$0xf] %vm5449_vm1, %v5684_v60  ;;  %v7078_v40 = vunpack.c.l.b16 %v6986_v30  ;;  %v6191_v50 = vor.u32 %v6190_v62, %v6187_v2  ;;  %v6202_v25 = vrot.slane %v6201_v24, 4  ;;  %v2832_v0 = vadd.f32 %v17457_v42, %v17456_v54  ;;  %v5484_v2 = vld [vmem:[#allocation3 + $0x60] sm:$0x1] }
 0x3d3   : > { %5958 = vst [vmem:[#allocation3 + $0x44] sm:$0x1] %v5957_v31  ;;  %v5687_v21 = vshrl.u32 %v5579_v58, 16  ;;  %v5360_v35 = vadd.f32 %v17458_v16, %v4934_v22  ;;  %11449 = vmatmul.msk.bf16.gmra.mxu3 %vm428_vm0, %v12129_v29  ;;  %v5537_v5 = vsel %vm14414_vm3, 0, %v5536_v14  ;;  %v7077_v11 = vunpack.c.l.b16 %v6983_v13  ;;  %v5959_v62 = vld [vmem:[#allocation3 + $0x48] sm:$0xf]  ;;  %v14792_v31 = vpop.f32.mrf.mxu0 }
 0x3d4   : > { %v3938_v30 = vadd.f32 %v17459_v9, %v3512_v26  ;;  %v6192_v20 = vrot.slane %v6191_v50, 4  ;;  %v6207_v63 = vsel %vm12500_vm9, %v6202_v25, %v6206_v39  ;;  %5538 = vst [vmem:[#allocation3 + $0x5c] sm:$0x1] %v5537_v5  ;;  %v5690_v45 = vshll.u32 %v5579_v58, 16  ;;  %v17461_v22 = vld [vmem:[#allocation23_spill] sm:$0xff]  ;;  %v17464_v16 = vld [vmem:[#allocation81_spill] sm:$0xff]  ;;  %v14803_v5 = vpop.f32.mrf.mxu2 }
 0x3d5   : > { %v14783_v46 = vrot.slane %v5687_v21, 7  ;;  %v5396_v6 = vadd.f32 %v14453_v10, %v5360_v35  ;;  %v3513_v49 = vadd.f32 %v17460_v8, %v14743_v19  ;;  %v7105_v24 = vpack.c.b16 %v7078_v40, %v7077_v11  ;;  %v17462_v19 = vld [vmem:[#allocation37_spill] sm:$0xff]  ;;  %v17463_v39 = vld [vmem:[#allocation103_spill] sm:$0xff]  ;;  %v17465_v9 = vld [vmem:[#allocation110_spill] sm:$0xff] }
 0x3d6   : > { %v4191_v14 = vpop.f32.mrf.mxu3  ;;  %v6197_v26 = vsel %vm12500_vm9, %v6192_v20, %v6196_v15  ;;  %v6486_v13 = vunpack.c.l.b16 %v6207_v63  ;;  %v5485_v60 = vsel %vm14384_vm7, 0, %v5484_v2  ;;  %v14797_v29 = vadd.f32 %v17462_v19, %v17461_v22  ;;  %v6909_v50 = vld [vmem:[#allocation3 + $0x3c] sm:$0xe]  ;;  %v17466_v2 = vld [vmem:[#allocation102_spill] sm:$0xff]  ;;  %v14819_v22 = vpop.f32.mrf.mxu1  ;;  %v5963_v19 = vld [vmem:[#allocation3 + $0x50] sm:$0x1] }
 0x3d7   : > { %v5692_v58 = vor.u32 %v5690_v45, %v14783_v46  ;;  %v5428_v33 = vmax.f32 %v5396_v6, 0.0  ;;  %v4253_v10 = vadd.f32 %v4191_v14, %v3938_v30  ;;  %5486 = vst [vmem:[#allocation3 + $0x60] sm:$0x1] %v5485_v60  ;;  %v6485_v40 = vunpack.c.l.b16 %v6197_v26  ;;  %v6046_v60 = vld [vmem:[#allocation3 + $0x3c] sm:$0xf] }
 0x3d8   : > { %v3514_v35 = vadd.f32 %v17464_v16, %v2832_v0  ;;  %11695 = vmatmul.msk.bf16.gmra.mxu0 %vm6537_vm5, %v7105_v24  ;;  %v3939_v30 = vadd.f32 %v17465_v9, %v3513_v49  ;;  %v5693_v6 = vrot.slane %v14783_v46, 4  ;;  %v11668_v14 = vrot.slane %v6909_v50, 9  ;;  %v14816_v46 = vld [vmem:[%s17189_s4] ss:$0 sm:$0xff]  ;;  %17467 = vst [vmem:[#allocation55_spill] sm:$0xff] %v14819_v22 }
 0x3d9   : > { %v5960_v15 = vsel %vm14508_vm4, %v5692_v58, %v5959_v62  ;;  %v5580_v25 = vpack.c.bf16 %v5428_v33, %v5428_v33  ;;  %v4935_v54 = vadd.f32 %v17463_v39, %v4253_v10  ;;  %v12169_v42 = vld [vmem:[#allocation3 + $0x3c] sm:$0xff]  ;;  %v6513_v11 = vpack.c.b16 %v6486_v13, %v6485_v40 }
 0x3da   : > { %v6047_v21 = vld [vmem:[#allocation3 + $0x40] sm:$0xf]  ;;  %5961 = vst [vmem:[#allocation3 + $0x48] sm:$0xf] %v5960_v15  ;;  %v6077_v20 = vld [vmem:[#allocation3 + $0x44] sm:$0x1] }
 0x3db   : > { %v6989_v63 = vrot.slane %v6047_v21, 5  ;;  %v6218_v45 = vshll.u32 %v6047_v21, 16  ;;  %v5695_v8 = vshrl.u32 %v5580_v25, 16  ;;  %v5361_v62 = vadd.f32 %v17466_v2, %v4935_v54  ;;  %11787 = vmatmul.msk.bf16.gmra.mxu1 %vm6537_vm5, %v12169_v42  ;;  %11563 = vmatmul.msk.bf16.gmra.mxu2 %vm6537_vm5, %v6513_v11  ;;  %v12130_v11 = vld [vmem:[#allocation2 + $0xcc] sm:$0xff]  ;;  %v14826_v22 = vpop.f32.mrf.mxu0 }
 0x3dc   : > { %v6992_v26 = vrot.slane %v6077_v20, 5  ;;  %v6222_v13 = vshrl.u32 %v6047_v21, 16  ;;  %v5698_v58 = vshll.u32 %v5580_v25, 16  ;;  %v6209_v10 = vshrl.u32 %v6046_v60, 16  ;;  %17468 = vst [vmem:[#allocation47_spill] sm:$0xff] %v14826_v22 }
 0x3dd   : > { %v6991_v0 = vrot.slane %v6989_v63, 4  ;;  %v14811_v24 = vrot.slane %v6218_v45, 5  ;;  %v5697_v49 = vrot.slane %v5695_v8, 7  ;;  %v5397_v33 = vadd.f32 %v14816_v46, %v5361_v62  ;;  %v5539_v62 = vld [vmem:[#allocation3 + $0x68] sm:$0x1] }
 0x3de   : > { %v4193_v40 = vpop.f32.mrf.mxu3  ;;  %v6212_v15 = vshll.u32 %v6046_v60, 16  ;;  %v6224_v39 = vrot.slane %v6222_v13, 4  ;;  %v6228_v54 = vshll.u32 %v6077_v20, 16  ;;  %v6990_v9 = vsel %vm12535_vm13, %v11668_v14, %v6989_v63  ;;  %v17469_v60 = vld [vmem:[#allocation107_spill] sm:$0xff] }
 0x3df   : > { %v6993_v50 = vsel %vm12535_vm13, %v6991_v0, %v6992_v26  ;;  %v5700_v42 = vor.u32 %v5698_v58, %v5697_v49  ;;  %v5702_v25 = vrot.slane %v5697_v49, 4  ;;  %v5429_v21 = vmax.f32 %v5397_v33, 0.0  ;;  %v17470_v58 = vld [vmem:[#allocation25_spill] sm:$0xff]  ;;  %v17471_v33 = vld [vmem:[#allocation39_spill] sm:$0xff] }
 0x3e0   : > { %v4254_v16 = vadd.f32 %v4193_v40, %v3939_v30  ;;  %v6211_v45 = vrot.slane %v6209_v10, 4  ;;  %v6214_v8 = vrot.slane %v6212_v15, 5  ;;  %v6225_v2 = vor.u32 %v6224_v39, %v14811_v24  ;;  %v17472_v15 = vld [vmem:[#allocation106_spill] sm:$0xff] }
 0x3e1   : > { %v5701_v0 = vsel %vm12554_vm15, %v5693_v6, %v5700_v42  ;;  %v5964_v20 = vsel %vm14384_vm7, %v5702_v25, %v5963_v19  ;;  %v5581_v26 = vpack.c.bf16 %v5429_v21, %v5429_v21  ;;  %v7080_v13 = vunpack.c.l.b16 %v6993_v50  ;;  %v12159_v19 = vld [vmem:[%s17190_s5] sm:$0xff]  ;;  %v14843_v50 = vpop.f32.mrf.mxu2 }
 0x3e2   : > { %v4936_v30 = vadd.f32 %v17469_v60, %v4254_v16  ;;  %5962 = vst.msk [vmem:[#allocation3 + $0x4c] sm:$0xf] %vm5449_vm1, %v5701_v0  ;;  %v6215_v63 = vor.u32 %v6214_v8, %v6211_v45  ;;  %v6226_v14 = vrot.slane %v6225_v2, 4  ;;  %v6230_v49 = vrot.slane %v6228_v54, 5  ;;  %v17474_v54 = vld [vmem:[#allocation115_spill] sm:$0xff]  ;;  %v17475_v2 = vld [vmem:[#allocation82_spill] sm:$0xff]  ;;  %6822 = vmatpush.bf16.msrb.mxu3 %v12159_v19 }
 0x3e3   : > { %v2834_v10 = vadd.f32 %v17471_v33, %v17470_v58  ;;  %5965 = vst [vmem:[#allocation3 + $0x50] sm:$0x1] %v5964_v20  ;;  %v5704_v40 = vshrl.u32 %v5581_v26, 16  ;;  %11450 = vmatmul.msk.bf16.gmra.mxu3 %vm428_vm0, %v12130_v11  ;;  %v5540_v6 = vsel %vm14414_vm3, 0, %v5539_v62  ;;  %v7079_v42 = vunpack.c.l.b16 %v6990_v9  ;;  %v5487_v0 = vld [vmem:[#allocation3 + $0x6c] sm:$0x1] }
 0x3e4   : > { %v5362_v39 = vadd.f32 %v17472_v15, %v4936_v30  ;;  %17473 = vst [vmem:[#allocation13_spill] sm:$0xff] %v14843_v50  ;;  %v3940_v25 = vadd.f32 %v17474_v54, %v3514_v35  ;;  %v6216_v21 = vrot.slane %v6215_v63, 4  ;;  %v6231_v16 = vsel %vm12500_vm9, %v6226_v14, %v6230_v49  ;;  %v5966_v20 = vld [vmem:[#allocation3 + $0x54] sm:$0xf]  ;;  %v17476_v58 = vld [vmem:[#allocation58_spill] sm:$0xff] }
 0x3e5   : > { %5541 = vst [vmem:[#allocation3 + $0x68] sm:$0x1] %v5540_v6  ;;  %v14848_v45 = vrot.slane %v5704_v40, 7  ;;  %v5707_v11 = vshll.u32 %v5581_v26, 16  ;;  %v3515_v62 = vadd.f32 %v17475_v2, %v14797_v29  ;;  %v7106_v60 = vpack.c.b16 %v7080_v13, %v7079_v42  ;;  %v17477_v29 = vld [vmem:[#allocation43_spill] sm:$0xff]  ;;  %v14863_v40 = vpop.f32.mrf.mxu1  ;;  %v17479_v6 = vld [vmem:[#allocation113_spill] sm:$0xff] }
 0x3e6   : > { %v5398_v8 = vadd.f32 %v14816_v46, %v5362_v39  ;;  %v4196_v9 = vpop.f32.mrf.mxu3  ;;  %v6221_v35 = vsel %vm12500_vm9, %v6216_v21, %v14811_v24  ;;  %v6488_v30 = vunpack.c.l.b16 %v6231_v16  ;;  %v5488_v63 = vsel %vm14384_vm7, 0, %v5487_v0  ;;  %17478 = vst [vmem:[#allocation59_spill] sm:$0xff] %v14863_v40  ;;  %v6910_v15 = vld [vmem:[#allocation3 + $0x48] sm:$0xe]  ;;  %v17480_v21 = vld [vmem:[#allocation84_spill] sm:$0xff] }
 0x3e7   : > { %v5709_v26 = vor.u32 %v5707_v11, %v14848_v45  ;;  %v4255_v49 = vadd.f32 %v4196_v9, %v3940_v25  ;;  %5489 = vst [vmem:[#allocation3 + $0x6c] sm:$0x1] %v5488_v63  ;;  %v14861_v33 = vadd.f32 %v17477_v29, %v17476_v58  ;;  %v6487_v13 = vunpack.c.l.b16 %v6221_v35  ;;  %v17481_v11 = vld [vmem:[#allocation41_spill] sm:$0xff]  ;;  %v14871_v35 = vpop.f32.mrf.mxu0 }
 0x3e8   : > { %v5430_v14 = vmax.f32 %v5398_v8, 0.0  ;;  %v3516_v16 = vadd.f32 %v17480_v21, %v2834_v10  ;;  %11696 = vmatmul.msk.bf16.gmra.mxu0 %vm6537_vm5, %v7106_v60  ;;  %v3941_v8 = vadd.f32 %v17481_v11, %v3515_v62  ;;  %17482 = vst [vmem:[#allocation49_spill] sm:$0xff] %v14871_v35 }
 0x3e9   : > { %v5967_v24 = vsel %vm14508_vm4, %v5709_v26, %v5966_v20  ;;  %v4937_v19 = vadd.f32 %v17479_v6, %v4255_v49  ;;  %v12170_v42 = vld [vmem:[#allocation3 + $0x48] sm:$0xff]  ;;  %v6514_v25 = vpack.c.b16 %v6488_v30, %v6487_v13  ;;  %v5710_v20 = vrot.slane %v14848_v45, 4  ;;  %v14878_v21 = vpop.f32.mrf.mxu2  ;;  %v5970_v45 = vld [vmem:[#allocation3 + $0x5c] sm:$0x1] }
 0x3ea   : > { %v5582_v39 = vpack.c.bf16 %v5430_v14, %v5430_v14  ;;  %v6049_v54 = vld [vmem:[#allocation3 + $0x4c] sm:$0xf]  ;;  %5968 = vst [vmem:[#allocation3 + $0x54] sm:$0xf] %v5967_v24  ;;  %v6078_v2 = vld [vmem:[#allocation3 + $0x50] sm:$0x1] }
 0x3eb   : > { %v6996_v0 = vrot.slane %v6049_v54, 5  ;;  %v6242_v9 = vshll.u32 %v6049_v54, 16  ;;  %v17483_v26 = vld [vmem:[#allocation111_spill] sm:$0xff]  ;;  %11788 = vmatmul.msk.bf16.gmra.mxu1 %vm6537_vm5, %v12170_v42  ;;  %v11669_v49 = vrot.slane %v6910_v15, 9  ;;  %11564 = vmatmul.msk.bf16.gmra.mxu2 %vm6537_vm5, %v6514_v25  ;;  %v6999_v60 = vrot.slane %v6078_v2, 5  ;;  %17484 = vst [vmem:[#allocation14_spill] sm:$0xff] %v14878_v21 }
 0x3ec   : > { %v5712_v63 = vshrl.u32 %v5582_v39, 16  ;;  %v5363_v14 = vadd.f32 %v17483_v26, %v4937_v19  ;;  %v6048_v30 = vld [vmem:[#allocation3 + $0x48] sm:$0xf]  ;;  %v6246_v62 = vshrl.u32 %v6049_v54, 16  ;;  %v5715_v13 = vshll.u32 %v5582_v39, 16  ;;  %v12143_v54 = vld [vmem:[#allocation3] sm:$0xff] }
 0x3ed   : > { %v6998_v10 = vrot.slane %v6996_v0, 4  ;;  %v6244_v58 = vrot.slane %v6242_v9, 5  ;;  %v6233_v6 = vshrl.u32 %v6048_v30, 16  ;;  %v6236_v15 = vshll.u32 %v6048_v30, 16  ;;  %v5542_v21 = vld [vmem:[#allocation3 + $0x74] sm:$0x1] }
 0x3ee   : > { %v5714_v29 = vrot.slane %v5712_v63, 7  ;;  %v5399_v24 = vadd.f32 %v14816_v46, %v5363_v14  ;;  %v4198_v11 = vpop.f32.mrf.mxu3  ;;  %v6248_v42 = vrot.slane %v6246_v62, 4  ;;  %v6252_v25 = vshll.u32 %v6078_v2, 16  ;;  %v17485_v2 = vld [vmem:[#allocation8_spill] sm:$0xff]  ;;  %v14889_v62 = vpop.f32.mrf.mxu1 }
 0x3ef   : > { %v7000_v19 = vsel %vm12535_vm13, %v6998_v10, %v6999_v60  ;;  %v4256_v9 = vadd.f32 %v4198_v11, %v3941_v8  ;;  %v6997_v39 = vsel %vm12535_vm13, %v11669_v49, %v6996_v0  ;;  %v6235_v63 = vrot.slane %v6233_v6, 4  ;;  %17486 = vst [vmem:[#allocation15_spill] sm:$0xff] %v14889_v62  ;;  %v5545_v62 = vld [vmem:[#allocation3 + $0x80] sm:$0x1] }
 0x3f0   : > { %v5717_v26 = vor.u32 %v5715_v13, %v5714_v29  ;;  %v5719_v40 = vrot.slane %v5714_v29, 4  ;;  %v5431_v35 = vmax.f32 %v5399_v24, 0.0  ;;  %v6238_v14 = vrot.slane %v6236_v15, 5  ;;  %v17487_v13 = vld [vmem:[#allocation27_spill] sm:$0xff]  ;;  %v17488_v24 = vld [vmem:[#allocation45_spill] sm:$0xff] }
 0x3f1   : > { %v6249_v22 = vor.u32 %v6248_v42, %v6244_v58  ;;  %v4938_v30 = vadd.f32 %v17485_v2, %v4256_v9  ;;  %v7082_v8 = vunpack.c.l.b16 %v7000_v19  ;;  %v6254_v49 = vrot.slane %v6252_v25, 5  ;;  %v14901_v19 = vpop.f32.mrf.mxu0  ;;  %v17491_v9 = vld [vmem:[#allocation86_spill] sm:$0xff] }
 0x3f2   : > { %v5718_v50 = vsel %vm12554_vm15, %v5710_v20, %v5717_v26  ;;  %v5971_v10 = vsel %vm14384_vm7, %v5719_v40, %v5970_v45  ;;  %v5583_v60 = vpack.c.bf16 %v5431_v35, %v5431_v35  ;;  %v6239_v29 = vor.u32 %v6238_v14, %v6235_v63  ;;  %v17489_v20 = vld [vmem:[#allocation9_spill] sm:$0xff]  ;;  %17490 = vst [vmem:[#allocation62_spill] sm:$0xff] %v14901_v19 }
 0x3f3   : > { %5969 = vst.msk [vmem:[#allocation3 + $0x58] sm:$0xf] %vm5449_vm1, %v5718_v50  ;;  %v6250_v0 = vrot.slane %v6249_v22, 4  ;;  %v2836_v6 = vadd.f32 %v17488_v24, %v17487_v13  ;;  %v5364_v15 = vadd.f32 %v17489_v20, %v4938_v30  ;;  %11647 = vmatmul.msk.bf16.vlgmr.msrb.gmra.mxu3 %vm6537_vm5, %v12143_v54  ;;  %v5543_v40 = vsel %vm14414_vm3, 0, %v5542_v21  ;;  %v5490_v63 = vld [vmem:[#allocation3 + $0x78] sm:$0x1] }
 0x3f4   : > { %5972 = vst [vmem:[#allocation3 + $0x5c] sm:$0x1] %v5971_v10  ;;  %v5721_v11 = vshrl.u32 %v5583_v60, 16  ;;  %v7081_v35 = vunpack.c.l.b16 %v6997_v39  ;;  %v3942_v45 = vadd.f32 %v14472_v47, %v3516_v16  ;;  %v6240_v50 = vrot.slane %v6239_v29, 4  ;;  %v5973_v21 = vld [vmem:[#allocation3 + $0x60] sm:$0xf]  ;;  %v14913_v29 = vpop.f32.mrf.mxu2 }
 0x3f5   : > { %v6255_v22 = vsel %vm12500_vm9, %v6250_v0, %v6254_v49  ;;  %5544 = vst [vmem:[#allocation3 + $0x74] sm:$0x1] %v5543_v40  ;;  %v5724_v25 = vshll.u32 %v5583_v60, 16  ;;  %v5400_v26 = vadd.f32 %v14816_v46, %v5364_v15  ;;  %v3517_v54 = vadd.f32 %v17491_v9, %v14861_v33  ;;  %v17492_v0 = vld [vmem:[#allocation29_spill] sm:$0xff]  ;;  %v17493_v33 = vld [vmem:[#allocation48_spill] sm:$0xff] }
 0x3f6   : > { %v14903_v42 = vrot.slane %v5721_v11, 7  ;;  %v7107_v39 = vpack.c.b16 %v7082_v8, %v7081_v35  ;;  %v4201_v14 = vpop.f32.mrf.mxu3  ;;  %v6245_v47 = vsel %vm12500_vm9, %v6240_v50, %v6244_v58  ;;  %v6490_v16 = vunpack.c.l.b16 %v6255_v22  ;;  %v6911_v13 = vld [vmem:[#allocation3 + $0x54] sm:$0xe]  ;;  %v17494_v11 = vld [vmem:[#allocation5_spill] sm:$0xff] }
 0x3f7   : > { %v5491_v10 = vsel %vm14384_vm7, 0, %v5490_v63  ;;  %v5432_v30 = vmax.f32 %v5400_v26, 0.0  ;;  %v4257_v60 = vadd.f32 %v4201_v14, %v3942_v45  ;;  %v14917_v49 = vadd.f32 %v17493_v33, %v17492_v0  ;;  %v17495_v35 = vld [vmem:[#allocation88_spill] sm:$0xff] }
 0x3f8   : > { %v5726_v2 = vor.u32 %v5724_v25, %v14903_v42  ;;  %5492 = vst [vmem:[#allocation3 + $0x78] sm:$0x1] %v5491_v10  ;;  %v6489_v8 = vunpack.c.l.b16 %v6245_v47  ;;  %v3518_v50 = vadd.f32 %v17495_v35, %v2836_v6  ;;  %11697 = vmatmul.msk.bf16.gmra.mxu0 %vm6537_vm5, %v7107_v39  ;;  %v17496_v22 = vld [vmem:[#allocation44_spill] sm:$0xff]  ;;  %v5727_v14 = vrot.slane %v14903_v42, 4 }
 0x3f9   : > { %v5584_v24 = vpack.c.bf16 %v5432_v30, %v5432_v30  ;;  %v4939_v20 = vadd.f32 %v17494_v11, %v4257_v60  ;;  %v3943_v25 = vadd.f32 %v17496_v22, %v3517_v54  ;;  %v14928_v30 = vpop.f32.mrf.mxu1  ;;  %v14934_v22 = vpop.f32.mrf.mxu0 }
 0x3fa   : > { %v5974_v58 = vsel %vm14508_vm4, %v5726_v2, %v5973_v21  ;;  %v12171_v15 = vld [vmem:[#allocation3 + $0x54] sm:$0xff]  ;;  %v6515_v45 = vpack.c.b16 %v6490_v16, %v6489_v8  ;;  %v17497_v21 = vld [vmem:[#allocation11_spill] sm:$0xff]  ;;  %v11670_v2 = vrot.slane %v6911_v13, 9  ;;  %17498 = vst [vmem:[#allocation52_spill] sm:$0xff] %v14928_v30 }
 0x3fb   : > { %v6051_v40 = vld [vmem:[#allocation3 + $0x58] sm:$0xf]  ;;  %5975 = vst [vmem:[#allocation3 + $0x60] sm:$0xf] %v5974_v58  ;;  %v6079_v26 = vld [vmem:[#allocation3 + $0x5c] sm:$0x1]  ;;  %v5365_v10 = vadd.f32 %v17497_v21, %v4939_v20  ;;  %11789 = vmatmul.msk.bf16.gmra.mxu1 %vm6537_vm5, %v12171_v15 }
 0x3fc   : > { %v7003_v9 = vrot.slane %v6051_v40, 5  ;;  %v6266_v63 = vshll.u32 %v6051_v40, 16  ;;  %v5729_v47 = vshrl.u32 %v5584_v24, 16  ;;  %11565 = vmatmul.msk.bf16.gmra.mxu2 %vm6537_vm5, %v6515_v45  ;;  %v7006_v39 = vrot.slane %v6079_v26, 5  ;;  %v6050_v16 = vld [vmem:[#allocation3 + $0x54] sm:$0xf] }
 0x3fd   : > { %v6270_v54 = vshrl.u32 %v6051_v40, 16  ;;  %v5732_v33 = vshll.u32 %v5584_v24, 16  ;;  %v5401_v8 = vadd.f32 %v14816_v46, %v5365_v10  ;;  %v6257_v42 = vshrl.u32 %v6050_v16, 16  ;;  %v5977_v58 = vld [vmem:[#allocation3 + $0x68] sm:$0x1] }
 0x3fe   : > { %v7005_v6 = vrot.slane %v7003_v9, 4  ;;  %v6268_v60 = vrot.slane %v6266_v63, 5  ;;  %v5731_v0 = vrot.slane %v5729_v47, 7  ;;  %v4203_v11 = vpop.f32.mrf.mxu3  ;;  %v6260_v13 = vshll.u32 %v6050_v16, 16 }
 0x3ff   : > { %v6272_v15 = vrot.slane %v6270_v54, 4  ;;  %v6276_v35 = vshll.u32 %v6079_v26, 16  ;;  %v5433_v30 = vmax.f32 %v5401_v8, 0.0  ;;  %v4258_v63 = vadd.f32 %v4203_v11, %v3943_v25  ;;  %v12144_v54 = vld [vmem:[#allocation3 + $0xc] sm:$0xff] }
 0x400   : > { %v7007_v20 = vsel %vm12535_vm13, %v7005_v6, %v7006_v39  ;;  %v5734_v45 = vor.u32 %v5732_v33, %v5731_v0  ;;  %v5736_v21 = vrot.slane %v5731_v0, 4  ;;  %v7004_v24 = vsel %vm12535_vm13, %v11670_v2, %v7003_v9  ;;  %v17499_v39 = vld [vmem:[#allocation50_spill] sm:$0xff]  ;;  %v14943_v0 = vpop.f32.mrf.mxu2  ;;  %v17500_v8 = vld [vmem:[#allocation31_spill] sm:$0xff] }
 0x401   : > { %v6259_v40 = vrot.slane %v6257_v42, 4  ;;  %v6262_v47 = vrot.slane %v6260_v13, 5  ;;  %v6273_v10 = vor.u32 %v6272_v15, %v6268_v60  ;;  %v5585_v26 = vpack.c.bf16 %v5433_v30, %v5433_v30  ;;  %v17501_v42 = vld [vmem:[#allocation51_spill] sm:$0xff]  ;;  %v17502_v13 = vld [vmem:[#allocation6_spill] sm:$0xff] }
 0x402   : > { %v5735_v19 = vsel %vm12554_vm15, %v5727_v14, %v5734_v45  ;;  %v5978_v6 = vsel %vm14384_vm7, %v5736_v21, %v5977_v58  ;;  %v4940_v16 = vadd.f32 %v17499_v39, %v4258_v63  ;;  %v7084_v25 = vunpack.c.l.b16 %v7007_v20 }
 0x403   : > { %5976 = vst.msk [vmem:[#allocation3 + $0x64] sm:$0xf] %vm5449_vm1, %v5735_v19  ;;  %v6263_v9 = vor.u32 %v6262_v47, %v6259_v40  ;;  %v6274_v2 = vrot.slane %v6273_v10, 4  ;;  %v6278_v33 = vrot.slane %v6276_v35, 5  ;;  %v2838_v11 = vadd.f32 %v17501_v42, %v17500_v8  ;;  %11648 = vmatmul.msk.bf16.gmra.mxu3 %vm6537_vm5, %v12144_v54  ;;  %v14955_v35 = vpop.f32.mrf.mxu1  ;;  %v17504_v47 = vld [vmem:[#allocation89_spill] sm:$0xff] }
 0x404   : > { %5979 = vst [vmem:[#allocation3 + $0x68] sm:$0x1] %v5978_v6  ;;  %v5738_v14 = vshrl.u32 %v5585_v26, 16  ;;  %v5366_v15 = vadd.f32 %v17502_v13, %v4940_v16  ;;  %v5546_v30 = vsel %vm14414_vm3, 0, %v5545_v62  ;;  %v7083_v58 = vunpack.c.l.b16 %v7004_v24  ;;  %v5493_v6 = vld [vmem:[#allocation3 + $0x84] sm:$0x1] }
 0x405   : > { %v3944_v45 = vadd.f32 %v14566_v43, %v3518_v50  ;;  %v6264_v19 = vrot.slane %v6263_v9, 4  ;;  %v6279_v20 = vsel %vm12500_vm9, %v6274_v2, %v6278_v33  ;;  %17503 = vst [vmem:[#allocation7_spill] sm:$0xff] %v14955_v35  ;;  %v5741_v63 = vshll.u32 %v5585_v26, 16  ;;  %v5980_v62 = vld [vmem:[#allocation3 + $0x6c] sm:$0xf]  ;;  %v14967_v26 = vpop.f32.mrf.mxu0  ;;  %v17505_v33 = vld [vmem:[#allocation32_spill] sm:$0xff] }
 0x406   : > { %5547 = vst [vmem:[#allocation3 + $0x80] sm:$0x1] %v5546_v30  ;;  %v14957_v21 = vrot.slane %v5738_v14, 7  ;;  %v5402_v40 = vadd.f32 %v14816_v46, %v5366_v15  ;;  %v3519_v10 = vadd.f32 %v17504_v47, %v14917_v49  ;;  %v7108_v24 = vpack.c.b16 %v7084_v25, %v7083_v58  ;;  %v4206_v39 = vpop.f32.mrf.mxu3  ;;  %v17506_v49 = vld [vmem:[#allocation56_spill] sm:$0xff]  ;;  %v6912_v42 = vld [vmem:[#allocation3 + $0x60] sm:$0xe] }
 0x407   : > { %v6269_v43 = vsel %vm12500_vm9, %v6264_v19, %v6268_v60  ;;  %v6492_v50 = vunpack.c.l.b16 %v6279_v20  ;;  %v5494_v16 = vsel %vm14384_vm7, 0, %v5493_v6  ;;  %v4259_v2 = vadd.f32 %v4206_v39, %v3944_v45  ;;  %v17507_v58 = vld [vmem:[#allocation90_spill] sm:$0xff] }
 0x408   : > { %v5743_v54 = vor.u32 %v5741_v63, %v14957_v21  ;;  %v5434_v9 = vmax.f32 %v5402_v40, 0.0  ;;  %5495 = vst [vmem:[#allocation3 + $0x84] sm:$0x1] %v5494_v16  ;;  %v14971_v8 = vadd.f32 %v17506_v49, %v17505_v33  ;;  %v6491_v25 = vunpack.c.l.b16 %v6269_v43  ;;  %11698 = vmatmul.msk.bf16.gmra.mxu0 %vm6537_vm5, %v7108_v24  ;;  %v14985_v16 = vpop.f32.mrf.mxu2  ;;  %v6052_v24 = vld [vmem:[#allocation3 + $0x60] sm:$0xf] }
 0x409   : > { %v4941_v13 = vadd.f32 %v14554_v23, %v4259_v2  ;;  %v3520_v19 = vadd.f32 %v17507_v58, %v2838_v11  ;;  %v3945_v20 = vadd.f32 %v14601_v57, %v3519_v10  ;;  %v5744_v6 = vrot.slane %v14957_v21, 4  ;;  %v12183_v11 = vld [vmem:[%s17190_s5 + $0x40] sm:$0xff]  ;;  %v5984_v49 = vld [vmem:[#allocation3 + $0x74] sm:$0x1] }
 0x40a   : > { %v5981_v60 = vsel %vm14508_vm4, %v5743_v54, %v5980_v62  ;;  %v5586_v14 = vpack.c.bf16 %v5434_v9, %v5434_v9  ;;  %v12172_v15 = vld [vmem:[#allocation3 + $0x60] sm:$0xff]  ;;  %v6516_v45 = vpack.c.b16 %v6492_v50, %v6491_v25  ;;  %v17508_v62 = vld [vmem:[#allocation12_spill] sm:$0xff]  ;;  %v11671_v23 = vrot.slane %v6912_v42, 9  ;;  %8148 = vmatpush.bf16.msrb.mxu2 %v12183_v11 }
 0x40b   : > { %v6053_v30 = vld [vmem:[#allocation3 + $0x64] sm:$0xf]  ;;  %5982 = vst [vmem:[#allocation3 + $0x6c] sm:$0xf] %v5981_v60  ;;  %v6080_v63 = vld [vmem:[#allocation3 + $0x68] sm:$0x1]  ;;  %v5367_v43 = vadd.f32 %v17508_v62, %v4941_v13  ;;  %11790 = vmatmul.msk.bf16.gmra.mxu1 %vm6537_vm5, %v12172_v15  ;;  %v14991_v42 = vpop.f32.mrf.mxu1 }
 0x40c   : > { %v7010_v40 = vrot.slane %v6053_v30, 5  ;;  %v6290_v47 = vshll.u32 %v6053_v30, 16  ;;  %v5746_v39 = vshrl.u32 %v5586_v14, 16  ;;  %11566 = vmatmul.msk.bf16.gmra.mxu2 %vm6537_vm5, %v6516_v45  ;;  %v7013_v10 = vrot.slane %v6080_v63, 5  ;;  %17509 = vst [vmem:[#allocation17_spill] sm:$0xff] %v14991_v42 }
 0x40d   : > { %v6294_v21 = vshrl.u32 %v6053_v30, 16  ;;  %v5749_v9 = vshll.u32 %v5586_v14, 16  ;;  %v5403_v2 = vadd.f32 %v14816_v46, %v5367_v43  ;;  %v6281_v33 = vshrl.u32 %v6052_v24, 16  ;;  %v14995_v30 = vpop.f32.mrf.mxu0  ;;  %v5548_v42 = vld [vmem:[#allocation3 + $0x8c] sm:$0x1] }
 0x40e   : > { %v7012_v57 = vrot.slane %v7010_v40, 4  ;;  %v14988_v50 = vrot.slane %v6290_v47, 5  ;;  %v5748_v54 = vrot.slane %v5746_v39, 7  ;;  %v4208_v25 = vpop.f32.mrf.mxu3  ;;  %v6284_v13 = vshll.u32 %v6052_v24, 16 }
 0x40f   : > { %v6296_v15 = vrot.slane %v6294_v21, 4  ;;  %v6300_v58 = vshll.u32 %v6080_v63, 16  ;;  %v5435_v62 = vmax.f32 %v5403_v2, 0.0  ;;  %v4260_v14 = vadd.f32 %v4208_v25, %v3945_v20  ;;  %v12145_v21 = vld [vmem:[#allocation3 + $0x18] sm:$0xff]  ;;  %v17511_v2 = vld [vmem:[#allocation60_spill] sm:$0xff] }
 0x410   : > { %v7014_v60 = vsel %vm12535_vm13, %v7012_v57, %v7013_v10  ;;  %v5751_v45 = vor.u32 %v5749_v9, %v5748_v54  ;;  %v5753_v47 = vrot.slane %v5748_v54, 4  ;;  %v7011_v39 = vsel %vm12535_vm13, %v11671_v23, %v7010_v40  ;;  %v17510_v9 = vld [vmem:[#allocation34_spill] sm:$0xff] }
 0x411   : > { %v6283_v43 = vrot.slane %v6281_v33, 4  ;;  %v6286_v11 = vrot.slane %v6284_v13, 5  ;;  %v6297_v35 = vor.u32 %v6296_v15, %v14988_v50  ;;  %v5587_v10 = vpack.c.bf16 %v5435_v62, %v5435_v62  ;;  %v5496_v62 = vld [vmem:[#allocation3 + $0x90] sm:$0x1] }
 0x412   : > { %v5752_v57 = vsel %vm12554_vm15, %v5744_v6, %v5751_v45  ;;  %v5985_v63 = vsel %vm14384_vm7, %v5753_v47, %v5984_v49  ;;  %v4942_v24 = vadd.f32 %v14595_v32, %v4260_v14  ;;  %v7086_v20 = vunpack.c.l.b16 %v7014_v60  ;;  %v15020_v14 = vpop.f32.mrf.mxu2 }
 0x413   : > { %5983 = vst.msk [vmem:[#allocation3 + $0x70] sm:$0xf] %vm5449_vm1, %v5752_v57  ;;  %v6287_v54 = vor.u32 %v6286_v11, %v6283_v43  ;;  %v6298_v40 = vrot.slane %v6297_v35, 4  ;;  %v6302_v23 = vrot.slane %v6300_v58, 5  ;;  %v2840_v33 = vadd.f32 %v17511_v2, %v17510_v9  ;;  %11649 = vmatmul.msk.bf16.gmra.mxu3 %vm6537_vm5, %v12145_v21  ;;  %v17514_v21 = vld [vmem:[#allocation63_spill] sm:$0xff] }
 0x414   : > { %5986 = vst [vmem:[#allocation3 + $0x74] sm:$0x1] %v5985_v63  ;;  %v5755_v25 = vshrl.u32 %v5587_v10, 16  ;;  %v5368_v6 = vadd.f32 %v14587_v27, %v4942_v24  ;;  %v5549_v49 = vsel %vm14414_vm3, 0, %v5548_v42  ;;  %v7085_v32 = vunpack.c.l.b16 %v7011_v39  ;;  %v17512_v27 = vld [vmem:[#allocation91_spill] sm:$0xff]  ;;  %v17513_v24 = vld [vmem:[#allocation36_spill] sm:$0xff] }
 0x415   : > { %v3946_v13 = vadd.f32 %v14634_v55, %v3520_v19  ;;  %v6288_v15 = vrot.slane %v6287_v54, 4  ;;  %v6303_v35 = vsel %vm12500_vm9, %v6298_v40, %v6302_v23  ;;  %5550 = vst [vmem:[#allocation3 + $0x8c] sm:$0x1] %v5549_v49  ;;  %v5758_v58 = vshll.u32 %v5587_v10, 16  ;;  %v5987_v42 = vld [vmem:[#allocation3 + $0x78] sm:$0xf]  ;;  %v15028_v10 = vpop.f32.mrf.mxu0 }
 0x416   : > { %v15015_v60 = vrot.slane %v5755_v25, 7  ;;  %v5404_v45 = vadd.f32 %v14816_v46, %v5368_v6  ;;  %v3521_v47 = vadd.f32 %v17512_v27, %v14971_v8  ;;  %v7109_v39 = vpack.c.b16 %v7086_v20, %v7085_v32  ;;  %v4211_v43 = vpop.f32.mrf.mxu3  ;;  %v6913_v23 = vld [vmem:[#allocation3 + $0x6c] sm:$0xe]  ;;  %v17515_v49 = vld [vmem:[#allocation92_spill] sm:$0xff] }
 0x417   : > { %v6293_v55 = vsel %vm12500_vm9, %v6288_v15, %v14988_v50  ;;  %v6494_v19 = vunpack.c.l.b16 %v6303_v35  ;;  %v5497_v11 = vsel %vm14384_vm7, 0, %v5496_v62  ;;  %v4261_v8 = vadd.f32 %v4211_v43, %v3946_v13  ;;  %v15034_v40 = vpop.f32.mrf.mxu1 }
 0x418   : > { %v5760_v57 = vor.u32 %v5758_v58, %v15015_v60  ;;  %v5436_v63 = vmax.f32 %v5404_v45, 0.0  ;;  %5498 = vst [vmem:[#allocation3 + $0x90] sm:$0x1] %v5497_v11  ;;  %v15032_v54 = vadd.f32 %v17514_v21, %v17513_v24  ;;  %v6493_v20 = vunpack.c.l.b16 %v6293_v55  ;;  %11699 = vmatmul.msk.bf16.gmra.mxu0 %vm6537_vm5, %v7109_v39  ;;  %v6054_v55 = vld [vmem:[#allocation3 + $0x6c] sm:$0xf] }
 0x419   : > { %v4943_v2 = vadd.f32 %v14623_v18, %v4261_v8  ;;  %v3522_v32 = vadd.f32 %v17515_v49, %v2840_v33  ;;  %v3947_v15 = vadd.f32 %v14663_v7, %v3521_v47  ;;  %v5761_v27 = vrot.slane %v15015_v60, 4  ;;  %v5991_v60 = vld [vmem:[#allocation3 + $0x80] sm:$0x1] }
 0x41a   : > { %v5988_v50 = vsel %vm14508_vm4, %v5760_v57, %v5987_v42  ;;  %v5588_v9 = vpack.c.bf16 %v5436_v63, %v5436_v63  ;;  %v12173_v25 = vld [vmem:[#allocation3 + $0x6c] sm:$0xff]  ;;  %v6517_v13 = vpack.c.b16 %v6494_v19, %v6493_v20  ;;  %v11672_v18 = vrot.slane %v6913_v23, 9 }
 0x41b   : > { %v6055_v6 = vld [vmem:[#allocation3 + $0x70] sm:$0xf]  ;;  %5989 = vst [vmem:[#allocation3 + $0x78] sm:$0xf] %v5988_v50  ;;  %v6081_v35 = vld [vmem:[#allocation3 + $0x74] sm:$0x1]  ;;  %v5369_v42 = vadd.f32 %v14614_v53, %v4943_v2  ;;  %11791 = vmatmul.msk.bf16.gmra.mxu1 %vm6537_vm5, %v12173_v25 }
 0x41c   : > { %v7017_v58 = vrot.slane %v6055_v6, 5  ;;  %v6314_v45 = vshll.u32 %v6055_v6, 16  ;;  %v5763_v62 = vshrl.u32 %v5588_v9, 16  ;;  %11567 = vmatmul.msk.bf16.gmra.mxu2 %vm6537_vm5, %v6517_v13  ;;  %v7020_v43 = vrot.slane %v6081_v35, 5 }
 0x41d   : > { %v6318_v19 = vshrl.u32 %v6055_v6, 16  ;;  %v5766_v47 = vshll.u32 %v5588_v9, 16  ;;  %v5405_v11 = vadd.f32 %v14816_v46, %v5369_v42  ;;  %v6305_v57 = vshrl.u32 %v6054_v55, 16  ;;  %v15053_v25 = vpop.f32.mrf.mxu0  ;;  %v5551_v42 = vld [vmem:[#allocation3 + $0x98] sm:$0x1] }
 0x41e   : > { %v7019_v33 = vrot.slane %v7017_v58, 4  ;;  %v15046_v39 = vrot.slane %v6314_v45, 5  ;;  %v5765_v7 = vrot.slane %v5763_v62, 7  ;;  %v15049_v63 = vpop.f32.mrf.mxu2  ;;  %v4213_v53 = vpop.f32.mrf.mxu3  ;;  %v6308_v24 = vshll.u32 %v6054_v55, 16 }
 0x41f   : > { %v6320_v21 = vrot.slane %v6318_v19, 4  ;;  %v6324_v20 = vshll.u32 %v6081_v35, 16  ;;  %v5437_v2 = vmax.f32 %v5405_v11, 0.0  ;;  %v4262_v6 = vadd.f32 %v4213_v53, %v3947_v15  ;;  %v15055_v9 = vpop.f32.mrf.mxu1  ;;  %v12146_v15 = vld [vmem:[#allocation3 + $0x24] sm:$0xff] }
 0x420   : > { %v7021_v8 = vsel %vm12535_vm13, %v7019_v33, %v7020_v43  ;;  %v5768_v23 = vor.u32 %v5766_v47, %v5765_v7  ;;  %v5770_v50 = vrot.slane %v5765_v7, 4  ;;  %v7018_v49 = vsel %vm12535_vm13, %v11672_v18, %v7017_v58  ;;  %v17516_v47 = vld [vmem:[#allocation38_spill] sm:$0xff]  ;;  %v17517_v11 = vld [vmem:[#allocation67_spill] sm:$0xff] }
 0x421   : > { %v6307_v13 = vrot.slane %v6305_v57, 4  ;;  %v6310_v45 = vrot.slane %v6308_v24, 5  ;;  %v6321_v62 = vor.u32 %v6320_v21, %v15046_v39  ;;  %v5589_v43 = vpack.c.bf16 %v5437_v2, %v5437_v2 }
 0x422   : > { %v5769_v33 = vsel %vm12554_vm15, %v5761_v27, %v5768_v23  ;;  %v5992_v35 = vsel %vm14384_vm7, %v5770_v50, %v5991_v60  ;;  %v4944_v55 = vadd.f32 %v14654_v56, %v4262_v6  ;;  %v7088_v19 = vunpack.c.l.b16 %v7021_v8  ;;  %v5499_v6 = vld [vmem:[#allocation3 + $0x9c] sm:$0x1] }
 0x423   : > { %5990 = vst.msk [vmem:[#allocation3 + $0x7c] sm:$0xf] %vm5449_vm1, %v5769_v33  ;;  %v6311_v7 = vor.u32 %v6310_v45, %v6307_v13  ;;  %v6322_v58 = vrot.slane %v6321_v62, 4  ;;  %v6326_v18 = vrot.slane %v6324_v20, 5  ;;  %v2842_v57 = vadd.f32 %v17517_v11, %v17516_v47  ;;  %11650 = vmatmul.msk.bf16.gmra.mxu3 %vm6537_vm5, %v12146_v15  ;;  %v5994_v13 = vld [vmem:[#allocation3 + $0x84] sm:$0xf] }
 0x424   : > { %5993 = vst [vmem:[#allocation3 + $0x80] sm:$0x1] %v5992_v35  ;;  %v5772_v53 = vshrl.u32 %v5589_v43, 16  ;;  %v5370_v27 = vadd.f32 %v14649_v28, %v4944_v55  ;;  %v5552_v60 = vsel %vm14414_vm3, 0, %v5551_v42  ;;  %v7087_v56 = vunpack.c.l.b16 %v7018_v49  ;;  %v17518_v28 = vld [vmem:[#allocation93_spill] sm:$0xff]  ;;  %v17519_v55 = vld [vmem:[#allocation40_spill] sm:$0xff] }
 0x425   : > { %v3948_v24 = vadd.f32 %v14702_v61, %v3522_v32  ;;  %v6312_v21 = vrot.slane %v6311_v7, 4  ;;  %v6327_v8 = vsel %vm12500_vm9, %v6322_v58, %v6326_v18  ;;  %5553 = vst [vmem:[#allocation3 + $0x98] sm:$0x1] %v5552_v60  ;;  %v5775_v23 = vshll.u32 %v5589_v43, 16  ;;  %v15088_v43 = vpop.f32.mrf.mxu0  ;;  %v17520_v15 = vld [vmem:[#allocation71_spill] sm:$0xff]  ;;  %v17522_v60 = vld [vmem:[#allocation94_spill] sm:$0xff] }
 0x426   : > { %v15075_v20 = vrot.slane %v5772_v53, 7  ;;  %v5406_v50 = vadd.f32 %v14816_v46, %v5370_v27  ;;  %v3523_v2 = vadd.f32 %v17518_v28, %v15032_v54  ;;  %v15080_v45 = vpop.f32.mrf.mxu2  ;;  %v7110_v49 = vpack.c.b16 %v7088_v19, %v7087_v56  ;;  %v4216_v62 = vpop.f32.mrf.mxu3  ;;  %v6914_v18 = vld [vmem:[#allocation3 + $0x78] sm:$0xe] }
 0x427   : > { %v6317_v61 = vsel %vm12500_vm9, %v6312_v21, %v15046_v39  ;;  %v6496_v32 = vunpack.c.l.b16 %v6327_v8  ;;  %v5500_v42 = vsel %vm14384_vm7, 0, %v5499_v6  ;;  %v4263_v54 = vadd.f32 %v4216_v62, %v3948_v24  ;;  %v15094_v58 = vpop.f32.mrf.mxu1 }
 0x428   : > { %v5777_v33 = vor.u32 %v5775_v23, %v15075_v20  ;;  %v5438_v35 = vmax.f32 %v5406_v50, 0.0  ;;  %5501 = vst [vmem:[#allocation3 + $0x9c] sm:$0x1] %v5500_v42  ;;  %v15092_v7 = vadd.f32 %v17520_v15, %v17519_v55  ;;  %v6495_v19 = vunpack.c.l.b16 %v6317_v61  ;;  %11700 = vmatmul.msk.bf16.gmra.mxu0 %vm6537_vm5, %v7110_v49  ;;  %v6056_v61 = vld [vmem:[#allocation3 + $0x78] sm:$0xf] }
 0x429   : > { %17521 = vst [vmem:[#allocation53_spill] sm:$0xff] %v15094_v58  ;;  %v4945_v11 = vadd.f32 %v14691_v38, %v4263_v54  ;;  %v3524_v56 = vadd.f32 %v17522_v60, %v2842_v57  ;;  %v3949_v21 = vadd.f32 %v14734_v36, %v3523_v2  ;;  %v5778_v28 = vrot.slane %v15075_v20, 4  ;;  %v5998_v20 = vld [vmem:[#allocation3 + $0x8c] sm:$0x1]  ;;  %v8980_v58 = vld [vmem:[#allocation3 + $0x3c] sm:$0xf] }
 0x42a   : > { %v5995_v39 = vsel %vm14508_vm4, %v5777_v33, %v5994_v13  ;;  %v5590_v47 = vpack.c.bf16 %v5438_v35, %v5438_v35  ;;  %v12174_v53 = vld [vmem:[#allocation3 + $0x78] sm:$0xff]  ;;  %v6518_v24 = vpack.c.b16 %v6496_v32, %v6495_v19  ;;  %v11673_v38 = vrot.slane %v6914_v18, 9 }
 0x42b   : > { %v6057_v27 = vld [vmem:[#allocation3 + $0x7c] sm:$0xf]  ;;  %5996 = vst [vmem:[#allocation3 + $0x84] sm:$0xf] %v5995_v39  ;;  %v6082_v8 = vld [vmem:[#allocation3 + $0x80] sm:$0x1]  ;;  %v5371_v13 = vadd.f32 %v14678_v37, %v4945_v11  ;;  %11792 = vmatmul.msk.bf16.gmra.mxu1 %vm6537_vm5, %v12174_v53 }
 0x42c   : > { %v7024_v23 = vrot.slane %v6057_v27, 5  ;;  %v6338_v50 = vshll.u32 %v6057_v27, 16  ;;  %v5780_v6 = vshrl.u32 %v5590_v47, 16  ;;  %11568 = vmatmul.msk.bf16.gmra.mxu2 %vm6537_vm5, %v6518_v24  ;;  %v7027_v62 = vrot.slane %v6082_v8, 5 }
 0x42d   : > { %v6342_v32 = vshrl.u32 %v6057_v27, 16  ;;  %v5783_v2 = vshll.u32 %v5590_v47, 16  ;;  %v5407_v42 = vadd.f32 %v14816_v46, %v5371_v13  ;;  %v6329_v33 = vshrl.u32 %v6056_v61, 16  ;;  %v15113_v53 = vpop.f32.mrf.mxu0  ;;  %v5554_v13 = vld [vmem:[#allocation3 + $0xa4] sm:$0x1] }
 0x42e   : > { %v7026_v57 = vrot.slane %v7024_v23, 4  ;;  %v15106_v49 = vrot.slane %v6338_v50, 5  ;;  %v5782_v36 = vrot.slane %v5780_v6, 7  ;;  %v15109_v35 = vpop.f32.mrf.mxu2  ;;  %v4218_v37 = vpop.f32.mrf.mxu3  ;;  %v6332_v55 = vshll.u32 %v6056_v61, 16 }
 0x42f   : > { %v6344_v15 = vrot.slane %v6342_v32, 4  ;;  %v6348_v19 = vshll.u32 %v6082_v8, 16  ;;  %v5439_v11 = vmax.f32 %v5407_v42, 0.0  ;;  %v4264_v27 = vadd.f32 %v4218_v37, %v3949_v21  ;;  %v15115_v47 = vpop.f32.mrf.mxu1  ;;  %v12147_v21 = vld [vmem:[#allocation3 + $0x30] sm:$0xff]  ;;  %v17525_v42 = vld [vmem:[#allocation74_spill] sm:$0xff] }
 0x430   : > { %v7028_v54 = vsel %vm12535_vm13, %v7026_v57, %v7027_v62  ;;  %v5785_v18 = vor.u32 %v5783_v2, %v5782_v36  ;;  %v5787_v39 = vrot.slane %v5782_v36, 4  ;;  %17523 = vst [vmem:[#allocation66_spill] sm:$0xff] %v15115_v47  ;;  %v7025_v60 = vsel %vm12535_vm13, %v11673_v38, %v7024_v23  ;;  %v17524_v2 = vld [vmem:[#allocation98_spill] sm:$0xff]  ;;  %v5560_v47 = vld [vmem:[#allocation3 + $0xbc] sm:$0x1] }
 0x431   : > { %v6331_v24 = vrot.slane %v6329_v33, 4  ;;  %v6334_v50 = vrot.slane %v6332_v55, 5  ;;  %v6345_v6 = vor.u32 %v6344_v15, %v15106_v49  ;;  %v5591_v62 = vpack.c.bf16 %v5439_v11, %v5439_v11 }
 0x432   : > { %v5786_v57 = vsel %vm12554_vm15, %v5778_v28, %v5785_v18  ;;  %v5999_v8 = vsel %vm14384_vm7, %v5787_v39, %v5998_v20  ;;  %v4946_v61 = vadd.f32 %v14720_v3, %v4264_v27  ;;  %v7090_v32 = vunpack.c.l.b16 %v7028_v54  ;;  %v5502_v27 = vld [vmem:[#allocation3 + $0xa8] sm:$0x1] }
 0x433   : > { %5997 = vst.msk [vmem:[#allocation3 + $0x88] sm:$0xf] %vm5449_vm1, %v5786_v57  ;;  %v6335_v36 = vor.u32 %v6334_v50, %v6331_v24  ;;  %v6346_v23 = vrot.slane %v6345_v6, 4  ;;  %v6350_v38 = vrot.slane %v6348_v19, 5  ;;  %v2844_v33 = vadd.f32 %v17525_v42, %v17524_v2  ;;  %11651 = vmatmul.msk.bf16.gmra.mxu3 %vm6537_vm5, %v12147_v21  ;;  %v6001_v24 = vld [vmem:[#allocation3 + $0x90] sm:$0xf] }
 0x434   : > { %6000 = vst [vmem:[#allocation3 + $0x8c] sm:$0x1] %v5999_v8  ;;  %v5789_v37 = vshrl.u32 %v5591_v62, 16  ;;  %v5372_v28 = vadd.f32 %v14708_v59, %v4946_v61  ;;  %v5555_v20 = vsel %vm14414_vm3, 0, %v5554_v13  ;;  %v7089_v3 = vunpack.c.l.b16 %v7025_v60  ;;  %v17526_v59 = vld [vmem:[#allocation95_spill] sm:$0xff]  ;;  %v17528_v61 = vld [vmem:[#allocation78_spill] sm:$0xff] }
 0x435   : > { %v3950_v55 = vadd.f32 %v14762_v51, %v3524_v56  ;;  %v6336_v15 = vrot.slane %v6335_v36, 4  ;;  %v6351_v54 = vsel %vm12500_vm9, %v6346_v23, %v6350_v38  ;;  %5556 = vst [vmem:[#allocation3 + $0xa4] sm:$0x1] %v5555_v20  ;;  %v5792_v18 = vshll.u32 %v5591_v62, 16  ;;  %v15148_v8 = vpop.f32.mrf.mxu0  ;;  %v17527_v62 = vld [vmem:[#allocation75_spill] sm:$0xff] }
 0x436   : > { %v15135_v19 = vrot.slane %v5789_v37, 7  ;;  %v5408_v39 = vadd.f32 %v14816_v46, %v5372_v28  ;;  %v3525_v11 = vadd.f32 %v17526_v59, %v15092_v7  ;;  %v15140_v50 = vpop.f32.mrf.mxu2  ;;  %v7111_v60 = vpack.c.b16 %v7090_v32, %v7089_v3  ;;  %v4221_v6 = vpop.f32.mrf.mxu3  ;;  %v6915_v23 = vld [vmem:[#allocation3 + $0x84] sm:$0xe]  ;;  %v17530_v28 = vld [vmem:[#allocation96_spill] sm:$0xff] }
 0x437   : > { %v6341_v51 = vsel %vm12500_vm9, %v6336_v15, %v15106_v49  ;;  %v6498_v56 = vunpack.c.l.b16 %v6351_v54  ;;  %v5503_v13 = vsel %vm14384_vm7, 0, %v5502_v27  ;;  %v4265_v7 = vadd.f32 %v4221_v6, %v3950_v55  ;;  %v15154_v36 = vpop.f32.mrf.mxu1  ;;  %v6058_v6 = vld [vmem:[#allocation3 + $0x84] sm:$0xf] }
 0x438   : > { %v5794_v57 = vor.u32 %v5792_v18, %v15135_v19  ;;  %v5440_v46 = vmax.f32 %v5408_v39, 0.0  ;;  %5504 = vst [vmem:[#allocation3 + $0xa8] sm:$0x1] %v5503_v13  ;;  %v15152_v21 = vadd.f32 %v17528_v61, %v17527_v62  ;;  %v6497_v32 = vunpack.c.l.b16 %v6341_v51  ;;  %11701 = vmatmul.msk.bf16.gmra.mxu0 %vm6537_vm5, %v7111_v60  ;;  %v6005_v13 = vld [vmem:[#allocation3 + $0x98] sm:$0x1] }
 0x439   : > { %17529 = vst [vmem:[#allocation19_spill] sm:$0xff] %v15154_v36  ;;  %v4947_v2 = vadd.f32 %v14757_v34, %v4265_v7  ;;  %v3526_v20 = vadd.f32 %v17530_v28, %v2844_v33  ;;  %v3951_v55 = vadd.f32 %v14803_v5, %v3525_v11  ;;  %v5795_v39 = vrot.slane %v15135_v19, 4  ;;  %v15171_v19 = vld [vmem:[%s17189_s4] ss:$0 sm:$0xff] }
 0x43a   : > { %v6002_v49 = vsel %vm14508_vm4, %v5794_v57, %v6001_v24  ;;  %v5592_v38 = vpack.c.bf16 %v5440_v46, %v5440_v46  ;;  %v12175_v42 = vld [vmem:[#allocation3 + $0x84] sm:$0xff]  ;;  %v6519_v3 = vpack.c.b16 %v6498_v56, %v6497_v32  ;;  %v11674_v34 = vrot.slane %v6915_v23, 9 }
 0x43b   : > { %v6059_v37 = vld [vmem:[#allocation3 + $0x88] sm:$0xf]  ;;  %6003 = vst [vmem:[#allocation3 + $0x90] sm:$0xf] %v6002_v49  ;;  %v6083_v15 = vld [vmem:[#allocation3 + $0x8c] sm:$0x1]  ;;  %v5373_v27 = vadd.f32 %v14749_v4, %v4947_v2  ;;  %11793 = vmatmul.msk.bf16.gmra.mxu1 %vm6537_vm5, %v12175_v42 }
 0x43c   : > { %v7031_v54 = vrot.slane %v6059_v37, 5  ;;  %v6362_v18 = vshll.u32 %v6059_v37, 16  ;;  %v5797_v59 = vshrl.u32 %v5592_v38, 16  ;;  %11569 = vmatmul.msk.bf16.gmra.mxu2 %vm6537_vm5, %v6519_v3  ;;  %v7034_v24 = vrot.slane %v6083_v15, 5 }
 0x43d   : > { %v6366_v51 = vshrl.u32 %v6059_v37, 16  ;;  %v5800_v11 = vshll.u32 %v5592_v38, 16  ;;  %v5409_v4 = vadd.f32 %v15171_v19, %v5373_v27  ;;  %v6353_v56 = vshrl.u32 %v6058_v6, 16  ;;  %v15176_v38 = vpop.f32.mrf.mxu0  ;;  %v5557_v27 = vld [vmem:[#allocation3 + $0xb0] sm:$0x1] }
 0x43e   : > { %v7033_v33 = vrot.slane %v7031_v54, 4  ;;  %v15166_v60 = vrot.slane %v6362_v18, 5  ;;  %v5799_v5 = vrot.slane %v5797_v59, 7  ;;  %v4223_v57 = vpop.f32.mrf.mxu3  ;;  %v6356_v7 = vshll.u32 %v6058_v6, 16  ;;  %v15178_v2 = vpop.f32.mrf.mxu2 }
 0x43f   : > { %v6368_v62 = vrot.slane %v6366_v51, 4  ;;  %v6372_v61 = vshll.u32 %v6083_v15, 16  ;;  %v5441_v49 = vmax.f32 %v5409_v4, 0.0  ;;  %v4266_v42 = vadd.f32 %v4223_v57, %v3951_v55  ;;  %v15180_v37 = vpop.f32.mrf.mxu1  ;;  %v12148_v55 = vld [vmem:[#allocation3 + $0x3c] sm:$0xff]  ;;  %v17533_v4 = vld [vmem:[#allocation80_spill] sm:$0xff] }
 0x440   : > { %v7035_v46 = vsel %vm12535_vm13, %v7033_v33, %v7034_v24  ;;  %v5802_v32 = vor.u32 %v5800_v11, %v5799_v5  ;;  %v5804_v23 = vrot.slane %v5799_v5, 4  ;;  %17531 = vst [vmem:[#allocation70_spill] sm:$0xff] %v15180_v37  ;;  %v7032_v28 = vsel %vm12535_vm13, %v11674_v34, %v7031_v54  ;;  %v17532_v11 = vld [vmem:[#allocation104_spill] sm:$0xff] }
 0x441   : > { %v6355_v3 = vrot.slane %v6353_v56, 4  ;;  %v6358_v18 = vrot.slane %v6356_v7, 5  ;;  %v6369_v59 = vor.u32 %v6368_v62, %v15166_v60  ;;  %v5593_v24 = vpack.c.bf16 %v5441_v49, %v5441_v49  ;;  %v17534_v7 = vld [vmem:[#allocation13_spill] sm:$0xff] }
 0x442   : > { %v5803_v15 = vsel %vm12554_vm15, %v5795_v39, %v5802_v32  ;;  %v6006_v33 = vsel %vm14384_vm7, %v5804_v23, %v6005_v13  ;;  %v4948_v6 = vadd.f32 %v14792_v31, %v4266_v42  ;;  %v7092_v51 = vunpack.c.l.b16 %v7035_v46 }
 0x443   : > { %6004 = vst.msk [vmem:[#allocation3 + $0x94] sm:$0xf] %vm5449_vm1, %v5803_v15  ;;  %v6359_v5 = vor.u32 %v6358_v18, %v6355_v3  ;;  %v6370_v54 = vrot.slane %v6369_v59, 4  ;;  %v6374_v34 = vrot.slane %v6372_v61, 5  ;;  %v2846_v56 = vadd.f32 %v17533_v4, %v17532_v11  ;;  %11652 = vmatmul.msk.bf16.gmra.mxu3 %vm6537_vm5, %v12148_v55  ;;  %v5505_v3 = vld [vmem:[#allocation3 + $0xb4] sm:$0x1] }
 0x444   : > { %6007 = vst [vmem:[#allocation3 + $0x98] sm:$0x1] %v6006_v33  ;;  %v5806_v57 = vshrl.u32 %v5593_v24, 16  ;;  %v5374_v39 = vadd.f32 %v14778_v52, %v4948_v6  ;;  %v5558_v13 = vsel %vm14414_vm3, 0, %v5557_v27  ;;  %v7091_v31 = vunpack.c.l.b16 %v7032_v28  ;;  %v17535_v52 = vld [vmem:[#allocation42_spill] sm:$0xff]  ;;  %v17536_v6 = vld [vmem:[#allocation108_spill] sm:$0xff] }
 0x445   : > { %v3952_v62 = vadd.f32 %v17534_v7, %v3526_v20  ;;  %v6360_v32 = vrot.slane %v6359_v5, 4  ;;  %v6375_v46 = vsel %vm12500_vm9, %v6370_v54, %v6374_v34  ;;  %5559 = vst [vmem:[#allocation3 + $0xb0] sm:$0x1] %v5558_v13  ;;  %v5809_v23 = vshll.u32 %v5593_v24, 16  ;;  %v6008_v18 = vld [vmem:[#allocation3 + $0x9c] sm:$0xf]  ;;  %v15215_v54 = vpop.f32.mrf.mxu0 }
 0x446   : > { %v15200_v61 = vrot.slane %v5806_v57, 7  ;;  %v5410_v49 = vadd.f32 %v15171_v19, %v5374_v39  ;;  %v3527_v42 = vadd.f32 %v17535_v52, %v15152_v21  ;;  %v7112_v59 = vpack.c.b16 %v7092_v51, %v7091_v31  ;;  %v4226_v27 = vpop.f32.mrf.mxu3  ;;  %v6916_v15 = vld [vmem:[#allocation3 + $0x90] sm:$0xe]  ;;  %v17537_v24 = vld [vmem:[#allocation83_spill] sm:$0xff]  ;;  %17538 = vst [vmem:[#allocation57_spill] sm:$0xff] %v15215_v54  ;;  %v15217_v51 = vpop.f32.mrf.mxu2  ;;  %v17541_v57 = vld [vmem:[#allocation10_spill] sm:$0xff] }
 0x447   : > { %v6365_v20 = vsel %vm12500_vm9, %v6360_v32, %v15166_v60  ;;  %v6500_v28 = vunpack.c.l.b16 %v6375_v46  ;;  %v5506_v33 = vsel %vm14384_vm7, 0, %v5505_v3  ;;  %v15212_v55 = vadd.f32 %v17537_v24, %v17536_v6  ;;  %v17539_v11 = vld [vmem:[#allocation112_spill] sm:$0xff]  ;;  %v17540_v60 = vld [vmem:[#allocation85_spill] sm:$0xff]  ;;  %v17542_v39 = vld [vmem:[#allocation87_spill] sm:$0xff] }
 0x448   : > { %v5811_v5 = vor.u32 %v5809_v23, %v15200_v61  ;;  %v5442_v21 = vmax.f32 %v5410_v49, 0.0  ;;  %v4267_v34 = vadd.f32 %v4226_v27, %v3952_v62  ;;  %5507 = vst [vmem:[#allocation3 + $0xb4] sm:$0x1] %v5506_v33  ;;  %v15221_v4 = vadd.f32 %v17540_v60, %v17539_v11  ;;  %v15227_v7 = vpop.f32.mrf.mxu1  ;;  %v17544_v32 = vld [vmem:[#allocation16_spill] sm:$0xff]  ;;  %v17545_v52 = vld [vmem:[#allocation47_spill] sm:$0xff]  ;;  %11702 = vmatmul.msk.bf16.gmra.mxu0 %vm6537_vm5, %v7112_v59  ;;  %v17546_v24 = vld [vmem:[#allocation14_spill] sm:$0xff] }
 0x449   : > { %v15225_v13 = vadd.f32 %v17542_v39, %v17541_v57  ;;  %v6499_v31 = vunpack.c.l.b16 %v6365_v20  ;;  %17543 = vst [vmem:[#allocation73_spill] sm:$0xff] %v15227_v7  ;;  %v3528_v46 = vadd.f32 %v17544_v32, %v2846_v56  ;;  %v11675_v33 = vrot.slane %v6916_v15, 9 }
 0x44a   : > { %v6009_v23 = vsel %vm14508_vm4, %v5811_v5, %v6008_v18  ;;  %v5594_v49 = vpack.c.bf16 %v5442_v21, %v5442_v21  ;;  %v4949_v62 = vadd.f32 %v17545_v52, %v4267_v34  ;;  %v12176_v3 = vld [vmem:[#allocation3 + $0x90] sm:$0xff]  ;;  %v3953_v11 = vadd.f32 %v17546_v24, %v3527_v42  ;;  %v17547_v18 = vld [vmem:[#allocation55_spill] sm:$0xff] }
 0x44b   : > { %v6061_v27 = vld [vmem:[#allocation3 + $0x94] sm:$0xf]  ;;  %6010 = vst [vmem:[#allocation3 + $0x9c] sm:$0xf] %v6009_v23  ;;  %v6520_v6 = vpack.c.b16 %v6500_v28, %v6499_v31  ;;  %v6084_v20 = vld [vmem:[#allocation3 + $0x98] sm:$0x1]  ;;  %11794 = vmatmul.msk.bf16.gmra.mxu1 %vm6537_vm5, %v12176_v3 }
 0x44c   : > { %v7038_v60 = vrot.slane %v6061_v27, 5  ;;  %v6386_v57 = vshll.u32 %v6061_v27, 16  ;;  %v5812_v56 = vrot.slane %v15200_v61, 4  ;;  %v5814_v39 = vshrl.u32 %v5594_v49, 16  ;;  %v6060_v34 = vld [vmem:[#allocation3 + $0x90] sm:$0xf] }
 0x44d   : > { %v5817_v32 = vshll.u32 %v5594_v49, 16  ;;  %v5375_v5 = vadd.f32 %v17547_v18, %v4949_v62  ;;  %11570 = vmatmul.msk.bf16.gmra.mxu2 %vm6537_vm5, %v6520_v6  ;;  %v7041_v21 = vrot.slane %v6084_v20, 5  ;;  %v6390_v28 = vshrl.u32 %v6061_v27, 16  ;;  %v6012_v49 = vld [vmem:[#allocation3 + $0xa4] sm:$0x1]  ;;  %v15246_v37 = vpop.f32.mrf.mxu0 }
 0x44e   : > { %v7040_v15 = vrot.slane %v7038_v60, 4  ;;  %v15239_v59 = vrot.slane %v6386_v57, 5  ;;  %v5816_v42 = vrot.slane %v5814_v39, 7  ;;  %v7039_v61 = vsel %vm12535_vm13, %v11675_v33, %v7038_v60  ;;  %v4228_v52 = vpop.f32.mrf.mxu3  ;;  %17548 = vst [vmem:[#allocation61_spill] sm:$0xff] %v15246_v37  ;;  %v15248_v27 = vpop.f32.mrf.mxu2 }
 0x44f   : > { %v5411_v31 = vadd.f32 %v15171_v19, %v5375_v5  ;;  %v6377_v23 = vshrl.u32 %v6060_v34, 16  ;;  %v6380_v3 = vshll.u32 %v6060_v34, 16  ;;  %v6392_v6 = vrot.slane %v6390_v28, 4  ;;  %v12149_v28 = vld [vmem:[#allocation3 + $0x48] sm:$0xff] }
 0x450   : > { %v7042_v62 = vsel %vm12535_vm13, %v7040_v15, %v7041_v21  ;;  %v6396_v24 = vshll.u32 %v6084_v20, 16  ;;  %v5819_v18 = vor.u32 %v5817_v32, %v5816_v42  ;;  %v5821_v7 = vrot.slane %v5816_v42, 4  ;;  %v15250_v5 = vpop.f32.mrf.mxu1  ;;  %v17550_v21 = vld [vmem:[#allocation49_spill] sm:$0xff] }
 0x451   : > { %v5443_v57 = vmax.f32 %v5411_v31, 0.0  ;;  %v4268_v39 = vadd.f32 %v4228_v52, %v3953_v11  ;;  %17549 = vst [vmem:[#allocation21_spill] sm:$0xff] %v15250_v5  ;;  %v7094_v33 = vunpack.c.l.b16 %v7042_v62  ;;  %v6379_v60 = vrot.slane %v6377_v23, 4  ;;  %v17551_v62 = vld [vmem:[#allocation59_spill] sm:$0xff] }
 0x452   : > { %v6382_v36 = vrot.slane %v6380_v3, 5  ;;  %v6393_v54 = vor.u32 %v6392_v6, %v15239_v59  ;;  %v5820_v15 = vsel %vm12554_vm15, %v5812_v56, %v5819_v18  ;;  %v6013_v20 = vsel %vm14384_vm7, %v5821_v7, %v6012_v49  ;;  %v17552_v18 = vld [vmem:[#allocation18_spill] sm:$0xff] }
 0x453   : > { %v5595_v32 = vpack.c.bf16 %v5443_v57, %v5443_v57  ;;  %v4950_v34 = vadd.f32 %v17550_v21, %v4268_v39  ;;  %6011 = vst.msk [vmem:[#allocation3 + $0xa0] sm:$0xf] %vm5449_vm1, %v5820_v15  ;;  %v3954_v11 = vadd.f32 %v14913_v29, %v3528_v46  ;;  %v6398_v23 = vrot.slane %v6396_v24, 5  ;;  %11653 = vmatmul.msk.bf16.gmra.mxu3 %vm6537_vm5, %v12149_v28  ;;  %v5508_v39 = vld [vmem:[#allocation3 + $0xc0] sm:$0x1] }
 0x454   : > { %v6383_v42 = vor.u32 %v6382_v36, %v6379_v60  ;;  %v6394_v31 = vrot.slane %v6393_v54, 4  ;;  %6014 = vst [vmem:[#allocation3 + $0xa4] sm:$0x1] %v6013_v20  ;;  %v7093_v56 = vunpack.c.l.b16 %v7039_v61  ;;  %v5561_v7 = vsel %vm14414_vm3, 0, %v5560_v47  ;;  %v17553_v36 = vld [vmem:[#allocation54_spill] sm:$0xff] }
 0x455   : > { %v5823_v52 = vshrl.u32 %v5595_v32, 16  ;;  %v5376_v3 = vadd.f32 %v17551_v62, %v4950_v34  ;;  %v3529_v29 = vadd.f32 %v17552_v18, %v15212_v55  ;;  %5562 = vst [vmem:[#allocation3 + $0xbc] sm:$0x1] %v5561_v7  ;;  %v3531_v54 = vadd.f32 %v17553_v36, %v15225_v13  ;;  %v6015_v60 = vld [vmem:[#allocation3 + $0xa8] sm:$0xf] }
 0x456   : > { %v6384_v49 = vrot.slane %v6383_v42, 4  ;;  %v6399_v6 = vsel %vm12500_vm9, %v6394_v31, %v6398_v23  ;;  %v5826_v24 = vshll.u32 %v5595_v32, 16  ;;  %v7113_v61 = vpack.c.b16 %v7094_v33, %v7093_v56  ;;  %v4231_v47 = vpop.f32.mrf.mxu3  ;;  %v6917_v21 = vld [vmem:[#allocation3 + $0x9c] sm:$0xe]  ;;  %v15282_v28 = vpop.f32.mrf.mxu2 }
 0x457   : > { %v15270_v46 = vrot.slane %v5823_v52, 7  ;;  %v5412_v57 = vadd.f32 %v15171_v19, %v5376_v3  ;;  %v6502_v20 = vunpack.c.l.b16 %v6399_v6  ;;  %v5509_v55 = vsel %vm14384_vm7, 0, %v5508_v39  ;;  %17554 = vst [vmem:[#allocation24_spill] sm:$0xff] %v15282_v28  ;;  %v15284_v42 = vpop.f32.mrf.mxu0 }
 0x458   : > { %v6389_v15 = vsel %vm12500_vm9, %v6384_v49, %v15239_v59  ;;  %v15279_v13 = vadd.f32 %v15020_v14, %v3531_v54  ;;  %v4269_v33 = vadd.f32 %v4231_v47, %v3954_v11  ;;  %5510 = vst [vmem:[#allocation3 + $0xc0] sm:$0x1] %v5509_v55  ;;  %v17556_v59 = vld [vmem:[#allocation20_spill] sm:$0xff]  ;;  %v17557_v14 = vld [vmem:[#allocation62_spill] sm:$0xff]  ;;  %v15293_v56 = vpop.f32.mrf.mxu1  ;;  %v11676_v6 = vrot.slane %v6917_v21, 9  ;;  %11703 = vmatmul.msk.bf16.gmra.mxu0 %vm6537_vm5, %v7113_v61 }
 0x459   : > { %v5828_v32 = vor.u32 %v5826_v24, %v15270_v46  ;;  %v5444_v34 = vmax.f32 %v5412_v57, 0.0  ;;  %17555 = vst [vmem:[#allocation77_spill] sm:$0xff] %v15284_v42  ;;  %v6501_v31 = vunpack.c.l.b16 %v6389_v15  ;;  %v15288_v23 = vadd.f32 %v17556_v59, %v15221_v4  ;;  %v6062_v55 = vld [vmem:[#allocation3 + $0x9c] sm:$0xf] }
 0x45a   : > { %v4951_v3 = vadd.f32 %v17557_v14, %v4269_v33  ;;  %17558 = vst [vmem:[#allocation64_spill] sm:$0xff] %v15293_v56  ;;  %v12177_v7 = vld [vmem:[#allocation3 + $0x9c] sm:$0xff]  ;;  %v3955_v18 = vadd.f32 %v14943_v0, %v3529_v29  ;;  %v5829_v24 = vrot.slane %v15270_v46, 4  ;;  %v6401_v46 = vshrl.u32 %v6062_v55, 16 }
 0x45b   : > { %v6016_v52 = vsel %vm14508_vm4, %v5828_v32, %v6015_v60  ;;  %v5596_v62 = vpack.c.bf16 %v5444_v34, %v5444_v34  ;;  %v6063_v49 = vld [vmem:[#allocation3 + $0xa0] sm:$0xf]  ;;  %v6521_v11 = vpack.c.b16 %v6502_v20, %v6501_v31  ;;  %v6085_v36 = vld [vmem:[#allocation3 + $0xa4] sm:$0x1]  ;;  %v17559_v60 = vld [vmem:[#allocation15_spill] sm:$0xff]  ;;  %11795 = vmatmul.msk.bf16.gmra.mxu1 %vm6537_vm5, %v12177_v7  ;;  %v6404_v59 = vshll.u32 %v6062_v55, 16 }
 0x45c   : > { %6017 = vst [vmem:[#allocation3 + $0xa8] sm:$0xf] %v6016_v52  ;;  %v7045_v4 = vrot.slane %v6063_v49, 5  ;;  %v6410_v54 = vshll.u32 %v6063_v49, 16  ;;  %v5377_v47 = vadd.f32 %v17559_v60, %v4951_v3  ;;  %v7048_v21 = vrot.slane %v6085_v36, 5 }
 0x45d   : > { %v5831_v57 = vshrl.u32 %v5596_v62, 16  ;;  %v5834_v39 = vshll.u32 %v5596_v62, 16  ;;  %11571 = vmatmul.msk.bf16.gmra.mxu2 %vm6537_vm5, %v6521_v11  ;;  %v6414_v20 = vshrl.u32 %v6063_v49, 16  ;;  %v6019_v34 = vld [vmem:[#allocation3 + $0xb0] sm:$0x1]  ;;  %v6420_v62 = vshll.u32 %v6085_v36, 16 }
 0x45e   : > { %v7047_v15 = vrot.slane %v7045_v4, 4  ;;  %v6412_v61 = vrot.slane %v6410_v54, 5  ;;  %v5413_v0 = vadd.f32 %v15171_v19, %v5377_v47  ;;  %v7046_v29 = vsel %vm12535_vm13, %v11676_v6, %v7045_v4  ;;  %v4233_v33 = vpop.f32.mrf.mxu3  ;;  %v15306_v11 = vpop.f32.mrf.mxu2  ;;  %v5563_v6 = vld [vmem:[#allocation3 + $0xc8] sm:$0x1] }
 0x45f   : > { %v5833_v32 = vrot.slane %v5831_v57, 7  ;;  %v6416_v52 = vrot.slane %v6414_v20, 4  ;;  %17560 = vst [vmem:[#allocation26_spill] sm:$0xff] %v15306_v11  ;;  %v4270_v49 = vadd.f32 %v4233_v33, %v3955_v18  ;;  %v6403_v57 = vrot.slane %v6401_v46, 4  ;;  %v15314_v55 = vpop.f32.mrf.mxu0  ;;  %v17562_v46 = vld [vmem:[#allocation52_spill] sm:$0xff] }
 0x460   : > { %v7049_v31 = vsel %vm12535_vm13, %v7047_v15, %v7048_v21  ;;  %v5445_v7 = vmax.f32 %v5413_v0, 0.0  ;;  %v6406_v60 = vrot.slane %v6404_v59, 5  ;;  %17561 = vst [vmem:[#allocation68_spill] sm:$0xff] %v15314_v55 }
 0x461   : > { %v5836_v14 = vor.u32 %v5834_v39, %v5833_v32  ;;  %v5838_v3 = vrot.slane %v5833_v32, 4  ;;  %v7096_v54 = vunpack.c.l.b16 %v7049_v31  ;;  %v6417_v47 = vor.u32 %v6416_v52, %v6412_v61  ;;  %v12150_v39 = vld [vmem:[#allocation3 + $0x54] sm:$0xff]  ;;  %v15317_v31 = vpop.f32.mrf.mxu1 }
 0x462   : > { %v5597_v21 = vpack.c.bf16 %v5445_v7, %v5445_v7  ;;  %v4952_v36 = vadd.f32 %v14934_v22, %v4270_v49  ;;  %v6407_v18 = vor.u32 %v6406_v60, %v6403_v57  ;;  %v6422_v32 = vrot.slane %v6420_v62, 5  ;;  %17563 = vst [vmem:[#allocation28_spill] sm:$0xff] %v15317_v31  ;;  %v6022_v57 = vld [vmem:[#allocation3 + $0xb4] sm:$0xf] }
 0x463   : > { %v5837_v4 = vsel %vm12554_vm15, %v5829_v24, %v5836_v14  ;;  %v6020_v15 = vsel %vm14384_vm7, %v5838_v3, %v6019_v34  ;;  %v6418_v20 = vrot.slane %v6417_v47, 4  ;;  %11654 = vmatmul.msk.bf16.gmra.mxu3 %vm6537_vm5, %v12150_v39  ;;  %v7095_v24 = vunpack.c.l.b16 %v7046_v29  ;;  %v6064_v49 = vld [vmem:[#allocation3 + $0xa8] sm:$0xf] }
 0x464   : > { %6018 = vst.msk [vmem:[#allocation3 + $0xac] sm:$0xf] %vm5449_vm1, %v5837_v4  ;;  %v5840_v0 = vshrl.u32 %v5597_v21, 16  ;;  %v5378_v33 = vadd.f32 %v17562_v46, %v4952_v36  ;;  %v5564_v22 = vsel %vm14414_vm3, 0, %v5563_v6  ;;  %v3956_v34 = vadd.f32 %v14985_v16, %v15288_v23  ;;  %v6918_v46 = vld [vmem:[#allocation3 + $0xa8] sm:$0xe] }
 0x465   : > { %6021 = vst [vmem:[#allocation3 + $0xb0] sm:$0x1] %v6020_v15  ;;  %v6408_v59 = vrot.slane %v6407_v18, 4  ;;  %v6423_v52 = vsel %vm12500_vm9, %v6418_v20, %v6422_v32  ;;  %v5843_v14 = vshll.u32 %v5597_v21, 16  ;;  %v7114_v7 = vpack.c.b16 %v7096_v54, %v7095_v24 }
 0x466   : > { %5565 = vst [vmem:[#allocation3 + $0xc8] sm:$0x1] %v5564_v22  ;;  %v5842_v62 = vrot.slane %v5840_v0, 7  ;;  %v5414_v3 = vadd.f32 %v15171_v19, %v5378_v33  ;;  %v4236_v60 = vpop.f32.mrf.mxu3  ;;  %v6504_v47 = vunpack.c.l.b16 %v6423_v52  ;;  %v6425_v6 = vshrl.u32 %v6064_v49, 16  ;;  %v15329_v15 = vpop.f32.mrf.mxu2  ;;  %v17565_v52 = vld [vmem:[#allocation7_spill] sm:$0xff] }
 0x467   : > { %v6413_v29 = vsel %vm12500_vm9, %v6408_v59, %v6412_v61  ;;  %v6428_v4 = vshll.u32 %v6064_v49, 16  ;;  %17564 = vst [vmem:[#allocation69_spill] sm:$0xff] %v15329_v15  ;;  %v4271_v36 = vadd.f32 %v4236_v60, %v3956_v34 }
 0x468   : > { %v5845_v16 = vor.u32 %v5843_v14, %v5842_v62  ;;  %v5446_v23 = vmax.f32 %v5414_v3, 0.0  ;;  %v6503_v39 = vunpack.c.l.b16 %v6413_v29  ;;  %v6427_v18 = vrot.slane %v6425_v6, 4  ;;  %11704 = vmatmul.msk.bf16.gmra.mxu0 %vm6537_vm5, %v7114_v7  ;;  %v15337_v3 = vpop.f32.mrf.mxu0 }
 0x469   : > { %v4953_v20 = vadd.f32 %v14967_v26, %v4271_v36  ;;  %v6430_v61 = vrot.slane %v6428_v4, 5  ;;  %17566 = vst [vmem:[#allocation30_spill] sm:$0xff] %v15337_v3  ;;  %v11677_v26 = vrot.slane %v6918_v46, 9  ;;  %v5846_v4 = vrot.slane %v5842_v62, 4 }
 0x46a   : > { %v6023_v21 = vsel %vm14508_vm4, %v5845_v16, %v6022_v57  ;;  %v5598_v54 = vpack.c.bf16 %v5446_v23, %v5446_v23  ;;  %v6522_v33 = vpack.c.b16 %v6504_v47, %v6503_v39  ;;  %v15341_v47 = vpop.f32.mrf.mxu1  ;;  %v6026_v16 = vld [vmem:[#allocation3 + $0xbc] sm:$0x1] }
 0x46b   : > { %v12178_v32 = vld [vmem:[#allocation3 + $0xa8] sm:$0xff]  ;;  %6024 = vst [vmem:[#allocation3 + $0xb4] sm:$0xf] %v6023_v21  ;;  %v5379_v14 = vadd.f32 %v17565_v52, %v4953_v20  ;;  %v6431_v39 = vor.u32 %v6430_v61, %v6427_v18 }
 0x46c   : > { %v6065_v0 = vld [vmem:[#allocation3 + $0xac] sm:$0xf]  ;;  %v6086_v24 = vld [vmem:[#allocation3 + $0xb0] sm:$0x1]  ;;  %v5848_v34 = vshrl.u32 %v5598_v54, 16  ;;  %11796 = vmatmul.msk.bf16.gmra.mxu1 %vm6537_vm5, %v12178_v32  ;;  %v5851_v29 = vshll.u32 %v5598_v54, 16 }
 0x46d   : > { %v7052_v22 = vrot.slane %v6065_v0, 5  ;;  %v6434_v59 = vshll.u32 %v6065_v0, 16  ;;  %11572 = vmatmul.msk.bf16.gmra.mxu2 %vm6537_vm5, %v6522_v33  ;;  %v7055_v57 = vrot.slane %v6086_v24, 5  ;;  %v5415_v7 = vadd.f32 %v15171_v19, %v5379_v14  ;;  %17567 = vst [vmem:[#allocation72_spill] sm:$0xff] %v15341_v47  ;;  %v15432_v47 = vld [vmem:[#allocation3 + $0x14] sm:$0x1] }
 0x46e   : > { %v5850_v60 = vrot.slane %v5848_v34, 7  ;;  %v6438_v6 = vshrl.u32 %v6065_v0, 16  ;;  %v4238_v23 = vpop.f32.mrf.mxu3  ;;  %v15345_v33 = vpop.f32.mrf.mxu2  ;;  %v12204_v34 = vld [vmem:[%s17190_s5 + $0x68] sm:$0xff]  ;;  %v6444_v52 = vshll.u32 %v6086_v24, 16 }
 0x46f   : > { %v7054_v49 = vrot.slane %v7052_v22, 4  ;;  %v6436_v21 = vrot.slane %v6434_v59, 5  ;;  %v5447_v46 = vmax.f32 %v5415_v7, 0.0  ;;  %17568 = vst [vmem:[#allocation46_spill] sm:$0xff] %v15345_v33  ;;  %v4272_v54 = vadd.f32 %v4238_v23, %v15279_v13  ;;  %8856 = vmatpush.bf16.msra.mxu0 %v12204_v34 }
 0x470   : > { %v5853_v20 = vor.u32 %v5851_v29, %v5850_v60  ;;  %v5855_v32 = vrot.slane %v5850_v60, 4  ;;  %v7053_v62 = vsel %vm12535_vm13, %v11677_v26, %v7052_v22  ;;  %v6440_v0 = vrot.slane %v6438_v6, 4  ;;  %v17569_v26 = vld [vmem:[#allocation17_spill] sm:$0xff] }
 0x471   : > { %v7056_v36 = vsel %vm12535_vm13, %v7054_v49, %v7055_v57  ;;  %v5599_v59 = vpack.c.bf16 %v5447_v46, %v5447_v46  ;;  %v4954_v14 = vadd.f32 %v14995_v30, %v4272_v54  ;;  %v12151_v49 = vld [vmem:[#allocation3 + $0x60] sm:$0xff]  ;;  %v7097_v29 = vunpack.c.l.b16 %v7053_v62  ;;  %v15366_v54 = vpop.f32.mrf.mxu0 }
 0x472   : > { %v5854_v18 = vsel %vm12554_vm15, %v5846_v4, %v5853_v20  ;;  %v6027_v61 = vsel %vm14384_vm7, %v5855_v32, %v6026_v16  ;;  %v6066_v13 = vld [vmem:[#allocation3 + $0xb4] sm:$0xf]  ;;  %v7098_v57 = vunpack.c.l.b16 %v7056_v36  ;;  %v6441_v60 = vor.u32 %v6440_v0, %v6436_v21  ;;  %v6029_v46 = vld [vmem:[#allocation3 + $0xc0] sm:$0xf]  ;;  %17570 = vst [vmem:[#allocation33_spill] sm:$0xff] %v15366_v54 }
 0x473   : > { %6025 = vst.msk [vmem:[#allocation3 + $0xb8] sm:$0xf] %vm5449_vm1, %v5854_v18  ;;  %v5857_v22 = vshrl.u32 %v5599_v59, 16  ;;  %v5380_v24 = vadd.f32 %v17569_v26, %v4954_v14  ;;  %11655 = vmatmul.msk.bf16.gmra.mxu3 %vm6537_vm5, %v12151_v49  ;;  %v6432_v7 = vrot.slane %v6431_v39, 4  ;;  %v6446_v4 = vrot.slane %v6444_v52, 5  ;;  %v15373_v18 = vpop.f32.mrf.mxu1 }
 0x474   : > { %6028 = vst [vmem:[#allocation3 + $0xbc] sm:$0x1] %v6027_v61  ;;  %v6442_v6 = vrot.slane %v6441_v60, 4  ;;  %v6449_v16 = vshrl.u32 %v6066_v13, 16  ;;  %v6452_v23 = vshll.u32 %v6066_v13, 16  ;;  %v5860_v20 = vshll.u32 %v5599_v59, 16 }
 0x475   : > { %v15361_v30 = vrot.slane %v5857_v22, 7  ;;  %v5416_v32 = vadd.f32 %v15171_v19, %v5380_v24  ;;  %v6437_v36 = vsel %vm12500_vm9, %v6432_v7, %v6436_v21  ;;  %v7115_v34 = vpack.c.b16 %v7098_v57, %v7097_v29  ;;  %17571 = vst [vmem:[#allocation65_spill] sm:$0xff] %v15373_v18  ;;  %v12203_v19 = vld [vmem:[%s17190_s5 + $0x60] sm:$0xff]  ;;  %v12186_v21 = vld [vmem:[%s17190_s5 + $0x58] sm:$0xff] }
 0x476   : > { %v15368_v0 = vpop.f32.mrf.mxu3  ;;  %v6447_v39 = vsel %vm12500_vm9, %v6442_v6, %v6446_v4  ;;  %v15375_v61 = vpop.f32.mrf.mxu2  ;;  %v6505_v59 = vunpack.c.l.b16 %v6437_v36  ;;  %v6451_v49 = vrot.slane %v6449_v16, 4  ;;  %v6454_v13 = vrot.slane %v6452_v23, 5  ;;  %8857 = vmatpush.bf16.msra.mxu0 %v12203_v19  ;;  %8557 = vmatpush.bf16.msra.mxu3 %v12186_v21  ;;  %v6919_v4 = vld [vmem:[#allocation3 + $0xb4] sm:$0xe]  ;;  %v15394_v19 = vld [vmem:[#allocation3 + $0x10] sm:$0xf] }
 0x477   : > { %v5862_v62 = vor.u32 %v5860_v20, %v15361_v30  ;;  %v5448_v52 = vmax.f32 %v5416_v32, 0.0  ;;  %17572 = vst [vmem:[#allocation101_spill] sm:$0xff] %v15375_v61  ;;  %v6506_v14 = vunpack.c.l.b16 %v6447_v39  ;;  %v6033_v21 = vld [vmem:[#allocation3 + $0xc8] sm:$0x1]  ;;  %v8263_v61 = vld [vmem:[#allocation3 + $0x18] sm:$0xe] }
 0x478   : > { %11705 = vmatmul.msk.bf16.gmra.mxu0 %vm6537_vm5, %v7115_v34  ;;  %v6455_v32 = vor.u32 %v6454_v13, %v6451_v49  ;;  %v12208_v34 = vld [vmem:[%s17190_s5 + $0x88] sm:$0xff] }
 0x479   : > { %v6030_v57 = vsel %vm14508_vm4, %v5862_v62, %v6029_v46  ;;  %v5600_v60 = vpack.c.bf16 %v5448_v52, %v5448_v52  ;;  %v6523_v24 = vpack.c.b16 %v6506_v14, %v6505_v59  ;;  %v7596_v46 = vld [vmem:[#allocation3 + $0xc] sm:$0xf]  ;;  %v11678_v14 = vrot.slane %v6919_v4, 9  ;;  %9932 = vmatpush.bf16.msra.mxu2 %v12208_v34  ;;  %v15406_v12 = vpop.f32.mrf.mxu0 }
 0x47a   : > { %v12179_v22 = vld [vmem:[#allocation3 + $0xb4] sm:$0xff]  ;;  %6031 = vst [vmem:[#allocation3 + $0xc0] sm:$0xf] %v6030_v57 }
 0x47b   : > { %v6067_v26 = vld [vmem:[#allocation3 + $0xb8] sm:$0xf]  ;;  %v6087_v29 = vld [vmem:[#allocation3 + $0xbc] sm:$0x1]  ;;  %v5865_v6 = vshrl.u32 %v5600_v60, 16  ;;  %v5868_v62 = vshll.u32 %v5600_v60, 16 }
 0x47c   : > { %v7059_v7 = vrot.slane %v6067_v26, 5  ;;  %11797 = vmatmul.msk.bf16.gmra.mxu1 %vm6537_vm5, %v12179_v22  ;;  %v6458_v16 = vshll.u32 %v6067_v26, 16  ;;  %v7062_v20 = vrot.slane %v6087_v29, 5  ;;  %v6462_v36 = vshrl.u32 %v6067_v26, 16  ;;  %17574 = vst [vmem:[#allocation97_spill] sm:$0xff] %v15406_v12 }
 0x47d   : > { %11573 = vmatmul.msk.bf16.gmra.mxu2 %vm6537_vm5, %v6523_v24  ;;  %v5867_v39 = vrot.slane %v5865_v6, 7  ;;  %v6468_v13 = vshll.u32 %v6087_v29, 16  ;;  %v5863_v22 = vrot.slane %v15361_v30, 4  ;;  %v7645_v60 = vshrl.u32 %v7596_v46, 16 }
 0x47e   : > { %v7061_v23 = vrot.slane %v7059_v7, 4  ;;  %v6460_v52 = vrot.slane %v6458_v16, 5  ;;  %v15396_v59 = vpop.f32.mrf.mxu3  ;;  %v6464_v49 = vrot.slane %v6462_v36, 4  ;;  %v12205_v16 = vld [vmem:[%s17190_s5 + $0x70] sm:$0xff]  ;;  %v7060_v4 = vsel %vm12535_vm13, %v11678_v14, %v7059_v7 }
 0x47f   : > { %v5870_v26 = vor.u32 %v5868_v62, %v5867_v39  ;;  %v5872_v24 = vrot.slane %v5867_v39, 4  ;;  %v15401_v6 = vpop.f32.mrf.mxu2  ;;  %v7654_v29 = vshll.u32 %v15394_v19, 16  ;;  %v15411_v36 = vld [vmem:[#allocation3 + $0x1c] sm:$0xf]  ;;  %v15417_v39 = vpop.f32.mrf.mxu1  ;;  %v12152_v62 = vld [vmem:[#allocation3 + $0x6c] sm:$0xff]  ;;  %v7658_v12 = vshrl.u32 %v15394_v19, 16  ;;  %9523 = vmatpush.bf16.msra.mxu1 %v12205_v16 }
 0x480   : > { %v7063_v57 = vsel %vm12535_vm13, %v7061_v23, %v7062_v20  ;;  %17573 = vst [vmem:[#allocation76_spill] sm:$0xff] %v15401_v6  ;;  %v6456_v23 = vrot.slane %v6455_v32, 4  ;;  %v6465_v20 = vor.u32 %v6464_v49, %v6460_v52  ;;  %v6470_v14 = vrot.slane %v6468_v13, 5  ;;  %v8262_v6 = vld [vmem:[#allocation3 + $0xc] sm:$0xe] }
 0x481   : > { %v5871_v30 = vsel %vm12554_vm15, %v5863_v22, %v5870_v26  ;;  %v6034_v34 = vsel %vm14384_vm7, %v5872_v24, %v6033_v21  ;;  %17575 = vst [vmem:[#allocation100_spill] sm:$0xff] %v15417_v39  ;;  %v7100_v41 = vunpack.c.l.b16 %v7063_v57  ;;  %v7648_v49 = vshll.u32 %v7596_v46, 16  ;;  %v8971_v21 = vld [vmem:[#allocation3 + $0x18] sm:$0xf] }
 0x482   : > { %6032 = vst.msk [vmem:[#allocation3 + $0xc4] sm:$0xf] %vm5449_vm1, %v5871_v30  ;;  %v6461_v7 = vsel %vm12500_vm9, %v6456_v23, %v6460_v52  ;;  %v6466_v32 = vrot.slane %v6465_v20, 4  ;;  %v7099_v44 = vunpack.c.l.b16 %v7060_v4  ;;  %v9029_v22 = vshll.u32 %v15411_v36, 16 }
 0x483   : > { %6035 = vst [vmem:[#allocation3 + $0xc8] sm:$0x1] %v6034_v34  ;;  %11656 = vmatmul.msk.bf16.gmra.mxu3 %vm6537_vm5, %v12152_v62  ;;  %v9033_v57 = vshrl.u32 %v15411_v36, 16  ;;  %v7656_v24 = vrot.slane %v7654_v29, 5  ;;  %v6507_v30 = vunpack.c.l.b16 %v6461_v7  ;;  %v7660_v52 = vrot.slane %v7658_v12, 4 }
 0x484   : > { %v6471_v26 = vsel %vm12500_vm9, %v6466_v32, %v6470_v14  ;;  %v7116_v16 = vpack.c.b16 %v7100_v41, %v7099_v44  ;;  %v9020_v46 = vshrl.u32 %v8971_v21, 16  ;;  %v9023_v13 = vshll.u32 %v8971_v21, 16  ;;  %v15434_v29 = vld [vmem:[#allocation3 + $0x20] sm:$0x1]  ;;  %v15436_v41 = vpop.f32.mrf.mxu0 }
 0x485   : > { %v6508_v1 = vunpack.c.l.b16 %v6471_v26  ;;  %v9031_v20 = vrot.slane %v9029_v22, 5  ;;  %v9035_v34 = vrot.slane %v9033_v57, 4  ;;  %v7647_v62 = vrot.slane %v7645_v60, 4  ;;  %17577 = vst [vmem:[#allocation35_spill] sm:$0xff] %v15436_v41 }
 0x486   : > { %v15428_v23 = vpop.f32.mrf.mxu3  ;;  %v7650_v39 = vrot.slane %v7648_v49, 5  ;;  %v7661_v32 = vor.u32 %v7660_v52, %v7656_v24  ;;  %v9022_v12 = vrot.slane %v9020_v46, 4  ;;  %v9025_v7 = vrot.slane %v9023_v13, 5  ;;  %v15451_v13 = vld [vmem:[#allocation3 + $0x28] sm:$0xf] }
 0x487   : > { %v15430_v4 = vpop.f32.mrf.mxu2  ;;  %v6524_v18 = vpack.c.b16 %v6508_v1, %v6507_v30  ;;  %v9036_v14 = vor.u32 %v9035_v34, %v9031_v20  ;;  %v15439_v44 = vpop.f32.mrf.mxu1  ;;  %v7664_v1 = vshll.u32 %v15432_v47, 16  ;;  %v9039_v49 = vshll.u32 %v15434_v29, 16  ;;  %v12153_v34 = vld [vmem:[#allocation3 + $0x78] sm:$0xff] }
 0x488   : > { %17576 = vst [vmem:[#allocation22_spill] sm:$0xff] %v15430_v4  ;;  %11706 = vmatmul.msk.bf16.gmra.mxu0 %vm6537_vm5, %v7116_v16  ;;  %v7651_v60 = vor.u32 %v7650_v39, %v7647_v62  ;;  %v7662_v21 = vrot.slane %v7661_v32, 4  ;;  %v9026_v57 = vor.u32 %v9025_v7, %v9022_v12  ;;  %v15447_v16 = vld [vmem:[#allocation3 + $0x1c] sm:$0xf]  ;;  %v7599_v39 = vld [vmem:[#allocation3 + $0x18] sm:$0xf] }
 0x489   : > { %v12180_v31 = vld [vmem:[#allocation3 + $0xc0] sm:$0xff]  ;;  %17578 = vst [vmem:[#allocation99_spill] sm:$0xff] %v15439_v44  ;;  %v9037_v26 = vrot.slane %v9036_v14, 4  ;;  %v7666_v46 = vrot.slane %v7664_v1, 5  ;;  %v7678_v32 = vshll.u32 %v15447_v16, 16  ;;  %v7682_v12 = vshrl.u32 %v15447_v16, 16 }
 0x48a   : > { %v7652_v52 = vrot.slane %v7651_v60, 4  ;;  %v8974_v7 = vld [vmem:[#allocation3 + $0x24] sm:$0xf]  ;;  %v9027_v14 = vrot.slane %v9026_v57, 4  ;;  %v9053_v1 = vshll.u32 %v15451_v13, 16  ;;  %v7669_v44 = vshrl.u32 %v7599_v39, 16 }
 0x48b   : > { %v7667_v62 = vsel %vm12500_vm9, %v7662_v21, %v7666_v46  ;;  %v9047_v57 = vshll.u32 %v8974_v7, 16 }
 0x48c   : > { %11798 = vmatmul.msk.bf16.gmra.mxu1 %vm6537_vm5, %v12180_v31  ;;  %v9041_v31 = vrot.slane %v9039_v49, 5  ;;  %v9057_v49 = vshrl.u32 %v15451_v13, 16  ;;  %v15465_v21 = vpop.f32.mrf.mxu0  ;;  %v9032_v46 = vsel %vm12500_vm9, %v9027_v14, %v9031_v20  ;;  %v15475_v54 = vrot.slane %v9053_v1, 5  ;;  %v7601_v20 = vld [vmem:[#allocation3 + $0x20] sm:$0x1] }
 0x48d   : > { %11574 = vmatmul.msk.bf16.gmra.mxu2 %vm6537_vm5, %v6524_v18  ;;  %v7657_v18 = vsel %vm12500_vm9, %v7652_v52, %v7656_v24  ;;  %v7672_v24 = vshll.u32 %v7599_v39, 16  ;;  %v8328_v52 = vrot.slane %v15394_v19, 5  ;;  %17580 = vst [vmem:[#allocation79_spill] sm:$0xff] %v15465_v21  ;;  %v7684_v39 = vrot.slane %v7682_v12, 4  ;;  %v7602_v12 = vld [vmem:[#allocation3 + $0x24] sm:$0xf] }
 0x48e   : > { %v15445_v22 = vpop.f32.mrf.mxu3  ;;  %v9042_v60 = vsel %vm12500_vm9, %v9037_v26, %v9041_v31  ;;  %v8033_v26 = vunpack.c.l.b16 %v7657_v18  ;;  %v8034_v31 = vunpack.c.l.b16 %v7667_v62  ;;  %v9059_v19 = vrot.slane %v9057_v49, 4 }
 0x48f   : > { %v15449_v30 = vpop.f32.mrf.mxu2  ;;  %v15469_v41 = vpop.f32.mrf.mxu1  ;;  %v9409_v4 = vunpack.c.l.b16 %v9042_v60  ;;  %v9408_v3 = vunpack.c.l.b16 %v9032_v46  ;;  %v7671_v14 = vrot.slane %v7669_v44, 4  ;;  %v8330_v5 = vrot.slane %v8328_v52, 4 }
 0x490   : > { %17579 = vst [vmem:[#allocation105_spill] sm:$0xff] %v15449_v30  ;;  %v9044_v30 = vshrl.u32 %v8974_v7, 16  ;;  %v7674_v7 = vrot.slane %v7672_v24, 5  ;;  %v9049_v62 = vrot.slane %v9047_v57, 5  ;;  %v11827_v60 = vrot.slane %v8262_v6, 9 }
 0x491   : > { %17581 = vst [vmem:[#allocation23_spill] sm:$0xff] %v15469_v41  ;;  %v12187_v41 = vld [vmem:[#allocation3 + $0x18] sm:$0xff]  ;;  %v8065_v33 = vpack.c.b16 %v8034_v31, %v8033_v26  ;;  %v9440_v55 = vpack.c.b16 %v9409_v4, %v9408_v3  ;;  %v8331_v1 = vrot.slane %v15432_v47, 5  ;;  %v8335_v49 = vrot.slane %v15447_v16, 5 }
 0x492   : > { %v9046_v18 = vrot.slane %v9044_v30, 4  ;;  %v7688_v24 = vshll.u32 %v7601_v20, 16  ;;  %v9060_v46 = vor.u32 %v9059_v19, %v15475_v54  ;;  %v8329_v6 = vsel %vm12535_vm13, %v11827_v60, %v8328_v52  ;;  %v15503_v60 = vld [vmem:[#allocation3 + $0x34] sm:$0xf] }
 0x493   : > { %11657 = vmatmul.msk.bf16.gmra.mxu3 %vm6537_vm5, %v12153_v34  ;;  %v15473_v34 = vrot.slane %v7678_v32, 5  ;;  %v15479_v32 = vld [vmem:[#allocation3 + $0x2c] sm:$0x1]  ;;  %v7675_v3 = vor.u32 %v7674_v7, %v7671_v14  ;;  %v8332_v4 = vsel %vm12535_vm13, %v8330_v5, %v8331_v1  ;;  %v7693_v30 = vshrl.u32 %v7602_v12, 16 }
 0x494   : > { %v9050_v47 = vor.u32 %v9049_v62, %v9046_v18  ;;  %v9063_v16 = vshll.u32 %v15479_v32, 16  ;;  %v11828_v57 = vrot.slane %v8263_v61, 9  ;;  %v8443_v26 = vunpack.c.l.b16 %v8329_v6  ;;  %v12154_v6 = vld [vmem:[#allocation3 + $0x84] sm:$0xff] }
 0x495   : > { %v7685_v44 = vor.u32 %v7684_v39, %v15473_v34  ;;  %v8444_v31 = vunpack.c.l.b16 %v8332_v4  ;;  %v8337_v39 = vrot.slane %v8335_v49, 4  ;;  %v8338_v19 = vrot.slane %v7601_v20, 5 }
 0x496   : > { %v15471_v56 = vpop.f32.mrf.mxu3  ;;  %v7690_v14 = vrot.slane %v7688_v24, 5  ;;  %v9061_v7 = vrot.slane %v9060_v46, 4  ;;  %v8336_v5 = vsel %vm12535_vm13, %v11828_v57, %v8335_v49  ;;  %v9065_v24 = vrot.slane %v9063_v16, 5  ;;  %v8977_v57 = vld [vmem:[#allocation3 + $0x30] sm:$0xf] }
 0x497   : > { %v15477_v21 = vpop.f32.mrf.mxu2  ;;  %v15505_v1 = vpack.c.b16 %v8444_v31, %v8443_v26  ;;  %v8339_v20 = vsel %vm12535_vm13, %v8337_v39, %v8338_v19  ;;  %v15509_v46 = vrot.slane %v7693_v30, 4  ;;  %v7696_v4 = vshll.u32 %v7602_v12, 16  ;;  %v7604_v31 = vld [vmem:[#allocation3 + $0x2c] sm:$0x1] }
 0x498   : > { %17582 = vst [vmem:[#allocation37_spill] sm:$0xff] %v15477_v21  ;;  %11947 = vmatmul.msk.bf16.vlgmr.msra.gmra.mxu0 %vm6537_vm5, %v12187_v41  ;;  %v7603_v41 = vld [vmem:[#allocation3 + $0x28] sm:$0xf]  ;;  %v15493_v21 = vpop.f32.mrf.mxu0  ;;  %v9051_v49 = vrot.slane %v9050_v47, 4  ;;  %v9066_v26 = vsel %vm12500_vm9, %v9061_v7, %v9065_v24  ;;  %v9077_v39 = vshll.u32 %v15503_v60, 16  ;;  %v9068_v30 = vshrl.u32 %v8977_v57, 16 }
 0x499   : > { %17583 = vst [vmem:[#allocation103_spill] sm:$0xff] %v15493_v21  ;;  %v7702_v62 = vshll.u32 %v7603_v41, 16  ;;  %v7706_v61 = vshrl.u32 %v7603_v41, 16  ;;  %v8446_v21 = vunpack.c.l.b16 %v8339_v20  ;;  %v8342_v15 = vrot.slane %v7603_v41, 5 }
 0x49a   : > { %v9056_v12 = vsel %vm12500_vm9, %v9051_v49, %v15475_v54  ;;  %v9071_v19 = vshll.u32 %v8977_v57, 16  ;;  %v7698_v20 = vrot.slane %v7696_v4, 5  ;;  %v15530_v54 = vrot.slane %v9077_v39, 5  ;;  %v12188_v4 = vld [vmem:[#allocation3 + $0x24] sm:$0xff] }
 0x49b   : > { %v15521_v47 = vrot.slane %v7702_v62, 5  ;;  %v7708_v16 = vrot.slane %v7706_v61, 4  ;;  %v7606_v61 = vld [vmem:[#allocation3 + $0x34] sm:$0xf]  ;;  %v7712_v57 = vshll.u32 %v7604_v31, 16 }
 0x49c   : > { %11975 = vmatmul.msk.bf16.vlgmr.msra.gmra.mxu1 %vm6537_vm5, %v9440_v55  ;;  %v7686_v55 = vrot.slane %v7685_v44, 4  ;;  %v7676_v44 = vrot.slane %v7675_v3, 4  ;;  %v9081_v3 = vshrl.u32 %v15503_v60, 16  ;;  %v9073_v39 = vrot.slane %v9071_v19, 5 }
 0x49d   : > { %11811 = vmatmul.msk.bf16.vlgmr.msrb.gmra.mxu2 %vm6537_vm5, %v8065_v33  ;;  %v15499_v33 = vpop.f32.mrf.mxu1  ;;  %v7709_v49 = vor.u32 %v7708_v16, %v15521_v47  ;;  %v7714_v19 = vrot.slane %v7712_v57, 5  ;;  %v9637_v57 = vld [vmem:[#allocation3 + $0x18] sm:$0xe] }
 0x49e   : > { %v15495_v52 = vpop.f32.mrf.mxu3  ;;  %17584 = vst [vmem:[#allocation81_spill] sm:$0xff] %v15499_v33  ;;  %v8445_v33 = vunpack.c.l.b16 %v8336_v5  ;;  %v7691_v42 = vsel %vm12500_vm9, %v7686_v55, %v7690_v14  ;;  %v8344_v14 = vrot.slane %v8342_v15, 4  ;;  %v7681_v7 = vsel %vm12500_vm9, %v7676_v44, %v15473_v34 }
 0x49f   : > { %v15501_v18 = vpop.f32.mrf.mxu2  ;;  %v9411_v5 = vunpack.c.l.b16 %v9066_v26  ;;  %v8036_v11 = vunpack.c.l.b16 %v7691_v42  ;;  %v9083_v62 = vrot.slane %v9081_v3, 4  ;;  %v8035_v42 = vunpack.c.l.b16 %v7681_v7  ;;  %v7605_v3 = vld [vmem:[#allocation3 + $0x30] sm:$0xf]  ;;  %v15548_v7 = vld [vmem:[#allocation3 + $0x38] sm:$0x1] }
 0x4a0   : > { %17585 = vst [vmem:[#allocation110_spill] sm:$0xff] %v15501_v18  ;;  %v8264_v18 = vld [vmem:[#allocation3 + $0x24] sm:$0xe]  ;;  %v15523_v41 = vpack.c.b16 %v8446_v21, %v8445_v33  ;;  %v15539_v44 = vpop.f32.mrf.mxu0  ;;  %v9070_v26 = vrot.slane %v9068_v30, 4  ;;  %v7710_v30 = vrot.slane %v7709_v49, 4  ;;  %v7730_v49 = vshrl.u32 %v7606_v61, 16 }
 0x4a1   : > { %v11829_v55 = vrot.slane %v8264_v18, 9  ;;  %v9410_v18 = vunpack.c.l.b16 %v9056_v12  ;;  %17587 = vst [vmem:[#allocation107_spill] sm:$0xff] %v15539_v44  ;;  %v15544_v12 = vld [vmem:[#allocation3 + $0x38] sm:$0x1] }
 0x4a3   : > { %11658 = vmatmul.msk.bf16.gmra.mxu3 %vm6537_vm5, %v12154_v6  ;;  %v8345_v6 = vrot.slane %v7604_v31, 5  ;;  %v8343_v21 = vsel %vm12535_vm13, %v11829_v55, %v8342_v15  ;;  %v9441_v15 = vpack.c.b16 %v9411_v5, %v9410_v18  ;;  %v7699_v55 = vor.u32 %v7698_v20, %v15509_v46  ;;  %v8265_v31 = vld [vmem:[#allocation3 + $0x30] sm:$0xe] }
 0x4a4   : > { %v8447_v16 = vunpack.c.l.b16 %v8343_v21  ;;  %v9074_v46 = vor.u32 %v9073_v39, %v9070_v26  ;;  %v9087_v20 = vshll.u32 %v15544_v12, 16  ;;  %v7720_v21 = vshll.u32 %v7605_v3, 16 }
 0x4a5   : > { %v8346_v34 = vsel %vm12535_vm13, %v8344_v14, %v8345_v6  ;;  %v15541_v28 = vpop.f32.mrf.mxu1  ;;  %v8066_v14 = vpack.c.b16 %v8036_v11, %v8035_v42  ;;  %v9084_v6 = vor.u32 %v9083_v62, %v15530_v54  ;;  %v11830_v18 = vrot.slane %v8265_v31, 9 }
 0x4a6   : > { %v15528_v24 = vpop.f32.mrf.mxu3  ;;  %v8448_v37 = vunpack.c.l.b16 %v8346_v34  ;;  %17588 = vst [vmem:[#allocation25_spill] sm:$0xff] %v15541_v28  ;;  %v7717_v34 = vshrl.u32 %v7605_v3, 16  ;;  %v7726_v11 = vshll.u32 %v7606_v61, 16  ;;  %v8352_v62 = vrot.slane %v15548_v7, 5  ;;  %v15567_v3 = vld [vmem:[#allocation3 + $0x40] sm:$0xf] }
 0x4a7   : > { %v15534_v33 = vpop.f32.mrf.mxu2  ;;  %v7715_v39 = vsel %vm12500_vm9, %v7710_v30, %v7714_v19  ;;  %v9075_v31 = vrot.slane %v9074_v46, 4  ;;  %v7732_v19 = vrot.slane %v7730_v49, 4 }
 0x4a8   : > { %17586 = vst [vmem:[#allocation102_spill] sm:$0xff] %v15534_v33  ;;  %v8349_v33 = vrot.slane %v7606_v61, 5  ;;  %11948 = vmatmul.msk.bf16.gmra.mxu0 %vm6537_vm5, %v12188_v4  ;;  %v15551_v5 = vpack.c.b16 %v8448_v37, %v8447_v16  ;;  %v7700_v4 = vrot.slane %v7699_v55, 4  ;;  %v9703_v61 = vrot.slane %v15411_v36, 5 }
 0x4a9   : > { %v9105_v36 = vshrl.u32 %v15567_v3, 16 }
 0x4aa   : > { %v8351_v42 = vrot.slane %v8349_v33, 4  ;;  %v8350_v37 = vsel %vm12535_vm13, %v11830_v18, %v8349_v33  ;;  %v7705_v26 = vsel %vm12500_vm9, %v7700_v4, %v15521_v47  ;;  %v7719_v33 = vrot.slane %v7717_v34, 4  ;;  %v12155_v18 = vld [vmem:[#allocation3 + $0x90] sm:$0xff]  ;;  %v15574_v4 = vpop.f32.mrf.mxu0 }
 0x4ab   : > { %v8449_v44 = vunpack.c.l.b16 %v8350_v37  ;;  %v11991_v47 = vrot.slane %v9637_v57, 9  ;;  %17591 = vst [vmem:[#allocation115_spill] sm:$0xff] %v15574_v4  ;;  %v7736_v37 = vshll.u32 %v15548_v7, 16  ;;  %v15603_v4 = vld [vmem:[#allocation3 + $0x44] sm:$0x1] }
 0x4ac   : > { %11976 = vmatmul.msk.bf16.gmra.mxu1 %vm6537_vm5, %v9441_v15  ;;  %v9085_v15 = vrot.slane %v9084_v6, 4  ;;  %v8353_v55 = vsel %vm12535_vm13, %v8351_v42, %v8352_v62  ;;  %v7722_v6 = vrot.slane %v7720_v21, 5  ;;  %v9101_v42 = vshll.u32 %v15567_v3, 16 }
 0x4ad   : > { %11812 = vmatmul.msk.bf16.gmra.mxu2 %vm6537_vm5, %v8066_v14  ;;  %v9089_v14 = vrot.slane %v9087_v20, 5  ;;  %v15580_v46 = vpop.f32.mrf.mxu1  ;;  %v9704_v20 = vsel %vm12535_vm13, %v11991_v47, %v9703_v61  ;;  %v9705_v21 = vrot.slane %v9703_v61, 4  ;;  %v8038_v62 = vunpack.c.l.b16 %v7715_v39 }
 0x4ae   : > { %v15556_v28 = vpop.f32.mrf.mxu3  ;;  %17592 = vst [vmem:[#allocation82_spill] sm:$0xff] %v15580_v46  ;;  %v7723_v49 = vor.u32 %v7722_v6, %v7719_v33  ;;  %v15598_v61 = vrot.slane %v9101_v42, 5  ;;  %v9818_v39 = vunpack.c.l.b16 %v9704_v20  ;;  %v8266_v33 = vld [vmem:[#allocation3 + $0x3c] sm:$0xe] }
 0x4af   : > { %17589 = vst [vmem:[#allocation39_spill] sm:$0xff] %v15556_v28  ;;  %v15560_v16 = vpop.f32.mrf.mxu2  ;;  %v8450_v28 = vunpack.c.l.b16 %v8353_v55  ;;  %v9090_v30 = vsel %vm12500_vm9, %v9085_v15, %v9089_v14  ;;  %v9080_v15 = vsel %vm12500_vm9, %v9075_v31, %v15530_v54  ;;  %v9092_v55 = vshrl.u32 %v8980_v58, 16  ;;  %v12189_v54 = vld [vmem:[#allocation3 + $0x30] sm:$0xff] }
 0x4b0   : > { %17590 = vst [vmem:[#allocation106_spill] sm:$0xff] %v15560_v16  ;;  %v15572_v16 = vrot.slane %v7726_v11, 5  ;;  %v9706_v11 = vrot.slane %v15434_v29, 5  ;;  %v9413_v57 = vunpack.c.l.b16 %v9090_v30  ;;  %v9095_v14 = vshll.u32 %v8980_v58, 16  ;;  %v7608_v30 = vld [vmem:[#allocation3 + $0x3c] sm:$0xf] }
 0x4b1   : > { %v15583_v34 = vpack.c.b16 %v8450_v28, %v8449_v44  ;;  %v9107_v29 = vrot.slane %v9105_v36, 4  ;;  %v9412_v31 = vunpack.c.l.b16 %v9080_v15  ;;  %v8037_v58 = vunpack.c.l.b16 %v7705_v26  ;;  %v15608_v36 = vld [vmem:[#allocation3 + $0x44] sm:$0x1] }
 0x4b2   : > { %v9707_v28 = vsel %vm12535_vm13, %v9705_v21, %v9706_v11  ;;  %v7733_v7 = vor.u32 %v7732_v19, %v15572_v16  ;;  %v7724_v6 = vrot.slane %v7723_v49, 4  ;;  %v9094_v20 = vrot.slane %v9092_v55, 4 }
 0x4b3   : > { %11659 = vmatmul.msk.bf16.gmra.mxu3 %vm6537_vm5, %v12155_v18  ;;  %v15592_v18 = vld [vmem:[#allocation3 + $0x40] sm:$0xf]  ;;  %v9819_v47 = vunpack.c.l.b16 %v9707_v28  ;;  %v9442_v42 = vpack.c.b16 %v9413_v57, %v9412_v31  ;;  %v9097_v28 = vrot.slane %v9095_v14, 5  ;;  %v8067_v19 = vpack.c.b16 %v8038_v62, %v8037_v58  ;;  %v9638_v14 = vld [vmem:[#allocation3 + $0x24] sm:$0xe]  ;;  %v15618_v31 = vpop.f32.mrf.mxu0 }
 0x4b4   : > { %v8356_v21 = vrot.slane %v15592_v18, 5  ;;  %v7738_v15 = vrot.slane %v7736_v37, 5  ;;  %v9108_v26 = vor.u32 %v9107_v29, %v15598_v61  ;;  %v11831_v49 = vrot.slane %v8266_v33, 9  ;;  %17596 = vst [vmem:[#allocation84_spill] sm:$0xff] %v15618_v31 }
 0x4b5   : > { %v15606_v11 = vpack.c.b16 %v9819_v47, %v9818_v39  ;;  %v7729_v39 = vsel %vm12500_vm9, %v7724_v6, %v15572_v16  ;;  %v7734_v57 = vrot.slane %v7733_v7, 4  ;;  %v8359_v55 = vrot.slane %v15603_v4, 5 }
 0x4b6   : > { %v15596_v44 = vpop.f32.mrf.mxu3  ;;  %v8358_v47 = vrot.slane %v8356_v21, 4  ;;  %v7741_v62 = vshrl.u32 %v7608_v30, 16  ;;  %v7744_v37 = vshll.u32 %v7608_v30, 16  ;;  %v8357_v29 = vsel %vm12535_vm13, %v11831_v49, %v8356_v21 }
 0x4b7   : > { %17593 = vst [vmem:[#allocation58_spill] sm:$0xff] %v15596_v44  ;;  %v15600_v46 = vpop.f32.mrf.mxu2  ;;  %v9098_v33 = vor.u32 %v9097_v28, %v9094_v20  ;;  %v9713_v58 = vrot.slane %v15479_v32, 5  ;;  %v7739_v21 = vsel %vm12500_vm9, %v7734_v57, %v7738_v15  ;;  %v7754_v20 = vshrl.u32 %v15592_v18, 16  ;;  %v15637_v28 = vld [vmem:[#allocation3 + $0x4c] sm:$0xf] }
 0x4b8   : > { %17594 = vst [vmem:[#allocation43_spill] sm:$0xff] %v15600_v46  ;;  %v9710_v46 = vrot.slane %v15451_v13, 5  ;;  %11949 = vmatmul.msk.bf16.gmra.mxu0 %vm6537_vm5, %v12189_v54  ;;  %v9111_v13 = vshll.u32 %v15608_v36, 16  ;;  %v15624_v54 = vpop.f32.mrf.mxu1  ;;  %v8360_v16 = vsel %vm12535_vm13, %v8358_v47, %v8359_v55  ;;  %v8451_v49 = vunpack.c.l.b16 %v8357_v29 }
 0x4b9   : > { %17595 = vst [vmem:[#allocation113_spill] sm:$0xff] %v15606_v11  ;;  %v8452_v31 = vunpack.c.l.b16 %v8360_v16  ;;  %v11992_v11 = vrot.slane %v9638_v14, 9  ;;  %v7743_v55 = vrot.slane %v7741_v62, 4  ;;  %v12156_v16 = vld [vmem:[#allocation3 + $0x9c] sm:$0xff]  ;;  %v9129_v15 = vshrl.u32 %v15637_v28, 16 }
 0x4ba   : > { %17597 = vst [vmem:[#allocation41_spill] sm:$0xff] %v15624_v54  ;;  %v9712_v7 = vrot.slane %v9710_v46, 4  ;;  %v9113_v47 = vrot.slane %v9111_v13, 5  ;;  %v8983_v54 = vld [vmem:[#allocation3 + $0x48] sm:$0xf]  ;;  %v8040_v57 = vunpack.c.l.b16 %v7739_v21  ;;  %v9099_v29 = vrot.slane %v9098_v33, 4 }
 0x4bb   : > { %v9711_v14 = vsel %vm12535_vm13, %v11992_v11, %v9710_v46  ;;  %v7756_v62 = vrot.slane %v7754_v20, 4  ;;  %v9717_v33 = vrot.slane %v15503_v60, 5 }
 0x4bc   : > { %11977 = vmatmul.msk.bf16.gmra.mxu1 %vm6537_vm5, %v9442_v42  ;;  %v9109_v42 = vrot.slane %v9108_v26, 4  ;;  %v9714_v32 = vsel %vm12535_vm13, %v9712_v7, %v9713_v58  ;;  %v7746_v26 = vrot.slane %v7744_v37, 5  ;;  %v9116_v37 = vshrl.u32 %v8983_v54, 16 }
 0x4bd   : > { %11813 = vmatmul.msk.bf16.gmra.mxu2 %vm6537_vm5, %v8067_v19  ;;  %v7750_v19 = vshll.u32 %v15592_v18, 16  ;;  %v15645_v18 = vpack.c.b16 %v8452_v31, %v8451_v49  ;;  %v9820_v46 = vunpack.c.l.b16 %v9711_v14  ;;  %v9821_v11 = vunpack.c.l.b16 %v9714_v32  ;;  %v15662_v14 = vpop.f32.mrf.mxu0 }
 0x4be   : > { %v15629_v6 = vpop.f32.mrf.mxu3  ;;  %v9114_v7 = vsel %vm12500_vm9, %v9109_v42, %v9113_v47  ;;  %v9104_v58 = vsel %vm12500_vm9, %v9099_v29, %v15598_v61  ;;  %v7747_v31 = vor.u32 %v7746_v26, %v7743_v55  ;;  %v9119_v49 = vshll.u32 %v8983_v54, 16  ;;  %v8267_v47 = vld [vmem:[#allocation3 + $0x48] sm:$0xe]  ;;  %17602 = vst [vmem:[#allocation9_spill] sm:$0xff] %v15662_v14 }
 0x4bf   : > { %17598 = vst [vmem:[#allocation111_spill] sm:$0xff] %v15629_v6  ;;  %v15632_v30 = vpop.f32.mrf.mxu2  ;;  %v9125_v6 = vshll.u32 %v15637_v28, 16  ;;  %v15649_v13 = vrot.slane %v7750_v19, 5  ;;  %v9415_v21 = vunpack.c.l.b16 %v9114_v7  ;;  %v9131_v42 = vrot.slane %v9129_v15, 4  ;;  %v15658_v19 = vld [vmem:[#allocation3 + $0x4c] sm:$0xf] }
 0x4c0   : > { %17599 = vst [vmem:[#allocation8_spill] sm:$0xff] %v15632_v30  ;;  %v8039_v30 = vunpack.c.l.b16 %v7729_v39  ;;  %v9639_v39 = vld [vmem:[#allocation3 + $0x30] sm:$0xe]  ;;  %v15660_v20 = vpack.c.b16 %v9821_v11, %v9820_v46  ;;  %v9719_v61 = vrot.slane %v9717_v33, 4  ;;  %v15666_v55 = vpop.f32.mrf.mxu1  ;;  %v9414_v60 = vunpack.c.l.b16 %v9104_v58  ;;  %v15671_v15 = vld [vmem:[#allocation3 + $0x50] sm:$0x1] }
 0x4c1   : > { %17600 = vst [vmem:[#allocation27_spill] sm:$0xff] %v15645_v18  ;;  %v15656_v44 = vrot.slane %v9125_v6, 5  ;;  %v11993_v18 = vrot.slane %v9639_v39, 9  ;;  %v7757_v6 = vor.u32 %v7756_v62, %v15649_v13  ;;  %v9118_v26 = vrot.slane %v9116_v37, 4  ;;  %v12190_v7 = vld [vmem:[#allocation3 + $0x3c] sm:$0xff] }
 0x4c2   : > { %17601 = vst [vmem:[#allocation45_spill] sm:$0xff] %v15660_v20  ;;  %v9720_v29 = vrot.slane %v15544_v12, 5  ;;  %v15674_v46 = vld [vmem:[#allocation3 + $0x50] sm:$0x1]  ;;  %v9121_v11 = vrot.slane %v9119_v49, 5  ;;  %v11832_v14 = vrot.slane %v8267_v47, 9  ;;  %v9443_v39 = vpack.c.b16 %v9415_v21, %v9414_v60 }
 0x4c3   : > { %11660 = vmatmul.msk.bf16.gmra.mxu3 %vm6537_vm5, %v12156_v16  ;;  %v8068_v16 = vpack.c.b16 %v8040_v57, %v8039_v30  ;;  %17604 = vst [vmem:[#allocation29_spill] sm:$0xff] %v15666_v55  ;;  %v8363_v30 = vrot.slane %v15658_v19, 5  ;;  %v9718_v57 = vsel %vm12535_vm13, %v11993_v18, %v9717_v33  ;;  %v9132_v58 = vor.u32 %v9131_v42, %v15656_v44 }
 0x4c4   : > { %v9721_v62 = vsel %vm12535_vm13, %v9719_v61, %v9720_v29  ;;  %v7760_v12 = vshll.u32 %v15603_v4, 16  ;;  %v8366_v47 = vrot.slane %v15671_v15, 5  ;;  %v9135_v18 = vshll.u32 %v15674_v46, 16 }
 0x4c5   : > { %v8364_v37 = vsel %vm12535_vm13, %v11832_v14, %v8363_v30  ;;  %v8365_v49 = vrot.slane %v8363_v30, 4  ;;  %v9822_v33 = vunpack.c.l.b16 %v9718_v57  ;;  %v9823_v21 = vunpack.c.l.b16 %v9721_v62 }
 0x4c6   : > { %v15664_v32 = vpop.f32.mrf.mxu3  ;;  %v7758_v4 = vrot.slane %v7757_v6, 4  ;;  %v9122_v61 = vor.u32 %v9121_v11, %v9118_v26  ;;  %v9133_v60 = vrot.slane %v9132_v58, 4  ;;  %v8453_v29 = vunpack.c.l.b16 %v8364_v37  ;;  %v8986_v26 = vld [vmem:[#allocation3 + $0x54] sm:$0xf]  ;;  %v15704_v11 = vld [vmem:[#allocation3 + $0x58] sm:$0xf]  ;;  %v15708_v37 = vpop.f32.mrf.mxu0 }
 0x4c7   : > { %17603 = vst [vmem:[#allocation86_spill] sm:$0xff] %v15664_v32  ;;  %v15668_v54 = vpop.f32.mrf.mxu2  ;;  %v8367_v14 = vsel %vm12535_vm13, %v8365_v49, %v8366_v47  ;;  %v15695_v30 = vpack.c.b16 %v9823_v21, %v9822_v33  ;;  %v7762_v57 = vrot.slane %v7760_v12, 5  ;;  %v7774_v12 = vshll.u32 %v15658_v19, 16  ;;  %v12157_v21 = vld [vmem:[#allocation3 + $0xa8] sm:$0xff] }
 0x4c8   : > { %17605 = vst [vmem:[#allocation48_spill] sm:$0xff] %v15668_v54  ;;  %v7748_v54 = vrot.slane %v7747_v31, 4  ;;  %11950 = vmatmul.msk.bf16.gmra.mxu0 %vm6537_vm5, %v12190_v7  ;;  %v7611_v31 = vld [vmem:[#allocation3 + $0x48] sm:$0xf]  ;;  %v8454_v7 = vunpack.c.l.b16 %v8367_v14  ;;  %v15714_v33 = vpop.f32.mrf.mxu1  ;;  %v9153_v14 = vshrl.u32 %v15704_v11, 16 }
 0x4c9   : > { %17606 = vst [vmem:[#allocation5_spill] sm:$0xff] %v15695_v30  ;;  %v7765_v62 = vshrl.u32 %v7611_v31, 16  ;;  %v7768_v6 = vshll.u32 %v7611_v31, 16  ;;  %v7763_v49 = vsel %vm12500_vm9, %v7758_v4, %v7762_v57  ;;  %v9727_v57 = vrot.slane %v15608_v36, 5 }
 0x4ca   : > { %v7753_v42 = vsel %vm12500_vm9, %v7748_v54, %v15649_v13  ;;  %v9137_v54 = vrot.slane %v9135_v18, 5  ;;  %v15706_v58 = vpack.c.b16 %v8454_v7, %v8453_v29  ;;  %17609 = vst [vmem:[#allocation11_spill] sm:$0xff] %v15708_v37  ;;  %v9123_v18 = vrot.slane %v9122_v61, 4 }
 0x4cb   : > { %v15702_v13 = vunpack.c.l.b16 %v7753_v42  ;;  %17610 = vst [vmem:[#allocation50_spill] sm:$0xff] %v15714_v33  ;;  %v9149_v42 = vshll.u32 %v15704_v11, 16  ;;  %v9140_v29 = vshrl.u32 %v8986_v26, 16  ;;  %v9155_v36 = vrot.slane %v9153_v14, 4 }
 0x4cc   : > { %11978 = vmatmul.msk.bf16.gmra.mxu1 %vm6537_vm5, %v9443_v39  ;;  %v9640_v39 = vld [vmem:[#allocation3 + $0x3c] sm:$0xe]  ;;  %v9138_v31 = vsel %vm12500_vm9, %v9133_v60, %v9137_v54  ;;  %v9128_v61 = vsel %vm12500_vm9, %v9123_v18, %v15656_v44  ;;  %v9731_v60 = vrot.slane %v15637_v28, 5  ;;  %v7770_v28 = vrot.slane %v7768_v6, 5  ;;  %v15749_v6 = vld [vmem:[#allocation3 + $0x5c] sm:$0x1] }
 0x4cd   : > { %11814 = vmatmul.msk.bf16.gmra.mxu2 %vm6537_vm5, %v8068_v16  ;;  %v9724_v16 = vrot.slane %v15567_v3, 5  ;;  %v7778_v3 = vshrl.u32 %v15658_v19, 16  ;;  %v11994_v47 = vrot.slane %v9640_v39, 9  ;;  %v8042_v19 = vunpack.c.l.b16 %v7763_v49 }
 0x4ce   : > { %v15697_v55 = vpop.f32.mrf.mxu3  ;;  %v9143_v39 = vshll.u32 %v8986_v26, 16  ;;  %v9417_v54 = vunpack.c.l.b16 %v9138_v31  ;;  %v15732_v30 = vrot.slane %v9149_v42, 5  ;;  %v9416_v44 = vunpack.c.l.b16 %v9128_v61  ;;  %v12185_v31 = vld [vmem:[%s17190_s5 + $0x50] sm:$0xff] }
 0x4cf   : > { %17607 = vst [vmem:[#allocation88_spill] sm:$0xff] %v15697_v55  ;;  %v9725_v4 = vsel %vm12535_vm13, %v11994_v47, %v9724_v16  ;;  %v9726_v7 = vrot.slane %v9724_v16, 4  ;;  %v7780_v33 = vrot.slane %v7778_v3, 4  ;;  %v9641_v16 = vld [vmem:[#allocation3 + $0x48] sm:$0xe]  ;;  %v7767_v26 = vrot.slane %v7765_v62, 4  ;;  %8558 = vmatpush.bf16.msra.mxu3 %v12185_v31 }
 0x4d0   : > { %v15700_v20 = vpop.f32.mrf.mxu2  ;;  %v9824_v49 = vunpack.c.l.b16 %v9725_v4  ;;  %v12191_v55 = vld [vmem:[#allocation3 + $0x48] sm:$0xff]  ;;  %v9142_v18 = vrot.slane %v9140_v29, 4  ;;  %v9145_v3 = vrot.slane %v9143_v39, 5  ;;  %v15741_v42 = vld [vmem:[#allocation3 + $0x58] sm:$0xf]  ;;  %v11995_v4 = vrot.slane %v9641_v16, 9 }
 0x4d1   : > { %17608 = vst [vmem:[#allocation44_spill] sm:$0xff] %v15700_v20  ;;  %v15728_v20 = vrot.slane %v7774_v12, 5  ;;  %v9728_v47 = vsel %vm12535_vm13, %v9726_v7, %v9727_v57  ;;  %v9733_v7 = vrot.slane %v9731_v60, 4  ;;  %v8069_v57 = vpack.c.b16 %v8042_v19, %v15702_v13  ;;  %v15747_v62 = vld [vmem:[#allocation3 + $0x5c] sm:$0x1] }
 0x4d2   : > { %v9825_v37 = vunpack.c.l.b16 %v9728_v47  ;;  %v8370_v39 = vrot.slane %v15741_v42, 5  ;;  %v9444_v47 = vpack.c.b16 %v9417_v54, %v9416_v44  ;;  %v9734_v16 = vrot.slane %v15674_v46, 5  ;;  %v15762_v54 = vpop.f32.mrf.mxu1 }
 0x4d3   : > { %11661 = vmatmul.msk.bf16.gmra.mxu3 %vm6537_vm5, %v12157_v21  ;;  %v8268_v21 = vld [vmem:[#allocation3 + $0x54] sm:$0xe]  ;;  %v7781_v61 = vor.u32 %v7780_v33, %v15728_v20  ;;  %v7771_v13 = vor.u32 %v7770_v28, %v7767_v26  ;;  %17614 = vst [vmem:[#allocation89_spill] sm:$0xff] %v15762_v54  ;;  %v9159_v46 = vshll.u32 %v15747_v62, 16 }
 0x4d4   : > { %v15743_v14 = vpack.c.b16 %v9825_v37, %v9824_v49  ;;  %v11833_v29 = vrot.slane %v8268_v21, 9  ;;  %v9732_v37 = vsel %vm12535_vm13, %v11995_v4, %v9731_v60  ;;  %v15756_v49 = vpop.f32.mrf.mxu0  ;;  %v8372_v19 = vrot.slane %v8370_v39, 4 }
 0x4d5   : > { %17613 = vst [vmem:[#allocation6_spill] sm:$0xff] %v15756_v49  ;;  %v8373_v21 = vrot.slane %v15749_v6, 5  ;;  %v9146_v60 = vor.u32 %v9145_v3, %v9142_v18  ;;  %v9735_v44 = vsel %vm12535_vm13, %v9733_v7, %v9734_v16  ;;  %v9826_v26 = vunpack.c.l.b16 %v9732_v37 }
 0x4d6   : > { %v15734_v32 = vpop.f32.mrf.mxu3  ;;  %17612 = vst [vmem:[#allocation51_spill] sm:$0xff] %v15743_v14  ;;  %v8371_v33 = vsel %vm12535_vm13, %v11833_v29, %v8370_v39  ;;  %v9827_v28 = vunpack.c.l.b16 %v9735_v44  ;;  %v7782_v31 = vrot.slane %v7781_v61, 4  ;;  %v9161_v16 = vrot.slane %v9159_v46, 5  ;;  %v12158_v61 = vld [vmem:[#allocation3 + $0xb4] sm:$0xff] }
 0x4d7   : > { %v8455_v29 = vunpack.c.l.b16 %v8371_v33  ;;  %v9147_v7 = vrot.slane %v9146_v60, 4  ;;  %v8989_v60 = vld [vmem:[#allocation3 + $0x60] sm:$0xf] }
 0x4d8   : > { %v15736_v12 = vpop.f32.mrf.mxu2  ;;  %11951 = vmatmul.msk.bf16.gmra.mxu0 %vm6537_vm5, %v12191_v55  ;;  %v8374_v55 = vsel %vm12535_vm13, %v8372_v19, %v8373_v21  ;;  %v15774_v18 = vpack.c.b16 %v9827_v28, %v9826_v26  ;;  %v7614_v19 = vld [vmem:[#allocation3 + $0x54] sm:$0xf]  ;;  %v7798_v21 = vshll.u32 %v15741_v42, 16 }
 0x4d9   : > { %17611 = vst [vmem:[#allocation31_spill] sm:$0xff] %v15736_v12  ;;  %v9156_v12 = vor.u32 %v9155_v36, %v15732_v30  ;;  %v7784_v36 = vshll.u32 %v15671_v15, 16  ;;  %v8456_v39 = vunpack.c.l.b16 %v8374_v55  ;;  %v7772_v15 = vrot.slane %v7771_v13, 4  ;;  %v9642_v28 = vld [vmem:[#allocation3 + $0x54] sm:$0xe] }
 0x4da   : > { %17616 = vst [vmem:[#allocation56_spill] sm:$0xff] %v15774_v18  ;;  %v9152_v13 = vsel %vm12500_vm9, %v9147_v7, %v15732_v30  ;;  %v7789_v26 = vshrl.u32 %v7614_v19, 16 }
 0x4db   : > { %v9157_v4 = vrot.slane %v9156_v12, 4  ;;  %v7786_v14 = vrot.slane %v7784_v36, 5  ;;  %v15780_v54 = vpack.c.b16 %v8456_v39, %v8455_v29  ;;  %v7777_v12 = vsel %vm12500_vm9, %v7772_v15, %v15728_v20 }
 0x4dc   : > { %11979 = vmatmul.msk.bf16.gmra.mxu1 %vm6537_vm5, %v9444_v47  ;;  %v7802_v36 = vshrl.u32 %v15741_v42, 16  ;;  %v15797_v44 = vpop.f32.mrf.mxu0  ;;  %v9418_v29 = vunpack.c.l.b16 %v9152_v13  ;;  %v7792_v42 = vshll.u32 %v7614_v19, 16  ;;  %v9164_v39 = vshrl.u32 %v8989_v60, 16  ;;  %v15810_v13 = vld [vmem:[#allocation3 + $0x68] sm:$0x1] }
 0x4dd   : > { %11815 = vmatmul.msk.bf16.gmra.mxu2 %vm6537_vm5, %v8069_v57  ;;  %v15778_v57 = vld [vmem:[#allocation3 + $0x64] sm:$0xf]  ;;  %v7787_v37 = vsel %vm12500_vm9, %v7782_v31, %v7786_v14  ;;  %v9162_v33 = vsel %vm12500_vm9, %v9157_v4, %v9161_v16  ;;  %v8043_v14 = vunpack.c.l.b16 %v7777_v12  ;;  %17618 = vst [vmem:[#allocation12_spill] sm:$0xff] %v15797_v44  ;;  %v9738_v31 = vrot.slane %v15704_v11, 5  ;;  %v15800_v4 = vpop.f32.mrf.mxu1  ;;  %v12192_v44 = vld [vmem:[#allocation3 + $0x54] sm:$0xff] }
 0x4de   : > { %v15772_v47 = vpop.f32.mrf.mxu3  ;;  %v9173_v46 = vshll.u32 %v15778_v57, 16  ;;  %v9177_v20 = vshrl.u32 %v15778_v57, 16  ;;  %v8044_v55 = vunpack.c.l.b16 %v7787_v37  ;;  %v9419_v30 = vunpack.c.l.b16 %v9162_v33  ;;  %17619 = vst [vmem:[#allocation34_spill] sm:$0xff] %v15800_v4  ;;  %v7618_v4 = vld [vmem:[#allocation3 + $0x64] sm:$0xf] }
 0x4df   : > { %17615 = vst [vmem:[#allocation32_spill] sm:$0xff] %v15772_v47  ;;  %v9167_v15 = vshll.u32 %v8989_v60, 16  ;;  %v15804_v16 = vrot.slane %v7798_v21, 5  ;;  %v11996_v33 = vrot.slane %v9642_v28, 9  ;;  %v9166_v19 = vrot.slane %v9164_v39, 4 }
 0x4e0   : > { %v15776_v3 = vpop.f32.mrf.mxu2  ;;  %v15806_v12 = vrot.slane %v9173_v46, 5  ;;  %v9179_v18 = vrot.slane %v9177_v20, 4  ;;  %v8070_v11 = vpack.c.b16 %v8044_v55, %v8043_v14  ;;  %v9445_v49 = vpack.c.b16 %v9419_v30, %v9418_v29  ;;  %v15818_v14 = vld [vmem:[#allocation3 + $0x68] sm:$0x1] }
 0x4e1   : > { %17617 = vst [vmem:[#allocation90_spill] sm:$0xff] %v15776_v3  ;;  %v9740_v3 = vrot.slane %v9738_v31, 4  ;;  %v9169_v60 = vrot.slane %v9167_v15, 5  ;;  %v9739_v21 = vsel %vm12535_vm13, %v11996_v33, %v9738_v31  ;;  %v7791_v46 = vrot.slane %v7789_v26, 4  ;;  %v8269_v26 = vld [vmem:[#allocation3 + $0x60] sm:$0xe] }
 0x4e2   : > { %v7794_v20 = vrot.slane %v7792_v42, 5  ;;  %v8377_v55 = vrot.slane %v7618_v4, 5  ;;  %v9828_v31 = vunpack.c.l.b16 %v9739_v21  ;;  %v7826_v21 = vshrl.u32 %v7618_v4, 16 }
 0x4e3   : > { %11662 = vmatmul.msk.bf16.gmra.mxu3 %vm6537_vm5, %v12158_v61  ;;  %v7804_v61 = vrot.slane %v7802_v36, 4  ;;  %v9741_v36 = vrot.slane %v15747_v62, 5  ;;  %v7808_v62 = vshll.u32 %v15749_v6, 16  ;;  %v9170_v42 = vor.u32 %v9169_v60, %v9166_v19 }
 0x4e4   : > { %v8379_v39 = vrot.slane %v8377_v55, 4  ;;  %v15827_v15 = vpop.f32.mrf.mxu0  ;;  %v11834_v19 = vrot.slane %v8269_v26, 9 }
 0x4e5   : > { %v7805_v28 = vor.u32 %v7804_v61, %v15804_v16  ;;  %v9742_v30 = vsel %vm12535_vm13, %v9740_v3, %v9741_v36  ;;  %17622 = vst [vmem:[#allocation36_spill] sm:$0xff] %v15827_v15  ;;  %v7795_v61 = vor.u32 %v7794_v20, %v7791_v46  ;;  %v7810_v15 = vrot.slane %v7808_v62, 5  ;;  %v8992_v46 = vld [vmem:[#allocation3 + $0x6c] sm:$0xf] }
 0x4e6   : > { %v15802_v7 = vpop.f32.mrf.mxu3  ;;  %v9829_v29 = vunpack.c.l.b16 %v9742_v30  ;;  %v15837_v30 = vld [vmem:[#allocation3 + $0x70] sm:$0xf] }
 0x4e7   : > { %17620 = vst [vmem:[#allocation60_spill] sm:$0xff] %v15802_v7  ;;  %v7806_v33 = vrot.slane %v7805_v28, 4  ;;  %v7822_v7 = vshll.u32 %v7618_v4, 16  ;;  %v7617_v4 = vld [vmem:[#allocation3 + $0x60] sm:$0xf]  ;;  %v9201_v26 = vshrl.u32 %v15837_v30, 16 }
 0x4e8   : > { %v15808_v37 = vpop.f32.mrf.mxu2  ;;  %11952 = vmatmul.msk.bf16.gmra.mxu0 %vm6537_vm5, %v12192_v44  ;;  %v9183_v44 = vshll.u32 %v15810_v13, 16  ;;  %v15831_v36 = vpack.c.b16 %v9829_v29, %v9828_v31  ;;  %v9197_v31 = vshll.u32 %v15837_v30, 16  ;;  %v7796_v62 = vrot.slane %v7795_v61, 4 }
 0x4e9   : > { %17621 = vst [vmem:[#allocation91_spill] sm:$0xff] %v15808_v37  ;;  %v9180_v37 = vor.u32 %v9179_v18, %v15806_v12  ;;  %v8380_v18 = vrot.slane %v15818_v14, 5  ;;  %v7811_v20 = vsel %vm12500_vm9, %v7806_v33, %v7810_v15  ;;  %v7828_v29 = vrot.slane %v7826_v21, 4 }
 0x4ea   : > { %17624 = vst [vmem:[#allocation92_spill] sm:$0xff] %v15831_v36  ;;  %v9185_v47 = vrot.slane %v9183_v44, 5  ;;  %v7801_v15 = vsel %vm12500_vm9, %v7796_v62, %v15804_v16  ;;  %v8046_v33 = vunpack.c.l.b16 %v7811_v20  ;;  %v7816_v61 = vshll.u32 %v7617_v4, 16 }
 0x4eb   : > { %v9181_v3 = vrot.slane %v9180_v37, 4  ;;  %v8381_v60 = vsel %vm12535_vm13, %v8379_v39, %v8380_v18  ;;  %v8378_v37 = vsel %vm12535_vm13, %v11834_v19, %v8377_v55  ;;  %v15854_v55 = vrot.slane %v7822_v7, 5 }
 0x4ec   : > { %11980 = vmatmul.msk.bf16.gmra.mxu1 %vm6537_vm5, %v9445_v49  ;;  %v9191_v39 = vshll.u32 %v8992_v46, 16  ;;  %v8457_v18 = vunpack.c.l.b16 %v8378_v37  ;;  %v7813_v19 = vshrl.u32 %v7617_v4, 16  ;;  %v15861_v36 = vrot.slane %v9197_v31, 5  ;;  %v12193_v37 = vld [vmem:[#allocation3 + $0x60] sm:$0xff] }
 0x4ed   : > { %11816 = vmatmul.msk.bf16.gmra.mxu2 %vm6537_vm5, %v8070_v11  ;;  %v15833_v11 = vpop.f32.mrf.mxu1  ;;  %v9186_v28 = vsel %vm12500_vm9, %v9181_v3, %v9185_v47  ;;  %v8458_v47 = vunpack.c.l.b16 %v8381_v60  ;;  %v9745_v60 = vrot.slane %v15778_v57, 5  ;;  %v8045_v16 = vunpack.c.l.b16 %v7801_v15  ;;  %v15878_v15 = vld [vmem:[#allocation3 + $0x74] sm:$0x1] }
 0x4ee   : > { %v15829_v49 = vpop.f32.mrf.mxu3  ;;  %17625 = vst [vmem:[#allocation38_spill] sm:$0xff] %v15833_v11  ;;  %v9421_v3 = vunpack.c.l.b16 %v9186_v28  ;;  %v7829_v20 = vor.u32 %v7828_v29, %v15854_v55  ;;  %v9193_v62 = vrot.slane %v9191_v39, 5  ;;  %v7832_v57 = vshll.u32 %v15818_v14, 16  ;;  %v8270_v29 = vld [vmem:[#allocation3 + $0x6c] sm:$0xe] }
 0x4ef   : > { %17623 = vst [vmem:[#allocation63_spill] sm:$0xff] %v15829_v49  ;;  %v9171_v49 = vrot.slane %v9170_v42, 4  ;;  %v9188_v42 = vshrl.u32 %v8992_v46, 16  ;;  %v15863_v7 = vpack.c.b16 %v8458_v47, %v8457_v18  ;;  %v15868_v46 = vpop.f32.mrf.mxu0  ;;  %v15873_v18 = vld [vmem:[#allocation3 + $0x74] sm:$0x1]  ;;  %v7818_v47 = vrot.slane %v7816_v61, 5 }
 0x4f0   : > { %v15835_v6 = vpop.f32.mrf.mxu2  ;;  %17630 = vst [vmem:[#allocation94_spill] sm:$0xff] %v15868_v46  ;;  %v9643_v39 = vld [vmem:[#allocation3 + $0x60] sm:$0xe]  ;;  %v12207_v14 = vld [vmem:[%s17190_s5 + $0x80] sm:$0xff]  ;;  %v11835_v61 = vrot.slane %v8270_v29, 9  ;;  %v7834_v46 = vrot.slane %v7832_v57, 5 }
 0x4f1   : > { %17626 = vst [vmem:[#allocation67_spill] sm:$0xff] %v15835_v6  ;;  %v9176_v44 = vsel %vm12500_vm9, %v9171_v49, %v15806_v12  ;;  %v9203_v12 = vrot.slane %v9201_v26, 4  ;;  %v9190_v28 = vrot.slane %v9188_v42, 4  ;;  %v7621_v6 = vld [vmem:[#allocation3 + $0x70] sm:$0xf]  ;;  %v7815_v26 = vrot.slane %v7813_v19, 4  ;;  %9933 = vmatpush.bf16.msra.mxu2 %v12207_v14 }
 0x4f2   : > { %17628 = vst [vmem:[#allocation40_spill] sm:$0xff] %v15863_v7  ;;  %v9420_v21 = vunpack.c.l.b16 %v9176_v44  ;;  %v8071_v44 = vpack.c.b16 %v8046_v33, %v8045_v16  ;;  %v8384_v42 = vrot.slane %v7621_v6, 5  ;;  %v7830_v19 = vrot.slane %v7829_v20, 4  ;;  %v7620_v20 = vld [vmem:[#allocation3 + $0x6c] sm:$0xf] }
 0x4f3   : > { %11855 = vmatmul.msk.bf16.vlgmr.msra.gmra.mxu3 %vm6537_vm5, %v15505_v1  ;;  %v9207_v33 = vshll.u32 %v15873_v18, 16  ;;  %v7846_v11 = vshll.u32 %v7621_v6, 16  ;;  %v7840_v14 = vshll.u32 %v7620_v20, 16 }
 0x4f4   : > { %v9446_v31 = vpack.c.b16 %v9421_v3, %v9420_v21  ;;  %v9748_v3 = vrot.slane %v15810_v13, 5  ;;  %v9194_v21 = vor.u32 %v9193_v62, %v9190_v28  ;;  %v7819_v13 = vor.u32 %v7818_v47, %v7815_v26  ;;  %v15900_v26 = vld [vmem:[#allocation3 + $0x7c] sm:$0xf] }
 0x4f5   : > { %v15871_v4 = vpop.f32.mrf.mxu1  ;;  %v11997_v28 = vrot.slane %v9643_v39, 9  ;;  %v8385_v29 = vsel %vm12535_vm13, %v11835_v61, %v8384_v42  ;;  %v7837_v39 = vshrl.u32 %v7620_v20, 16  ;;  %v9221_v61 = vshll.u32 %v15900_v26, 16 }
 0x4f6   : > { %v15859_v1 = vpop.f32.mrf.mxu3  ;;  %17631 = vst [vmem:[#allocation98_spill] sm:$0xff] %v15871_v4  ;;  %v9747_v4 = vrot.slane %v9745_v60, 4  ;;  %v9195_v57 = vrot.slane %v9194_v21, 4 }
 0x4f7   : > { %17627 = vst [vmem:[#allocation93_spill] sm:$0xff] %v15859_v1  ;;  %v7850_v1 = vshrl.u32 %v7621_v6, 16  ;;  %v9746_v47 = vsel %vm12535_vm13, %v11997_v28, %v9745_v60  ;;  %v8995_v6 = vld [vmem:[#allocation3 + $0x78] sm:$0xf]  ;;  %v15914_v60 = vrot.slane %v7846_v11, 5 }
 0x4f8   : > { %v15865_v49 = vpop.f32.mrf.mxu2  ;;  %11953 = vmatmul.msk.bf16.gmra.mxu0 %vm6537_vm5, %v12193_v37  ;;  %v8387_v37 = vrot.slane %v15878_v15, 5  ;;  %v9749_v16 = vsel %vm12535_vm13, %v9747_v4, %v9748_v3  ;;  %v7835_v4 = vsel %vm12500_vm9, %v7830_v19, %v7834_v46  ;;  %v9209_v3 = vrot.slane %v9207_v33, 5 }
 0x4f9   : > { %17629 = vst [vmem:[#allocation71_spill] sm:$0xff] %v15865_v49  ;;  %v9204_v49 = vor.u32 %v9203_v12, %v15861_v36  ;;  %v8386_v12 = vrot.slane %v8384_v42, 4  ;;  %v9225_v46 = vshrl.u32 %v15900_v26, 16  ;;  %v8459_v19 = vunpack.c.l.b16 %v8385_v29 }
 0x4fa   : > { %v7852_v21 = vrot.slane %v7850_v1, 4  ;;  %v8048_v29 = vunpack.c.l.b16 %v7835_v4  ;;  %v7839_v1 = vrot.slane %v7837_v39, 4  ;;  %v7856_v4 = vshll.u32 %v15878_v15, 16 }
 0x4fb   : > { %v8388_v7 = vsel %vm12535_vm13, %v8386_v12, %v8387_v37  ;;  %v9830_v12 = vunpack.c.l.b16 %v9746_v47  ;;  %v9200_v37 = vsel %vm12500_vm9, %v9195_v57, %v15861_v36  ;;  %v15928_v47 = vrot.slane %v9221_v61, 5 }
 0x4fc   : > { %11981 = vmatmul.msk.bf16.gmra.mxu1 %vm6537_vm5, %v9446_v31  ;;  %v9422_v57 = vunpack.c.l.b16 %v9200_v37 }
 0x4fd   : > { %11817 = vmatmul.msk.bf16.gmra.mxu2 %vm6537_vm5, %v8071_v44  ;;  %v9205_v44 = vrot.slane %v9204_v49, 4  ;;  %v8460_v49 = vunpack.c.l.b16 %v8388_v7  ;;  %v15910_v33 = vpop.f32.mrf.mxu1  ;;  %v7820_v7 = vrot.slane %v7819_v13, 4  ;;  %v7842_v13 = vrot.slane %v7840_v14, 5  ;;  %v15937_v14 = vld [vmem:[#allocation3 + $0x80] sm:$0x1] }
 0x4fe   : > { %v15890_v31 = vpop.f32.mrf.mxu3  ;;  %17635 = vst [vmem:[#allocation78_spill] sm:$0xff] %v15910_v33  ;;  %v9227_v33 = vrot.slane %v9225_v46, 4 }
 0x4ff   : > { %17632 = vst [vmem:[#allocation74_spill] sm:$0xff] %v15890_v31  ;;  %v15904_v31 = vpop.f32.mrf.mxu0  ;;  %v9210_v42 = vsel %vm12500_vm9, %v9205_v44, %v9209_v3  ;;  %v9215_v44 = vshll.u32 %v8995_v6, 16  ;;  %v15919_v20 = vpack.c.b16 %v8460_v49, %v8459_v19  ;;  %v7825_v28 = vsel %vm12500_vm9, %v7820_v7, %v15854_v55  ;;  %v12194_v19 = vld [vmem:[#allocation3 + $0x6c] sm:$0xff]  ;;  %v15935_v7 = vld [vmem:[#allocation3 + $0x7c] sm:$0xf] }
 0x500   : > { %v15892_v62 = vpop.f32.mrf.mxu2  ;;  %17634 = vst [vmem:[#allocation75_spill] sm:$0xff] %v15904_v31  ;;  %v9423_v3 = vunpack.c.l.b16 %v9210_v42  ;;  %v7853_v49 = vor.u32 %v7852_v21, %v15914_v60  ;;  %v8047_v55 = vunpack.c.l.b16 %v7825_v28  ;;  %v7843_v46 = vor.u32 %v7842_v13, %v7839_v1  ;;  %v15941_v21 = vld [vmem:[#allocation3 + $0x80] sm:$0x1]  ;;  %v7623_v13 = vld [vmem:[#allocation3 + $0x78] sm:$0xf]  ;;  %v12199_v31 = vld [vmem:[#allocation3 + $0xa8] sm:$0xff] }
 0x501   : > { %17633 = vst [vmem:[#allocation95_spill] sm:$0xff] %v15892_v62  ;;  %v9831_v62 = vunpack.c.l.b16 %v9749_v16  ;;  %v9212_v16 = vshrl.u32 %v8995_v6, 16  ;;  %v9752_v6 = vrot.slane %v15837_v30, 5  ;;  %v9217_v42 = vrot.slane %v9215_v44, 5  ;;  %v8271_v30 = vld [vmem:[#allocation3 + $0x78] sm:$0xe] }
 0x502   : > { %v9447_v39 = vpack.c.b16 %v9423_v3, %v9422_v57  ;;  %v8072_v61 = vpack.c.b16 %v8048_v29, %v8047_v55  ;;  %v7854_v37 = vrot.slane %v7853_v49, 4  ;;  %v8391_v15 = vrot.slane %v15935_v7, 5 }
 0x503   : > { %11856 = vmatmul.msk.bf16.gmra.mxu3 %vm6537_vm5, %v15523_v41  ;;  %v15924_v41 = vpack.c.b16 %v9831_v62, %v9830_v12  ;;  %v9214_v62 = vrot.slane %v9212_v16, 4  ;;  %v9228_v12 = vor.u32 %v9227_v33, %v15928_v47  ;;  %v9644_v16 = vld [vmem:[#allocation3 + $0x6c] sm:$0xe]  ;;  %v9754_v44 = vrot.slane %v9752_v6, 4 }
 0x504   : > { %v9755_v28 = vrot.slane %v15873_v18, 5  ;;  %v7858_v29 = vrot.slane %v7856_v4, 5  ;;  %v9231_v33 = vshll.u32 %v15937_v14, 16  ;;  %v8393_v55 = vrot.slane %v8391_v15, 4 }
 0x505   : > { %17636 = vst [vmem:[#allocation96_spill] sm:$0xff] %v15924_v41  ;;  %v9218_v1 = vor.u32 %v9217_v42, %v9214_v62  ;;  %v15950_v57 = vpop.f32.mrf.mxu1  ;;  %v8394_v49 = vrot.slane %v15941_v21, 5  ;;  %v6825_v18 = vadd.f32 %v15368_v0, %v15049_v63  ;;  %v9229_v4 = vrot.slane %v9228_v12, 4  ;;  %v15967_v63 = vld [vmem:[#allocation3 + $0x88] sm:$0xf] }
 0x506   : > { %v15926_v11 = vpop.f32.mrf.mxu3  ;;  %17639 = vst [vmem:[#allocation13_spill] sm:$0xff] %v15950_v57  ;;  %v11998_v62 = vrot.slane %v9644_v16, 9  ;;  %v7859_v41 = vsel %vm12500_vm9, %v7854_v37, %v7858_v29  ;;  %v8998_v16 = vld [vmem:[#allocation3 + $0x84] sm:$0xf]  ;;  %v9249_v37 = vshrl.u32 %v15967_v63, 16 }
 0x507   : > { %v15946_v3 = vpop.f32.mrf.mxu0  ;;  %v9219_v12 = vrot.slane %v9218_v1, 4  ;;  %v8050_v1 = vunpack.c.l.b16 %v7859_v41 }
 0x508   : > { %v15930_v36 = vpop.f32.mrf.mxu2  ;;  %11954 = vmatmul.msk.bf16.gmra.mxu0 %vm6537_vm5, %v12194_v19  ;;  %17638 = vst [vmem:[#allocation80_spill] sm:$0xff] %v15946_v3  ;;  %v11836_v19 = vrot.slane %v8271_v30, 9  ;;  %v7861_v30 = vshrl.u32 %v7623_v13, 16  ;;  %v7864_v3 = vshll.u32 %v7623_v13, 16 }
 0x509   : > { %17637 = vst [vmem:[#allocation104_spill] sm:$0xff] %v15930_v36 }
 0x50a   : > { %v8392_v57 = vsel %vm12535_vm13, %v11836_v19, %v8391_v15  ;;  %v7870_v19 = vshll.u32 %v15935_v7, 16  ;;  %v7866_v41 = vrot.slane %v7864_v3, 5 }
 0x50b   : > { %v8461_v13 = vunpack.c.l.b16 %v8392_v57 }
 0x50c   : > { %11982 = vmatmul.msk.bf16.gmra.mxu1 %vm6537_vm5, %v9447_v39  ;;  %v9756_v39 = vsel %vm12535_vm13, %v9754_v44, %v9755_v28  ;;  %v8395_v44 = vsel %vm12535_vm13, %v8393_v55, %v8394_v49  ;;  %v9233_v28 = vrot.slane %v9231_v33, 5  ;;  %v7874_v33 = vshrl.u32 %v15935_v7, 16 }
 0x50d   : > { %11818 = vmatmul.msk.bf16.gmra.mxu2 %vm6537_vm5, %v8072_v61  ;;  %v7844_v61 = vrot.slane %v7843_v46, 4  ;;  %v8462_v0 = vunpack.c.l.b16 %v8395_v44  ;;  %v9753_v46 = vsel %vm12535_vm13, %v11998_v62, %v9752_v6  ;;  %v9833_v29 = vunpack.c.l.b16 %v9756_v39 }
 0x50e   : > { %v15957_v36 = vpop.f32.mrf.mxu3  ;;  %v9234_v15 = vsel %vm12500_vm9, %v9229_v4, %v9233_v28  ;;  %v6827_v55 = vadd.f32 %v15396_v59, %v15080_v45  ;;  %v9832_v49 = vunpack.c.l.b16 %v9753_v46  ;;  %v9224_v39 = vsel %vm12500_vm9, %v9219_v12, %v15928_v47  ;;  %v15999_v47 = vpop.f32.mrf.mxu1 }
 0x50f   : > { %v7849_v6 = vsel %vm12500_vm9, %v7844_v61, %v15914_v60  ;;  %v9236_v4 = vshrl.u32 %v8998_v16, 16  ;;  %v9239_v62 = vshll.u32 %v8998_v16, 16  ;;  %v15987_v7 = vpack.c.b16 %v8462_v0, %v8461_v13  ;;  %17643 = vst [vmem:[#allocation112_spill] sm:$0xff] %v15999_v47  ;;  %v12195_v0 = vld [vmem:[#allocation3 + $0x78] sm:$0xff] }
 0x510   : > { %v15959_v42 = vpop.f32.mrf.mxu2  ;;  %v9425_v57 = vunpack.c.l.b16 %v9234_v15  ;;  %v9251_v45 = vrot.slane %v9249_v37, 4  ;;  %v15991_v59 = vpack.c.b16 %v9833_v29, %v9832_v49  ;;  %v7863_v60 = vrot.slane %v7861_v30, 4  ;;  %v16005_v15 = vld [vmem:[#allocation3 + $0x8c] sm:$0x1]  ;;  %v7627_v30 = vld [vmem:[#allocation3 + $0x88] sm:$0xf] }
 0x511   : > { %17640 = vst [vmem:[#allocation42_spill] sm:$0xff] %v15959_v42  ;;  %v9245_v42 = vshll.u32 %v15967_v63, 16  ;;  %v15997_v61 = vrot.slane %v7870_v19, 5  ;;  %v7876_v46 = vrot.slane %v7874_v33, 4  ;;  %v9424_v16 = vunpack.c.l.b16 %v9224_v39 }
 0x512   : > { %17641 = vst [vmem:[#allocation108_spill] sm:$0xff] %v15991_v59  ;;  %v7266_v37 = vadd.f32 %v15028_v10, %v6825_v18  ;;  %v8049_v29 = vunpack.c.l.b16 %v7849_v6  ;;  %v9238_v13 = vrot.slane %v9236_v4, 4  ;;  %v9241_v49 = vrot.slane %v9239_v62, 5  ;;  %v16012_v10 = vld [vmem:[#allocation3 + $0x8c] sm:$0x1] }
 0x513   : > { %11857 = vmatmul.msk.bf16.gmra.mxu3 %vm6537_vm5, %v15551_v5  ;;  %v15989_v44 = vrot.slane %v9245_v42, 5  ;;  %v15993_v5 = vpop.f32.mrf.mxu0  ;;  %v9759_v42 = vrot.slane %v15900_v26, 5  ;;  %v7267_v3 = vadd.f32 %v15053_v25, %v6827_v55  ;;  %v9448_v19 = vpack.c.b16 %v9425_v57, %v9424_v16  ;;  %v9645_v4 = vld [vmem:[#allocation3 + $0x78] sm:$0xe] }
 0x514   : > { %17642 = vst [vmem:[#allocation83_spill] sm:$0xff] %v15993_v5  ;;  %v7867_v59 = vor.u32 %v7866_v41, %v7863_v60  ;;  %v7877_v39 = vor.u32 %v7876_v46, %v15997_v61  ;;  %v7880_v26 = vshll.u32 %v15941_v21, 16  ;;  %v9255_v18 = vshll.u32 %v16005_v15, 16 }
 0x515   : > { %v9252_v33 = vor.u32 %v9251_v45, %v15989_v44  ;;  %v8398_v6 = vrot.slane %v7627_v30, 5  ;;  %v9761_v25 = vrot.slane %v9759_v42, 4  ;;  %v9762_v55 = vrot.slane %v15937_v14, 5  ;;  %v8272_v45 = vld [vmem:[#allocation3 + $0x84] sm:$0xe] }
 0x516   : > { %v15995_v28 = vpop.f32.mrf.mxu3  ;;  %v16019_v62 = vadd.f32 %v15428_v23, %v15109_v35  ;;  %v7564_v21 = vadd.f32 %v15034_v40, %v7266_v37  ;;  %v9242_v57 = vor.u32 %v9241_v49, %v9238_v13  ;;  %v8401_v46 = vrot.slane %v16012_v10, 5 }
 0x517   : > { %v9253_v60 = vrot.slane %v9252_v33, 4  ;;  %v8400_v41 = vrot.slane %v8398_v6, 4  ;;  %v9763_v14 = vsel %vm12535_vm13, %v9761_v25, %v9762_v55  ;;  %v7565_v35 = vadd.f32 %v15055_v9, %v7267_v3  ;;  %v7626_v33 = vld [vmem:[#allocation3 + $0x84] sm:$0xf]  ;;  %v16039_v55 = vld [vmem:[#allocation3 + $0x94] sm:$0xf] }
 0x518   : > { %v16001_v12 = vpop.f32.mrf.mxu2  ;;  %11955 = vmatmul.msk.bf16.gmra.mxu0 %vm6537_vm5, %v12195_v0  ;;  %v7868_v23 = vrot.slane %v7867_v59, 4  ;;  %v11837_v40 = vrot.slane %v8272_v45, 9  ;;  %v7894_v25 = vshll.u32 %v7627_v30, 16  ;;  %v16043_v59 = vpop.f32.mrf.mxu1  ;;  %v9273_v45 = vshrl.u32 %v16039_v55, 16 }
 0x519   : > { %17644 = vst [vmem:[#allocation85_spill] sm:$0xff] %v16001_v12  ;;  %v8073_v12 = vpack.c.b16 %v8050_v1, %v8049_v29  ;;  %v16023_v1 = vadd.f32 %v15445_v22, %v15140_v50  ;;  %v7878_v50 = vrot.slane %v7877_v39, 4  ;;  %v11999_v22 = vrot.slane %v9645_v4, 9 }
 0x51a   : > { %v9257_v29 = vrot.slane %v9255_v18, 5  ;;  %v8402_v37 = vsel %vm12535_vm13, %v8400_v41, %v8401_v46  ;;  %17646 = vst [vmem:[#allocation87_spill] sm:$0xff] %v16043_v59  ;;  %v7898_v39 = vshrl.u32 %v7627_v30, 16  ;;  %v9835_v18 = vunpack.c.l.b16 %v9763_v14 }
 0x51b   : > { %v16035_v13 = vpop.f32.mrf.mxu0  ;;  %v9760_v9 = vsel %vm12535_vm13, %v11999_v22, %v9759_v42  ;;  %v7873_v4 = vsel %vm12500_vm9, %v7868_v23, %v15997_v61  ;;  %v9269_v42 = vshll.u32 %v16039_v55, 16  ;;  %v16061_v61 = vrot.slane %v7894_v25, 5 }
 0x51c   : > { %11983 = vmatmul.msk.bf16.gmra.mxu1 %vm6537_vm5, %v9448_v19  ;;  %17645 = vst [vmem:[#allocation10_spill] sm:$0xff] %v16035_v13  ;;  %v9243_v19 = vrot.slane %v9242_v57, 4  ;;  %v9258_v3 = vsel %vm12500_vm9, %v9253_v60, %v9257_v29  ;;  %v9001_v57 = vld [vmem:[#allocation3 + $0x90] sm:$0xf]  ;;  %v7888_v60 = vshll.u32 %v7626_v33, 16  ;;  %v9834_v41 = vunpack.c.l.b16 %v9760_v9 }
 0x51d   : > { %11819 = vmatmul.msk.bf16.gmra.mxu2 %vm6537_vm5, %v8073_v12  ;;  %v7882_v12 = vrot.slane %v7880_v26, 5  ;;  %v8399_v26 = vsel %vm12535_vm13, %v11837_v40, %v8398_v6  ;;  %v7885_v6 = vshrl.u32 %v7626_v33, 16  ;;  %v9427_v46 = vunpack.c.l.b16 %v9258_v3 }
 0x51e   : > { %v16030_v0 = vpop.f32.mrf.mxu3  ;;  %v9248_v30 = vsel %vm12500_vm9, %v9243_v19, %v15989_v44  ;;  %v8463_v14 = vunpack.c.l.b16 %v8399_v26  ;;  %v8464_v23 = vunpack.c.l.b16 %v8402_v37  ;;  %v9260_v22 = vshrl.u32 %v9001_v57, 16 }
 0x51f   : > { %v16067_v40 = vrot.slane %v9269_v42, 5  ;;  %v9275_v59 = vrot.slane %v9273_v45, 4  ;;  %v9426_v33 = vunpack.c.l.b16 %v9248_v30  ;;  %v7887_v9 = vrot.slane %v7885_v6, 4  ;;  %v16079_v45 = vld [vmem:[#allocation3 + $0x98] sm:$0x1] }
 0x520   : > { %v8150_v16 = vpop.f32.mrf.mxu2  ;;  %v16069_v44 = vpack.c.b16 %v8464_v23, %v8463_v14  ;;  %v7890_v25 = vrot.slane %v7888_v60, 5  ;;  %v9766_v3 = vrot.slane %v15967_v63, 5  ;;  %v6835_v37 = vadd.f32 %v15471_v56, %v15178_v2  ;;  %v16087_v56 = vpop.f32.mrf.mxu1  ;;  %v16099_v14 = vld [vmem:[#allocation3 + $0x94] sm:$0xf] }
 0x521   : > { %v16037_v49 = vadd.f32 %v8150_v16, %v7564_v21  ;;  %v7883_v21 = vsel %vm12500_vm9, %v7878_v50, %v7882_v12  ;;  %v7900_v50 = vrot.slane %v7898_v39, 4  ;;  %v9263_v16 = vshll.u32 %v9001_v57, 16  ;;  %17649 = vst [vmem:[#allocation14_spill] sm:$0xff] %v16087_v56 }
 0x522   : > { %v16063_v12 = vpack.c.b16 %v9835_v18, %v9834_v41  ;;  %v6837_v39 = vadd.f32 %v15495_v52, %v15217_v51  ;;  %v12196_v18 = vld [vmem:[#allocation3 + $0x84] sm:$0xff]  ;;  %v9449_v57 = vpack.c.b16 %v9427_v46, %v9426_v33  ;;  %v9262_v30 = vrot.slane %v9260_v22, 4  ;;  %v17652_v33 = vld [vmem:[#allocation24_spill] sm:$0xff] }
 0x523   : > { %11858 = vmatmul.msk.bf16.gmra.mxu3 %vm6537_vm5, %v15583_v34  ;;  %v8052_v34 = vunpack.c.l.b16 %v7883_v21  ;;  %v8051_v21 = vunpack.c.l.b16 %v7873_v4  ;;  %v7901_v42 = vor.u32 %v7900_v50, %v16061_v61  ;;  %v9265_v6 = vrot.slane %v9263_v16, 5  ;;  %v16083_v60 = vpop.f32.mrf.mxu0  ;;  %v9646_v4 = vld [vmem:[#allocation3 + $0x84] sm:$0xe] }
 0x524   : > { %17647 = vst [vmem:[#allocation16_spill] sm:$0xff] %v16063_v12  ;;  %v7268_v63 = vadd.f32 %v15088_v43, %v16019_v62  ;;  %v9276_v51 = vor.u32 %v9275_v59, %v16067_v40  ;;  %v7891_v52 = vor.u32 %v7890_v25, %v7887_v9  ;;  %v9768_v41 = vrot.slane %v9766_v3, 4  ;;  %v17653_v9 = vld [vmem:[#allocation39_spill] sm:$0xff] }
 0x525   : > { %17648 = vst [vmem:[#allocation47_spill] sm:$0xff] %v16083_v60  ;;  %v8074_v2 = vpack.c.b16 %v8052_v34, %v8051_v21  ;;  %v9769_v46 = vrot.slane %v16005_v15, 5  ;;  %v7269_v43 = vadd.f32 %v15113_v53, %v16023_v1  ;;  %v16095_v62 = vadd.f32 %v15148_v8, %v6835_v37  ;;  %v17650_v1 = vld [vmem:[#allocation53_spill] sm:$0xff]  ;;  %v7629_v34 = vld [vmem:[#allocation3 + $0x90] sm:$0xf] }
 0x526   : > { %v16065_v29 = vpop.f32.mrf.mxu3  ;;  %v9279_v59 = vshll.u32 %v16079_v45, 16  ;;  %v16102_v23 = vadd.f32 %v15176_v38, %v6837_v39  ;;  %v9266_v50 = vor.u32 %v9265_v6, %v9262_v30  ;;  %v6840_v53 = vadd.f32 %v15528_v24, %v15248_v27  ;;  %v16119_v24 = vld [vmem:[#allocation3 + $0xa0] sm:$0xf]  ;;  %v7634_v60 = vld [vmem:[#allocation3 + $0xa4] sm:$0x1] }
 0x527   : > { %v9770_v15 = vsel %vm12535_vm13, %v9768_v41, %v9769_v46  ;;  %v7566_v8 = vadd.f32 %v17650_v1, %v7268_v63  ;;  %v9277_v16 = vrot.slane %v9276_v51, 4  ;;  %v16113_v25 = vadd.f32 %v17653_v9, %v17652_v33  ;;  %v17654_v46 = vld [vmem:[#allocation27_spill] sm:$0xff]  ;;  %v17657_v9 = vld [vmem:[#allocation66_spill] sm:$0xff] }
 0x528   : > { %v8152_v19 = vpop.f32.mrf.mxu2  ;;  %11956 = vmatmul.msk.bf16.gmra.mxu0 %vm6537_vm5, %v12196_v18  ;;  %v7892_v37 = vrot.slane %v7891_v52, 4  ;;  %v7918_v18 = vshll.u32 %v16099_v14, 16  ;;  %v7922_v27 = vshrl.u32 %v16099_v14, 16  ;;  %v9267_v6 = vrot.slane %v9266_v50, 4  ;;  %v16142_v33 = vpop.f32.mrf.mxu1 }
 0x529   : > { %v16076_v26 = vadd.f32 %v8152_v19, %v7565_v35  ;;  %v7904_v35 = vshll.u32 %v16012_v10, 16  ;;  %v7902_v10 = vrot.slane %v7901_v42, 4  ;;  %v12000_v19 = vrot.slane %v9646_v4, 9  ;;  %17656 = vst [vmem:[#allocation59_spill] sm:$0xff] %v16142_v33 }
 0x52a   : > { %v7909_v63 = vshrl.u32 %v7629_v34, 16  ;;  %v9837_v51 = vunpack.c.l.b16 %v9770_v15  ;;  %v9293_v4 = vshll.u32 %v16119_v24, 16  ;;  %v9297_v41 = vshrl.u32 %v16119_v24, 16 }
 0x52b   : > { %v7906_v39 = vrot.slane %v7904_v35, 5  ;;  %v9767_v42 = vsel %vm12535_vm13, %v12000_v19, %v9766_v3  ;;  %v7912_v35 = vshll.u32 %v7629_v34, 16  ;;  %v7897_v3 = vsel %vm12500_vm9, %v7892_v37, %v16061_v61  ;;  %v16139_v15 = vpop.f32.mrf.mxu0  ;;  %v8273_v34 = vld [vmem:[#allocation3 + $0x90] sm:$0xe] }
 0x52c   : > { %11984 = vmatmul.msk.bf16.gmra.mxu1 %vm6537_vm5, %v9449_v57  ;;  %v9281_v57 = vrot.slane %v9279_v59, 5  ;;  %v9272_v59 = vsel %vm12500_vm9, %v9267_v6, %v16067_v40  ;;  %v9836_v50 = vunpack.c.l.b16 %v9767_v42  ;;  %17655 = vst [vmem:[#allocation49_spill] sm:$0xff] %v16139_v15  ;;  %v7924_v1 = vrot.slane %v7922_v27, 4 }
 0x52d   : > { %11820 = vmatmul.msk.bf16.gmra.mxu2 %vm6537_vm5, %v8074_v2  ;;  %v7907_v30 = vsel %vm12500_vm9, %v7902_v10, %v7906_v39  ;;  %v9004_v2 = vld [vmem:[#allocation3 + $0x9c] sm:$0xf]  ;;  %v16137_v10 = vrot.slane %v7918_v18, 5  ;;  %v8405_v19 = vrot.slane %v16099_v14, 5  ;;  %v7631_v18 = vld [vmem:[#allocation3 + $0x98] sm:$0x1]  ;;  %v9428_v12 = vunpack.c.l.b16 %v9272_v59 }
 0x52e   : > { %v16109_v22 = vpop.f32.mrf.mxu3  ;;  %v9282_v52 = vsel %vm12500_vm9, %v9277_v16, %v9281_v57  ;;  %v9287_v16 = vshll.u32 %v9004_v2, 16  ;;  %v8054_v61 = vunpack.c.l.b16 %v7907_v30  ;;  %v16145_v39 = vpack.c.b16 %v9837_v51, %v9836_v50  ;;  %v17660_v50 = vld [vmem:[#allocation57_spill] sm:$0xff] }
 0x52f   : > { %17651 = vst [vmem:[#allocation55_spill] sm:$0xff] %v16109_v22  ;;  %v9429_v37 = vunpack.c.l.b16 %v9282_v52  ;;  %v7911_v57 = vrot.slane %v7909_v63, 4  ;;  %v7914_v42 = vrot.slane %v7912_v35, 5  ;;  %v16149_v6 = vrot.slane %v9293_v4, 5  ;;  %v16157_v35 = vld [vmem:[#allocation3 + $0xa4] sm:$0x1] }
 0x530   : > { %v8155_v38 = vpop.f32.mrf.mxu2  ;;  %17658 = vst [vmem:[#allocation18_spill] sm:$0xff] %v16145_v39  ;;  %v9299_v27 = vrot.slane %v9297_v41, 4  ;;  %v11838_v14 = vrot.slane %v8273_v34, 9  ;;  %v8407_v15 = vrot.slane %v8405_v19, 4  ;;  %v7925_v30 = vor.u32 %v7924_v1, %v16137_v10  ;;  %v7632_v4 = vld [vmem:[#allocation3 + $0x9c] sm:$0xf] }
 0x531   : > { %v16116_v21 = vadd.f32 %v8155_v38, %v7566_v8  ;;  %v9284_v8 = vshrl.u32 %v9004_v2, 16  ;;  %v7567_v38 = vadd.f32 %v17657_v9, %v7269_v43  ;;  %v12197_v43 = vld [vmem:[#allocation3 + $0x90] sm:$0xff]  ;;  %v9289_v52 = vrot.slane %v9287_v16, 5  ;;  %v17663_v16 = vld [vmem:[#allocation58_spill] sm:$0xff]  ;;  %v17670_v39 = vld [vmem:[#allocation111_spill] sm:$0xff] }
 0x532   : > { %v16155_v9 = vadd.f32 %v17660_v50, %v6840_v53  ;;  %v9450_v63 = vpack.c.b16 %v9429_v37, %v9428_v12  ;;  %v8408_v41 = vrot.slane %v7631_v18, 5  ;;  %v7915_v34 = vor.u32 %v7914_v42, %v7911_v57  ;;  %v17662_v12 = vld [vmem:[#allocation26_spill] sm:$0xff] }
 0x533   : > { %11859 = vmatmul.msk.bf16.gmra.mxu3 %vm6537_vm5, %v17654_v46  ;;  %v8053_v46 = vunpack.c.l.b16 %v7897_v3  ;;  %v9286_v51 = vrot.slane %v9284_v8, 4  ;;  %v17207_v3 = vrot.slane %v16039_v55, 5  ;;  %v8406_v1 = vsel %vm12535_vm13, %v11838_v14, %v8405_v19  ;;  %v17661_v8 = vld [vmem:[#allocation61_spill] sm:$0xff]  ;;  %v16175_v19 = vld [vmem:[#allocation3 + $0xa0] sm:$0xf] }
 0x534   : > { %v16166_v53 = vadd.f32 %v17661_v8, %v16113_v25  ;;  %v6845_v37 = vadd.f32 %v17663_v16, %v17662_v12  ;;  %v9303_v42 = vshll.u32 %v16157_v35, 16  ;;  %v8465_v25 = vunpack.c.l.b16 %v8406_v1 }
 0x535   : > { %v8075_v59 = vpack.c.b16 %v8054_v61, %v8053_v46  ;;  %v7926_v61 = vrot.slane %v7925_v30, 4  ;;  %v9290_v57 = vor.u32 %v9289_v52, %v9286_v51  ;;  %v9775_v14 = vrot.slane %v17207_v3, 4 }
 0x536   : > { %v16147_v40 = vpop.f32.mrf.mxu3  ;;  %v9776_v50 = vrot.slane %v16079_v45, 5  ;;  %v7916_v30 = vrot.slane %v7915_v34, 4  ;;  %v7936_v52 = vshll.u32 %v7632_v4, 16  ;;  %v7942_v12 = vshll.u32 %v16175_v19, 16 }
 0x537   : > { %17659 = vst [vmem:[#allocation54_spill] sm:$0xff] %v16147_v40  ;;  %v9305_v34 = vrot.slane %v9303_v42, 5 }
 0x538   : > { %v8157_v2 = vpop.f32.mrf.mxu2  ;;  %11957 = vmatmul.msk.bf16.gmra.mxu0 %vm6537_vm5, %v12197_v43  ;;  %v8409_v43 = vsel %vm12535_vm13, %v8407_v15, %v8408_v41  ;;  %v17665_v15 = vld [vmem:[#allocation19_spill] sm:$0xff]  ;;  %v16193_v45 = vsel %vm12535_vm13, %v9775_v14, %v9776_v50 }
 0x539   : > { %v16151_v33 = vadd.f32 %v8157_v2, %v7567_v38  ;;  %v9300_v38 = vor.u32 %v9299_v27, %v16149_v6  ;;  %v7928_v2 = vshll.u32 %v7631_v18, 16  ;;  %v7933_v27 = vshrl.u32 %v7632_v4, 16  ;;  %v16180_v18 = vpop.f32.mrf.mxu0  ;;  %v9007_v50 = vld [vmem:[#allocation3 + $0xa8] sm:$0xf] }
 0x53a   : > { %v8466_v46 = vunpack.c.l.b16 %v8409_v43  ;;  %17664 = vst [vmem:[#allocation20_spill] sm:$0xff] %v16180_v18  ;;  %v17668_v43 = vld [vmem:[#allocation77_spill] sm:$0xff]  ;;  %v7946_v4 = vshrl.u32 %v16175_v19, 16 }
 0x53b   : > { %v9301_v51 = vrot.slane %v9300_v38, 4  ;;  %v7930_v1 = vrot.slane %v7928_v2, 5  ;;  %v16196_v3 = vadd.f32 %v17668_v43, %v6845_v37  ;;  %v16201_v38 = vld [vmem:[#allocation3 + $0xac] sm:$0xf]  ;;  %v7921_v2 = vsel %vm12500_vm9, %v7916_v30, %v16137_v10  ;;  %v17669_v43 = vld [vmem:[#allocation69_spill] sm:$0xff] }
 0x53c   : > { %11985 = vmatmul.msk.bf16.gmra.mxu1 %vm6537_vm5, %v9450_v63  ;;  %v7568_v63 = vadd.f32 %v17665_v15, %v16095_v62  ;;  %v16189_v16 = vpack.c.b16 %v8466_v46, %v8465_v25  ;;  %v9647_v15 = vld [vmem:[#allocation3 + $0x90] sm:$0xe]  ;;  %v9291_v46 = vrot.slane %v9290_v57, 4  ;;  %v7935_v14 = vrot.slane %v7933_v27, 4 }
 0x53d   : > { %11821 = vmatmul.msk.bf16.gmra.mxu2 %vm6537_vm5, %v8075_v59  ;;  %v16186_v59 = vpop.f32.mrf.mxu1  ;;  %v7931_v25 = vsel %vm12500_vm9, %v7926_v61, %v7930_v1  ;;  %v9306_v37 = vsel %vm12500_vm9, %v9301_v51, %v9305_v34  ;;  %v9317_v42 = vshll.u32 %v16201_v38, 16  ;;  %v16219_v61 = vrot.slane %v7942_v12, 5  ;;  %v17671_v34 = vld [vmem:[#allocation70_spill] sm:$0xff] }
 0x53e   : > { %v16184_v41 = vpop.f32.mrf.mxu3  ;;  %17667 = vst [vmem:[#allocation15_spill] sm:$0xff] %v16186_v59  ;;  %v6847_v59 = vadd.f32 %v17670_v39, %v17669_v43  ;;  %v9296_v10 = vsel %vm12500_vm9, %v9291_v46, %v16149_v6  ;;  %v12001_v57 = vrot.slane %v9647_v15, 9  ;;  %v7948_v27 = vrot.slane %v7946_v4, 4 }
 0x53f   : > { %17666 = vst [vmem:[#allocation62_spill] sm:$0xff] %v16184_v41  ;;  %v9308_v30 = vshrl.u32 %v9007_v50, 16  ;;  %v9311_v51 = vshll.u32 %v9007_v50, 16  ;;  %v8412_v1 = vrot.slane %v16175_v19, 5  ;;  %v7569_v18 = vadd.f32 %v17671_v34, %v16102_v23 }
 0x540   : > { %v8160_v8 = vpop.f32.mrf.mxu2  ;;  %v8055_v39 = vunpack.c.l.b16 %v7921_v2  ;;  %v8056_v43 = vunpack.c.l.b16 %v7931_v25  ;;  %v9431_v56 = vunpack.c.l.b16 %v9306_v37  ;;  %v16226_v6 = vrot.slane %v9317_v42, 5  ;;  %v12198_v37 = vld [vmem:[#allocation3 + $0x9c] sm:$0xff] }
 0x541   : > { %v16198_v62 = vadd.f32 %v8160_v8, %v7568_v63  ;;  %v7938_v63 = vrot.slane %v7936_v52, 5  ;;  %v9321_v8 = vshrl.u32 %v16201_v38, 16  ;;  %v8274_v52 = vld [vmem:[#allocation3 + $0x9c] sm:$0xe]  ;;  %v17673_v4 = vrot.slane %v16039_v55, 5  ;;  %v16233_v2 = vpop.f32.mrf.mxu0 }
 0x542   : > { %v9430_v19 = vunpack.c.l.b16 %v9296_v10  ;;  %v11839_v50 = vrot.slane %v8274_v52, 9  ;;  %v8414_v47 = vrot.slane %v8412_v1, 4  ;;  %v9839_v23 = vunpack.c.l.b16 %v16193_v45  ;;  %17674 = vst [vmem:[#allocation7_spill] sm:$0xff] %v16233_v2  ;;  %v16243_v10 = vld [vmem:[#allocation3 + $0xb0] sm:$0x1] }
 0x543   : > { %11860 = vmatmul.msk.bf16.gmra.mxu3 %vm6537_vm5, %v15706_v58  ;;  %v7939_v13 = vor.u32 %v7938_v63, %v7935_v14  ;;  %v9323_v12 = vrot.slane %v9321_v8, 4  ;;  %v9774_v15 = vsel %vm12535_vm13, %v12001_v57, %v17673_v4  ;;  %v7949_v14 = vor.u32 %v7948_v27, %v16219_v61  ;;  %v17675_v8 = vld [vmem:[#allocation68_spill] sm:$0xff] }
 0x544   : > { %v9310_v63 = vrot.slane %v9308_v30, 4  ;;  %v9313_v42 = vrot.slane %v9311_v51, 5  ;;  %v16239_v55 = vadd.f32 %v17675_v8, %v6847_v59  ;;  %v9451_v57 = vpack.c.b16 %v9431_v56, %v9430_v19  ;;  %v17677_v30 = vld [vmem:[#allocation46_spill] sm:$0xff]  ;;  %v9648_v8 = vld [vmem:[#allocation3 + $0x9c] sm:$0xe] }
 0x545   : > { %v16241_v34 = vpop.f32.mrf.mxu1  ;;  %v8415_v52 = vrot.slane %v7634_v60, 5  ;;  %v9838_v4 = vunpack.c.l.b16 %v9774_v15  ;;  %v8076_v45 = vpack.c.b16 %v8056_v43, %v8055_v39  ;;  %v8413_v27 = vsel %vm12535_vm13, %v11839_v50, %v8412_v1  ;;  %v17678_v51 = vld [vmem:[#allocation86_spill] sm:$0xff]  ;;  %v17681_v39 = vld [vmem:[#allocation88_spill] sm:$0xff]  ;;  %v7635_v50 = vld [vmem:[#allocation3 + $0xa8] sm:$0xf] }
 0x546   : > { %v16224_v58 = vpop.f32.mrf.mxu3  ;;  %17676 = vst [vmem:[#allocation17_spill] sm:$0xff] %v16241_v34  ;;  %v16251_v59 = vadd.f32 %v17678_v51, %v17677_v30  ;;  %v7940_v56 = vrot.slane %v7939_v13, 4  ;;  %v7950_v43 = vrot.slane %v7949_v14, 4  ;;  %v9314_v1 = vor.u32 %v9313_v42, %v9310_v63  ;;  %v16282_v34 = vld [vmem:[#allocation3 + $0xb8] sm:$0xf] }
 0x547   : > { %17672 = vst [vmem:[#allocation52_spill] sm:$0xff] %v16224_v58  ;;  %v8416_v19 = vsel %vm12535_vm13, %v8414_v47, %v8415_v52  ;;  %v16256_v15 = vpack.c.b16 %v9839_v23, %v9838_v4  ;;  %v8467_v30 = vunpack.c.l.b16 %v8413_v27  ;;  %v9780_v47 = vrot.slane %v16119_v24, 5  ;;  %v17684_v52 = vld [vmem:[#allocation21_spill] sm:$0xff]  ;;  %v9010_v27 = vld [vmem:[#allocation3 + $0xb4] sm:$0xf] }
 0x548   : > { %v8162_v46 = vpop.f32.mrf.mxu2  ;;  %11958 = vmatmul.msk.bf16.gmra.mxu0 %vm6537_vm5, %v12198_v37  ;;  %v17680_v37 = vld [vmem:[#allocation101_spill] sm:$0xff]  ;;  %v8468_v51 = vunpack.c.l.b16 %v8416_v19  ;;  %v7571_v4 = vadd.f32 %v17684_v52, %v16166_v53  ;;  %v7945_v14 = vsel %vm12500_vm9, %v7940_v56, %v16219_v61  ;;  %v12002_v24 = vrot.slane %v9648_v8, 9 }
 0x549   : > { %v16235_v25 = vadd.f32 %v8162_v46, %v7569_v18  ;;  %v7952_v18 = vshll.u32 %v7634_v60, 16  ;;  %v9324_v46 = vor.u32 %v9323_v12, %v16226_v6  ;;  %17679 = vst [vmem:[#allocation53_spill] sm:$0xff] %v16256_v15  ;;  %v16260_v60 = vadd.f32 %v17681_v39, %v17680_v37 }
 0x54a   : > { %v9327_v12 = vshll.u32 %v16243_v10, 16  ;;  %v7957_v39 = vshrl.u32 %v7635_v50, 16  ;;  %v16276_v19 = vpack.c.b16 %v8468_v51, %v8467_v30  ;;  %v9315_v52 = vrot.slane %v9314_v1, 4 }
 0x54b   : > { %v7954_v63 = vrot.slane %v7952_v18, 5  ;;  %v9325_v42 = vrot.slane %v9324_v46, 4  ;;  %v9341_v18 = vshll.u32 %v16282_v34, 16  ;;  %v9345_v46 = vshrl.u32 %v16282_v34, 16 }
 0x54c   : > { %11986 = vmatmul.msk.bf16.gmra.mxu1 %vm6537_vm5, %v9451_v57  ;;  %v17682_v57 = vld [vmem:[#allocation73_spill] sm:$0xff]  ;;  %v9329_v15 = vrot.slane %v9327_v12, 5  ;;  %v9782_v56 = vrot.slane %v9780_v47, 4  ;;  %v9332_v30 = vshrl.u32 %v9010_v27, 16  ;;  %v7959_v51 = vrot.slane %v7957_v39, 4 }
 0x54d   : > { %11822 = vmatmul.msk.bf16.gmra.mxu2 %vm6537_vm5, %v8076_v45  ;;  %v7570_v13 = vadd.f32 %v17682_v57, %v16155_v9  ;;  %v16274_v45 = vld [vmem:[#allocation3 + $0xac] sm:$0xf]  ;;  %v7960_v9 = vshll.u32 %v7635_v50, 16  ;;  %v7955_v53 = vsel %vm12500_vm9, %v7950_v43, %v7954_v63  ;;  %v16287_v50 = vpop.f32.mrf.mxu0  ;;  %v9335_v43 = vshll.u32 %v9010_v27, 16  ;;  %v16292_v1 = vpop.f32.mrf.mxu1 }
 0x54e   : > { %v16267_v23 = vpop.f32.mrf.mxu3  ;;  %v7966_v61 = vshll.u32 %v16274_v45, 16  ;;  %17685 = vst [vmem:[#allocation39_spill] sm:$0xff] %v16287_v50  ;;  %v9330_v8 = vsel %vm12500_vm9, %v9325_v42, %v9329_v15  ;;  %v8058_v12 = vunpack.c.l.b16 %v7955_v53  ;;  %v9320_v50 = vsel %vm12500_vm9, %v9315_v52, %v16226_v6 }
 0x54f   : > { %17683 = vst [vmem:[#allocation24_spill] sm:$0xff] %v16267_v23  ;;  %v7962_v63 = vrot.slane %v7960_v9, 5  ;;  %v16300_v2 = vrot.slane %v9341_v18, 5  ;;  %v9347_v15 = vrot.slane %v9345_v46, 4  ;;  %v8419_v42 = vrot.slane %v16274_v45, 5 }
 0x550   : > { %v8165_v37 = vpop.f32.mrf.mxu2  ;;  %17686 = vst [vmem:[#allocation27_spill] sm:$0xff] %v16292_v1  ;;  %v8057_v27 = vunpack.c.l.b16 %v7945_v14  ;;  %v9433_v5 = vunpack.c.l.b16 %v9330_v8  ;;  %v16303_v1 = vrot.slane %v7966_v61, 5  ;;  %v8275_v23 = vld [vmem:[#allocation3 + $0xa8] sm:$0xe]  ;;  %v9334_v53 = vrot.slane %v9332_v30, 4 }
 0x551   : > { %v16278_v57 = vadd.f32 %v8165_v37, %v7570_v13  ;;  %v7970_v13 = vshrl.u32 %v16274_v45, 16  ;;  %v9783_v37 = vrot.slane %v16157_v35, 5  ;;  %v7637_v35 = vld [vmem:[#allocation3 + $0xb0] sm:$0x1]  ;;  %v9337_v58 = vrot.slane %v9335_v43, 5 }
 0x552   : > { %v9781_v6 = vsel %vm12535_vm13, %v12002_v24, %v9780_v47  ;;  %v8077_v18 = vpack.c.b16 %v8058_v12, %v8057_v27  ;;  %v9432_v45 = vunpack.c.l.b16 %v9320_v50  ;;  %v16311_v14 = vld [vmem:[#allocation3 + $0xbc] sm:$0x1]  ;;  %v8421_v61 = vrot.slane %v8419_v42, 4 }
 0x553   : > { %11861 = vmatmul.msk.bf16.gmra.mxu3 %vm6537_vm5, %v15780_v54  ;;  %v9784_v54 = vsel %vm12535_vm13, %v9782_v56, %v9783_v37  ;;  %v7972_v9 = vrot.slane %v7970_v13, 4  ;;  %v7963_v56 = vor.u32 %v7962_v63, %v7959_v51  ;;  %v9348_v37 = vor.u32 %v9347_v15, %v16300_v2  ;;  %v7638_v51 = vld [vmem:[#allocation3 + $0xb4] sm:$0xf]  ;;  %v17690_v27 = vld [vmem:[#allocation33_spill] sm:$0xff] }
 0x554   : > { %v9841_v46 = vunpack.c.l.b16 %v9784_v54  ;;  %v11840_v13 = vrot.slane %v8275_v23, 9  ;;  %v9452_v30 = vpack.c.b16 %v9433_v5, %v9432_v45  ;;  %v7976_v43 = vshll.u32 %v7637_v35, 16 }
 0x555   : > { %v8422_v41 = vrot.slane %v7637_v35, 5  ;;  %v9840_v47 = vunpack.c.l.b16 %v9781_v6  ;;  %v7973_v24 = vor.u32 %v7972_v9, %v16303_v1  ;;  %v9338_v50 = vor.u32 %v9337_v58, %v9334_v53  ;;  %v17692_v35 = vld [vmem:[#allocation64_spill] sm:$0xff]  ;;  %v16341_v6 = vpop.f32.mrf.mxu1 }
 0x556   : > { %v16307_v39 = vpop.f32.mrf.mxu3  ;;  %v9351_v12 = vshll.u32 %v16311_v14, 16  ;;  %v16334_v54 = vadd.f32 %v17690_v27, %v16260_v60  ;;  %v7572_v9 = vadd.f32 %v17692_v35, %v16196_v3  ;;  %v9349_v53 = vrot.slane %v9348_v37, 4  ;;  %17693 = vst [vmem:[#allocation26_spill] sm:$0xff] %v16341_v6 }
 0x557   : > { %17687 = vst [vmem:[#allocation66_spill] sm:$0xff] %v16307_v39  ;;  %v16316_v39 = vld [vmem:[#allocation3 + $0xb8] sm:$0xf]  ;;  %v8423_v23 = vsel %vm12535_vm13, %v8421_v61, %v8422_v41  ;;  %v16328_v15 = vpack.c.b16 %v9841_v46, %v9840_v47  ;;  %v7964_v41 = vrot.slane %v7963_v56, 4  ;;  %v7981_v60 = vshrl.u32 %v7638_v51, 16 }
 0x558   : > { %v8167_v52 = vpop.f32.mrf.mxu2  ;;  %11959 = vmatmul.msk.bf16.gmra.mxu0 %vm6537_vm5, %v12199_v31  ;;  %v7990_v63 = vshll.u32 %v16316_v39, 16  ;;  %v7994_v5 = vshrl.u32 %v16316_v39, 16  ;;  %v17689_v31 = vld [vmem:[#allocation30_spill] sm:$0xff]  ;;  %v8470_v61 = vunpack.c.l.b16 %v8423_v23 }
 0x559   : > { %v16313_v8 = vadd.f32 %v8167_v52, %v7571_v4  ;;  %v8420_v4 = vsel %vm12535_vm13, %v11840_v13, %v8419_v42  ;;  %17688 = vst [vmem:[#allocation57_spill] sm:$0xff] %v16328_v15  ;;  %v7276_v58 = vadd.f32 %v17689_v31, %v16251_v59  ;;  %v16336_v42 = vpop.f32.mrf.mxu0  ;;  %v7978_v52 = vrot.slane %v7976_v43, 5  ;;  %v9013_v15 = vld [vmem:[#allocation3 + $0xc0] sm:$0xf]  ;;  %v16353_v43 = vld [vmem:[#allocation3 + $0xc4] sm:$0xf] }
 0x55a   : > { %17691 = vst [vmem:[#allocation61_spill] sm:$0xff] %v16336_v42  ;;  %v8469_v45 = vunpack.c.l.b16 %v8420_v4  ;;  %v7974_v59 = vrot.slane %v7973_v24, 4  ;;  %v9353_v13 = vrot.slane %v9351_v12, 5  ;;  %v9339_v31 = vrot.slane %v9338_v50, 4  ;;  %v17696_v12 = vld [vmem:[#allocation76_spill] sm:$0xff] }
 0x55b   : > { %v16345_v27 = vrot.slane %v7990_v63, 5  ;;  %v9356_v4 = vshrl.u32 %v9013_v15, 16  ;;  %v9359_v24 = vshll.u32 %v9013_v15, 16  ;;  %v7969_v50 = vsel %vm12500_vm9, %v7964_v41, %v16303_v1  ;;  %v7640_v15 = vld [vmem:[#allocation3 + $0xbc] sm:$0x1] }
 0x55c   : > { %11987 = vmatmul.msk.bf16.gmra.mxu1 %vm6537_vm5, %v9452_v30  ;;  %v7984_v30 = vshll.u32 %v7638_v51, 16  ;;  %v16347_v3 = vpack.c.b16 %v8470_v61, %v8469_v45  ;;  %v9354_v56 = vsel %vm12500_vm9, %v9349_v53, %v9353_v13  ;;  %v16357_v51 = vadd.f32 %v15734_v32, %v17696_v12  ;;  %v9649_v32 = vld [vmem:[#allocation3 + $0xa8] sm:$0xe]  ;;  %v17697_v45 = vld [vmem:[#allocation40_spill] sm:$0xff] }
 0x55d   : > { %11823 = vmatmul.msk.bf16.gmra.mxu2 %vm6537_vm5, %v8077_v18  ;;  %v7996_v18 = vrot.slane %v7994_v5, 4  ;;  %v9365_v63 = vshll.u32 %v16353_v43, 16  ;;  %v9369_v5 = vshrl.u32 %v16353_v43, 16  ;;  %v7979_v23 = vsel %vm12500_vm9, %v7974_v59, %v7978_v52  ;;  %v8276_v59 = vld [vmem:[#allocation3 + $0xb4] sm:$0xe]  ;;  %v16383_v42 = vpop.f32.mrf.mxu1 }
 0x55e   : > { %v16343_v46 = vpop.f32.mrf.mxu3  ;;  %v9344_v35 = vsel %vm12500_vm9, %v9339_v31, %v16300_v2  ;;  %v7986_v53 = vrot.slane %v7984_v30, 5  ;;  %v9435_v61 = vunpack.c.l.b16 %v9354_v56  ;;  %v9358_v41 = vrot.slane %v9356_v4, 4  ;;  %v17701_v4 = vld [vmem:[#allocation72_spill] sm:$0xff] }
 0x55f   : > { %17694 = vst [vmem:[#allocation58_spill] sm:$0xff] %v16343_v46  ;;  %v7997_v1 = vor.u32 %v7996_v18, %v16345_v27  ;;  %v9787_v13 = vrot.slane %v16201_v38, 5  ;;  %v16373_v12 = vrot.slane %v9365_v63, 5  ;;  %v9371_v52 = vrot.slane %v9369_v5, 4 }
 0x560   : > { %v8170_v47 = vpop.f32.mrf.mxu2  ;;  %v8426_v2 = vrot.slane %v16316_v39, 5  ;;  %v8059_v31 = vunpack.c.l.b16 %v7969_v50  ;;  %v12003_v6 = vrot.slane %v9649_v32, 9  ;;  %v8060_v18 = vunpack.c.l.b16 %v7979_v23  ;;  %v16385_v39 = vld [vmem:[#allocation3 + $0xc8] sm:$0x1]  ;;  %v12200_v32 = vld [vmem:[#allocation3 + $0xb4] sm:$0xff] }
 0x561   : > { %v16349_v37 = vadd.f32 %v8170_v47, %v7572_v9  ;;  %v7983_v9 = vrot.slane %v7981_v60, 4  ;;  %v9361_v47 = vrot.slane %v9359_v24, 5  ;;  %v17698_v60 = vld [vmem:[#allocation28_spill] sm:$0xff]  ;;  %v7574_v38 = vadd.f32 %v17701_v4, %v7276_v58 }
 0x562   : > { %v7573_v30 = vadd.f32 %v17698_v60, %v16239_v55  ;;  %v9434_v24 = vunpack.c.l.b16 %v9344_v35  ;;  %v7998_v46 = vrot.slane %v7997_v1, 4  ;;  %v11841_v40 = vrot.slane %v8276_v59, 9 }
 0x563   : > { %17695 = vst [vmem:[#allocation19_spill] sm:$0xff] %v16349_v37  ;;  %11862 = vmatmul.msk.bf16.gmra.mxu3 %vm6537_vm5, %v17697_v45  ;;  %v8000_v37 = vshll.u32 %v7640_v15, 16  ;;  %v16378_v45 = vpop.f32.mrf.mxu0  ;;  %v7987_v63 = vor.u32 %v7986_v53, %v7983_v9  ;;  %v8428_v55 = vrot.slane %v8426_v2, 4  ;;  %v9789_v50 = vrot.slane %v9787_v13, 4 }
 0x564   : > { %17699 = vst [vmem:[#allocation77_spill] sm:$0xff] %v16378_v45  ;;  %v9453_v45 = vpack.c.b16 %v9435_v61, %v9434_v24  ;;  %v9362_v22 = vor.u32 %v9361_v47, %v9358_v41  ;;  %v9372_v23 = vor.u32 %v9371_v52, %v16373_v12  ;;  %v8429_v58 = vrot.slane %v7640_v15, 5  ;;  %v9650_v47 = vld [vmem:[#allocation3 + $0xb4] sm:$0xe] }
 0x565   : > { %v9788_v35 = vsel %vm12535_vm13, %v12003_v6, %v9787_v13  ;;  %v9790_v9 = vrot.slane %v16243_v10, 5  ;;  %v8078_v53 = vpack.c.b16 %v8060_v18, %v8059_v31  ;;  %v16394_v1 = vrot.slane %v7987_v63, 4  ;;  %v16406_v10 = vld [vmem:[#allocation3 + $0xc0] sm:$0xf] }
 0x566   : > { %v16380_v56 = vpop.f32.mrf.mxu3  ;;  %v9375_v59 = vshll.u32 %v16385_v39, 16  ;;  %v8427_v61 = vsel %vm12535_vm13, %v11841_v40, %v8426_v2  ;;  %v8430_v41 = vsel %vm12535_vm13, %v8428_v55, %v8429_v58  ;;  %v9373_v52 = vrot.slane %v9372_v23, 4  ;;  %v7642_v2 = vld [vmem:[#allocation3 + $0xc4] sm:$0xf]  ;;  %v9651_v58 = vld [vmem:[#allocation3 + $0xc0] sm:$0xe] }
 0x567   : > { %17700 = vst [vmem:[#allocation69_spill] sm:$0xff] %v16380_v56  ;;  %v8002_v56 = vrot.slane %v8000_v37, 5  ;;  %v17702_v37 = vld [vmem:[#allocation65_spill] sm:$0xff]  ;;  %v9791_v13 = vsel %vm12535_vm13, %v9789_v50, %v9790_v9  ;;  %v7993_v40 = vsel %vm12500_vm9, %v16394_v1, %v16345_v27  ;;  %v8472_v31 = vunpack.c.l.b16 %v8430_v41  ;;  %v16426_v27 = vld [vmem:[#allocation3 + $0xc8] sm:$0x1] }
 0x568   : > { %v8172_v5 = vpop.f32.mrf.mxu2  ;;  %11960 = vmatmul.msk.bf16.gmra.mxu0 %vm6537_vm5, %v12200_v32  ;;  %v16402_v15 = vadd.f32 %v17702_v37, %v16334_v54  ;;  %v9363_v54 = vrot.slane %v9362_v22, 4  ;;  %v9377_v24 = vrot.slane %v9375_v59, 5  ;;  %v8005_v63 = vshrl.u32 %v16406_v10, 16 }
 0x569   : > { %v16387_v60 = vadd.f32 %v8172_v5, %v7573_v30  ;;  %v8003_v6 = vsel %vm12500_vm9, %v7998_v46, %v8002_v56  ;;  %v9842_v46 = vunpack.c.l.b16 %v9788_v35  ;;  %v8471_v30 = vunpack.c.l.b16 %v8427_v61  ;;  %v8277_v5 = vld [vmem:[#allocation3 + $0xc0] sm:$0xe]  ;;  %v16439_v61 = vpop.f32.mrf.mxu1 }
 0x56a   : > { %v9794_v56 = vrot.slane %v16282_v34, 5  ;;  %v16420_v4 = vunpack.c.l.b16 %v8003_v6  ;;  %v12004_v55 = vrot.slane %v9650_v47, 9  ;;  %v9368_v22 = vsel %vm12500_vm9, %v9363_v54, %v16373_v12 }
 0x56b   : > { %v8014_v32 = vshll.u32 %v7642_v2, 16  ;;  %v16428_v23 = vpack.c.b16 %v8472_v31, %v8471_v30  ;;  %v16432_v35 = vpop.f32.mrf.mxu0  ;;  %v9797_v59 = vrot.slane %v16311_v14, 5  ;;  %v9378_v12 = vsel %vm12500_vm9, %v9373_v52, %v9377_v24 }
 0x56c   : > { %11988 = vmatmul.msk.bf16.gmra.mxu1 %vm6537_vm5, %v9453_v45  ;;  %v9843_v45 = vunpack.c.l.b16 %v9791_v13  ;;  %v9796_v1 = vrot.slane %v9794_v56, 4  ;;  %v8018_v37 = vshrl.u32 %v7642_v2, 16  ;;  %v11842_v6 = vrot.slane %v8277_v5, 9 }
 0x56d   : > { %11824 = vmatmul.msk.bf16.gmra.mxu2 %vm6537_vm5, %v8078_v53  ;;  %v9795_v53 = vsel %vm12535_vm13, %v12004_v55, %v9794_v56  ;;  %v8433_v41 = vrot.slane %v7642_v2, 5  ;;  %v8436_v13 = vrot.slane %v16426_v27, 5  ;;  %v12005_v47 = vrot.slane %v9651_v58, 9 }
 0x56e   : > { %v16418_v18 = vpop.f32.mrf.mxu3  ;;  %v16430_v34 = vpack.c.b16 %v9843_v45, %v9842_v46  ;;  %v9801_v54 = vrot.slane %v16353_v43, 5  ;;  %v9844_v30 = vunpack.c.l.b16 %v9795_v53  ;;  %v8008_v31 = vshll.u32 %v16406_v10, 16 }
 0x56f   : > { %v8434_v14 = vsel %vm12535_vm13, %v11842_v6, %v8433_v41  ;;  %v8435_v46 = vrot.slane %v8433_v41, 4  ;;  %v9804_v56 = vrot.slane %v16385_v39, 5  ;;  %v9436_v24 = vunpack.c.l.b16 %v9368_v22  ;;  %v12201_v41 = vld [vmem:[#allocation3 + $0xc0] sm:$0xff] }
 0x570   : > { %v8175_v50 = vpop.f32.mrf.mxu2  ;;  %v9802_v2 = vsel %vm12535_vm13, %v12005_v47, %v9801_v54  ;;  %v9803_v45 = vrot.slane %v9801_v54, 4  ;;  %v9437_v5 = vunpack.c.l.b16 %v9378_v12  ;;  %v8473_v58 = vunpack.c.l.b16 %v8434_v14  ;;  %v17703_v54 = vld [vmem:[#allocation97_spill] sm:$0xff] }
 0x571   : > { %v16434_v9 = vadd.f32 %v8175_v50, %v7574_v38  ;;  %v9798_v38 = vsel %vm12535_vm13, %v9796_v1, %v9797_v59  ;;  %v8437_v43 = vsel %vm12535_vm13, %v8435_v46, %v8436_v13  ;;  %v8016_v50 = vrot.slane %v8014_v32, 5 }
 0x572   : > { %v9845_v52 = vunpack.c.l.b16 %v9798_v38  ;;  %v8474_v53 = vunpack.c.l.b16 %v8437_v43  ;;  %v9805_v10 = vsel %vm12535_vm13, %v9803_v45, %v9804_v56  ;;  %v8020_v6 = vrot.slane %v8018_v37, 4  ;;  %v16477_v37 = vpop.f32.mrf.mxu1  ;;  %v17705_v45 = vld [vmem:[#allocation32_spill] sm:$0xff] }
 0x573   : > { %11863 = vmatmul.msk.bf16.gmra.mxu3 %vm6537_vm5, %v15919_v20  ;;  %v9846_v39 = vunpack.c.l.b16 %v9802_v2  ;;  %v9847_v22 = vunpack.c.l.b16 %v9805_v10  ;;  %v8061_v13 = vunpack.c.l.b16 %v7993_v40  ;;  %v9454_v32 = vpack.c.b16 %v9437_v5, %v9436_v24  ;;  %v16473_v46 = vpop.f32.mrf.mxu0  ;;  %v17704_v2 = vld [vmem:[#allocation22_spill] sm:$0xff]  ;;  %v17706_v56 = vld [vmem:[#allocation100_spill] sm:$0xff] }
 0x574   : > { %v16457_v20 = vpack.c.b16 %v9845_v52, %v9844_v30  ;;  %v16467_v38 = vpack.c.b16 %v8474_v53, %v8473_v58  ;;  %v7278_v14 = vadd.f32 %v17703_v54, %v16357_v51  ;;  %v8010_v40 = vrot.slane %v8008_v31, 5  ;;  %v17707_v31 = vld [vmem:[#allocation35_spill] sm:$0xff] }
 0x575   : > { %v16469_v47 = vpack.c.b16 %v9847_v22, %v9846_v39  ;;  %v8021_v30 = vor.u32 %v8020_v6, %v8016_v50  ;;  %v8024_v52 = vshll.u32 %v16426_v27, 16  ;;  %v6857_v51 = vadd.f32 %v17705_v45, %v17704_v2  ;;  %v17708_v39 = vld [vmem:[#allocation105_spill] sm:$0xff]  ;;  %v17713_v2 = vld [vmem:[#allocation63_spill] sm:$0xff] }
 0x576   : > { %v8560_v55 = vpop.f32.mrf.mxu3  ;;  %v7576_v24 = vadd.f32 %v17706_v56, %v7278_v14 }
 0x577   : > { %v16462_v59 = vadd.f32 %v8560_v55, %v16037_v49  ;;  %v8079_v49 = vpack.c.b16 %v16420_v4, %v8061_v13  ;;  %v8022_v58 = vrot.slane %v8021_v30, 4  ;;  %v7279_v10 = vadd.f32 %v17707_v31, %v6857_v51  ;;  %v17714_v51 = vld [vmem:[#allocation23_spill] sm:$0xff]  ;;  %v17717_v31 = vld [vmem:[#allocation93_spill] sm:$0xff] }
 0x578   : > { %v8177_v1 = vpop.f32.mrf.mxu2  ;;  %11961 = vmatmul.msk.bf16.gmra.mxu0 %vm6537_vm5, %v12201_v41  ;;  %v17710_v41 = vld [vmem:[#allocation99_spill] sm:$0xff] }
 0x579   : > { %v16465_v12 = vadd.f32 %v8177_v1, %v16402_v15  ;;  %v8007_v15 = vrot.slane %v8005_v63, 4  ;;  %v8026_v63 = vrot.slane %v8024_v52, 5  ;;  %v7577_v13 = vadd.f32 %v17710_v41, %v7279_v10 }
 0x57b   : > { %v8011_v55 = vor.u32 %v8010_v40, %v8007_v15  ;;  %v8027_v1 = vsel %vm12500_vm9, %v8022_v58, %v8026_v63  ;;  %v17711_v40 = vld [vmem:[#allocation79_spill] sm:$0xff]  ;;  %v17716_v63 = vld [vmem:[#allocation110_spill] sm:$0xff] }
 0x57c   : > { %11989 = vmatmul.msk.bf16.gmra.mxu1 %vm6537_vm5, %v9454_v32  ;;  %v8064_v54 = vunpack.c.l.b16 %v8027_v1  ;;  %v6865_v10 = vadd.f32 %v17717_v31, %v17716_v63 }
 0x57d   : > { %11825 = vmatmul.msk.bf16.gmra.mxu2 %vm6537_vm5, %v8079_v49  ;;  %v8012_v27 = vrot.slane %v8011_v55, 4  ;;  %v17715_v55 = vld [vmem:[#allocation103_spill] sm:$0xff] }
 0x57e   : > { %v8562_v5 = vpop.f32.mrf.mxu3 }
 0x57f   : > { %v16486_v4 = vadd.f32 %v8562_v5, %v16076_v26  ;;  %v8017_v6 = vsel %vm12500_vm9, %v8012_v27, %v8016_v50  ;;  %v17709_v26 = vld [vmem:[#allocation60_spill] sm:$0xff]  ;;  %v17712_v50 = vld [vmem:[#allocation37_spill] sm:$0xff] }
 0x580   : > { %v8180_v43 = vpop.f32.mrf.mxu2  ;;  %v6860_v22 = vadd.f32 %v17709_v26, %v17708_v39  ;;  %v6862_v45 = vadd.f32 %v17713_v2, %v17712_v50  ;;  %v17718_v27 = vld [vmem:[#allocation81_spill] sm:$0xff] }
 0x581   : > { %v16488_v53 = vadd.f32 %v8180_v43, %v7576_v24 }
 0x582   : > { %v7280_v30 = vadd.f32 %v17711_v40, %v6860_v22  ;;  %v7281_v58 = vadd.f32 %v17715_v55, %v6862_v45  ;;  %v17725_v45 = vld [vmem:[#allocation106_spill] sm:$0xff] }
 0x583   : > { %11864 = vmatmul.msk.bf16.gmra.mxu3 %vm6537_vm5, %v15987_v7  ;;  %v8063_v7 = vunpack.c.l.b16 %v8017_v6 }
 0x584   : > { %v7578_v56 = vadd.f32 %v17714_v51, %v7280_v30  ;;  %v7579_v1 = vadd.f32 %v17718_v27, %v7281_v58  ;;  %v6870_v51 = vadd.f32 %v15926_v11, %v17725_v45  ;;  %v17729_v27 = vld [vmem:[#allocation43_spill] sm:$0xff]  ;;  %v17737_v45 = vld [vmem:[#allocation50_spill] sm:$0xff] }
 0x585   : > { %v8080_v52 = vpack.c.b16 %v8064_v54, %v8063_v7  ;;  %v17722_v54 = vld [vmem:[#allocation74_spill] sm:$0xff] }
 0x586   : > { %v8565_v32 = vpop.f32.mrf.mxu3 }
 0x587   : > { %v16501_v49 = vadd.f32 %v8565_v32, %v16116_v21  ;;  %v17721_v32 = vld [vmem:[#allocation102_spill] sm:$0xff] }
 0x588   : > { %v8182_v14 = vpop.f32.mrf.mxu2 }
 0x589   : > { %v16503_v15 = vadd.f32 %v8182_v14, %v7577_v13  ;;  %v17720_v13 = vld [vmem:[#allocation113_spill] sm:$0xff] }
 0x58a   : > { %v17723_v14 = vld [vmem:[#allocation25_spill] sm:$0xff] }
 0x58d   : > { %11826 = vmatmul.msk.bf16.gmra.mxu2 %vm6537_vm5, %v8080_v52 }
 0x58e   : > { %v8567_v24 = vpop.f32.mrf.mxu3 }
 0x58f   : > { %v16511_v43 = vadd.f32 %v8567_v24, %v16151_v33  ;;  %v17719_v33 = vld [vmem:[#allocation107_spill] sm:$0xff] }
 0x590   : > { %v8185_v5 = vpop.f32.mrf.mxu2  ;;  %v7282_v41 = vadd.f32 %v17719_v33, %v6865_v10  ;;  %v17728_v10 = vld [vmem:[#allocation45_spill] sm:$0xff] }
 0x591   : > { %v16513_v21 = vadd.f32 %v8185_v5, %v7578_v56  ;;  %v17726_v56 = vld [vmem:[#allocation82_spill] sm:$0xff] }
 0x592   : > { %v7580_v7 = vadd.f32 %v17723_v14, %v7282_v41 }
 0x593   : > { %11865 = vmatmul.msk.bf16.gmra.mxu3 %vm6537_vm5, %v16069_v44  ;;  %v6867_v44 = vadd.f32 %v17722_v54, %v17721_v32  ;;  %v17732_v32 = vld [vmem:[#allocation8_spill] sm:$0xff] }
 0x594   : > { %v6875_v54 = vadd.f32 %v15995_v28, %v17732_v32 }
 0x596   : > { %v8570_v6 = vpop.f32.mrf.mxu3 }
 0x597   : > { %v16522_v26 = vadd.f32 %v8570_v6, %v16198_v62  ;;  %v17724_v62 = vld [vmem:[#allocation115_spill] sm:$0xff] }
 0x598   : > { %v8187_v39 = vpop.f32.mrf.mxu2  ;;  %v7283_v2 = vadd.f32 %v17724_v62, %v6867_v44  ;;  %v17733_v44 = vld [vmem:[#allocation29_spill] sm:$0xff] }
 0x599   : > { %v16524_v22 = vadd.f32 %v8187_v39, %v7579_v1  ;;  %v17730_v1 = vld [vmem:[#allocation41_spill] sm:$0xff] }
 0x59a   : > { %v7581_v24 = vadd.f32 %v17726_v56, %v7283_v2  ;;  %v17735_v62 = vld [vmem:[#allocation5_spill] sm:$0xff] }
 0x59d   : > { %12019 = vmatmul.msk.bf16.vlgmr.msra.gmra.mxu2 %vm6537_vm5, %v17720_v13 }
 0x59e   : > { %v8572_v40 = vpop.f32.mrf.mxu3 }
 0x59f   : > { %v16533_v52 = vadd.f32 %v8572_v40, %v16235_v25  ;;  %v17727_v25 = vld [vmem:[#allocation84_spill] sm:$0xff]  ;;  %v17734_v40 = vld [vmem:[#allocation11_spill] sm:$0xff] }
 0x5a0   : > { %v8190_v30 = vpop.f32.mrf.mxu2  ;;  %v7284_v31 = vadd.f32 %v17727_v25, %v6870_v51  ;;  %v17740_v25 = vld [vmem:[#allocation89_spill] sm:$0xff] }
 0x5a1   : > { %v16535_v50 = vadd.f32 %v8190_v30, %v7580_v7  ;;  %v7286_v30 = vadd.f32 %v17734_v40, %v6875_v54  ;;  %v5511_v54 = vld [vmem:[#allocation3 + $0xcc] sm:$0x1] }
 0x5a2   : > { %v7582_v6 = vadd.f32 %v17730_v1, %v7284_v31  ;;  %v17742_v1 = vld [vmem:[#allocation51_spill] sm:$0xff]  ;;  %v5512_v40 = vsel %vm14384_vm7, 0, %v5511_v54 }
 0x5a3   : > { %11866 = vmatmul.msk.bf16.gmra.mxu3 %vm6537_vm5, %v16189_v16  ;;  %v6872_v16 = vadd.f32 %v15957_v36, %v17729_v27  ;;  %v7584_v51 = vadd.f32 %v17737_v45, %v7286_v30  ;;  %5513 = vst [vmem:[#allocation3 + $0xcc] sm:$0x1] %v5512_v40 }
 0x5a6   : > { %v8575_v5 = vpop.f32.mrf.mxu3 }
 0x5a7   : > { %v16544_v58 = vadd.f32 %v8575_v5, %v16278_v57  ;;  %v17731_v57 = vld [vmem:[#allocation9_spill] sm:$0xff]  ;;  %v17739_v5 = vld [vmem:[#allocation44_spill] sm:$0xff] }
 0x5a8   : > { %v8192_v55 = vpop.f32.mrf.mxu2  ;;  %v7285_v13 = vadd.f32 %v17731_v57, %v6872_v16  ;;  %v17741_v16 = vld [vmem:[#allocation12_spill] sm:$0xff]  ;;  %v17745_v57 = vld [vmem:[#allocation34_spill] sm:$0xff] }
 0x5a9   : > { %v16546_v63 = vadd.f32 %v8192_v55, %v7581_v24  ;;  %v17738_v24 = vld [vmem:[#allocation6_spill] sm:$0xff]  ;;  %v6880_v55 = vadd.f32 %v16065_v29, %v17739_v5  ;;  %v5566_v29 = vld [vmem:[#allocation3 + $0xd4] sm:$0x1] }
 0x5aa   : > { %v7583_v14 = vadd.f32 %v17733_v44, %v7285_v13  ;;  %v16591_v44 = vld [vmem:[#allocation3 + $0xd0] sm:$0xf]  ;;  %v17750_v5 = vld [vmem:[#allocation54_spill] sm:$0xff] }
 0x5ad   : > { %12020 = vmatmul.msk.bf16.gmra.mxu2 %vm6537_vm5, %v17728_v10 }
 0x5ae   : > { %v8577_v11 = vpop.f32.mrf.mxu3 }
 0x5af   : > { %v16555_v33 = vadd.f32 %v8577_v11, %v16313_v8  ;;  %v17736_v8 = vld [vmem:[#allocation48_spill] sm:$0xff]  ;;  %v17744_v11 = vld [vmem:[#allocation55_spill] sm:$0xff] }
 0x5b0   : > { %v8195_v39 = vpop.f32.mrf.mxu2  ;;  %v6877_v2 = vadd.f32 %v16030_v0, %v17736_v8  ;;  %v7288_v0 = vadd.f32 %v17741_v16, %v6880_v55  ;;  %v9389_v8 = vshll.u32 %v16591_v44, 16 }
 0x5b1   : > { %v16557_v41 = vadd.f32 %v8195_v39, %v7582_v6  ;;  %v17743_v6 = vld [vmem:[#allocation31_spill] sm:$0xff] }
 0x5b2   : > { %v7287_v28 = vadd.f32 %v17738_v24, %v6877_v2  ;;  %v6882_v39 = vadd.f32 %v17744_v11, %v17743_v6  ;;  %v7586_v13 = vadd.f32 %v17745_v57, %v7288_v0  ;;  %v17748_v2 = vld [vmem:[#allocation36_spill] sm:$0xff]  ;;  %v9016_v6 = vld [vmem:[#allocation3 + $0xcc] sm:$0xf]  ;;  %v17752_v11 = vld [vmem:[#allocation94_spill] sm:$0xff] }
 0x5b3   : > { %11867 = vmatmul.msk.bf16.gmra.mxu3 %vm6537_vm5, %v16276_v19 }
 0x5b4   : > { %v7585_v31 = vadd.f32 %v17740_v25, %v7287_v28  ;;  %v7289_v45 = vadd.f32 %v17748_v2, %v6882_v39  ;;  %v17749_v28 = vld [vmem:[#allocation90_spill] sm:$0xff]  ;;  %v17754_v2 = vld [vmem:[#allocation91_spill] sm:$0xff] }
 0x5b5   : > { %v6885_v55 = vadd.f32 %v17750_v5, %v17749_v28  ;;  %v17751_v25 = vld [vmem:[#allocation38_spill] sm:$0xff] }
 0x5b7   : > { %v7290_v39 = vadd.f32 %v17752_v11, %v6885_v55 }
 0x5b8   : > { %v8197_v36 = vpop.f32.mrf.mxu2 }
 0x5b9   : > { %v16565_v7 = vadd.f32 %v8197_v36, %v7583_v14  ;;  %v16593_v14 = vpop.f32.mrf.mxu0  ;;  %v17753_v36 = vld [vmem:[#allocation56_spill] sm:$0xff] }
 0x5bd   : > { %12021 = vmatmul.msk.bf16.gmra.mxu2 %vm6537_vm5, %v17735_v62  ;;  %v5567_v62 = vsel %vm14414_vm3, 0, %v5566_v29 }
 0x5be   : > { %5568 = vst [vmem:[#allocation3 + $0xd4] sm:$0x1] %v5567_v62  ;;  %v16618_v62 = vpop.f32.mrf.mxu1 }
 0x5c0   : > { %v8200_v56 = vpop.f32.mrf.mxu2 }
 0x5c1   : > { %v16573_v19 = vadd.f32 %v8200_v56, %v7584_v51  ;;  %v9393_v51 = vshrl.u32 %v16591_v44, 16  ;;  %v9391_v56 = vrot.slane %v9389_v8, 5 }
 0x5c3   : > { %11868 = vmatmul.msk.bf16.gmra.mxu3 %vm6537_vm5, %v16347_v3  ;;  %v9395_v24 = vrot.slane %v9393_v51, 4 }
 0x5c5   : > { %v9396_v16 = vor.u32 %v9395_v24, %v9391_v56  ;;  %v16610_v57 = vld [vmem:[#allocation3 + $0xd4] sm:$0x1]  ;;  %v17756_v24 = vld [vmem:[#allocation98_spill] sm:$0xff] }
 0x5c6   : > { %v9399_v29 = vshll.u32 %v16610_v57, 16  ;;  %v7588_v28 = vadd.f32 %v17756_v24, %v7290_v39  ;;  %v17758_v39 = vld [vmem:[#allocation67_spill] sm:$0xff] }
 0x5c7   : > { %v9397_v54 = vrot.slane %v9396_v16, 4 }
 0x5c8   : > { %v8202_v10 = vpop.f32.mrf.mxu2  ;;  %v9401_v8 = vrot.slane %v9399_v29, 5  ;;  %v17759_v29 = vld [vmem:[#allocation52_spill] sm:$0xff] }
 0x5c9   : > { %v16581_v27 = vadd.f32 %v8202_v10, %v7585_v31  ;;  %v7587_v31 = vadd.f32 %v17751_v25, %v7289_v45  ;;  %v17755_v45 = vld [vmem:[#allocation62_spill] sm:$0xff] }
 0x5ca   : > { %v6887_v51 = vadd.f32 %v17755_v45, %v17754_v2  ;;  %v9402_v25 = vsel %vm12500_vm9, %v9397_v54, %v9401_v8  ;;  %v16635_v54 = vpop.f32.mrf.mxu1  ;;  %v17761_v45 = vld [vmem:[#allocation80_spill] sm:$0xff] }
 0x5cb   : > { %v9439_v16 = vunpack.c.l.b16 %v9402_v25 }
 0x5cd   : > { %12022 = vmatmul.msk.bf16.gmra.mxu2 %vm6537_vm5, %v17742_v1  ;;  %v12202_v1 = vld [vmem:[#allocation3 + $0xcc] sm:$0xff] }
 0x5d0   : > { %v8205_v32 = vpop.f32.mrf.mxu2 }
 0x5d1   : > { %v16589_v3 = vadd.f32 %v8205_v32, %v7586_v13  ;;  %v9380_v13 = vshrl.u32 %v9016_v6, 16  ;;  %v16612_v32 = vpop.f32.mrf.mxu0  ;;  %11962 = vmatmul.msk.bf16.gmra.mxu0 %vm6537_vm5, %v12202_v1  ;;  %v17757_v1 = vld [vmem:[#allocation75_spill] sm:$0xff] }
 0x5d3   : > { %11869 = vmatmul.msk.bf16.gmra.mxu3 %vm6537_vm5, %v16428_v23  ;;  %v9383_v23 = vshll.u32 %v9016_v6, 16  ;;  %v9382_v40 = vrot.slane %v9380_v13, 4  ;;  %v7291_v6 = vadd.f32 %v17757_v1, %v6887_v51  ;;  %v17764_v51 = vld [vmem:[#allocation24_spill] sm:$0xff]  ;;  %v17767_v1 = vld [vmem:[#allocation95_spill] sm:$0xff] }
 0x5d5   : > { %v9385_v30 = vrot.slane %v9383_v23, 5 }
 0x5d7   : > { %v9386_v5 = vor.u32 %v9385_v30, %v9382_v40  ;;  %v17760_v40 = vld [vmem:[#allocation78_spill] sm:$0xff] }
 0x5d8   : > { %v8207_v10 = vpop.f32.mrf.mxu2  ;;  %v7589_v30 = vadd.f32 %v17760_v40, %v7291_v6  ;;  %v17768_v6 = vld [vmem:[#allocation66_spill] sm:$0xff] }
 0x5d9   : > { %v16607_v0 = vadd.f32 %v8207_v10, %v7587_v31  ;;  %v9387_v10 = vrot.slane %v9386_v5, 4 }
 0x5db   : > { %v9392_v11 = vsel %vm12500_vm9, %v9387_v10, %v9391_v56  ;;  %v17762_v56 = vld [vmem:[#allocation92_spill] sm:$0xff]  ;;  %v17766_v10 = vld [vmem:[#allocation83_spill] sm:$0xff] }
 0x5dc   : > { %v9438_v13 = vunpack.c.l.b16 %v9392_v11  ;;  %v6895_v11 = vadd.f32 %v17768_v6, %v17767_v1  ;;  %v17778_v6 = vld [vmem:[#allocation14_spill] sm:$0xff] }
 0x5dd   : > { %12023 = vmatmul.msk.bf16.gmra.mxu2 %vm6537_vm5, %v17753_v36  ;;  %v6890_v36 = vadd.f32 %v17759_v29, %v17758_v39 }
 0x5de   : > { %v9455_v23 = vpack.c.b16 %v9439_v16, %v9438_v13  ;;  %v17769_v13 = vld [vmem:[#allocation112_spill] sm:$0xff] }
 0x5df   : > { %v7292_v48 = vadd.f32 %v17761_v45, %v6890_v36  ;;  %v17770_v36 = vld [vmem:[#allocation10_spill] sm:$0xff] }
 0x5e0   : > { %v8210_v55 = vpop.f32.mrf.mxu2  ;;  %11990 = vmatmul.msk.bf16.gmra.mxu1 %vm6537_vm5, %v9455_v23  ;;  %v7294_v40 = vadd.f32 %v17770_v36, %v6895_v11  ;;  %v17773_v45 = vld [vmem:[#allocation58_spill] sm:$0xff] }
 0x5e1   : > { %v16625_v31 = vadd.f32 %v8210_v55, %v7588_v28  ;;  %v17765_v28 = vld [vmem:[#allocation13_spill] sm:$0xff] }
 0x5e2   : > { %v7590_v5 = vadd.f32 %v17765_v28, %v7292_v48  ;;  %v17775_v28 = vld [vmem:[#allocation47_spill] sm:$0xff] }
 0x5e3   : > { %11870 = vmatmul.msk.bf16.gmra.mxu3 %vm6537_vm5, %v16467_v38  ;;  %v17763_v38 = vld [vmem:[#allocation71_spill] sm:$0xff] }
 0x5e4   : > { %v6892_v24 = vadd.f32 %v17764_v51, %v17763_v38 }
 0x5e6   : > { %v7293_v16 = vadd.f32 %v17766_v10, %v6892_v24  ;;  %v17776_v10 = vld [vmem:[#allocation42_spill] sm:$0xff] }
 0x5e8   : > { %v8212_v8 = vpop.f32.mrf.mxu2  ;;  %v7591_v23 = vadd.f32 %v17769_v13, %v7293_v16  ;;  %v17777_v16 = vld [vmem:[#allocation69_spill] sm:$0xff] }
 0x5e9   : > { %v16638_v2 = vadd.f32 %v8212_v8, %v7589_v30  ;;  %v17771_v30 = vld [vmem:[#allocation96_spill] sm:$0xff]  ;;  %v6900_v1 = vadd.f32 %v17777_v16, %v17776_v10  ;;  %v17784_v10 = vld [vmem:[#allocation15_spill] sm:$0xff] }
 0x5ea   : > { %v17772_v8 = vld [vmem:[#allocation104_spill] sm:$0xff] }
 0x5eb   : > { %v6897_v48 = vadd.f32 %v17773_v45, %v17772_v8  ;;  %v17782_v45 = vld [vmem:[#allocation59_spill] sm:$0xff] }
 0x5ed   : > { %12024 = vmatmul.msk.bf16.gmra.mxu2 %vm6537_vm5, %v17762_v56  ;;  %v17774_v56 = vld [vmem:[#allocation87_spill] sm:$0xff] }
 0x5ee   : > { %v7592_v38 = vadd.f32 %v17774_v56, %v7294_v40  ;;  %v17781_v40 = vld [vmem:[#allocation85_spill] sm:$0xff] }
 0x5ef   : > { %v6902_v8 = vadd.f32 %v16418_v18, %v17781_v40 }
 0x5f0   : > { %v8215_v55 = vpop.f32.mrf.mxu2 }
 0x5f1   : > { %v16646_v25 = vadd.f32 %v8215_v55, %v7590_v5  ;;  %v7295_v5 = vadd.f32 %v17775_v28, %v6897_v48  ;;  %v12340_v55 = vmov 1  }
 0x5f2   : > { %12233 = vset.pattern.permute.xlu2 %v12340_v55 }
 0x5f3   : > { %v7593_v11 = vadd.f32 %v17778_v6, %v7295_v5 }
 0x5f8   : > { %v8217_v39 = vpop.f32.mrf.mxu2 }
 0x5f9   : > { %v16652_v29 = vadd.f32 %v8217_v39, %v7591_v23  ;;  %v17779_v39 = vld [vmem:[#allocation49_spill] sm:$0xff] }
 0x5fa   : > { %v7296_v36 = vadd.f32 %v17779_v39, %v6900_v1  ;;  %v17785_v1 = vld [vmem:[#allocation7_spill] sm:$0xff]  ;;  %v17787_v39 = vld [vmem:[#allocation17_spill] sm:$0xff] }
 0x5fc   : > { %v7594_v48 = vadd.f32 %v17782_v45, %v7296_v36  ;;  %v16689_v36 = vld [vmem:[%s17191_s6] ss:$0 sm:$0xff] }
 0x5fd   : > { %12025 = vmatmul.msk.bf16.gmra.mxu2 %vm6537_vm5, %v17771_v30  ;;  %v17780_v30 = vld [vmem:[#allocation108_spill] sm:$0xff] }
 0x600   : > { %v8220_v51 = vpop.f32.mrf.mxu2 }
 0x601   : > { %v16660_v24 = vadd.f32 %v8220_v51, %v7592_v38  ;;  %v17783_v51 = vld [vmem:[#allocation20_spill] sm:$0xff] }
 0x602   : > { %v7297_v28 = vadd.f32 %v17783_v51, %v6902_v8  ;;  %v17788_v8 = vld [vmem:[#allocation39_spill] sm:$0xff]  ;;  %v16694_v51 = vpop.f32.mrf.mxu3 }
 0x603   : > { %v8940_v45 = vadd.f32 %v17788_v8, %v16486_v4 }
 0x604   : > { %v7595_v5 = vadd.f32 %v17784_v10, %v7297_v28 }
 0x608   : > { %v8222_v13 = vpop.f32.mrf.mxu2 }
 0x609   : > { %v16667_v23 = vadd.f32 %v8222_v13, %v7593_v11  ;;  %v8939_v11 = vadd.f32 %v17785_v1, %v16462_v59  ;;  %v17786_v13 = vld [vmem:[#allocation16_spill] sm:$0xff]  ;;  %v17789_v59 = vld [vmem:[#allocation27_spill] sm:$0xff] }
 0x60a   : > { %v9606_v28 = vadd.f32 %v17789_v59, %v8940_v45  ;;  %v16707_v8 = vpop.f32.mrf.mxu3 }
 0x60b   : > { %v9605_v18 = vadd.f32 %v17787_v39, %v8939_v11  ;;  %v17791_v39 = vld [vmem:[#allocation18_spill] sm:$0xff] }
 0x60d   : > { %12026 = vmatmul.msk.bf16.gmra.mxu2 %vm6537_vm5, %v17780_v30 }
 0x610   : > { %v8225_v56 = vpop.f32.mrf.mxu2 }
 0x611   : > { %v16675_v38 = vadd.f32 %v8225_v56, %v7594_v48 }
 0x618   : > { %v8227_v16 = vpop.f32.mrf.mxu2 }
 0x619   : > { %v16679_v6 = vadd.f32 %v8227_v16, %v7595_v5  ;;  %v17790_v16 = vld [vmem:[#allocation61_spill] sm:$0xff] }
 0x61a   : > { %v8941_v1 = vadd.f32 %v17790_v16, %v16501_v49 }
 0x61d   : > { %12027 = vmatmul.msk.bf16.gmra.mxu2 %vm6537_vm5, %v17786_v13  ;;  %v16700_v13 = vpop.f32.mrf.mxu0 }
 0x620   : > { %v9935_v30 = vpop.f32.mrf.mxu2 }
 0x621   : > { %v10015_v40 = vadd.f32 %v9935_v30, %v9605_v18  ;;  %v16704_v18 = vpop.f32.mrf.mxu1  ;;  %v17792_v30 = vld [vmem:[#allocation26_spill] sm:$0xff] }
 0x623   : > { %v10051_v48 = vadd.f32 %v16689_v36, %v10015_v40  ;;  %v9607_v40 = vadd.f32 %v17792_v30, %v8941_v1 }
 0x625   : > { %v10083_v56 = vmax.f32 %v10051_v48, 0.0 }
 0x627   : > { %10340 = vperm.xlu2 %12233, %v10083_v56   ;;  %10149 = vperm.xlu0 %12232, %v10083_v56   ;;  %v17793_v56 = vld [vmem:[#allocation77_spill] sm:$0xff] }
 0x628   : > { %v9937_v10 = vpop.f32.mrf.mxu2  ;;  %v8942_v49 = vadd.f32 %v17793_v56, %v16511_v43  ;;  %v8943_v43 = vadd.f32 %v16432_v35, %v16522_v26  ;;  %v8944_v35 = vadd.f32 %v16473_v46, %v16533_v52  ;;  %v8945_v46 = vadd.f32 %v16593_v14, %v16544_v58 }
 0x629   : > { %v10016_v5 = vadd.f32 %v9937_v10, %v9606_v28  ;;  %v16712_v10 = vpop.f32.mrf.mxu0  ;;  %v16716_v1 = vpop.f32.mrf.mxu1  ;;  %v8946_v58 = vadd.f32 %v16612_v32, %v16555_v33 }
 0x62b   : > { %v10052_v11 = vadd.f32 %v16689_v36, %v10016_v5  ;;  %v9608_v5 = vadd.f32 %v16383_v42, %v8942_v49  ;;  %v9609_v42 = vadd.f32 %v16439_v61, %v8943_v43  ;;  %v9610_v61 = vadd.f32 %v16477_v37, %v8944_v35 }
 0x62d   : > { %12028 = vmatmul.msk.bf16.gmra.mxu2 %vm6537_vm5, %v17791_v39  ;;  %v10084_v4 = vmax.f32 %v10052_v11, 0.0  ;;  %v16718_v39 = vpop.f32.mrf.mxu3 }
 0x62f   : > { %10154 = vperm.xlu0 %12232, %v10084_v4  }
 0x630   : > { %v9940_v45 = vpop.f32.mrf.mxu2 }
 0x631   : > { %v10017_v48 = vadd.f32 %v9940_v45, %v9607_v40  ;;  %v17794_v40 = vld [vmem:[#allocation53_spill] sm:$0xff]  ;;  %v16728_v56 = vpop.f32.mrf.mxu0 }
 0x633   : > { %v10053_v59 = vadd.f32 %v16689_v36, %v10017_v48  ;;  %v17795_v48 = vmov 0  }
 0x635   : > { %v10085_v28 = vmax.f32 %v10053_v59, 0.0  ;;  %v16730_v59 = vpop.f32.mrf.mxu1 }
 0x637   : > { %12234 = vset.pattern.permute.xlu0 %v12340_v55  ;;  %10159 = vperm.xlu1 %12235, %v10085_v28  }
 0x638   : > { %10344 = vperm.xlu0 %12234, %v10084_v4   ;;  %v9942_v16 = vpop.f32.mrf.mxu2 }
 0x639   : > { %v10018_v11 = vadd.f32 %v9942_v16, %v9608_v5  ;;  %v16735_v5 = vpop.f32.mrf.mxu3  ;;  %v16740_v43 = vpop.f32.mrf.mxu0 }
 0x63b   : > { %v10054_v30 = vadd.f32 %v16689_v36, %v10018_v11 }
 0x63d   : > { %12029 = vmatmul.msk.bf16.gmra.mxu2 %vm6537_vm5, %v17794_v40  ;;  %v10086_v45 = vmax.f32 %v10054_v30, 0.0  ;;  %v16745_v30 = vpop.f32.mrf.mxu1  ;;  %v17796_v40 = vld [vmem:[#allocation57_spill] sm:$0xff] }
 0x63f   : > { %12236 = vset.pattern.permute.xlu1 %v12340_v55  ;;  %10352 = vperm.xlu2 %12233, %v10086_v45  }
 0x640   : > { %10348 = vperm.xlu1 %12236, %v10085_v28   ;;  %v9945_v4 = vpop.f32.mrf.mxu2  ;;  %12241 = vset.pattern.permute.xlu0 %v17795_v48 }
 0x641   : > { %v10019_v49 = vadd.f32 %v9945_v4, %v9609_v42  ;;  %v16749_v37 = vpop.f32.mrf.mxu3  ;;  %v9611_v4 = vadd.f32 %v16618_v62, %v8945_v46  ;;  %v16756_v35 = vpop.f32.mrf.mxu0  ;;  %v9612_v62 = vadd.f32 %v16635_v54, %v8946_v58  ;;  %v8649_v54 = vadd.f32 %v16707_v8, %v16387_v60 }
 0x642   : > { %v8650_v60 = vadd.f32 %v16718_v39, %v16434_v9 }
 0x643   : > { %v10055_v26 = vadd.f32 %v16689_v36, %v10019_v49 }
 0x645   : > { %v10087_v16 = vmax.f32 %v10055_v26, 0.0 }
 0x647   : > { %12238 = vset.pattern.permute.xlu2 %v17795_v48 }
 0x648   : > { %12237 = vset.pattern.permute.xlu1 %v17795_v48  ;;  %10169 = vperm.xlu2 %12238, %v10087_v16   ;;  %v9947_v28 = vpop.f32.mrf.mxu2 }
 0x649   : > { %v10020_v11 = vadd.f32 %v9947_v28, %v9610_v61  ;;  %10164 = vperm.xlu1 %12237, %v10086_v45   ;;  %v16758_v61 = vpop.f32.mrf.mxu1  ;;  %v17797_v28 = vld [vmem:[#allocation19_spill] sm:$0xff]  ;;  %v16763_v46 = vpop.f32.mrf.mxu3 }
 0x64b   : > { %v10056_v52 = vadd.f32 %v16689_v36, %v10020_v11  ;;  %v8648_v11 = vadd.f32 %v16694_v51, %v17797_v28 }
 0x64d   : > { %12030 = vmatmul.msk.bf16.gmra.mxu2 %vm6537_vm5, %v17796_v40  ;;  %v10088_v42 = vmax.f32 %v10056_v52, 0.0  ;;  %v8947_v33 = vadd.f32 %v16700_v13, %v8648_v11  ;;  %v16771_v40 = vpop.f32.mrf.mxu0 }
 0x650   : > { %10174 = vperm.xlu2 %12238, %v10088_v42   ;;  %v9950_v49 = vpop.f32.mrf.mxu2 }
 0x651   : > { %v10021_v45 = vadd.f32 %v9950_v49, %v9611_v4  ;;  %12239 = vset.pattern.permute.xlu1 %v12340_v55  ;;  %v16777_v49 = vpop.f32.mrf.mxu1 }
 0x652   : > { %10356 = vperm.xlu1 %12239, %v10087_v16  }
 0x653   : > { %v10057_v14 = vadd.f32 %v16689_v36, %v10021_v45  ;;  %v16780_v45 = vpop.f32.mrf.mxu3 }
 0x655   : > { %v10089_v26 = vmax.f32 %v10057_v14, 0.0 }
 0x657   : > { %10179 = vperm.xlu0 %12241, %v10089_v26  }
 0x658   : > { %12240 = vset.pattern.permute.xlu2 %v12340_v55  ;;  %v9952_v16 = vpop.f32.mrf.mxu2 }
 0x659   : > { %v10022_v52 = vadd.f32 %v9952_v16, %v9612_v62  ;;  %10360 = vperm.xlu2 %12240, %v10088_v42   ;;  %v9613_v42 = vadd.f32 %v16704_v18, %v8947_v33  ;;  %v16791_v11 = vpop.f32.mrf.mxu1 }
 0x65a   : > { %12243 = vset.pattern.permute.xlu1 %v17795_v48 }
 0x65b   : > { %v10058_v32 = vadd.f32 %v16689_v36, %v10022_v52  ;;  %v16795_v16 = vpop.f32.mrf.mxu3 }
 0x65d   : > { %12031 = vmatmul.msk.bf16.gmra.mxu2 %vm6537_vm5, %v16430_v34  ;;  %v10090_v51 = vmax.f32 %v10058_v32, 0.0  ;;  %v8948_v34 = vadd.f32 %v16712_v10, %v8649_v54  ;;  %v8949_v10 = vadd.f32 %v16728_v56, %v8650_v60  ;;  %v9811_v60 = vrot.slane %v16610_v57, 5 }
 0x65f   : > { %12242 = vset.pattern.permute.xlu0 %v12340_v55  ;;  %10184 = vperm.xlu1 %12243, %v10090_v51   ;;  %v9614_v18 = vadd.f32 %v16716_v1, %v8948_v34  ;;  %v8651_v1 = vadd.f32 %v16735_v5, %v16465_v12  ;;  %v9615_v39 = vadd.f32 %v16730_v59, %v8949_v10 }
 0x660   : > { %10364 = vperm.xlu0 %12242, %v10089_v26   ;;  %v9955_v4 = vpop.f32.mrf.mxu2  ;;  %v16789_v26 = vpop.f32.mrf.mxu0  ;;  %v8652_v5 = vadd.f32 %v16749_v37, %v16488_v53 }
 0x661   : > { %v10023_v13 = vadd.f32 %v9955_v4, %v9613_v42  ;;  %12245 = vset.pattern.permute.xlu2 %v17795_v48  ;;  %v8950_v32 = vadd.f32 %v16740_v43, %v8651_v1  ;;  %v9808_v4 = vrot.slane %v16591_v44, 5  ;;  %v8653_v44 = vadd.f32 %v16763_v46, %v16503_v15 }
 0x663   : > { %v10059_v58 = vadd.f32 %v16689_v36, %v10023_v13  ;;  %v16810_v12 = vpop.f32.mrf.mxu3  ;;  %v9616_v59 = vadd.f32 %v16745_v30, %v8950_v32  ;;  %v8951_v13 = vadd.f32 %v16756_v35, %v8652_v5  ;;  %v9810_v30 = vrot.slane %v9808_v4, 4 }
 0x665   : > { %v10091_v14 = vmax.f32 %v10059_v58, 0.0  ;;  %v9652_v58 = vld [vmem:[#allocation3 + $0xcc] sm:$0xe]  ;;  %v9617_v35 = vadd.f32 %v16758_v61, %v8951_v13  ;;  %v9812_v57 = vsel %vm12535_vm13, %v9810_v30, %v9811_v60 }
 0x666   : > { %v12006_v37 = vrot.slane %v9652_v58, 9  ;;  %v9849_v1 = vunpack.c.l.b16 %v9812_v57 }
 0x667   : > { %12244 = vset.pattern.permute.xlu1 %v12340_v55  ;;  %10189 = vperm.xlu2 %12245, %v10091_v14  }
 0x668   : > { %10368 = vperm.xlu1 %12244, %v10090_v51   ;;  %v9957_v8 = vpop.f32.mrf.mxu2  ;;  %12247 = vset.pattern.permute.xlu0 %v17795_v48  ;;  %v16804_v33 = vpop.f32.mrf.mxu0  ;;  %v9809_v10 = vsel %vm12535_vm13, %v12006_v37, %v9808_v4  ;;  %v10115_v37 = vld [vmem:[#allocation4] sm:$0xff] }
 0x669   : > { %v10024_v28 = vadd.f32 %v9957_v8, %v9614_v18 }
 0x66b   : > { %v10060_v62 = vadd.f32 %v16689_v36, %v10024_v28  ;;  %v8602_v8 = vpop.f32.mrf.mxu3 }
 0x66d   : > { %v10092_v9 = vmax.f32 %v10060_v62, 0.0  ;;  %12032 = vmatmul.msk.bf16.gmra.mxu2 %vm6537_vm5, %v16457_v20  ;;  %v16808_v20 = vpop.f32.mrf.mxu1  ;;  %v8952_v62 = vadd.f32 %v16771_v40, %v8653_v44 }
 0x66f   : > { %12246 = vset.pattern.permute.xlu2 %v12340_v55  ;;  %10194 = vperm.xlu0 %12247, %v10092_v9  }
 0x670   : > { %10372 = vperm.xlu2 %12246, %v10091_v14   ;;  %v9960_v52 = vpop.f32.mrf.mxu2  ;;  %12249 = vset.pattern.permute.xlu1 %v17795_v48  ;;  %v16820_v14 = vpop.f32.mrf.mxu0 }
 0x671   : > { %v10025_v56 = vadd.f32 %v9960_v52, %v9615_v39  ;;  %v8654_v39 = vadd.f32 %v16780_v45, %v16513_v21  ;;  %v9618_v52 = vadd.f32 %v16777_v49, %v8952_v62  ;;  %v8655_v21 = vadd.f32 %v16795_v16, %v16524_v22 }
 0x672   : > { %v8656_v16 = vadd.f32 %v16810_v12, %v16535_v50 }
 0x673   : > { %v10061_v51 = vadd.f32 %v16689_v36, %v10025_v56  ;;  %v8954_v13 = vadd.f32 %v16804_v33, %v8655_v21 }
 0x675   : > { %v10093_v54 = vmax.f32 %v10061_v51, 0.0  ;;  %v16825_v18 = vpop.f32.mrf.mxu1  ;;  %v8605_v51 = vpop.f32.mrf.mxu3 }
 0x677   : > { %12248 = vset.pattern.permute.xlu0 %v12340_v55  ;;  %10199 = vperm.xlu1 %12249, %v10093_v54  }
 0x678   : > { %10376 = vperm.xlu0 %12248, %v10092_v9   ;;  %v9962_v42 = vpop.f32.mrf.mxu2  ;;  %12251 = vset.pattern.permute.xlu2 %v17795_v48  ;;  %v9848_v9 = vunpack.c.l.b16 %v9809_v10  ;;  %v8901_v61 = vpop.f32.mrf.mxu0  ;;  %v8657_v10 = vadd.f32 %v8602_v8, %v16546_v63 }
 0x679   : > { %v10026_v43 = vadd.f32 %v9962_v42, %v9616_v59 }
 0x67a   : > { %v9865_v32 = vpack.c.b16 %v9849_v1, %v9848_v9  ;;  %v16878_v1 = vld [vmem:[#allocation4 + $0x20] sm:$0xff] }
 0x67b   : > { %v10062_v34 = vadd.f32 %v16689_v36, %v10026_v43 }
 0x67d   : > { %v10094_v53 = vmax.f32 %v10062_v34, 0.0  ;;  %12033 = vmatmul.msk.bf16.gmra.mxu2 %vm6537_vm5, %v16469_v47  ;;  %v16843_v17 = vpop.f32.mrf.mxu1  ;;  %v16857_v58 = vpop.f32.mrf.mxu3 }
 0x67f   : > { %12250 = vset.pattern.permute.xlu1 %v12340_v55  ;;  %10204 = vperm.xlu2 %12251, %v10094_v53  }
 0x680   : > { %10380 = vperm.xlu1 %12250, %v10093_v54   ;;  %v9965_v28 = vpop.f32.mrf.mxu2  ;;  %12253 = vset.pattern.permute.xlu0 %v17795_v48  ;;  %v8953_v54 = vadd.f32 %v16789_v26, %v8654_v39  ;;  %v8904_v42 = vpop.f32.mrf.mxu0 }
 0x681   : > { %v10027_v47 = vadd.f32 %v9965_v28, %v9617_v35  ;;  %v10341_v43 = vpop.permute.xlu2 %10340  ;;  %v8955_v28 = vadd.f32 %v16820_v14, %v8656_v16 }
 0x682   : > { %v9619_v49 = vadd.f32 %v16791_v11, %v8953_v54  ;;  %v9620_v11 = vadd.f32 %v16808_v20, %v8954_v13  ;;  %v8658_v54 = vadd.f32 %v8605_v51, %v16557_v41 }
 0x683   : > { %v10063_v15 = vadd.f32 %v16689_v36, %v10027_v47  ;;  %v9621_v57 = vadd.f32 %v16825_v18, %v8955_v28 }
 0x684   : > { %v8957_v51 = vadd.f32 %v8904_v42, %v8658_v54 }
 0x685   : > { %v10095_v46 = vmax.f32 %v10063_v15, 0.0  ;;  %v16853_v4 = vpop.f32.mrf.mxu1  ;;  %v8610_v20 = vpop.f32.mrf.mxu3 }
 0x687   : > { %12252 = vset.pattern.permute.xlu2 %v12340_v55  ;;  %10209 = vperm.xlu0 %12253, %v10095_v46  }
 0x688   : > { %10384 = vperm.xlu2 %12252, %v10094_v53   ;;  %v9967_v56 = vpop.f32.mrf.mxu2  ;;  %12255 = vset.pattern.permute.xlu1 %v17795_v48  ;;  %v8906_v35 = vpop.f32.mrf.mxu0 }
 0x689   : > { %v10028_v40 = vadd.f32 %v9967_v56, %v9618_v52  ;;  %v8956_v52 = vadd.f32 %v8901_v61, %v8657_v10 }
 0x68b   : > { %v10064_v5 = vadd.f32 %v16689_v36, %v10028_v40  ;;  %v10467_v40 = vmul.f32 %v10341_v43, %v10115_v37 }
 0x68d   : > { %v10096_v59 = vmax.f32 %v10064_v5, 0.0  ;;  %12034 = vmatmul.msk.bf16.gmra.mxu2 %vm6537_vm5, %v9865_v32  ;;  %v16870_v12 = vpop.f32.mrf.mxu1  ;;  %v9622_v5 = vadd.f32 %v16843_v17, %v8956_v52  ;;  %v10118_v52 = vld [vmem:[#allocation4 + $0x18] sm:$0xff] }
 0x68f   : > { %12254 = vset.pattern.permute.xlu0 %v12340_v55  ;;  %10214 = vperm.xlu1 %12255, %v10096_v59  }
 0x690   : > { %10388 = vperm.xlu0 %12254, %v10095_v46   ;;  %v9970_v45 = vpop.f32.mrf.mxu2  ;;  %12257 = vset.pattern.permute.xlu2 %v17795_v48  ;;  %v10116_v46 = vld [vmem:[#allocation4 + $0x8] sm:$0xff]  ;;  %v8909_v56 = vpop.f32.mrf.mxu0 }
 0x691   : > { %v10029_v26 = vadd.f32 %v9970_v45, %v9619_v49  ;;  %v10117_v49 = vld [vmem:[#allocation4 + $0x10] sm:$0xff] }
 0x693   : > { %v10065_v34 = vadd.f32 %v16689_v36, %v10029_v26  ;;  %v16891_v26 = vld [vmem:[#allocation4 + $0x28] sm:$0xff] }
 0x695   : > { %v10097_v22 = vmax.f32 %v10065_v34, 0.0  ;;  %v9575_v32 = vpop.f32.mrf.mxu1 }
 0x697   : > { %12256 = vset.pattern.permute.xlu1 %v12340_v55  ;;  %10219 = vperm.xlu2 %12257, %v10097_v22  }
 0x698   : > { %10392 = vperm.xlu1 %12256, %v10096_v59   ;;  %v9972_v53 = vpop.f32.mrf.mxu2  ;;  %12259 = vset.pattern.permute.xlu0 %v17795_v48  ;;  %v8612_v59 = vpop.f32.mrf.mxu3 }
 0x699   : > { %v10030_v30 = vadd.f32 %v9972_v53, %v9620_v11  ;;  %v10150_v33 = vpop.permute.xlu0 %10149  ;;  %v16864_v60 = vpop.permute.xlu2 %10352  ;;  %v8659_v53 = vadd.f32 %v16857_v58, %v16565_v7  ;;  %v8660_v58 = vadd.f32 %v8610_v20, %v16573_v19 }
 0x69a   : > { %v16866_v44 = vmul.f32 %v10150_v33, %v10115_v37  ;;  %v8911_v11 = vpop.f32.mrf.mxu0  ;;  %v9623_v37 = vadd.f32 %v16853_v4, %v8957_v51 }
 0x69b   : > { %v10066_v50 = vadd.f32 %v16689_v36, %v10030_v30 }
 0x69d   : > { %v10098_v47 = vmax.f32 %v10066_v50, 0.0  ;;  %v9577_v30 = vpop.f32.mrf.mxu1 }
 0x69f   : > { %12258 = vset.pattern.permute.xlu2 %v12340_v55  ;;  %10224 = vperm.xlu0 %12259, %v10098_v47  }
 0x6a0   : > { %10396 = vperm.xlu2 %12258, %v10097_v22   ;;  %v9975_v62 = vpop.f32.mrf.mxu2  ;;  %12261 = vset.pattern.permute.xlu1 %v17795_v48  ;;  %v8615_v28 = vpop.f32.mrf.mxu3 }
 0x6a1   : > { %v10031_v15 = vadd.f32 %v9975_v62, %v9621_v57  ;;  %v10155_v14 = vpop.permute.xlu0 %10154 }
 0x6a2   : > { %v16876_v9 = vmul.f32 %v10155_v14, %v10116_v46  ;;  %v10170_v39 = vpop.permute.xlu2 %10169 }
 0x6a3   : > { %v10067_v63 = vadd.f32 %v16689_v36, %v10031_v15  ;;  %v16882_v8 = vmul.f32 %v10170_v39, %v16878_v1  ;;  %v8914_v15 = vpop.f32.mrf.mxu0  ;;  %v8959_v39 = vadd.f32 %v8909_v56, %v8660_v58 }
 0x6a5   : > { %v10099_v18 = vmax.f32 %v10067_v63, 0.0  ;;  %v9625_v54 = vadd.f32 %v9575_v32, %v8959_v39 }
 0x6a7   : > { %12260 = vset.pattern.permute.xlu0 %v12340_v55  ;;  %10229 = vperm.xlu1 %12261, %v10099_v18  }
 0x6a8   : > { %10400 = vperm.xlu0 %12260, %v10098_v47   ;;  %v9977_v21 = vpop.f32.mrf.mxu2  ;;  %10531 = vrot.lane.b32.xlu2 %v10467_v40, %s12341_s11  ;;  %v8958_v47 = vadd.f32 %v8906_v35, %v8659_v53  ;;  %v9580_v35 = vpop.f32.mrf.mxu1  ;;  %v8661_v40 = vadd.f32 %v8612_v59, %v16581_v27 }
 0x6a9   : > { %v10032_v61 = vadd.f32 %v9977_v21, %v9622_v5  ;;  %v10160_v45 = vpop.permute.xlu1 %10159  ;;  %12263 = vset.pattern.permute.xlu2 %v17795_v48  ;;  %v8617_v20 = vpop.f32.mrf.mxu3  ;;  %v10470_v5 = vmul.f32 %v16864_v60, %v10118_v52 }
 0x6aa   : > { %v16889_v43 = vmul.f32 %v10160_v45, %v10117_v49  ;;  %v10175_v41 = vpop.permute.xlu2 %10174  ;;  %v10345_v17 = vpop.permute.xlu0 %10344  ;;  %v9624_v4 = vadd.f32 %v16870_v12, %v8958_v47  ;;  %v8960_v51 = vadd.f32 %v8911_v11, %v8661_v40 }
 0x6ab   : > { %v10068_v13 = vadd.f32 %v16689_v36, %v10032_v61  ;;  %v16895_v34 = vmul.f32 %v10175_v41, %v16891_v26  ;;  %v10468_v16 = vmul.f32 %v10345_v17, %v10116_v46  ;;  %v8916_v41 = vpop.f32.mrf.mxu0 }
 0x6ad   : > { %v10100_v22 = vmax.f32 %v10068_v13, 0.0  ;;  %v8662_v13 = vadd.f32 %v8615_v28, %v16589_v3  ;;  %v8663_v28 = vadd.f32 %v8617_v20, %v16607_v0 }
 0x6af   : > { %12262 = vset.pattern.permute.xlu1 %v12340_v55  ;;  %v8962_v0 = vadd.f32 %v8916_v41, %v8663_v28 }
 0x6b0   : > { %10533 = vrot.lane.b32.xlu0 %v10468_v16, %s12341_s11  ;;  %10404 = vperm.xlu1 %12262, %v10099_v18   ;;  %v9980_v42 = vpop.f32.mrf.mxu2  ;;  %v9582_v32 = vpop.f32.mrf.mxu1 }
 0x6b1   : > { %v10033_v33 = vadd.f32 %v9980_v42, %v9623_v37  ;;  %10234 = vperm.xlu2 %12263, %v10100_v22   ;;  %12265 = vset.pattern.permute.xlu0 %v17795_v48  ;;  %v8620_v59 = vpop.f32.mrf.mxu3  ;;  %v10121_v42 = vld [vmem:[#allocation4 + $0x30] sm:$0xff] }
 0x6b2   : > { %v10349_v50 = vpop.permute.xlu1 %10348 }
 0x6b3   : > { %v10069_v10 = vadd.f32 %v16689_v36, %v10033_v33  ;;  %v10469_v7 = vmul.f32 %v10349_v50, %v10117_v49  ;;  %v10361_v46 = vpop.permute.xlu2 %10360  ;;  %v16915_v49 = vld [vmem:[#allocation4 + $0x40] sm:$0xff]  ;;  %v8961_v50 = vadd.f32 %v8914_v15, %v8662_v13 }
 0x6b4   : > { %v10472_v47 = vmul.f32 %v10361_v46, %v16891_v26 }
 0x6b5   : > { %v10101_v57 = vmax.f32 %v10069_v10, 0.0 }
 0x6b8   : > { %10535 = vrot.lane.b32.xlu1 %v10469_v7, %s12341_s11  ;;  %10239 = vperm.xlu0 %12265, %v10101_v57   ;;  %v9982_v62 = vpop.f32.mrf.mxu2 }
 0x6b9   : > { %v10034_v14 = vadd.f32 %v9982_v62, %v9624_v4  ;;  %12264 = vset.pattern.permute.xlu2 %v12340_v55  ;;  %12267 = vset.pattern.permute.xlu1 %v17795_v48  ;;  %v8622_v7 = vpop.f32.mrf.mxu3 }
 0x6ba   : > { %10408 = vperm.xlu2 %12264, %v10100_v22   ;;  %v9626_v22 = vadd.f32 %v9577_v30, %v8960_v51  ;;  %v9585_v30 = vpop.f32.mrf.mxu1 }
 0x6bb   : > { %v10070_v63 = vadd.f32 %v16689_v36, %v10034_v14  ;;  %v10165_v19 = vpop.permute.xlu1 %10164  ;;  %v10122_v14 = vld [vmem:[#allocation4 + $0x38] sm:$0xff] }
 0x6bc   : > { %v16910_v12 = vmul.f32 %v10165_v19, %v10118_v52  ;;  %v8664_v52 = vadd.f32 %v8620_v59, %v16625_v31  ;;  %v9628_v19 = vadd.f32 %v9582_v32, %v8962_v0 }
 0x6bd   : > { %v10102_v18 = vmax.f32 %v10070_v63, 0.0 }
 0x6c0   : > { %12266 = vset.pattern.permute.xlu0 %v12340_v55  ;;  %10244 = vperm.xlu1 %12267, %v10102_v18   ;;  %v9985_v21 = vpop.f32.mrf.mxu2 }
 0x6c1   : > { %v10035_v61 = vadd.f32 %v9985_v21, %v9625_v54  ;;  %v10190_v56 = vpop.permute.xlu2 %10189  ;;  %10412 = vperm.xlu0 %12266, %v10101_v57   ;;  %v9627_v57 = vadd.f32 %v9580_v35, %v8961_v50  ;;  %v16940_v54 = vld [vmem:[#allocation4 + $0x58] sm:$0xff]  ;;  %v8625_v41 = vpop.f32.mrf.mxu3 }
 0x6c2   : > { %v16918_v45 = vmul.f32 %v10190_v56, %v16915_v49  ;;  %10537 = vrot.lane.b32.xlu2 %v10470_v5, %s12341_s11  ;;  %v9587_v21 = vpop.f32.mrf.mxu1 }
 0x6c3   : > { %12269 = vset.pattern.permute.xlu2 %v17795_v48  ;;  %v10071_v27 = vadd.f32 %v16689_v36, %v10035_v61 }
 0x6c4   : > { %v10357_v60 = vpop.permute.xlu1 %10356 }
 0x6c5   : > { %v10471_v17 = vmul.f32 %v10357_v60, %v16878_v1  ;;  %v10103_v16 = vmax.f32 %v10071_v27, 0.0  ;;  %v8919_v1 = vpop.f32.mrf.mxu0  ;;  %v8665_v27 = vadd.f32 %v8622_v7, %v16638_v2  ;;  %v10125_v7 = vld [vmem:[#allocation4 + $0x50] sm:$0xff] }
 0x6c6   : > { %v8963_v56 = vadd.f32 %v8919_v1, %v8664_v52  ;;  %v8666_v1 = vadd.f32 %v8625_v41, %v16646_v25 }
 0x6c8   : > { %12268 = vset.pattern.permute.xlu1 %v12340_v55  ;;  %v9987_v53 = vpop.f32.mrf.mxu2  ;;  %v9629_v60 = vadd.f32 %v9585_v30, %v8963_v56 }
 0x6c9   : > { %v10036_v37 = vadd.f32 %v9987_v53, %v9626_v22  ;;  %v10180_v33 = vpop.permute.xlu0 %10179  ;;  %10539 = vrot.lane.b32.xlu0 %v10471_v17, %s12341_s11  ;;  %10416 = vperm.xlu1 %12268, %v10102_v18   ;;  %v8627_v50 = vpop.f32.mrf.mxu3 }
 0x6ca   : > { %v16927_v11 = vmul.f32 %v10180_v33, %v10121_v42  ;;  %10249 = vperm.xlu2 %12269, %v10103_v16   ;;  %12271 = vset.pattern.permute.xlu0 %v17795_v48  ;;  %v10373_v4 = vpop.permute.xlu2 %10372  ;;  %v9590_v2 = vpop.f32.mrf.mxu1 }
 0x6cb   : > { %v10072_v3 = vadd.f32 %v16689_v36, %v10036_v37  ;;  %v10475_v30 = vmul.f32 %v10373_v4, %v16915_v49 }
 0x6cd   : > { %v10104_v10 = vmax.f32 %v10072_v3, 0.0  ;;  %v8921_v35 = vpop.f32.mrf.mxu0 }
 0x6d0   : > { %v9990_v58 = vpop.f32.mrf.mxu2 }
 0x6d1   : > { %v10037_v62 = vadd.f32 %v9990_v58, %v9627_v57  ;;  %v10185_v39 = vpop.permute.xlu1 %10184  ;;  %10541 = vrot.lane.b32.xlu1 %v10472_v47, %s12341_s11  ;;  %10254 = vperm.xlu0 %12271, %v10104_v10   ;;  %v8630_v4 = vpop.f32.mrf.mxu3 }
 0x6d2   : > { %v16934_v15 = vmul.f32 %v10185_v39, %v10122_v14  ;;  %12270 = vset.pattern.permute.xlu2 %v12340_v55  ;;  %12273 = vset.pattern.permute.xlu1 %v17795_v48  ;;  %v10365_v46 = vpop.permute.xlu0 %10364  ;;  %v9592_v49 = vpop.f32.mrf.mxu1  ;;  %v8668_v41 = vadd.f32 %v8630_v4, %v16660_v24 }
 0x6d3   : > { %v10073_v26 = vadd.f32 %v16689_v36, %v10037_v62  ;;  %10420 = vperm.xlu2 %12270, %v10103_v16   ;;  %v10473_v18 = vmul.f32 %v10365_v46, %v10121_v42  ;;  %v10124_v16 = vld [vmem:[#allocation4 + $0x48] sm:$0xff]  ;;  %v8964_v42 = vadd.f32 %v8921_v35, %v8665_v27 }
 0x6d5   : > { %v10105_v63 = vmax.f32 %v10073_v26, 0.0  ;;  %v8924_v13 = vpop.f32.mrf.mxu0  ;;  %v9630_v3 = vadd.f32 %v9587_v21, %v8964_v42  ;;  %v8667_v26 = vadd.f32 %v8627_v50, %v16652_v29 }
 0x6d6   : > { %v8965_v39 = vadd.f32 %v8924_v13, %v8666_v1 }
 0x6d8   : > { %v9992_v20 = vpop.f32.mrf.mxu2  ;;  %v9631_v35 = vadd.f32 %v9590_v2, %v8965_v39 }
 0x6d9   : > { %v10038_v40 = vadd.f32 %v9992_v20, %v9628_v19  ;;  %v10205_v5 = vpop.permute.xlu2 %10204  ;;  %12272 = vset.pattern.permute.xlu0 %v12340_v55  ;;  %10259 = vperm.xlu1 %12273, %v10105_v63  }
 0x6da   : > { %v16944_v61 = vmul.f32 %v10205_v5, %v16940_v54  ;;  %10424 = vperm.xlu0 %12272, %v10104_v10   ;;  %v10369_v51 = vpop.permute.xlu1 %10368 }
 0x6db   : > { %10543 = vrot.lane.b32.xlu2 %v10473_v18, %s12341_s11  ;;  %v10074_v31 = vadd.f32 %v16689_v36, %v10038_v40  ;;  %v10474_v32 = vmul.f32 %v10369_v51, %v10122_v14 }
 0x6dc   : > { %12275 = vset.pattern.permute.xlu2 %v17795_v48 }
 0x6dd   : > { %v10106_v17 = vmax.f32 %v10074_v31, 0.0  ;;  %v8926_v14 = vpop.f32.mrf.mxu0  ;;  %v9595_v31 = vpop.f32.mrf.mxu1 }
 0x6de   : > { %v8966_v5 = vadd.f32 %v8926_v14, %v8667_v26 }
 0x6e0   : > { %v9995_v59 = vpop.f32.mrf.mxu2  ;;  %v9632_v51 = vadd.f32 %v9592_v49, %v8966_v5 }
 0x6e1   : > { %v10039_v22 = vadd.f32 %v9995_v59, %v9629_v60  ;;  %v10195_v53 = vpop.permute.xlu0 %10194  ;;  %12274 = vset.pattern.permute.xlu1 %v12340_v55  ;;  %v8632_v60 = vpop.f32.mrf.mxu3  ;;  %v10127_v59 = vld [vmem:[#allocation4 + $0x60] sm:$0xff] }
 0x6e2   : > { %v16951_v37 = vmul.f32 %v10195_v53, %v10124_v16  ;;  %10545 = vrot.lane.b32.xlu0 %v10474_v32, %s12341_s11  ;;  %10428 = vperm.xlu1 %12274, %v10105_v63   ;;  %v10385_v10 = vpop.permute.xlu2 %10384  ;;  %v16965_v63 = vld [vmem:[#allocation4 + $0x70] sm:$0xff] }
 0x6e3   : > { %10264 = vperm.xlu2 %12275, %v10106_v17   ;;  %12277 = vset.pattern.permute.xlu0 %v17795_v48  ;;  %v10075_v33 = vadd.f32 %v16689_v36, %v10039_v22  ;;  %v10478_v1 = vmul.f32 %v10385_v10, %v16940_v54 }
 0x6e5   : > { %v10107_v28 = vmax.f32 %v10075_v33, 0.0  ;;  %v8929_v21 = vpop.f32.mrf.mxu0  ;;  %v9597_v14 = vpop.f32.mrf.mxu1 }
 0x6e6   : > { %v8967_v42 = vadd.f32 %v8929_v21, %v8668_v41 }
 0x6e8   : > { %v9997_v47 = vpop.f32.mrf.mxu2  ;;  %v9633_v33 = vadd.f32 %v9595_v31, %v8967_v42 }
 0x6e9   : > { %v10040_v57 = vadd.f32 %v9997_v47, %v9630_v3  ;;  %v10200_v58 = vpop.permute.xlu1 %10199  ;;  %v8669_v3 = vadd.f32 %v8632_v60, %v16667_v23  ;;  %v8635_v39 = vpop.f32.mrf.mxu3 }
 0x6ea   : > { %v16958_v62 = vmul.f32 %v10200_v58, %v10125_v7  ;;  %10547 = vrot.lane.b32.xlu1 %v10475_v30, %s12341_s11  ;;  %10269 = vperm.xlu0 %12277, %v10107_v28   ;;  %v10377_v0 = vpop.permute.xlu0 %10376 }
 0x6eb   : > { %12276 = vset.pattern.permute.xlu2 %v12340_v55  ;;  %12279 = vset.pattern.permute.xlu1 %v17795_v48  ;;  %v10076_v25 = vadd.f32 %v16689_v36, %v10040_v57  ;;  %v10476_v20 = vmul.f32 %v10377_v0, %v10124_v16 }
 0x6ec   : > { %10432 = vperm.xlu2 %12276, %v10106_v17  }
 0x6ed   : > { %v10108_v46 = vmax.f32 %v10076_v25, 0.0  ;;  %v8931_v2 = vpop.f32.mrf.mxu0 }
 0x6ee   : > { %v8968_v23 = vadd.f32 %v8931_v2, %v8669_v3 }
 0x6f0   : > { %v10000_v52 = vpop.f32.mrf.mxu2 }
 0x6f1   : > { %v10220_v19 = vpop.permute.xlu2 %10219  ;;  %v10041_v18 = vadd.f32 %v10000_v52, %v9631_v35  ;;  %v9600_v52 = vpop.f32.mrf.mxu1 }
 0x6f2   : > { %v16968_v40 = vmul.f32 %v10220_v19, %v16965_v63  ;;  %12278 = vset.pattern.permute.xlu0 %v12340_v55  ;;  %10274 = vperm.xlu1 %12279, %v10108_v46   ;;  %v10381_v56 = vpop.permute.xlu1 %10380 }
 0x6f3   : > { %10436 = vperm.xlu0 %12278, %v10107_v28   ;;  %v10077_v29 = vadd.f32 %v16689_v36, %v10041_v18  ;;  %v10477_v32 = vmul.f32 %v10381_v56, %v10125_v7  ;;  %v10128_v28 = vld [vmem:[#allocation4 + $0x68] sm:$0xff]  ;;  %v8637_v56 = vpop.f32.mrf.mxu3 }
 0x6f4   : > { %10549 = vrot.lane.b32.xlu2 %v10476_v20, %s12341_s11  ;;  %v16996_v18 = vld [vmem:[#allocation4 + $0x88] sm:$0xff]  ;;  %v8671_v41 = vadd.f32 %v8637_v56, %v16679_v6 }
 0x6f5   : > { %12281 = vset.pattern.permute.xlu2 %v17795_v48  ;;  %v10109_v17 = vmax.f32 %v10077_v29, 0.0  ;;  %v8934_v4 = vpop.f32.mrf.mxu0 }
 0x6f8   : > { %v10002_v27 = vpop.f32.mrf.mxu2 }
 0x6f9   : > { %v10210_v13 = vpop.permute.xlu0 %10209  ;;  %v10042_v22 = vadd.f32 %v10002_v27, %v9632_v51 }
 0x6fa   : > { %v16975_v16 = vmul.f32 %v10210_v13, %v10127_v59  ;;  %v16977_v53 = vpop.permute.xlu2 %10396  ;;  %12280 = vset.pattern.permute.xlu1 %v12340_v55 }
 0x6fb   : > { %10551 = vrot.lane.b32.xlu0 %v10477_v32, %s12341_s11  ;;  %10440 = vperm.xlu1 %12280, %v10108_v46   ;;  %v10078_v24 = vadd.f32 %v16689_v36, %v10042_v22  ;;  %v8670_v46 = vadd.f32 %v8635_v39, %v16675_v38  ;;  %v10130_v32 = vld [vmem:[#allocation4 + $0x78] sm:$0xff] }
 0x6fc   : > { %10279 = vperm.xlu2 %12281, %v10109_v17   ;;  %12283 = vset.pattern.permute.xlu0 %v17795_v48 }
 0x6fd   : > { %v10110_v57 = vmax.f32 %v10078_v24, 0.0  ;;  %v8969_v29 = vadd.f32 %v8934_v4, %v8670_v46  ;;  %v8936_v60 = vpop.f32.mrf.mxu0  ;;  %v10135_v46 = vld [vmem:[#allocation4 + $0xa0] sm:$0xff] }
 0x6fe   : > { %v8970_v24 = vadd.f32 %v8936_v60, %v8671_v41 }
 0x6ff   : > { %v9635_v27 = vadd.f32 %v9600_v52, %v8969_v29 }
 0x700   : > { %v10005_v50 = vpop.f32.mrf.mxu2 }
 0x701   : > { %v10043_v30 = vadd.f32 %v10005_v50, %v9633_v33  ;;  %v10215_v47 = vpop.permute.xlu1 %10214  ;;  %v9602_v33 = vpop.f32.mrf.mxu1 }
 0x702   : > { %v16985_v7 = vmul.f32 %v10215_v47, %v10128_v28  ;;  %v10532_v58 = vpop.permute.xlu2 %10531  ;;  %v10389_v0 = vpop.permute.xlu0 %10388  ;;  %v9636_v50 = vadd.f32 %v9602_v33, %v8970_v24 }
 0x703   : > { %v10627_v25 = vadd.f32 %v10532_v58, %v16866_v44  ;;  %v10659_v49 = vmul.f32 %v10532_v58, %v16866_v44  ;;  %10553 = vrot.lane.b32.xlu1 %v10478_v1, %s12341_s11  ;;  %10284 = vperm.xlu0 %12283, %v10110_v57   ;;  %v10079_v54 = vadd.f32 %v16689_v36, %v10043_v30  ;;  %v10131_v1 = vld [vmem:[#allocation4 + $0x80] sm:$0xff] }
 0x704   : > { %12282 = vset.pattern.permute.xlu2 %v12340_v55  ;;  %12285 = vset.pattern.permute.xlu1 %v17795_v48  ;;  %v9634_v44 = vadd.f32 %v9597_v14, %v8968_v23  ;;  %v10479_v19 = vmul.f32 %v10389_v0, %v10127_v59 }
 0x705   : > { %v16992_v10 = vadd.f32 %v10659_v49, %v10627_v25  ;;  %10444 = vperm.xlu2 %12282, %v10109_v17   ;;  %v10111_v35 = vmax.f32 %v10079_v54, 0.0 }
 0x708   : > { %v10007_v26 = vpop.f32.mrf.mxu2 }
 0x709   : > { %v10044_v20 = vadd.f32 %v10007_v26, %v9634_v44 }
 0x70a   : > { %v10393_v31 = vpop.permute.xlu1 %10392 }
 0x70b   : > { %v10235_v5 = vpop.permute.xlu2 %10234  ;;  %10289 = vperm.xlu1 %12285, %v10111_v35   ;;  %12284 = vset.pattern.permute.xlu0 %v12340_v55  ;;  %v10080_v38 = vadd.f32 %v16689_v36, %v10044_v20  ;;  %v10480_v22 = vmul.f32 %v10393_v31, %v10128_v28  ;;  %v10481_v28 = vmul.f32 %v16977_v53, %v16965_v63  ;;  %v10134_v31 = vld [vmem:[#allocation4 + $0x98] sm:$0xff] }
 0x70c   : > { %v16999_v21 = vmul.f32 %v10235_v5, %v16996_v18  ;;  %10448 = vperm.xlu0 %12284, %v10110_v57  }
 0x70d   : > { %10555 = vrot.lane.b32.xlu2 %v10479_v19, %s12341_s11  ;;  %v10112_v17 = vmax.f32 %v10080_v38, 0.0  ;;  %v10133_v19 = vld [vmem:[#allocation4 + $0x90] sm:$0xff] }
 0x70e   : > { %12287 = vset.pattern.permute.xlu2 %v17795_v48 }
 0x710   : > { %v10010_v51 = vpop.f32.mrf.mxu2 }
 0x711   : > { %v10225_v59 = vpop.permute.xlu0 %10224  ;;  %v10045_v42 = vadd.f32 %v10010_v51, %v9635_v27 }
 0x712   : > { %v17006_v13 = vmul.f32 %v10225_v59, %v10130_v32 }
 0x713   : > { %12286 = vset.pattern.permute.xlu1 %v12340_v55  ;;  %v10081_v6 = vadd.f32 %v16689_v36, %v10045_v42  ;;  %v12330_v36 = vld [vmem:[%s17191_s6] ss:$0 sm:$0xff] }
 0x714   : > { %v10409_v2 = vpop.permute.xlu2 %10408  ;;  %10452 = vperm.xlu1 %12286, %v10111_v35   ;;  %10557 = vrot.lane.b32.xlu0 %v10480_v22, %s12341_s11 }
 0x715   : > { %10294 = vperm.xlu2 %12287, %v10112_v17   ;;  %12289 = vset.pattern.permute.xlu0 %v17795_v48  ;;  %v10113_v14 = vmax.f32 %v10081_v6, 0.0  ;;  %v10484_v27 = vmul.f32 %v10409_v2, %v16996_v18 }
 0x718   : > { %v10012_v3 = vpop.f32.mrf.mxu2 }
 0x719   : > { %v10230_v30 = vpop.permute.xlu1 %10229  ;;  %v10046_v47 = vadd.f32 %v10012_v3, %v9636_v50  ;;  %v10138_v50 = vld [vmem:[#allocation4 + $0xb8] sm:$0xff] }
 0x71a   : > { %v17014_v57 = vmul.f32 %v10230_v30, %v10131_v1  ;;  %v10401_v58 = vpop.permute.xlu0 %10400 }
 0x71b   : > { %v10082_v63 = vadd.f32 %v12330_v36, %v10046_v47  ;;  %v10482_v26 = vmul.f32 %v10401_v58, %v10130_v32  ;;  %v10137_v36 = vld [vmem:[#allocation4 + $0xb0] sm:$0xff] }
 0x71c   : > { %v10538_v39 = vpop.permute.xlu2 %10537  ;;  %10559 = vrot.lane.b32.xlu1 %v10481_v28, %s12341_s11  ;;  %10299 = vperm.xlu0 %12289, %v10113_v14   ;;  %v10136_v28 = vld [vmem:[#allocation4 + $0xa8] sm:$0xff] }
 0x71d   : > { %v10630_v25 = vadd.f32 %v10538_v39, %v16910_v12  ;;  %v10662_v49 = vmul.f32 %v10538_v39, %v16910_v12  ;;  %12288 = vset.pattern.permute.xlu2 %v12340_v55  ;;  %12291 = vset.pattern.permute.xlu1 %v17795_v48  ;;  %v10114_v23 = vmax.f32 %v10082_v63, 0.0 }
 0x71e   : > { %10456 = vperm.xlu2 %12288, %v10112_v17  }
 0x71f   : > { %v17024_v53 = vadd.f32 %v10662_v49, %v10630_v25 }
 0x722   : > { %v10534_v54 = vpop.permute.xlu0 %10533  ;;  %v10405_v4 = vpop.permute.xlu1 %10404 }
 0x723   : > { %v10628_v0 = vadd.f32 %v10534_v54, %v16876_v9  ;;  %v10660_v12 = vmul.f32 %v10534_v54, %v16876_v9  ;;  %v10483_v56 = vmul.f32 %v10405_v4, %v10131_v1 }
 0x724   : > { %v10250_v35 = vpop.permute.xlu2 %10249  ;;  %10304 = vperm.xlu1 %12291, %v10114_v23   ;;  %12290 = vset.pattern.permute.xlu0 %v12340_v55 }
 0x725   : > { %v17028_v44 = vadd.f32 %v10660_v12, %v10628_v0  ;;  %v17030_v52 = vmul.f32 %v10250_v35, %v10135_v46  ;;  %10460 = vperm.xlu0 %12290, %v10113_v14  }
 0x726   : > { %10561 = vrot.lane.b32.xlu2 %v10482_v26, %s12341_s11 }
 0x72a   : > { %v10536_v48 = vpop.permute.xlu1 %10535  ;;  %v10240_v20 = vpop.permute.xlu0 %10239 }
 0x72b   : > { %v10629_v5 = vadd.f32 %v10536_v48, %v16889_v43  ;;  %v10661_v9 = vmul.f32 %v10536_v48, %v16889_v43  ;;  %v17036_v29 = vmul.f32 %v10240_v20, %v10133_v19 }
 0x72c   : > { %12292 = vset.pattern.permute.xlu1 %v12340_v55 }
 0x72d   : > { %v17039_v38 = vadd.f32 %v10661_v9, %v10629_v5  ;;  %v10421_v41 = vpop.permute.xlu2 %10420  ;;  %10464 = vperm.xlu1 %12292, %v10114_v23   ;;  %10563 = vrot.lane.b32.xlu0 %v10483_v56, %s12341_s11  ;;  %v10141_v5 = vld [vmem:[#allocation4 + $0xd0] sm:$0xff] }
 0x72e   : > { %v10487_v42 = vmul.f32 %v10421_v41, %v10135_v46 }
 0x732   : > { %v10245_v51 = vpop.permute.xlu1 %10244 }
 0x733   : > { %v17043_v60 = vmul.f32 %v10245_v51, %v10134_v31  ;;  %v10413_v32 = vpop.permute.xlu0 %10412 }
 0x734   : > { %v10485_v59 = vmul.f32 %v10413_v32, %v10133_v19 }
 0x735   : > { %v10544_v43 = vpop.permute.xlu2 %10543  ;;  %10565 = vrot.lane.b32.xlu1 %v10484_v27, %s12341_s11 }
 0x736   : > { %v10633_v17 = vadd.f32 %v10544_v43, %v16927_v11  ;;  %v10665_v55 = vmul.f32 %v10544_v43, %v16927_v11  ;;  %10567 = vrot.lane.b32.xlu2 %v10485_v59, %s12341_s11 }
 0x738   : > { %v17049_v22 = vadd.f32 %v10665_v55, %v10633_v17  ;;  %v10140_v55 = vld [vmem:[#allocation4 + $0xc8] sm:$0xff] }
 0x73b   : > { %v10540_v24 = vpop.permute.xlu0 %10539  ;;  %v10417_v33 = vpop.permute.xlu1 %10416 }
 0x73c   : > { %v10631_v18 = vadd.f32 %v10540_v24, %v16882_v8  ;;  %v10663_v2 = vmul.f32 %v10540_v24, %v16882_v8  ;;  %v10486_v6 = vmul.f32 %v10417_v33, %v10134_v31  ;;  %v10139_v31 = vld [vmem:[#allocation4 + $0xc0] sm:$0xff] }
 0x73d   : > { %v10265_v3 = vpop.permute.xlu2 %10264  ;;  %10571 = vrot.lane.b32.xlu1 %v10487_v42, %s12341_s11 }
 0x73e   : > { %v17054_v1 = vadd.f32 %v10663_v2, %v10631_v18  ;;  %v17056_v30 = vmul.f32 %v10265_v3, %v10138_v50  ;;  %10569 = vrot.lane.b32.xlu0 %v10486_v6, %s12341_s11 }
 0x743   : > { %v10542_v11 = vpop.permute.xlu1 %10541  ;;  %v10255_v47 = vpop.permute.xlu0 %10254 }
 0x744   : > { %v10632_v58 = vadd.f32 %v10542_v11, %v16895_v34  ;;  %v10664_v14 = vmul.f32 %v10542_v11, %v16895_v34  ;;  %v17061_v39 = vmul.f32 %v10255_v47, %v10136_v28 }
 0x746   : > { %v17063_v8 = vadd.f32 %v10664_v14, %v10632_v58  ;;  %v10433_v25 = vpop.permute.xlu2 %10432  ;;  %v10144_v14 = vld [vmem:[#allocation4 + $0xe8] sm:$0xff] }
 0x747   : > { %v10490_v49 = vmul.f32 %v10433_v25, %v10138_v50 }
 0x749   : > { %10577 = vrot.lane.b32.xlu1 %v10490_v49, %s12341_s11 }
 0x74b   : > { %v10260_v63 = vpop.permute.xlu1 %10259 }
 0x74c   : > { %v17066_v23 = vmul.f32 %v10260_v63, %v10137_v36  ;;  %v10425_v54 = vpop.permute.xlu0 %10424 }
 0x74d   : > { %v10488_v4 = vmul.f32 %v10425_v54, %v10136_v28 }
 0x74e   : > { %v10550_v0 = vpop.permute.xlu2 %10549 }
 0x74f   : > { %v10636_v12 = vadd.f32 %v10550_v0, %v16951_v37  ;;  %v10668_v26 = vmul.f32 %v10550_v0, %v16951_v37  ;;  %10573 = vrot.lane.b32.xlu2 %v10488_v4, %s12341_s11  ;;  %v10142_v4 = vld [vmem:[#allocation4 + $0xd8] sm:$0xff] }
 0x751   : > { %v17071_v34 = vadd.f32 %v10668_v26, %v10636_v12 }
 0x754   : > { %v10546_v46 = vpop.permute.xlu0 %10545  ;;  %v10429_v35 = vpop.permute.xlu1 %10428 }
 0x755   : > { %v10634_v48 = vadd.f32 %v10546_v46, %v16934_v15  ;;  %v10666_v19 = vmul.f32 %v10546_v46, %v16934_v15  ;;  %v10489_v20 = vmul.f32 %v10429_v35, %v10137_v36  ;;  %v10143_v35 = vld [vmem:[#allocation4 + $0xe0] sm:$0xff] }
 0x756   : > { %v10280_v9 = vpop.permute.xlu2 %10279 }
 0x757   : > { %v17075_v56 = vadd.f32 %v10666_v19, %v10634_v48  ;;  %v17077_v41 = vmul.f32 %v10280_v9, %v10141_v5  ;;  %10575 = vrot.lane.b32.xlu0 %v10489_v20, %s12341_s11 }
 0x75c   : > { %v10548_v37 = vpop.permute.xlu1 %10547  ;;  %v10270_v51 = vpop.permute.xlu0 %10269 }
 0x75d   : > { %v10635_v27 = vadd.f32 %v10548_v37, %v16918_v45  ;;  %v10667_v32 = vmul.f32 %v10548_v37, %v16918_v45  ;;  %v17082_v59 = vmul.f32 %v10270_v51, %v10139_v31 }
 0x75f   : > { %v17084_v43 = vadd.f32 %v10667_v32, %v10635_v27  ;;  %v10445_v15 = vpop.permute.xlu2 %10444 }
 0x760   : > { %v10493_v17 = vmul.f32 %v10445_v15, %v10141_v5 }
 0x762   : > { %10583 = vrot.lane.b32.xlu1 %v10493_v17, %s12341_s11 }
 0x764   : > { %v10275_v42 = vpop.permute.xlu1 %10274 }
 0x765   : > { %v17087_v24 = vmul.f32 %v10275_v42, %v10140_v55  ;;  %v10437_v33 = vpop.permute.xlu0 %10436 }
 0x766   : > { %v10491_v18 = vmul.f32 %v10437_v33, %v10139_v31 }
 0x767   : > { %v10556_v2 = vpop.permute.xlu2 %10555 }
 0x768   : > { %v10639_v6 = vadd.f32 %v10556_v2, %v16975_v16  ;;  %v10671_v50 = vmul.f32 %v10556_v2, %v16975_v16  ;;  %10579 = vrot.lane.b32.xlu2 %v10491_v18, %s12341_s11  ;;  %v10145_v18 = vld [vmem:[#allocation4 + $0xf0] sm:$0xff] }
 0x76a   : > { %v17092_v45 = vadd.f32 %v10671_v50, %v10639_v6 }
 0x76d   : > { %v10552_v3 = vpop.permute.xlu0 %10551  ;;  %v10441_v11 = vpop.permute.xlu1 %10440 }
 0x76e   : > { %v10637_v28 = vadd.f32 %v10552_v3, %v16958_v62  ;;  %v10669_v47 = vmul.f32 %v10552_v3, %v16958_v62  ;;  %v10492_v58 = vmul.f32 %v10441_v11, %v10140_v55  ;;  %v10146_v3 = vld [vmem:[#allocation4 + $0xf8] sm:$0xff] }
 0x76f   : > { %v10295_v25 = vpop.permute.xlu2 %10294 }
 0x770   : > { %v17096_v49 = vadd.f32 %v10669_v47, %v10637_v28  ;;  %v17098_v36 = vmul.f32 %v10295_v25, %v10144_v14  ;;  %10581 = vrot.lane.b32.xlu0 %v10492_v58, %s12341_s11 }
 0x775   : > { %v10554_v16 = vpop.permute.xlu1 %10553  ;;  %v10285_v0 = vpop.permute.xlu0 %10284 }
 0x776   : > { %v10638_v63 = vadd.f32 %v10554_v16, %v16944_v61  ;;  %v10670_v54 = vmul.f32 %v10554_v16, %v16944_v61  ;;  %v17103_v12 = vmul.f32 %v10285_v0, %v10142_v4 }
 0x778   : > { %v17105_v26 = vadd.f32 %v10670_v54, %v10638_v63  ;;  %v10457_v62 = vpop.permute.xlu2 %10456 }
 0x779   : > { %v10496_v46 = vmul.f32 %v10457_v62, %v10144_v14 }
 0x77b   : > { %10589 = vrot.lane.b32.xlu1 %v10496_v46, %s12341_s11 }
 0x77d   : > { %v10290_v48 = vpop.permute.xlu1 %10289 }
 0x77e   : > { %v17108_v19 = vmul.f32 %v10290_v48, %v10143_v35  ;;  %v10449_v20 = vpop.permute.xlu0 %10448 }
 0x77f   : > { %v10494_v5 = vmul.f32 %v10449_v20, %v10142_v4 }
 0x780   : > { %v10562_v9 = vpop.permute.xlu2 %10561 }
 0x781   : > { %v10642_v37 = vadd.f32 %v10562_v9, %v17006_v13  ;;  %v10674_v61 = vmul.f32 %v10562_v9, %v17006_v13  ;;  %10585 = vrot.lane.b32.xlu2 %v10494_v5, %s12341_s11 }
 0x783   : > { %v17113_v31 = vadd.f32 %v10674_v61, %v10642_v37 }
 0x786   : > { %v10453_v51 = vpop.permute.xlu1 %10452  ;;  %v10558_v27 = vpop.permute.xlu0 %10557 }
 0x787   : > { %v10495_v32 = vmul.f32 %v10453_v51, %v10143_v35  ;;  %v10640_v15 = vadd.f32 %v10558_v27, %v16985_v7  ;;  %v10672_v17 = vmul.f32 %v10558_v27, %v16985_v7 }
 0x789   : > { %10587 = vrot.lane.b32.xlu0 %v10495_v32, %s12341_s11  ;;  %v17118_v55 = vadd.f32 %v10672_v17, %v10640_v15 }
 0x78e   : > { %v10560_v42 = vpop.permute.xlu1 %10559  ;;  %v10300_v2 = vpop.permute.xlu0 %10299 }
 0x78f   : > { %v10641_v33 = vadd.f32 %v10560_v42, %v16968_v40  ;;  %v10673_v13 = vmul.f32 %v10560_v42, %v16968_v40  ;;  %v17122_v6 = vmul.f32 %v10300_v2, %v10145_v18 }
 0x790   : > { %v10568_v46 = vpop.permute.xlu2 %10567 }
 0x791   : > { %v17124_v50 = vadd.f32 %v10673_v13, %v10641_v33 }
 0x796   : > { %v10305_v11 = vpop.permute.xlu1 %10304 }
 0x797   : > { %v17126_v28 = vmul.f32 %v10305_v11, %v10146_v3  ;;  %v10461_v7 = vpop.permute.xlu0 %10460 }
 0x798   : > { %v10497_v47 = vmul.f32 %v10461_v7, %v10145_v18 }
 0x79a   : > { %10591 = vrot.lane.b32.xlu2 %v10497_v47, %s12341_s11 }
 0x79f   : > { %v10465_v58 = vpop.permute.xlu1 %10464  ;;  %v10564_v40 = vpop.permute.xlu0 %10563 }
 0x7a0   : > { %v10498_v14 = vmul.f32 %v10465_v58, %v10146_v3  ;;  %v10643_v25 = vadd.f32 %v10564_v40, %v17014_v57  ;;  %v10675_v16 = vmul.f32 %v10564_v40, %v17014_v57 }
 0x7a2   : > { %10593 = vrot.lane.b32.xlu0 %v10498_v14, %s12341_s11  ;;  %v10707_v63 = vadd.f32 %v10675_v16, %v10643_v25 }
 0x7a7   : > { %v10566_v54 = vpop.permute.xlu1 %10565 }
 0x7a8   : > { %v10644_v4 = vadd.f32 %v10566_v54, %v16999_v21  ;;  %v10676_v0 = vmul.f32 %v10566_v54, %v16999_v21 }
 0x7aa   : > { %v10708_v62 = vadd.f32 %v10676_v0, %v10644_v4 }
 0x7af   : > { %v10572_v21 = vpop.permute.xlu1 %10571 }
 0x7b0   : > { %10723 = vxpose.xlu1.b32.start [1/16] (narrow) %v16992_v10, 32  ;;  %v10645_v10 = vadd.f32 %v10568_v46, %v17036_v29  ;;  %v10570_v57 = vpop.permute.xlu0 %10569  ;;  %v10679_v5 = vmul.f32 %v10572_v21, %v17030_v52 }
 0x7b1   : > { %v10678_v48 = vmul.f32 %v10570_v57, %v17043_v60 }
 0x7b8   : > { %10724 = vxpose.xlu1.b32.cont [2/16] (narrow) %v17028_v44, 32  ;;  %v10677_v44 = vmul.f32 %v10568_v46, %v17036_v29  ;;  %v10574_v29 = vpop.permute.xlu2 %10573 }
 0x7b9   : > { %v10680_v37 = vmul.f32 %v10574_v29, %v17061_v39 }
 0x7ba   : > { %v10709_v35 = vadd.f32 %v10677_v44, %v10645_v10 }
 0x7c0   : > { %10725 = vxpose.xlu1.b32.cont [3/16] (narrow) %v17039_v38, 32  ;;  %10755 = vxpose.xlu2.b32.start [1/16] (narrow) %v10707_v63, 32  ;;  %v10646_v38 = vadd.f32 %v10570_v57, %v17043_v60 }
 0x7c2   : > { %v10710_v20 = vadd.f32 %v10678_v48, %v10646_v38 }
 0x7c8   : > { %10726 = vxpose.xlu1.b32.cont [4/16] (narrow) %v17024_v53, 32  ;;  %10756 = vxpose.xlu2.b32.cont [2/16] (narrow) %v10708_v62, 32  ;;  %v10647_v53 = vadd.f32 %v10572_v21, %v17030_v52  ;;  %v10578_v52 = vpop.permute.xlu1 %10577 }
 0x7c9   : > { %v10576_v60 = vpop.permute.xlu0 %10575  ;;  %v10682_v32 = vmul.f32 %v10578_v52, %v17056_v30 }
 0x7ca   : > { %v10711_v9 = vadd.f32 %v10679_v5, %v10647_v53  ;;  %v10681_v51 = vmul.f32 %v10576_v60, %v17066_v23 }
 0x7d0   : > { %10727 = vxpose.xlu1.b32.cont [5/16] (narrow) %v17054_v1, 32  ;;  %10757 = vxpose.xlu2.b32.cont [3/16] (narrow) %v10709_v35, 32  ;;  %v10648_v1 = vadd.f32 %v10574_v29, %v17061_v39  ;;  %v10580_v39 = vpop.permute.xlu2 %10579 }
 0x7d1   : > { %v10683_v17 = vmul.f32 %v10580_v39, %v17082_v59 }
 0x7d2   : > { %v10712_v61 = vadd.f32 %v10680_v37, %v10648_v1 }
 0x7d8   : > { %10728 = vxpose.xlu1.b32.cont [6/16] (narrow) %v17063_v8, 32  ;;  %10758 = vxpose.xlu2.b32.cont [4/16] (narrow) %v10710_v20, 32  ;;  %v10649_v8 = vadd.f32 %v10576_v60, %v17066_v23 }
 0x7da   : > { %v10713_v27 = vadd.f32 %v10681_v51, %v10649_v8 }
 0x7e0   : > { %10729 = vxpose.xlu1.b32.cont [7/16] (narrow) %v17049_v22, 32  ;;  %10759 = vxpose.xlu2.b32.cont [5/16] (narrow) %v10711_v9, 32  ;;  %v10650_v22 = vadd.f32 %v10578_v52, %v17056_v30  ;;  %v10584_v30 = vpop.permute.xlu1 %10583 }
 0x7e1   : > { %v10685_v18 = vmul.f32 %v10584_v30, %v17077_v41 }
 0x7e2   : > { %v10714_v15 = vadd.f32 %v10682_v32, %v10650_v22  ;;  %v10582_v23 = vpop.permute.xlu0 %10581 }
 0x7e3   : > { %v10684_v33 = vmul.f32 %v10582_v23, %v17087_v24 }
 0x7e8   : > { %10730 = vxpose.xlu1.b32.cont [8/16] (narrow) %v17075_v56, 32  ;;  %10760 = vxpose.xlu2.b32.cont [6/16] (narrow) %v10712_v61, 32  ;;  %v10651_v56 = vadd.f32 %v10580_v39, %v17082_v59  ;;  %v10586_v59 = vpop.permute.xlu2 %10585 }
 0x7e9   : > { %v10686_v3 = vmul.f32 %v10586_v59, %v17103_v12 }
 0x7ea   : > { %v10715_v42 = vadd.f32 %v10683_v17, %v10651_v56 }
 0x7f0   : > { %10731 = vxpose.xlu1.b32.cont [9/16] (narrow) %v17084_v43, 32  ;;  %10761 = vxpose.xlu2.b32.cont [7/16] (narrow) %v10713_v27, 32  ;;  %v10652_v43 = vadd.f32 %v10582_v23, %v17087_v24 }
 0x7f2   : > { %v10716_v13 = vadd.f32 %v10684_v33, %v10652_v43 }
 0x7f4   : > { %v10592_v14 = vpop.permute.xlu2 %10591 }
 0x7f5   : > { %v10689_v40 = vmul.f32 %v10592_v14, %v17122_v6 }
 0x7f8   : > { %10732 = vxpose.xlu1.b32.cont [10/16] (narrow) %v17071_v34, 32  ;;  %10762 = vxpose.xlu2.b32.cont [8/16] (narrow) %v10714_v15, 32  ;;  %v10653_v34 = vadd.f32 %v10584_v30, %v17077_v41  ;;  %v10590_v41 = vpop.permute.xlu1 %10589 }
 0x7f9   : > { %v10688_v58 = vmul.f32 %v10590_v41, %v17098_v36 }
 0x7fa   : > { %v10717_v2 = vadd.f32 %v10685_v18, %v10653_v34 }
 0x7fb   : > { %v10588_v24 = vpop.permute.xlu0 %10587 }
 0x7fc   : > { %v10687_v7 = vmul.f32 %v10588_v24, %v17108_v19 }
 0x800   : > { %10733 = vxpose.xlu1.b32.cont [11/16] (narrow) %v17096_v49, 32  ;;  %10763 = vxpose.xlu2.b32.cont [9/16] (narrow) %v10715_v42, 32  ;;  %v10654_v49 = vadd.f32 %v10586_v59, %v17103_v12 }
 0x802   : > { %v10718_v11 = vadd.f32 %v10686_v3, %v10654_v49 }
 0x808   : > { %10734 = vxpose.xlu1.b32.cont [12/16] (narrow) %v17105_v26, 32  ;;  %10764 = vxpose.xlu2.b32.cont [10/16] (narrow) %v10716_v13, 32  ;;  %v10655_v26 = vadd.f32 %v10588_v24, %v17108_v19 }
 0x80a   : > { %v10719_v47 = vadd.f32 %v10687_v7, %v10655_v26 }
 0x810   : > { %10735 = vxpose.xlu1.b32.cont [13/16] (narrow) %v17092_v45, 32  ;;  %10765 = vxpose.xlu2.b32.cont [11/16] (narrow) %v10717_v2, 32  ;;  %v10656_v45 = vadd.f32 %v10590_v41, %v17098_v36 }
 0x812   : > { %v10720_v12 = vadd.f32 %v10688_v58, %v10656_v45 }
 0x814   : > { %v10594_v25 = vpop.permute.xlu0 %10593 }
 0x815   : > { %v10690_v16 = vmul.f32 %v10594_v25, %v17126_v28 }
 0x818   : > { %10736 = vxpose.xlu1.b32.cont [14/16] (narrow) %v17118_v55, 32  ;;  %10766 = vxpose.xlu2.b32.cont [12/16] (narrow) %v10718_v11, 32  ;;  %v10657_v55 = vadd.f32 %v10592_v14, %v17122_v6 }
 0x81a   : > { %v10721_v19 = vadd.f32 %v10689_v40, %v10657_v55 }
 0x820   : > { %10737 = vxpose.xlu1.b32.cont [15/16] (narrow) %v17124_v50, 32  ;;  %10767 = vxpose.xlu2.b32.cont [13/16] (narrow) %v10719_v47, 32  ;;  %v10658_v50 = vadd.f32 %v10594_v25, %v17126_v28 }
 0x822   : > { %v10722_v63 = vadd.f32 %v10690_v16, %v10658_v50 }
 0x828   : > { %10738 = vxpose.xlu1.b32.end [16/16] (narrow) %v17113_v31, 32  ;;  %10768 = vxpose.xlu2.b32.cont [14/16] (narrow) %v10720_v12, 32 }
 0x830   : > { %10769 = vxpose.xlu2.b32.cont [15/16] (narrow) %v10721_v19, 32 }
 0x838   : > { %10770 = vxpose.xlu2.b32.end [16/16] (narrow) %v10722_v63, 32 }
 0x854   : > { %v10739_v36 = vpop.trf.xlu1 }
 0x855   : > { %10787 = vst [vmem:[%s278_s18] sm:$0xff] %v10739_v36 }
 0x859   : > { %v10771_v31 = vpop.trf.xlu2 }
 0x85a   : > { %10788 = vst [vmem:[%s278_s18 + $0x8] sm:$0xff] %v10771_v31 }
 0x85c   : > { %v10740_v54 = vpop.trf.xlu1 }
 0x85d   : > { %10789 = vst [vmem:[%s278_s18 + $0x10] sm:$0xff] %v10740_v54 }
 0x861   : > { %v10772_v6 = vpop.trf.xlu2 }
 0x862   : > { %10790 = vst [vmem:[%s278_s18 + $0x18] sm:$0xff] %v10772_v6 }
 0x864   : > { %v10741_v4 = vpop.trf.xlu1 }
 0x865   : > { %10791 = vst [vmem:[%s278_s18 + $0x20] sm:$0xff] %v10741_v4 }
 0x869   : > { %v10773_v0 = vpop.trf.xlu2 }
 0x86a   : > { %10792 = vst [vmem:[%s278_s18 + $0x28] sm:$0xff] %v10773_v0 }
 0x86c   : > { %v10742_v28 = vpop.trf.xlu1 }
 0x86d   : > { %10793 = vst [vmem:[%s278_s18 + $0x30] sm:$0xff] %v10742_v28 }
 0x871   : > { %v10774_v62 = vpop.trf.xlu2 }
 0x872   : > { %10794 = vst [vmem:[%s278_s18 + $0x38] sm:$0xff] %v10774_v62 }
 0x873 PF: > { %s17_s24 = sadd.s32 1, %s12337_s24  }
 0x874   : > { %p14_p4 = scmp.ge.s32.totalorder %s17_s24, 4  }
 0x876   :  { %16 = sbr.rel (!%p14_p4) target bundleno = 1 (0x1), region = 100 }

</bundles_post_ra>
